<compile_context>
chip_gen: v7x
topology: tpu7x:2x2x1
jax: 0.10.0
libtpu: 0.0.40
codegen_flags: <defaults>
</compile_context>

<pallas_src>
import functools
import math

import jax
import jax.numpy as jnp
from jax.experimental import pallas as pl
from jax.experimental.pallas import tpu as pltpu

CFG = {'n': [0.33, 0.25], 't': [0.33, 0.375], 's': [0.33, 0.5],
       'm': [0.67, 0.75], 'l': [1.0, 1.0], 'x': [1.33, 1.25]}

_ACT = jnp.bfloat16                      # storage dtype for weights/activations
_NEG = -1.0e4                            # "-inf" sentinel for maxpool padding
_VMEM = pltpu.MemorySpace.VMEM


# ---------------------------------------------------------------------------
# In-kernel building blocks
# ---------------------------------------------------------------------------
def _silu(x):
    return x * jax.nn.sigmoid(x)


def _cbs(w, b, xb):
    """ConvModule core: (BN-folded) matmul + bias + SiLU, f32 epilogue."""
    y = jnp.dot(w, xb, preferred_element_type=jnp.float32) + b
    return _silu(y)


def _csp_body(xb, mask, wms, bms, w1_ref, b1_ref, w2_ref, b2_ref,
              wf1, wf2, bf, patch_ref, *, mid, Wp, Mp, shortcut, nblk):
    """CSPLayer on the padded-flat (C, Mp) activation, entirely inside VMEM.

    The bottleneck 3x3 conv assembles its 9-tap patch matrix in `patch_ref` via
    uniform column shifts (the zero ring of the flat layout supplies the conv's
    zero padding) and runs as one K = 9*mid matmul."""
    ms = _cbs(wms, bms, xb)                        # fused main+short 1x1
    x_main = ms[:mid, :]
    x_short_b = ms[mid:, :].astype(_ACT)
    for blk in range(nblk):
        y1 = _cbs(w1_ref[blk], b1_ref[blk], x_main.astype(_ACT)) * mask
        patch_ref[...] = jnp.zeros(patch_ref.shape, patch_ref.dtype)
        t = 0
        for kh in range(3):
            for kw in range(3):
                s = (kh - 1) * Wp + (kw - 1)       # tap == uniform column shift
                lo, hi = max(0, -s), Mp - max(0, s)
                patch_ref[t * mid:(t + 1) * mid, lo:hi] = y1[:, lo + s:hi + s]
                t += 1
        y2 = _cbs(w2_ref[blk], b2_ref[blk], patch_ref[...].astype(_ACT))
        x_main = x_main + y2 if shortcut else y2
    acc = jnp.dot(wf1, x_main.astype(_ACT), preferred_element_type=jnp.float32)
    acc = acc + jnp.dot(wf2, x_short_b, preferred_element_type=jnp.float32)
    return _silu(acc + bf)                         # final 1x1 over implicit concat


# ---------------------------------------------------------------------------
# Pallas kernels (one per stage, whole model = 5 pallas_calls)
# ---------------------------------------------------------------------------
def _stem_kernel(p_ref, mask_ref, w_ref, o_ref):
    acc = jnp.dot(w_ref[...], p_ref[...], preferred_element_type=jnp.float32)
    o_ref[...] = (_silu(acc) * mask_ref[...]).astype(o_ref.dtype)


def _stage_kernel(p_ref, mask_ref, wd_ref, wms_ref, bms_ref, w1_ref, b1_ref,
                  w2_ref, b2_ref, wf1_ref, wf2_ref, bf_ref, o_ref, patch_ref,
                  *, mid, Wp, Mp, shortcut, nblk):
    mask = mask_ref[...]
    x = _silu(jnp.dot(wd_ref[...], p_ref[...],
                      preferred_element_type=jnp.float32))    # 3x3/s2 entry conv
    out = _csp_body(x.astype(_ACT), mask, wms_ref[...], bms_ref[...],
                    w1_ref, b1_ref, w2_ref, b2_ref,
                    wf1_ref[...], wf2_ref[...], bf_ref[...], patch_ref,
                    mid=mid, Wp=Wp, Mp=Mp, shortcut=shortcut, nblk=nblk)
    o_ref[...] = (out * mask).astype(o_ref.dtype)


def _stage4_kernel(p_ref, mask_ref, wd_ref, ws1_ref, bs1_ref, ws2_ref, bs2_ref,
                   wms_ref, bms_ref, w1_ref, b1_ref, w2_ref, b2_ref,
                   wf1_ref, wf2_ref, bf_ref, o_ref, patch_ref, pool_ref,
                   *, mid, Wp, Mp, G, shortcut, nblk):
    mask = mask_ref[...]
    x = _silu(jnp.dot(wd_ref[...], p_ref[...],
                      preferred_element_type=jnp.float32))    # 3x3/s2 entry conv

    # ---- SPP bottleneck (k = 5, 9, 13), lane-dense, fully in VMEM ----------
    y = _cbs(ws1_ref[...], bs1_ref[...], x.astype(_ACT))      # 1x1 reduce

    def put(v):          # keep interior values, force ring/guards to sentinel
        pool_ref[:, G:G + Mp] = v * mask + _NEG * (1.0 - mask)

    def maxpass(offs):
        m = pool_ref[:, G + offs[0]:G + offs[0] + Mp]
        for off in offs[1:]:
            m = jnp.maximum(m, pool_ref[:, G + off:G + off + Mp])
        return m

    def pool5():         # separable 5x5 max pool (1x5 then 5x1) on flat layout
        put(maxpass([-2, -1, 0, 1, 2]))
        v = maxpass([-2 * Wp, -Wp, 0, Wp, 2 * Wp])
        put(v)           # re-mask so the cascade stays exact
        return v

    pool_ref[...] = jnp.full(pool_ref.shape, _NEG, pool_ref.dtype)
    put(y)
    p5 = pool5()         # maxpool k=5
    p9 = pool5()         # maxpool k=9  == pool5(pool5)
    p13 = pool5()        # maxpool k=13 == pool5(pool5(pool5))

    # SPP conv2 over the implicit concat [y, p5, p9, p13] (never materialized)
    acc = jnp.dot(ws2_ref[0], y.astype(_ACT), preferred_element_type=jnp.float32)
    acc = acc + jnp.dot(ws2_ref[1], p5.astype(_ACT), preferred_element_type=jnp.float32)
    acc = acc + jnp.dot(ws2_ref[2], p9.astype(_ACT), preferred_element_type=jnp.float32)
    acc = acc + jnp.dot(ws2_ref[3], p13.astype(_ACT), preferred_element_type=jnp.float32)
    z = _silu(acc + bs2_ref[...])

    out = _csp_body(z.astype(_ACT), mask, wms_ref[...], bms_ref[...],
                    w1_ref, b1_ref, w2_ref, b2_ref,
                    wf1_ref[...], wf2_ref[...], bf_ref[...], patch_ref,
                    mid=mid, Wp=Wp, Mp=Mp, shortcut=shortcut, nblk=nblk)
    o_ref[...] = (out * mask).astype(o_ref.dtype)


# ---------------------------------------------------------------------------
# pallas_call wrappers (whole-array VMEM residency, grid = ())
# ---------------------------------------------------------------------------
def _stem_call(patches, mask, w):
    cout, mp = w.shape[0], patches.shape[1]
    return pl.pallas_call(
        _stem_kernel,
        out_shape=jax.ShapeDtypeStruct((cout, mp), _ACT),
        in_specs=[pl.BlockSpec(memory_space=_VMEM)] * 3,
        out_specs=pl.BlockSpec(memory_space=_VMEM),
    )(patches, mask, w)


def _stage_call(patches, mask, sp, *, Wp, shortcut):
    csp = sp['csp']
    mid, nblk = csp['mid'], csp['w1'].shape[0]
    cout, mp = sp['wd'].shape[0], patches.shape[1]
    kern = functools.partial(_stage_kernel, mid=mid, Wp=Wp, Mp=mp,
                             shortcut=shortcut, nblk=nblk)
    return pl.pallas_call(
        kern,
        out_shape=jax.ShapeDtypeStruct((cout, mp), _ACT),
        in_specs=[pl.BlockSpec(memory_space=_VMEM)] * 12,
        out_specs=pl.BlockSpec(memory_space=_VMEM),
        scratch_shapes=[pltpu.VMEM((9 * mid, mp), jnp.float32)],
    )(patches, mask, sp['wd'], csp['ms_w'], csp['ms_b'], csp['w1'], csp['b1'],
      csp['w2'], csp['b2'], csp['fw1'], csp['fw2'], csp['fb'])


def _stage4_call(patches, mask, sp, *, Wp, shortcut):
    csp, spp = sp['csp'], sp['spp']
    mid, nblk = csp['mid'], csp['w1'].shape[0]
    cout, mp = sp['wd'].shape[0], patches.shape[1]
    c2 = spp['w1'].shape[0]
    G = 2 * Wp + 2
    kern = functools.partial(_stage4_kernel, mid=mid, Wp=Wp, Mp=mp, G=G,
                             shortcut=shortcut, nblk=nblk)
    return pl.pallas_call(
        kern,
        out_shape=jax.ShapeDtypeStruct((cout, mp), _ACT),
        in_specs=[pl.BlockSpec(memory_space=_VMEM)] * 16,
        out_specs=pl.BlockSpec(memory_space=_VMEM),
        scratch_shapes=[pltpu.VMEM((9 * mid, mp), jnp.float32),
                        pltpu.VMEM((c2, mp + 2 * G), jnp.float32)],
    )(patches, mask, sp['wd'], spp['w1'], spp['b1'], spp['w2'], spp['b2'],
      csp['ms_w'], csp['ms_b'], csp['w1'], csp['b1'], csp['w2'], csp['b2'],
      csp['fw1'], csp['fw2'], csp['fb'])


# ---------------------------------------------------------------------------
# XLA glue: padded-flat layout helpers, patch construction, output extraction
# ---------------------------------------------------------------------------
def _pad_flat(x4d):
    """(C, N, H, W) -> zero-ring padded, flattened (C, N*(H+2)*(W+2))."""
    c, n, h, w = x4d.shape
    xp = jnp.pad(x4d, ((0, 0), (0, 0), (1, 1), (1, 1)))
    return xp.reshape(c, n * (h + 2) * (w + 2))


def _ring_mask(n, h, w):
    m = jnp.pad(jnp.ones((1, n, h, w), jnp.float32),
                ((0, 0), (0, 0), (1, 1), (1, 1)))
    return m.reshape(1, n * (h + 2) * (w + 2))


def _append_ones(p):
    return jnp.concatenate([p, jnp.ones((1, p.shape[1]), p.dtype)], axis=0)


def _stem_patches(x):
    """Focus space-to-depth + im2col of the stem 3x3/s1 conv, emitted directly
    in the padded-flat layout the stem matmul writes to, plus a ones row for
    the folded bias."""
    xc = jnp.concatenate([x[:, :, ::2, ::2], x[:, :, 1::2, ::2],
                          x[:, :, ::2, 1::2], x[:, :, 1::2, 1::2]], axis=0)
    c, n, h, w = xc.shape
    xp = jnp.pad(xc, ((0, 0), (0, 0), (1, 1), (1, 1)))
    taps = [xp[:, :, kh:kh + h, kw:kw + w] for kh in range(3) for kw in range(3)]
    p = _pad_flat(jnp.concatenate(taps, axis=0))
    return _append_ones(p), h, w


def _downsample_patches(y_flat, c, n, h, w):
    """im2col for the 3x3/s2 stage-entry conv.  The carried activation already
    has a zero ring which doubles as the conv's zero padding.  Output is in the
    padded-flat layout of the halved resolution, plus a ones row."""
    hp, wp = h + 2, w + 2
    y = y_flat.reshape(c, n, hp, wp)
    ho, wo = h // 2, w // 2
    taps = [y[:, :, kh:kh + 2 * ho:2, kw:kw + 2 * wo:2]
            for kh in range(3) for kw in range(3)]
    p = _pad_flat(jnp.concatenate(taps, axis=0))
    return _append_ones(p), ho, wo


def _unpad_nchw(y_flat, c, n, h, w):
    y = y_flat.reshape(c, n, h + 2, w + 2)[:, :, 1:h + 1, 1:w + 1]
    return jnp.transpose(y, (1, 0, 2, 3)).astype(jnp.float32)


# ---------------------------------------------------------------------------
# Parameter construction (deterministic, synthetic; BN folded in f32)
# ---------------------------------------------------------------------------
def _make_conv_params(key, cin, cout, k, eps=1e-3, fold_bias=False):
    fan_in = cin * k * k
    bound = 1.0 / math.sqrt(fan_in)                 # kaiming_uniform(a=sqrt(5))
    # weight layout: (cout, K) with K ordered (kh, kw, cin)
    w = jax.random.uniform(key, (cout, k * k * cin),
                           minval=-bound, maxval=bound, dtype=jnp.float32)
    scale = 1.0 / jnp.sqrt(jnp.ones((cout,), jnp.float32) + eps)   # gamma/sqrt(var+eps)
    bias = jnp.zeros((cout,), jnp.float32)                         # beta - mean*scale
    w = w * scale[:, None]                          # fold BN scale in f32, cast last
    if fold_bias:
        w = jnp.concatenate([w, bias[:, None]], axis=1)            # bias column
        return dict(w=w.astype(_ACT))
    return dict(w=w.astype(_ACT), b=bias.reshape(cout, 1))


def _make_csp_params(key, cin, cout, n, expand=0.5):
    mid = int(cout * expand)
    keys = jax.random.split(key, 3 + 2 * n)
    main = _make_conv_params(keys[0], cin, mid, 1)
    short = _make_conv_params(keys[1], cin, mid, 1)
    final = _make_conv_params(keys[2], 2 * mid, cout, 1)
    w1, b1, w2, b2 = [], [], [], []
    for b in range(n):
        c1 = _make_conv_params(keys[3 + 2 * b], mid, mid, 1)
        c2 = _make_conv_params(keys[4 + 2 * b], mid, mid, 3)
        w1.append(c1['w']); b1.append(c1['b'])
        w2.append(c2['w']); b2.append(c2['b'])
    return dict(
        mid=mid,
        ms_w=jnp.concatenate([main['w'], short['w']], axis=0),   # fused main+short
        ms_b=jnp.concatenate([main['b'], short['b']], axis=0),
        w1=jnp.stack(w1), b1=jnp.stack(b1),
        w2=jnp.stack(w2), b2=jnp.stack(b2),
        fw1=final['w'][:, :mid], fw2=final['w'][:, mid:], fb=final['b'])


def _make_spp_params(key, c, c2):
    k1, k2 = jax.random.split(key)
    conv1 = _make_conv_params(k1, c, c2, 1)
    conv2 = _make_conv_params(k2, 4 * c2, c, 1)
    # split conv2's columns into the 4 concat parts -> (4, c, c2)
    w2 = jnp.transpose(conv2['w'].reshape(c, 4, c2), (1, 0, 2))
    return dict(w1=conv1['w'], b1=conv1['b'], w2=w2, b2=conv2['b'])


def build_cspdarknet_params(key, subtype='cspdark_s',
                            out_channels=(16, 32, 64, 64, 128),
                            layers=(1, 2, 2, 1)):
    depth_mul, width_mul = CFG[subtype.split('_')[1]]
    oc = [int(c * width_mul) for c in out_channels]
    ly = [max(round(l * depth_mul), 1) for l in layers]
    keys = jax.random.split(key, 12)
    ki = iter(keys)
    params = {'stem': _make_conv_params(next(ki), 3 * 4, oc[0], 3, fold_bias=True),
              'oc': oc}
    for i in range(1, 5):
        sp = dict(wd=_make_conv_params(next(ki), oc[i - 1], oc[i], 3,
                                       fold_bias=True)['w'])
        if i == 4:
            sp['spp'] = _make_spp_params(next(ki), oc[4], oc[4] // 2)
        sp['csp'] = _make_csp_params(next(ki), oc[i], oc[i], ly[i - 1])
        params['stage{}'.format(i)] = sp
    return params


# ---------------------------------------------------------------------------
# Forward
# ---------------------------------------------------------------------------
def cspdarknet_forward(params, x_nchw, out_stages=(2, 3, 4)):
    oc = params['oc']
    n = x_nchw.shape[0]
    x = jnp.transpose(x_nchw, (1, 0, 2, 3)).astype(_ACT)      # NCHW -> (C, N, H, W)
    patches, h, w = _stem_patches(x)                          # Focus + stem im2col
    y = _stem_call(patches, _ring_mask(n, h, w), params['stem']['w'])
    c = oc[0]
    outputs = []
    for i in range(1, 5):
        sp = params['stage{}'.format(i)]
        patches, h, w = _downsample_patches(y, c, n, h, w)
        mask = _ring_mask(n, h, w)
        if i == 4:   # SPPF assumes ksizes == (5, 9, 13) (cascaded 5x5 pools)
            y = _stage4_call(patches, mask, sp, Wp=w + 2, shortcut=False)
        else:
            y = _stage_call(patches, mask, sp, Wp=w + 2, shortcut=True)
        c = oc[i]
        if i in out_stages:
            outputs.append(_unpad_nchw(y, c, n, h, w))
    return outputs if len(out_stages) > 1 else outputs[0]


# ---------------------------------------------------------------------------
if __name__ == "__main__":
    key = jax.random.PRNGKey(0)
    pkey, xkey = jax.random.split(key)

    # small-but-consistent config: cspdark_s (depth 0.33, width 0.5)
    params = build_cspdarknet_params(pkey, subtype='cspdark_s',
                                     out_channels=(16, 32, 64, 64, 128),
                                     layers=(1, 2, 2, 1))

    x = jax.random.normal(xkey, (2, 3, 64, 64), dtype=jnp.float32)  # NCHW

    fwd = jax.jit(functools.partial(cspdarknet_forward, params))
    outs = jax.block_until_ready(fwd(x))

    # expected (cspdark_s, 64x64 input): [(2,32,8,8), (2,32,4,4), (2,64,2,2)]
    assert len(outs) == 3
    assert outs[0].shape == (2, 32, 8, 8)
    assert outs[1].shape == (2, 32, 4, 4)
    assert outs[2].shape == (2, 64, 2, 2)
    assert all(bool(jnp.all(jnp.isfinite(o))) for o in outs)

    print("KERNEL_OK")
</pallas_src>

<mosaic_0001>
module attributes {stable_mosaic.version = 11 : i64} {
  func.func @_stem_kernel(%arg0: memref<109x2312xbf16, #tpu.memory_space<vmem>>, %arg1: memref<1x2312xf32, #tpu.memory_space<vmem>>, %arg2: memref<8x109xbf16, #tpu.memory_space<vmem>>, %arg3: memref<8x2312xbf16, #tpu.memory_space<vmem>>) attributes {dimension_semantics = [], scalar_prefetch = 0 : i64, scratch_operands = 0 : i64, tpu.core_type = #tpu.core_type<tc>} {
    %c0 = arith.constant 0 : index
    %c0_0 = arith.constant 0 : index
    %0 = vector.load %arg2[%c0, %c0_0] : memref<8x109xbf16, #tpu.memory_space<vmem>>, vector<8x109xbf16>
    %c0_1 = arith.constant 0 : index
    %c0_2 = arith.constant 0 : index
    %1 = vector.load %arg0[%c0_1, %c0_2] : memref<109x2312xbf16, #tpu.memory_space<vmem>>, vector<109x2312xbf16>
    %cst = arith.constant dense<0.000000e+00> : vector<8x2312xf32>
    %2 = tpu.matmul %0, %1, %cst {dimension_numbers = #tpu.dot_dimension_numbers<[1], [0], [0], [1], [0, 0, 1, 1], [], []>} : vector<8x109xbf16>, vector<109x2312xbf16>, vector<8x2312xf32> -> vector<8x2312xf32>
    %3 = arith.negf %2 : vector<8x2312xf32>
    %4 = math.exp %3 : vector<8x2312xf32>
    %cst_3 = arith.constant 1.000000e+00 : f32
    %5 = vector.broadcast %cst_3 : f32 to vector<8x2312xf32>
    %6 = arith.addf %5, %4 : vector<8x2312xf32>
    %7 = arith.divf %5, %6 : vector<8x2312xf32>
    %8 = arith.mulf %2, %7 : vector<8x2312xf32>
    %c0_4 = arith.constant 0 : index
    %c0_5 = arith.constant 0 : index
    %9 = vector.load %arg1[%c0_4, %c0_5] : memref<1x2312xf32, #tpu.memory_space<vmem>>, vector<1x2312xf32>
    %10 = vector.broadcast %9 : vector<1x2312xf32> to vector<8x2312xf32>
    %11 = arith.mulf %8, %10 : vector<8x2312xf32>
    %12 = arith.truncf %11 : vector<8x2312xf32> to vector<8x2312xbf16>
    %c0_6 = arith.constant 0 : index
    %c0_7 = arith.constant 0 : index
    %13 = vector.load %arg3[%c0_6, %c0_7] : memref<8x2312xbf16, #tpu.memory_space<vmem>>, vector<8x2312xbf16>
    tpu.vector_store %arg3[%c0_6, %c0_7], %12 {strides = array<i32>} : memref<8x2312xbf16, #tpu.memory_space<vmem>>, vector<8x2312xbf16>,
    return
  }
}

module attributes {stable_mosaic.version = 11 : i64} {
  func.func @_stage_kernel(%arg0: memref<73x648xbf16, #tpu.memory_space<vmem>>, %arg1: memref<1x648xf32, #tpu.memory_space<vmem>>, %arg2: memref<16x73xbf16, #tpu.memory_space<vmem>>, %arg3: memref<16x16xbf16, #tpu.memory_space<vmem>>, %arg4: memref<16x1xf32, #tpu.memory_space<vmem>>, %arg5: memref<1x8x8xbf16, #tpu.memory_space<vmem>>, %arg6: memref<1x8x1xf32, #tpu.memory_space<vmem>>, %arg7: memref<1x8x72xbf16, #tpu.memory_space<vmem>>, %arg8: memref<1x8x1xf32, #tpu.memory_space<vmem>>, %arg9: memref<16x8xbf16, #tpu.memory_space<vmem>>, %arg10: memref<16x8xbf16, #tpu.memory_space<vmem>>, %arg11: memref<16x1xf32, #tpu.memory_space<vmem>>, %arg12: memref<16x648xbf16, #tpu.memory_space<vmem>>, %arg13: memref<72x648xf32, #tpu.memory_space<vmem>>) attributes {dimension_semantics = [], scalar_prefetch = 0 : i64, scratch_operands = 1 : i64, tpu.core_type = #tpu.core_type<tc>} {
    %c0 = arith.constant 0 : index
    %c0_0 = arith.constant 0 : index
    %0 = vector.load %arg1[%c0, %c0_0] : memref<1x648xf32, #tpu.memory_space<vmem>>, vector<1x648xf32>
    %c0_1 = arith.constant 0 : index
    %c0_2 = arith.constant 0 : index
    %1 = vector.load %arg2[%c0_1, %c0_2] : memref<16x73xbf16, #tpu.memory_space<vmem>>, vector<16x73xbf16>
    %c0_3 = arith.constant 0 : index
    %c0_4 = arith.constant 0 : index
    %2 = vector.load %arg0[%c0_3, %c0_4] : memref<73x648xbf16, #tpu.memory_space<vmem>>, vector<73x648xbf16>
    %cst = arith.constant dense<0.000000e+00> : vector<16x648xf32>
    %3 = tpu.matmul %1, %2, %cst {dimension_numbers = #tpu.dot_dimension_numbers<[1], [0], [0], [1], [0, 0, 1, 1], [], []>} : vector<16x73xbf16>, vector<73x648xbf16>, vector<16x648xf32> -> vector<16x648xf32>
    %4 = arith.negf %3 : vector<16x648xf32>
    %5 = math.exp %4 : vector<16x648xf32>
    %cst_5 = arith.constant 1.000000e+00 : f32
    %6 = vector.broadcast %cst_5 : f32 to vector<16x648xf32>
    %7 = arith.addf %6, %5 : vector<16x648xf32>
    %8 = arith.divf %6, %7 : vector<16x648xf32>
    %9 = arith.mulf %3, %8 : vector<16x648xf32>
    %10 = arith.truncf %9 : vector<16x648xf32> to vector<16x648xbf16>
    %c0_6 = arith.constant 0 : index
    %c0_7 = arith.constant 0 : index
    %11 = vector.load %arg3[%c0_6, %c0_7] : memref<16x16xbf16, #tpu.memory_space<vmem>>, vector<16x16xbf16>
    %c0_8 = arith.constant 0 : index
    %c0_9 = arith.constant 0 : index
    %12 = vector.load %arg4[%c0_8, %c0_9] : memref<16x1xf32, #tpu.memory_space<vmem>>, vector<16x1xf32>
    %c0_10 = arith.constant 0 : index
    %c0_11 = arith.constant 0 : index
    %13 = vector.load %arg9[%c0_10, %c0_11] : memref<16x8xbf16, #tpu.memory_space<vmem>>, vector<16x8xbf16>
    %c0_12 = arith.constant 0 : index
    %c0_13 = arith.constant 0 : index
    %14 = vector.load %arg10[%c0_12, %c0_13] : memref<16x8xbf16, #tpu.memory_space<vmem>>, vector<16x8xbf16>
    %c0_14 = arith.constant 0 : index
    %c0_15 = arith.constant 0 : index
    %15 = vector.load %arg11[%c0_14, %c0_15] : memref<16x1xf32, #tpu.memory_space<vmem>>, vector<16x1xf32>
    %cst_16 = arith.constant dense<0.000000e+00> : vector<16x648xf32>
    %16 = tpu.matmul %11, %10, %cst_16 {dimension_numbers = #tpu.dot_dimension_numbers<[1], [0], [0], [1], [0, 0, 1, 1], [], []>} : vector<16x16xbf16>, vector<16x648xbf16>, vector<16x648xf32> -> vector<16x648xf32>
    %17 = vector.broadcast %12 : vector<16x1xf32> to vector<16x648xf32>
    %18 = arith.addf %16, %17 : vector<16x648xf32>
    %19 = arith.negf %18 : vector<16x648xf32>
    %20 = math.exp %19 : vector<16x648xf32>
    %cst_17 = arith.constant 1.000000e+00 : f32
    %21 = vector.broadcast %cst_17 : f32 to vector<16x648xf32>
    %22 = arith.addf %21, %20 : vector<16x648xf32>
    %23 = arith.divf %21, %22 : vector<16x648xf32>
    %24 = arith.mulf %18, %23 : vector<16x648xf32>
    %25 = vector.extract_strided_slice %24 {offsets = [0, 0], sizes = [8, 648], strides = [1, 1]} : vector<16x648xf32> to vector<8x648xf32>
    %26 = vector.extract_strided_slice %24 {offsets = [8, 0], sizes = [8, 648], strides = [1, 1]} : vector<16x648xf32> to vector<8x648xf32>
    %27 = arith.truncf %26 : vector<8x648xf32> to vector<8x648xbf16>
    %c0_18 = arith.constant 0 : index
    %c0_19 = arith.constant 0 : index
    %c0_20 = arith.constant 0 : index
    %28 = vector.load %arg5[%c0_18, %c0_19, %c0_20] : memref<1x8x8xbf16, #tpu.memory_space<vmem>>, vector<1x8x8xbf16>
    %29 = vector.shape_cast %28 : vector<1x8x8xbf16> to vector<8x8xbf16>
    %c0_21 = arith.constant 0 : index
    %c0_22 = arith.constant 0 : index
    %c0_23 = arith.constant 0 : index
    %30 = vector.load %arg6[%c0_21, %c0_22, %c0_23] : memref<1x8x1xf32, #tpu.memory_space<vmem>>, vector<1x8x1xf32>
    %31 = vector.shape_cast %30 : vector<1x8x1xf32> to vector<8x1xf32>
    %32 = arith.truncf %25 : vector<8x648xf32> to vector<8x648xbf16>
    %cst_24 = arith.constant dense<0.000000e+00> : vector<8x648xf32>
    %33 = tpu.matmul %29, %32, %cst_24 {dimension_numbers = #tpu.dot_dimension_numbers<[1], [0], [0], [1], [0, 0, 1, 1], [], []>} : vector<8x8xbf16>, vector<8x648xbf16>, vector<8x648xf32> -> vector<8x648xf32>
    %34 = vector.broadcast %31 : vector<8x1xf32> to vector<8x648xf32>
    %35 = arith.addf %33, %34 : vector<8x648xf32>
    %36 = arith.negf %35 : vector<8x648xf32>
    %37 = math.exp %36 : vector<8x648xf32>
    %cst_25 = arith.constant 1.000000e+00 : f32
    %38 = vector.broadcast %cst_25 : f32 to vector<8x648xf32>
    %39 = arith.addf %38, %37 : vector<8x648xf32>
    %40 = arith.divf %38, %39 : vector<8x648xf32>
    %41 = arith.mulf %35, %40 : vector<8x648xf32>
    %42 = vector.broadcast %0 : vector<1x648xf32> to vector<8x648xf32>
    %43 = arith.mulf %41, %42 : vector<8x648xf32>
    %cst_26 = arith.constant 0.000000e+00 : f32
    %44 = vector.broadcast %cst_26 : f32 to vector<72x648xf32>
    %c0_27 = arith.constant 0 : index
    %c0_28 = arith.constant 0 : index
    %45 = vector.load %arg13[%c0_27, %c0_28] : memref<72x648xf32, #tpu.memory_space<vmem>>, vector<72x648xf32>
    tpu.vector_store %arg13[%c0_27, %c0_28], %44 {strides = array<i32>} : memref<72x648xf32, #tpu.memory_space<vmem>>, vector<72x648xf32>,
    %46 = vector.extract_strided_slice %43 {offsets = [0, 0], sizes = [8, 629], strides = [1, 1]} : vector<8x648xf32> to vector<8x629xf32>
    %c0_29 = arith.constant 0 : index
    %c19 = arith.constant 19 : index
    %47 = vector.load %arg13[%c0_29, %c19] : memref<72x648xf32, #tpu.memory_space<vmem>>, vector<8x629xf32>
    tpu.vector_store %arg13[%c0_29, %c19], %46 {strides = array<i32>} : memref<72x648xf32, #tpu.memory_space<vmem>>, vector<8x629xf32>,
    %48 = vector.extract_strided_slice %43 {offsets = [0, 0], sizes = [8, 630], strides = [1, 1]} : vector<8x648xf32> to vector<8x630xf32>
    %c8 = arith.constant 8 : index
    %c18 = arith.constant 18 : index
    %49 = vector.load %arg13[%c8, %c18] : memref<72x648xf32, #tpu.memory_space<vmem>>, vector<8x630xf32>
    tpu.vector_store %arg13[%c8, %c18], %48 {strides = array<i32>} : memref<72x648xf32, #tpu.memory_space<vmem>>, vector<8x630xf32>,
    %50 = vector.extract_strided_slice %43 {offsets = [0, 0], sizes = [8, 631], strides = [1, 1]} : vector<8x648xf32> to vector<8x631xf32>
    %c16 = arith.constant 16 : index
    %c17 = arith.constant 17 : index
    %51 = vector.load %arg13[%c16, %c17] : memref<72x648xf32, #tpu.memory_space<vmem>>, vector<8x631xf32>
    tpu.vector_store %arg13[%c16, %c17], %50 {strides = array<i32>} : memref<72x648xf32, #tpu.memory_space<vmem>>, vector<8x631xf32>,
    %52 = vector.extract_strided_slice %43 {offsets = [0, 0], sizes = [8, 647], strides = [1, 1]} : vector<8x648xf32> to vector<8x647xf32>
    %c24 = arith.constant 24 : index
    %c1 = arith.constant 1 : index
    %53 = vector.load %arg13[%c24, %c1] : memref<72x648xf32, #tpu.memory_space<vmem>>, vector<8x647xf32>
    tpu.vector_store %arg13[%c24, %c1], %52 {strides = array<i32>} : memref<72x648xf32, #tpu.memory_space<vmem>>, vector<8x647xf32>,
    %c32 = arith.constant 32 : index
    %c0_30 = arith.constant 0 : index
    %54 = vector.load %arg13[%c32, %c0_30] : memref<72x648xf32, #tpu.memory_space<vmem>>, vector<8x648xf32>
    tpu.vector_store %arg13[%c32, %c0_30], %43 {strides = array<i32>} : memref<72x648xf32, #tpu.memory_space<vmem>>, vector<8x648xf32>,
    %55 = vector.extract_strided_slice %43 {offsets = [0, 1], sizes = [8, 647], strides = [1, 1]} : vector<8x648xf32> to vector<8x647xf32>
    %c40 = arith.constant 40 : index
    %c0_31 = arith.constant 0 : index
    %56 = vector.load %arg13[%c40, %c0_31] : memref<72x648xf32, #tpu.memory_space<vmem>>, vector<8x647xf32>
    tpu.vector_store %arg13[%c40, %c0_31], %55 {strides = array<i32>} : memref<72x648xf32, #tpu.memory_space<vmem>>, vector<8x647xf32>,
    %57 = vector.extract_strided_slice %43 {offsets = [0, 17], sizes = [8, 631], strides = [1, 1]} : vector<8x648xf32> to vector<8x631xf32>
    %c48 = arith.constant 48 : index
    %c0_32 = arith.constant 0 : index
    %58 = vector.load %arg13[%c48, %c0_32] : memref<72x648xf32, #tpu.memory_space<vmem>>, vector<8x631xf32>
    tpu.vector_store %arg13[%c48, %c0_32], %57 {strides = array<i32>} : memref<72x648xf32, #tpu.memory_space<vmem>>, vector<8x631xf32>,
    %59 = vector.extract_strided_slice %43 {offsets = [0, 18], sizes = [8, 630], strides = [1, 1]} : vector<8x648xf32> to vector<8x630xf32>
    %c56 = arith.constant 56 : index
    %c0_33 = arith.constant 0 : index
    %60 = vector.load %arg13[%c56, %c0_33] : memref<72x648xf32, #tpu.memory_space<vmem>>, vector<8x630xf32>
    tpu.vector_store %arg13[%c56, %c0_33], %59 {strides = array<i32>} : memref<72x648xf32, #tpu.memory_space<vmem>>, vector<8x630xf32>,
    %61 = vector.extract_strided_slice %43 {offsets = [0, 19], sizes = [8, 629], strides = [1, 1]} : vector<8x648xf32> to vector<8x629xf32>
    %c64 = arith.constant 64 : index
    %c0_34 = arith.constant 0 : index
    %62 = vector.load %arg13[%c64, %c0_34] : memref<72x648xf32, #tpu.memory_space<vmem>>, vector<8x629xf32>
    tpu.vector_store %arg13[%c64, %c0_34], %61 {strides = array<i32>} : memref<72x648xf32, #tpu.memory_space<vmem>>, vector<8x629xf32>,
    %c0_35 = arith.constant 0 : index
    %c0_36 = arith.constant 0 : index
    %c0_37 = arith.constant 0 : index
    %63 = vector.load %arg7[%c0_35, %c0_36, %c0_37] : memref<1x8x72xbf16, #tpu.memory_space<vmem>>, vector<1x8x72xbf16>
    %64 = vector.shape_cast %63 : vector<1x8x72xbf16> to vector<8x72xbf16>
    %c0_38 = arith.constant 0 : index
    %c0_39 = arith.constant 0 : index
    %c0_40 = arith.constant 0 : index
    %65 = vector.load %arg8[%c0_38, %c0_39, %c0_40] : memref<1x8x1xf32, #tpu.memory_space<vmem>>, vector<1x8x1xf32>
    %66 = vector.shape_cast %65 : vector<1x8x1xf32> to vector<8x1xf32>
    %c0_41 = arith.constant 0 : index
    %c0_42 = arith.constant 0 : index
    %67 = vector.load %arg13[%c0_41, %c0_42] : memref<72x648xf32, #tpu.memory_space<vmem>>, vector<72x648xf32>
    %68 = arith.truncf %67 : vector<72x648xf32> to vector<72x648xbf16>
    %cst_43 = arith.constant dense<0.000000e+00> : vector<8x648xf32>
    %69 = tpu.matmul %64, %68, %cst_43 {dimension_numbers = #tpu.dot_dimension_numbers<[1], [0], [0], [1], [0, 0, 1, 1], [], []>} : vector<8x72xbf16>, vector<72x648xbf16>, vector<8x648xf32> -> vector<8x648xf32>
    %70 = vector.broadcast %66 : vector<8x1xf32> to vector<8x648xf32>
    %71 = arith.addf %69, %70 : vector<8x648xf32>
    %72 = arith.negf %71 : vector<8x648xf32>
    %73 = math.exp %72 : vector<8x648xf32>
    %cst_44 = arith.constant 1.000000e+00 : f32
    %74 = vector.broadcast %cst_44 : f32 to vector<8x648xf32>
    %75 = arith.addf %74, %73 : vector<8x648xf32>
    %76 = arith.divf %74, %75 : vector<8x648xf32>
    %77 = arith.mulf %71, %76 : vector<8x648xf32>
    %78 = arith.addf %25, %77 : vector<8x648xf32>
    %79 = arith.truncf %78 : vector<8x648xf32> to vector<8x648xbf16>
    %cst_45 = arith.constant dense<0.000000e+00> : vector<16x648xf32>
    %80 = tpu.matmul %13, %79, %cst_45 {dimension_numbers = #tpu.dot_dimension_numbers<[1], [0], [0], [1], [0, 0, 1, 1], [], []>} : vector<16x8xbf16>, vector<8x648xbf16>, vector<16x648xf32> -> vector<16x648xf32>
    %cst_46 = arith.constant dense<0.000000e+00> : vector<16x648xf32>
    %81 = tpu.matmul %14, %27, %cst_46 {dimension_numbers = #tpu.dot_dimension_numbers<[1], [0], [0], [1], [0, 0, 1, 1], [], []>} : vector<16x8xbf16>, vector<8x648xbf16>, vector<16x648xf32> -> vector<16x648xf32>
    %82 = arith.addf %80, %81 : vector<16x648xf32>
    %83 = vector.broadcast %15 : vector<16x1xf32> to vector<16x648xf32>
    %84 = arith.addf %82, %83 : vector<16x648xf32>
    %85 = arith.negf %84 : vector<16x648xf32>
    %86 = math.exp %85 : vector<16x648xf32>
    %cst_47 = arith.constant 1.000000e+00 : f32
    %87 = vector.broadcast %cst_47 : f32 to vector<16x648xf32>
    %88 = arith.addf %87, %86 : vector<16x648xf32>
    %89 = arith.divf %87, %88 : vector<16x648xf32>
    %90 = arith.mulf %84, %89 : vector<16x648xf32>
    %91 = vector.broadcast %0 : vector<1x648xf32> to vector<16x648xf32>
    %92 = arith.mulf %90, %91 : vector<16x648xf32>
    %93 = arith.truncf %92 : vector<16x648xf32> to vector<16x648xbf16>
    %c0_48 = arith.constant 0 : index
    %c0_49 = arith.constant 0 : index
    %94 = vector.load %arg12[%c0_48, %c0_49] : memref<16x648xbf16, #tpu.memory_space<vmem>>, vector<16x648xbf16>
    tpu.vector_store %arg12[%c0_48, %c0_49], %93 {strides = array<i32>} : memref<16x648xbf16, #tpu.memory_space<vmem>>, vector<16x648xbf16>,
    return
  }
}

module attributes {stable_mosaic.version = 11 : i64} {
  func.func @_stage_kernel(%arg0: memref<145x200xbf16, #tpu.memory_space<vmem>>, %arg1: memref<1x200xf32, #tpu.memory_space<vmem>>, %arg2: memref<32x145xbf16, #tpu.memory_space<vmem>>, %arg3: memref<32x32xbf16, #tpu.memory_space<vmem>>, %arg4: memref<32x1xf32, #tpu.memory_space<vmem>>, %arg5: memref<1x16x16xbf16, #tpu.memory_space<vmem>>, %arg6: memref<1x16x1xf32, #tpu.memory_space<vmem>>, %arg7: memref<1x16x144xbf16, #tpu.memory_space<vmem>>, %arg8: memref<1x16x1xf32, #tpu.memory_space<vmem>>, %arg9: memref<32x16xbf16, #tpu.memory_space<vmem>>, %arg10: memref<32x16xbf16, #tpu.memory_space<vmem>>, %arg11: memref<32x1xf32, #tpu.memory_space<vmem>>, %arg12: memref<32x200xbf16, #tpu.memory_space<vmem>>, %arg13: memref<144x200xf32, #tpu.memory_space<vmem>>) attributes {dimension_semantics = [], scalar_prefetch = 0 : i64, scratch_operands = 1 : i64, tpu.core_type = #tpu.core_type<tc>} {
    %c0 = arith.constant 0 : index
    %c0_0 = arith.constant 0 : index
    %0 = vector.load %arg1[%c0, %c0_0] : memref<1x200xf32, #tpu.memory_space<vmem>>, vector<1x200xf32>
    %c0_1 = arith.constant 0 : index
    %c0_2 = arith.constant 0 : index
    %1 = vector.load %arg2[%c0_1, %c0_2] : memref<32x145xbf16, #tpu.memory_space<vmem>>, vector<32x145xbf16>
    %c0_3 = arith.constant 0 : index
    %c0_4 = arith.constant 0 : index
    %2 = vector.load %arg0[%c0_3, %c0_4] : memref<145x200xbf16, #tpu.memory_space<vmem>>, vector<145x200xbf16>
    %cst = arith.constant dense<0.000000e+00> : vector<32x200xf32>
    %3 = tpu.matmul %1, %2, %cst {dimension_numbers = #tpu.dot_dimension_numbers<[1], [0], [0], [1], [0, 0, 1, 1], [], []>} : vector<32x145xbf16>, vector<145x200xbf16>, vector<32x200xf32> -> vector<32x200xf32>
    %4 = arith.negf %3 : vector<32x200xf32>
    %5 = math.exp %4 : vector<32x200xf32>
    %cst_5 = arith.constant 1.000000e+00 : f32
    %6 = vector.broadcast %cst_5 : f32 to vector<32x200xf32>
    %7 = arith.addf %6, %5 : vector<32x200xf32>
    %8 = arith.divf %6, %7 : vector<32x200xf32>
    %9 = arith.mulf %3, %8 : vector<32x200xf32>
    %10 = arith.truncf %9 : vector<32x200xf32> to vector<32x200xbf16>
    %c0_6 = arith.constant 0 : index
    %c0_7 = arith.constant 0 : index
    %11 = vector.load %arg3[%c0_6, %c0_7] : memref<32x32xbf16, #tpu.memory_space<vmem>>, vector<32x32xbf16>
    %c0_8 = arith.constant 0 : index
    %c0_9 = arith.constant 0 : index
    %12 = vector.load %arg4[%c0_8, %c0_9] : memref<32x1xf32, #tpu.memory_space<vmem>>, vector<32x1xf32>
    %c0_10 = arith.constant 0 : index
    %c0_11 = arith.constant 0 : index
    %13 = vector.load %arg9[%c0_10, %c0_11] : memref<32x16xbf16, #tpu.memory_space<vmem>>, vector<32x16xbf16>
    %c0_12 = arith.constant 0 : index
    %c0_13 = arith.constant 0 : index
    %14 = vector.load %arg10[%c0_12, %c0_13] : memref<32x16xbf16, #tpu.memory_space<vmem>>, vector<32x16xbf16>
    %c0_14 = arith.constant 0 : index
    %c0_15 = arith.constant 0 : index
    %15 = vector.load %arg11[%c0_14, %c0_15] : memref<32x1xf32, #tpu.memory_space<vmem>>, vector<32x1xf32>
    %cst_16 = arith.constant dense<0.000000e+00> : vector<32x200xf32>
    %16 = tpu.matmul %11, %10, %cst_16 {dimension_numbers = #tpu.dot_dimension_numbers<[1], [0], [0], [1], [0, 0, 1, 1], [], []>} : vector<32x32xbf16>, vector<32x200xbf16>, vector<32x200xf32> -> vector<32x200xf32>
    %17 = vector.broadcast %12 : vector<32x1xf32> to vector<32x200xf32>
    %18 = arith.addf %16, %17 : vector<32x200xf32>
    %19 = arith.negf %18 : vector<32x200xf32>
    %20 = math.exp %19 : vector<32x200xf32>
    %cst_17 = arith.constant 1.000000e+00 : f32
    %21 = vector.broadcast %cst_17 : f32 to vector<32x200xf32>
    %22 = arith.addf %21, %20 : vector<32x200xf32>
    %23 = arith.divf %21, %22 : vector<32x200xf32>
    %24 = arith.mulf %18, %23 : vector<32x200xf32>
    %25 = vector.extract_strided_slice %24 {offsets = [0, 0], sizes = [16, 200], strides = [1, 1]} : vector<32x200xf32> to vector<16x200xf32>
    %26 = vector.extract_strided_slice %24 {offsets = [16, 0], sizes = [16, 200], strides = [1, 1]} : vector<32x200xf32> to vector<16x200xf32>
    %27 = arith.truncf %26 : vector<16x200xf32> to vector<16x200xbf16>
    %c0_18 = arith.constant 0 : index
    %c0_19 = arith.constant 0 : index
    %c0_20 = arith.constant 0 : index
    %28 = vector.load %arg5[%c0_18, %c0_19, %c0_20] : memref<1x16x16xbf16, #tpu.memory_space<vmem>>, vector<1x16x16xbf16>
    %29 = vector.shape_cast %28 : vector<1x16x16xbf16> to vector<16x16xbf16>
    %c0_21 = arith.constant 0 : index
    %c0_22 = arith.constant 0 : index
    %c0_23 = arith.constant 0 : index
    %30 = vector.load %arg6[%c0_21, %c0_22, %c0_23] : memref<1x16x1xf32, #tpu.memory_space<vmem>>, vector<1x16x1xf32>
    %31 = vector.shape_cast %30 : vector<1x16x1xf32> to vector<16x1xf32>
    %32 = arith.truncf %25 : vector<16x200xf32> to vector<16x200xbf16>
    %cst_24 = arith.constant dense<0.000000e+00> : vector<16x200xf32>
    %33 = tpu.matmul %29, %32, %cst_24 {dimension_numbers = #tpu.dot_dimension_numbers<[1], [0], [0], [1], [0, 0, 1, 1], [], []>} : vector<16x16xbf16>, vector<16x200xbf16>, vector<16x200xf32> -> vector<16x200xf32>
    %34 = vector.broadcast %31 : vector<16x1xf32> to vector<16x200xf32>
    %35 = arith.addf %33, %34 : vector<16x200xf32>
    %36 = arith.negf %35 : vector<16x200xf32>
    %37 = math.exp %36 : vector<16x200xf32>
    %cst_25 = arith.constant 1.000000e+00 : f32
    %38 = vector.broadcast %cst_25 : f32 to vector<16x200xf32>
    %39 = arith.addf %38, %37 : vector<16x200xf32>
    %40 = arith.divf %38, %39 : vector<16x200xf32>
    %41 = arith.mulf %35, %40 : vector<16x200xf32>
    %42 = vector.broadcast %0 : vector<1x200xf32> to vector<16x200xf32>
    %43 = arith.mulf %41, %42 : vector<16x200xf32>
    %cst_26 = arith.constant 0.000000e+00 : f32
    %44 = vector.broadcast %cst_26 : f32 to vector<144x200xf32>
    %c0_27 = arith.constant 0 : index
    %c0_28 = arith.constant 0 : index
    %45 = vector.load %arg13[%c0_27, %c0_28] : memref<144x200xf32, #tpu.memory_space<vmem>>, vector<144x200xf32>
    tpu.vector_store %arg13[%c0_27, %c0_28], %44 {strides = array<i32>} : memref<144x200xf32, #tpu.memory_space<vmem>>, vector<144x200xf32>,
    %46 = vector.extract_strided_slice %43 {offsets = [0, 0], sizes = [16, 189], strides = [1, 1]} : vector<16x200xf32> to vector<16x189xf32>
    %c0_29 = arith.constant 0 : index
    %c11 = arith.constant 11 : index
    %47 = vector.load %arg13[%c0_29, %c11] : memref<144x200xf32, #tpu.memory_space<vmem>>, vector<16x189xf32>
    tpu.vector_store %arg13[%c0_29, %c11], %46 {strides = array<i32>} : memref<144x200xf32, #tpu.memory_space<vmem>>, vector<16x189xf32>,
    %48 = vector.extract_strided_slice %43 {offsets = [0, 0], sizes = [16, 190], strides = [1, 1]} : vector<16x200xf32> to vector<16x190xf32>
    %c16 = arith.constant 16 : index
    %c10 = arith.constant 10 : index
    %49 = vector.load %arg13[%c16, %c10] : memref<144x200xf32, #tpu.memory_space<vmem>>, vector<16x190xf32>
    tpu.vector_store %arg13[%c16, %c10], %48 {strides = array<i32>} : memref<144x200xf32, #tpu.memory_space<vmem>>, vector<16x190xf32>,
    %50 = vector.extract_strided_slice %43 {offsets = [0, 0], sizes = [16, 191], strides = [1, 1]} : vector<16x200xf32> to vector<16x191xf32>
    %c32 = arith.constant 32 : index
    %c9 = arith.constant 9 : index
    %51 = vector.load %arg13[%c32, %c9] : memref<144x200xf32, #tpu.memory_space<vmem>>, vector<16x191xf32>
    tpu.vector_store %arg13[%c32, %c9], %50 {strides = array<i32>} : memref<144x200xf32, #tpu.memory_space<vmem>>, vector<16x191xf32>,
    %52 = vector.extract_strided_slice %43 {offsets = [0, 0], sizes = [16, 199], strides = [1, 1]} : vector<16x200xf32> to vector<16x199xf32>
    %c48 = arith.constant 48 : index
    %c1 = arith.constant 1 : index
    %53 = vector.load %arg13[%c48, %c1] : memref<144x200xf32, #tpu.memory_space<vmem>>, vector<16x199xf32>
    tpu.vector_store %arg13[%c48, %c1], %52 {strides = array<i32>} : memref<144x200xf32, #tpu.memory_space<vmem>>, vector<16x199xf32>,
    %c64 = arith.constant 64 : index
    %c0_30 = arith.constant 0 : index
    %54 = vector.load %arg13[%c64, %c0_30] : memref<144x200xf32, #tpu.memory_space<vmem>>, vector<16x200xf32>
    tpu.vector_store %arg13[%c64, %c0_30], %43 {strides = array<i32>} : memref<144x200xf32, #tpu.memory_space<vmem>>, vector<16x200xf32>,
    %55 = vector.extract_strided_slice %43 {offsets = [0, 1], sizes = [16, 199], strides = [1, 1]} : vector<16x200xf32> to vector<16x199xf32>
    %c80 = arith.constant 80 : index
    %c0_31 = arith.constant 0 : index
    %56 = vector.load %arg13[%c80, %c0_31] : memref<144x200xf32, #tpu.memory_space<vmem>>, vector<16x199xf32>
    tpu.vector_store %arg13[%c80, %c0_31], %55 {strides = array<i32>} : memref<144x200xf32, #tpu.memory_space<vmem>>, vector<16x199xf32>,
    %57 = vector.extract_strided_slice %43 {offsets = [0, 9], sizes = [16, 191], strides = [1, 1]} : vector<16x200xf32> to vector<16x191xf32>
    %c96 = arith.constant 96 : index
    %c0_32 = arith.constant 0 : index
    %58 = vector.load %arg13[%c96, %c0_32] : memref<144x200xf32, #tpu.memory_space<vmem>>, vector<16x191xf32>
    tpu.vector_store %arg13[%c96, %c0_32], %57 {strides = array<i32>} : memref<144x200xf32, #tpu.memory_space<vmem>>, vector<16x191xf32>,
    %59 = vector.extract_strided_slice %43 {offsets = [0, 10], sizes = [16, 190], strides = [1, 1]} : vector<16x200xf32> to vector<16x190xf32>
    %c112 = arith.constant 112 : index
    %c0_33 = arith.constant 0 : index
    %60 = vector.load %arg13[%c112, %c0_33] : memref<144x200xf32, #tpu.memory_space<vmem>>, vector<16x190xf32>
    tpu.vector_store %arg13[%c112, %c0_33], %59 {strides = array<i32>} : memref<144x200xf32, #tpu.memory_space<vmem>>, vector<16x190xf32>,
    %61 = vector.extract_strided_slice %43 {offsets = [0, 11], sizes = [16, 189], strides = [1, 1]} : vector<16x200xf32> to vector<16x189xf32>
    %c128 = arith.constant 128 : index
    %c0_34 = arith.constant 0 : index
    %62 = vector.load %arg13[%c128, %c0_34] : memref<144x200xf32, #tpu.memory_space<vmem>>, vector<16x189xf32>
    tpu.vector_store %arg13[%c128, %c0_34], %61 {strides = array<i32>} : memref<144x200xf32, #tpu.memory_space<vmem>>, vector<16x189xf32>,
    %c0_35 = arith.constant 0 : index
    %c0_36 = arith.constant 0 : index
    %c0_37 = arith.constant 0 : index
    %63 = vector.load %arg7[%c0_35, %c0_36, %c0_37] : memref<1x16x144xbf16, #tpu.memory_space<vmem>>, vector<1x16x144xbf16>
    %64 = vector.shape_cast %63 : vector<1x16x144xbf16> to vector<16x144xbf16>
    %c0_38 = arith.constant 0 : index
    %c0_39 = arith.constant 0 : index
    %c0_40 = arith.constant 0 : index
    %65 = vector.load %arg8[%c0_38, %c0_39, %c0_40] : memref<1x16x1xf32, #tpu.memory_space<vmem>>, vector<1x16x1xf32>
    %66 = vector.shape_cast %65 : vector<1x16x1xf32> to vector<16x1xf32>
    %c0_41 = arith.constant 0 : index
    %c0_42 = arith.constant 0 : index
    %67 = vector.load %arg13[%c0_41, %c0_42] : memref<144x200xf32, #tpu.memory_space<vmem>>, vector<144x200xf32>
    %68 = arith.truncf %67 : vector<144x200xf32> to vector<144x200xbf16>
    %cst_43 = arith.constant dense<0.000000e+00> : vector<16x200xf32>
    %69 = tpu.matmul %64, %68, %cst_43 {dimension_numbers = #tpu.dot_dimension_numbers<[1], [0], [0], [1], [0, 0, 1, 1], [], []>} : vector<16x144xbf16>, vector<144x200xbf16>, vector<16x200xf32> -> vector<16x200xf32>
    %70 = vector.broadcast %66 : vector<16x1xf32> to vector<16x200xf32>
    %71 = arith.addf %69, %70 : vector<16x200xf32>
    %72 = arith.negf %71 : vector<16x200xf32>
    %73 = math.exp %72 : vector<16x200xf32>
    %cst_44 = arith.constant 1.000000e+00 : f32
    %74 = vector.broadcast %cst_44 : f32 to vector<16x200xf32>
    %75 = arith.addf %74, %73 : vector<16x200xf32>
    %76 = arith.divf %74, %75 : vector<16x200xf32>
    %77 = arith.mulf %71, %76 : vector<16x200xf32>
    %78 = arith.addf %25, %77 : vector<16x200xf32>
    %79 = arith.truncf %78 : vector<16x200xf32> to vector<16x200xbf16>
    %cst_45 = arith.constant dense<0.000000e+00> : vector<32x200xf32>
    %80 = tpu.matmul %13, %79, %cst_45 {dimension_numbers = #tpu.dot_dimension_numbers<[1], [0], [0], [1], [0, 0, 1, 1], [], []>} : vector<32x16xbf16>, vector<16x200xbf16>, vector<32x200xf32> -> vector<32x200xf32>
    %cst_46 = arith.constant dense<0.000000e+00> : vector<32x200xf32>
    %81 = tpu.matmul %14, %27, %cst_46 {dimension_numbers = #tpu.dot_dimension_numbers<[1], [0], [0], [1], [0, 0, 1, 1], [], []>} : vector<32x16xbf16>, vector<16x200xbf16>, vector<32x200xf32> -> vector<32x200xf32>
    %82 = arith.addf %80, %81 : vector<32x200xf32>
    %83 = vector.broadcast %15 : vector<32x1xf32> to vector<32x200xf32>
    %84 = arith.addf %82, %83 : vector<32x200xf32>
    %85 = arith.negf %84 : vector<32x200xf32>
    %86 = math.exp %85 : vector<32x200xf32>
    %cst_47 = arith.constant 1.000000e+00 : f32
    %87 = vector.broadcast %cst_47 : f32 to vector<32x200xf32>
    %88 = arith.addf %87, %86 : vector<32x200xf32>
    %89 = arith.divf %87, %88 : vector<32x200xf32>
    %90 = arith.mulf %84, %89 : vector<32x200xf32>
    %91 = vector.broadcast %0 : vector<1x200xf32> to vector<32x200xf32>
    %92 = arith.mulf %90, %91 : vector<32x200xf32>
    %93 = arith.truncf %92 : vector<32x200xf32> to vector<32x200xbf16>
    %c0_48 = arith.constant 0 : index
    %c0_49 = arith.constant 0 : index
    %94 = vector.load %arg12[%c0_48, %c0_49] : memref<32x200xbf16, #tpu.memory_space<vmem>>, vector<32x200xbf16>
    tpu.vector_store %arg12[%c0_48, %c0_49], %93 {strides = array<i32>} : memref<32x200xbf16, #tpu.memory_space<vmem>>, vector<32x200xbf16>,
    return
  }
}

module attributes {stable_mosaic.version = 11 : i64} {
  func.func @_stage_kernel(%arg0: memref<289x72xbf16, #tpu.memory_space<vmem>>, %arg1: memref<1x72xf32, #tpu.memory_space<vmem>>, %arg2: memref<32x289xbf16, #tpu.memory_space<vmem>>, %arg3: memref<32x32xbf16, #tpu.memory_space<vmem>>, %arg4: memref<32x1xf32, #tpu.memory_space<vmem>>, %arg5: memref<1x16x16xbf16, #tpu.memory_space<vmem>>, %arg6: memref<1x16x1xf32, #tpu.memory_space<vmem>>, %arg7: memref<1x16x144xbf16, #tpu.memory_space<vmem>>, %arg8: memref<1x16x1xf32, #tpu.memory_space<vmem>>, %arg9: memref<32x16xbf16, #tpu.memory_space<vmem>>, %arg10: memref<32x16xbf16, #tpu.memory_space<vmem>>, %arg11: memref<32x1xf32, #tpu.memory_space<vmem>>, %arg12: memref<32x72xbf16, #tpu.memory_space<vmem>>, %arg13: memref<144x72xf32, #tpu.memory_space<vmem>>) attributes {dimension_semantics = [], scalar_prefetch = 0 : i64, scratch_operands = 1 : i64, tpu.core_type = #tpu.core_type<tc>} {
    %c0 = arith.constant 0 : index
    %c0_0 = arith.constant 0 : index
    %0 = vector.load %arg1[%c0, %c0_0] : memref<1x72xf32, #tpu.memory_space<vmem>>, vector<1x72xf32>
    %c0_1 = arith.constant 0 : index
    %c0_2 = arith.constant 0 : index
    %1 = vector.load %arg2[%c0_1, %c0_2] : memref<32x289xbf16, #tpu.memory_space<vmem>>, vector<32x289xbf16>
    %c0_3 = arith.constant 0 : index
    %c0_4 = arith.constant 0 : index
    %2 = vector.load %arg0[%c0_3, %c0_4] : memref<289x72xbf16, #tpu.memory_space<vmem>>, vector<289x72xbf16>
    %cst = arith.constant dense<0.000000e+00> : vector<32x72xf32>
    %3 = tpu.matmul %1, %2, %cst {dimension_numbers = #tpu.dot_dimension_numbers<[1], [0], [0], [1], [0, 0, 1, 1], [], []>} : vector<32x289xbf16>, vector<289x72xbf16>, vector<32x72xf32> -> vector<32x72xf32>
    %4 = arith.negf %3 : vector<32x72xf32>
    %5 = math.exp %4 : vector<32x72xf32>
    %cst_5 = arith.constant 1.000000e+00 : f32
    %6 = vector.broadcast %cst_5 : f32 to vector<32x72xf32>
    %7 = arith.addf %6, %5 : vector<32x72xf32>
    %8 = arith.divf %6, %7 : vector<32x72xf32>
    %9 = arith.mulf %3, %8 : vector<32x72xf32>
    %10 = arith.truncf %9 : vector<32x72xf32> to vector<32x72xbf16>
    %c0_6 = arith.constant 0 : index
    %c0_7 = arith.constant 0 : index
    %11 = vector.load %arg3[%c0_6, %c0_7] : memref<32x32xbf16, #tpu.memory_space<vmem>>, vector<32x32xbf16>
    %c0_8 = arith.constant 0 : index
    %c0_9 = arith.constant 0 : index
    %12 = vector.load %arg4[%c0_8, %c0_9] : memref<32x1xf32, #tpu.memory_space<vmem>>, vector<32x1xf32>
    %c0_10 = arith.constant 0 : index
    %c0_11 = arith.constant 0 : index
    %13 = vector.load %arg9[%c0_10, %c0_11] : memref<32x16xbf16, #tpu.memory_space<vmem>>, vector<32x16xbf16>
    %c0_12 = arith.constant 0 : index
    %c0_13 = arith.constant 0 : index
    %14 = vector.load %arg10[%c0_12, %c0_13] : memref<32x16xbf16, #tpu.memory_space<vmem>>, vector<32x16xbf16>
    %c0_14 = arith.constant 0 : index
    %c0_15 = arith.constant 0 : index
    %15 = vector.load %arg11[%c0_14, %c0_15] : memref<32x1xf32, #tpu.memory_space<vmem>>, vector<32x1xf32>
    %cst_16 = arith.constant dense<0.000000e+00> : vector<32x72xf32>
    %16 = tpu.matmul %11, %10, %cst_16 {dimension_numbers = #tpu.dot_dimension_numbers<[1], [0], [0], [1], [0, 0, 1, 1], [], []>} : vector<32x32xbf16>, vector<32x72xbf16>, vector<32x72xf32> -> vector<32x72xf32>
    %17 = vector.broadcast %12 : vector<32x1xf32> to vector<32x72xf32>
    %18 = arith.addf %16, %17 : vector<32x72xf32>
    %19 = arith.negf %18 : vector<32x72xf32>
    %20 = math.exp %19 : vector<32x72xf32>
    %cst_17 = arith.constant 1.000000e+00 : f32
    %21 = vector.broadcast %cst_17 : f32 to vector<32x72xf32>
    %22 = arith.addf %21, %20 : vector<32x72xf32>
    %23 = arith.divf %21, %22 : vector<32x72xf32>
    %24 = arith.mulf %18, %23 : vector<32x72xf32>
    %25 = vector.extract_strided_slice %24 {offsets = [0, 0], sizes = [16, 72], strides = [1, 1]} : vector<32x72xf32> to vector<16x72xf32>
    %26 = vector.extract_strided_slice %24 {offsets = [16, 0], sizes = [16, 72], strides = [1, 1]} : vector<32x72xf32> to vector<16x72xf32>
    %27 = arith.truncf %26 : vector<16x72xf32> to vector<16x72xbf16>
    %c0_18 = arith.constant 0 : index
    %c0_19 = arith.constant 0 : index
    %c0_20 = arith.constant 0 : index
    %28 = vector.load %arg5[%c0_18, %c0_19, %c0_20] : memref<1x16x16xbf16, #tpu.memory_space<vmem>>, vector<1x16x16xbf16>
    %29 = vector.shape_cast %28 : vector<1x16x16xbf16> to vector<16x16xbf16>
    %c0_21 = arith.constant 0 : index
    %c0_22 = arith.constant 0 : index
    %c0_23 = arith.constant 0 : index
    %30 = vector.load %arg6[%c0_21, %c0_22, %c0_23] : memref<1x16x1xf32, #tpu.memory_space<vmem>>, vector<1x16x1xf32>
    %31 = vector.shape_cast %30 : vector<1x16x1xf32> to vector<16x1xf32>
    %32 = arith.truncf %25 : vector<16x72xf32> to vector<16x72xbf16>
    %cst_24 = arith.constant dense<0.000000e+00> : vector<16x72xf32>
    %33 = tpu.matmul %29, %32, %cst_24 {dimension_numbers = #tpu.dot_dimension_numbers<[1], [0], [0], [1], [0, 0, 1, 1], [], []>} : vector<16x16xbf16>, vector<16x72xbf16>, vector<16x72xf32> -> vector<16x72xf32>
    %34 = vector.broadcast %31 : vector<16x1xf32> to vector<16x72xf32>
    %35 = arith.addf %33, %34 : vector<16x72xf32>
    %36 = arith.negf %35 : vector<16x72xf32>
    %37 = math.exp %36 : vector<16x72xf32>
    %cst_25 = arith.constant 1.000000e+00 : f32
    %38 = vector.broadcast %cst_25 : f32 to vector<16x72xf32>
    %39 = arith.addf %38, %37 : vector<16x72xf32>
    %40 = arith.divf %38, %39 : vector<16x72xf32>
    %41 = arith.mulf %35, %40 : vector<16x72xf32>
    %42 = vector.broadcast %0 : vector<1x72xf32> to vector<16x72xf32>
    %43 = arith.mulf %41, %42 : vector<16x72xf32>
    %cst_26 = arith.constant 0.000000e+00 : f32
    %44 = vector.broadcast %cst_26 : f32 to vector<144x72xf32>
    %c0_27 = arith.constant 0 : index
    %c0_28 = arith.constant 0 : index
    %45 = vector.load %arg13[%c0_27, %c0_28] : memref<144x72xf32, #tpu.memory_space<vmem>>, vector<144x72xf32>
    tpu.vector_store %arg13[%c0_27, %c0_28], %44 {strides = array<i32>} : memref<144x72xf32, #tpu.memory_space<vmem>>, vector<144x72xf32>,
    %46 = vector.extract_strided_slice %43 {offsets = [0, 0], sizes = [16, 65], strides = [1, 1]} : vector<16x72xf32> to vector<16x65xf32>
    %c0_29 = arith.constant 0 : index
    %c7 = arith.constant 7 : index
    %47 = vector.load %arg13[%c0_29, %c7] : memref<144x72xf32, #tpu.memory_space<vmem>>, vector<16x65xf32>
    tpu.vector_store %arg13[%c0_29, %c7], %46 {strides = array<i32>} : memref<144x72xf32, #tpu.memory_space<vmem>>, vector<16x65xf32>,
    %48 = vector.extract_strided_slice %43 {offsets = [0, 0], sizes = [16, 66], strides = [1, 1]} : vector<16x72xf32> to vector<16x66xf32>
    %c16 = arith.constant 16 : index
    %c6 = arith.constant 6 : index
    %49 = vector.load %arg13[%c16, %c6] : memref<144x72xf32, #tpu.memory_space<vmem>>, vector<16x66xf32>
    tpu.vector_store %arg13[%c16, %c6], %48 {strides = array<i32>} : memref<144x72xf32, #tpu.memory_space<vmem>>, vector<16x66xf32>,
    %50 = vector.extract_strided_slice %43 {offsets = [0, 0], sizes = [16, 67], strides = [1, 1]} : vector<16x72xf32> to vector<16x67xf32>
    %c32 = arith.constant 32 : index
    %c5 = arith.constant 5 : index
    %51 = vector.load %arg13[%c32, %c5] : memref<144x72xf32, #tpu.memory_space<vmem>>, vector<16x67xf32>
    tpu.vector_store %arg13[%c32, %c5], %50 {strides = array<i32>} : memref<144x72xf32, #tpu.memory_space<vmem>>, vector<16x67xf32>,
    %52 = vector.extract_strided_slice %43 {offsets = [0, 0], sizes = [16, 71], strides = [1, 1]} : vector<16x72xf32> to vector<16x71xf32>
    %c48 = arith.constant 48 : index
    %c1 = arith.constant 1 : index
    %53 = vector.load %arg13[%c48, %c1] : memref<144x72xf32, #tpu.memory_space<vmem>>, vector<16x71xf32>
    tpu.vector_store %arg13[%c48, %c1], %52 {strides = array<i32>} : memref<144x72xf32, #tpu.memory_space<vmem>>, vector<16x71xf32>,
    %c64 = arith.constant 64 : index
    %c0_30 = arith.constant 0 : index
    %54 = vector.load %arg13[%c64, %c0_30] : memref<144x72xf32, #tpu.memory_space<vmem>>, vector<16x72xf32>
    tpu.vector_store %arg13[%c64, %c0_30], %43 {strides = array<i32>} : memref<144x72xf32, #tpu.memory_space<vmem>>, vector<16x72xf32>,
    %55 = vector.extract_strided_slice %43 {offsets = [0, 1], sizes = [16, 71], strides = [1, 1]} : vector<16x72xf32> to vector<16x71xf32>
    %c80 = arith.constant 80 : index
    %c0_31 = arith.constant 0 : index
    %56 = vector.load %arg13[%c80, %c0_31] : memref<144x72xf32, #tpu.memory_space<vmem>>, vector<16x71xf32>
    tpu.vector_store %arg13[%c80, %c0_31], %55 {strides = array<i32>} : memref<144x72xf32, #tpu.memory_space<vmem>>, vector<16x71xf32>,
    %57 = vector.extract_strided_slice %43 {offsets = [0, 5], sizes = [16, 67], strides = [1, 1]} : vector<16x72xf32> to vector<16x67xf32>
    %c96 = arith.constant 96 : index
    %c0_32 = arith.constant 0 : index
    %58 = vector.load %arg13[%c96, %c0_32] : memref<144x72xf32, #tpu.memory_space<vmem>>, vector<16x67xf32>
    tpu.vector_store %arg13[%c96, %c0_32], %57 {strides = array<i32>} : memref<144x72xf32, #tpu.memory_space<vmem>>, vector<16x67xf32>,
    %59 = vector.extract_strided_slice %43 {offsets = [0, 6], sizes = [16, 66], strides = [1, 1]} : vector<16x72xf32> to vector<16x66xf32>
    %c112 = arith.constant 112 : index
    %c0_33 = arith.constant 0 : index
    %60 = vector.load %arg13[%c112, %c0_33] : memref<144x72xf32, #tpu.memory_space<vmem>>, vector<16x66xf32>
    tpu.vector_store %arg13[%c112, %c0_33], %59 {strides = array<i32>} : memref<144x72xf32, #tpu.memory_space<vmem>>, vector<16x66xf32>,
    %61 = vector.extract_strided_slice %43 {offsets = [0, 7], sizes = [16, 65], strides = [1, 1]} : vector<16x72xf32> to vector<16x65xf32>
    %c128 = arith.constant 128 : index
    %c0_34 = arith.constant 0 : index
    %62 = vector.load %arg13[%c128, %c0_34] : memref<144x72xf32, #tpu.memory_space<vmem>>, vector<16x65xf32>
    tpu.vector_store %arg13[%c128, %c0_34], %61 {strides = array<i32>} : memref<144x72xf32, #tpu.memory_space<vmem>>, vector<16x65xf32>,
    %c0_35 = arith.constant 0 : index
    %c0_36 = arith.constant 0 : index
    %c0_37 = arith.constant 0 : index
    %63 = vector.load %arg7[%c0_35, %c0_36, %c0_37] : memref<1x16x144xbf16, #tpu.memory_space<vmem>>, vector<1x16x144xbf16>
    %64 = vector.shape_cast %63 : vector<1x16x144xbf16> to vector<16x144xbf16>
    %c0_38 = arith.constant 0 : index
    %c0_39 = arith.constant 0 : index
    %c0_40 = arith.constant 0 : index
    %65 = vector.load %arg8[%c0_38, %c0_39, %c0_40] : memref<1x16x1xf32, #tpu.memory_space<vmem>>, vector<1x16x1xf32>
    %66 = vector.shape_cast %65 : vector<1x16x1xf32> to vector<16x1xf32>
    %c0_41 = arith.constant 0 : index
    %c0_42 = arith.constant 0 : index
    %67 = vector.load %arg13[%c0_41, %c0_42] : memref<144x72xf32, #tpu.memory_space<vmem>>, vector<144x72xf32>
    %68 = arith.truncf %67 : vector<144x72xf32> to vector<144x72xbf16>
    %cst_43 = arith.constant dense<0.000000e+00> : vector<16x72xf32>
    %69 = tpu.matmul %64, %68, %cst_43 {dimension_numbers = #tpu.dot_dimension_numbers<[1], [0], [0], [1], [0, 0, 1, 1], [], []>} : vector<16x144xbf16>, vector<144x72xbf16>, vector<16x72xf32> -> vector<16x72xf32>
    %70 = vector.broadcast %66 : vector<16x1xf32> to vector<16x72xf32>
    %71 = arith.addf %69, %70 : vector<16x72xf32>
    %72 = arith.negf %71 : vector<16x72xf32>
    %73 = math.exp %72 : vector<16x72xf32>
    %cst_44 = arith.constant 1.000000e+00 : f32
    %74 = vector.broadcast %cst_44 : f32 to vector<16x72xf32>
    %75 = arith.addf %74, %73 : vector<16x72xf32>
    %76 = arith.divf %74, %75 : vector<16x72xf32>
    %77 = arith.mulf %71, %76 : vector<16x72xf32>
    %78 = arith.addf %25, %77 : vector<16x72xf32>
    %79 = arith.truncf %78 : vector<16x72xf32> to vector<16x72xbf16>
    %cst_45 = arith.constant dense<0.000000e+00> : vector<32x72xf32>
    %80 = tpu.matmul %13, %79, %cst_45 {dimension_numbers = #tpu.dot_dimension_numbers<[1], [0], [0], [1], [0, 0, 1, 1], [], []>} : vector<32x16xbf16>, vector<16x72xbf16>, vector<32x72xf32> -> vector<32x72xf32>
    %cst_46 = arith.constant dense<0.000000e+00> : vector<32x72xf32>
    %81 = tpu.matmul %14, %27, %cst_46 {dimension_numbers = #tpu.dot_dimension_numbers<[1], [0], [0], [1], [0, 0, 1, 1], [], []>} : vector<32x16xbf16>, vector<16x72xbf16>, vector<32x72xf32> -> vector<32x72xf32>
    %82 = arith.addf %80, %81 : vector<32x72xf32>
    %83 = vector.broadcast %15 : vector<32x1xf32> to vector<32x72xf32>
    %84 = arith.addf %82, %83 : vector<32x72xf32>
    %85 = arith.negf %84 : vector<32x72xf32>
    %86 = math.exp %85 : vector<32x72xf32>
    %cst_47 = arith.constant 1.000000e+00 : f32
    %87 = vector.broadcast %cst_47 : f32 to vector<32x72xf32>
    %88 = arith.addf %87, %86 : vector<32x72xf32>
    %89 = arith.divf %87, %88 : vector<32x72xf32>
    %90 = arith.mulf %84, %89 : vector<32x72xf32>
    %91 = vector.broadcast %0 : vector<1x72xf32> to vector<32x72xf32>
    %92 = arith.mulf %90, %91 : vector<32x72xf32>
    %93 = arith.truncf %92 : vector<32x72xf32> to vector<32x72xbf16>
    %c0_48 = arith.constant 0 : index
    %c0_49 = arith.constant 0 : index
    %94 = vector.load %arg12[%c0_48, %c0_49] : memref<32x72xbf16, #tpu.memory_space<vmem>>, vector<32x72xbf16>
    tpu.vector_store %arg12[%c0_48, %c0_49], %93 {strides = array<i32>} : memref<32x72xbf16, #tpu.memory_space<vmem>>, vector<32x72xbf16>,
    return
  }
}

module attributes {stable_mosaic.version = 11 : i64} {
  func.func @_stage4_kernel(%arg0: memref<289x32xbf16, #tpu.memory_space<vmem>>, %arg1: memref<1x32xf32, #tpu.memory_space<vmem>>, %arg2: memref<64x289xbf16, #tpu.memory_space<vmem>>, %arg3: memref<32x64xbf16, #tpu.memory_space<vmem>>, %arg4: memref<32x1xf32, #tpu.memory_space<vmem>>, %arg5: memref<4x64x32xbf16, #tpu.memory_space<vmem>>, %arg6: memref<64x1xf32, #tpu.memory_space<vmem>>, %arg7: memref<64x64xbf16, #tpu.memory_space<vmem>>, %arg8: memref<64x1xf32, #tpu.memory_space<vmem>>, %arg9: memref<1x32x32xbf16, #tpu.memory_space<vmem>>, %arg10: memref<1x32x1xf32, #tpu.memory_space<vmem>>, %arg11: memref<1x32x288xbf16, #tpu.memory_space<vmem>>, %arg12: memref<1x32x1xf32, #tpu.memory_space<vmem>>, %arg13: memref<64x32xbf16, #tpu.memory_space<vmem>>, %arg14: memref<64x32xbf16, #tpu.memory_space<vmem>>, %arg15: memref<64x1xf32, #tpu.memory_space<vmem>>, %arg16: memref<64x32xbf16, #tpu.memory_space<vmem>>, %arg17: memref<288x32xf32, #tpu.memory_space<vmem>>, %arg18: memref<32x52xf32, #tpu.memory_space<vmem>>) attributes {dimension_semantics = [], scalar_prefetch = 0 : i64, scratch_operands = 2 : i64, tpu.core_type = #tpu.core_type<tc>} {
    %c0 = arith.constant 0 : index
    %c0_0 = arith.constant 0 : index
    %0 = vector.load %arg1[%c0, %c0_0] : memref<1x32xf32, #tpu.memory_space<vmem>>, vector<1x32xf32>
    %c0_1 = arith.constant 0 : index
    %c0_2 = arith.constant 0 : index
    %1 = vector.load %arg2[%c0_1, %c0_2] : memref<64x289xbf16, #tpu.memory_space<vmem>>, vector<64x289xbf16>
    %c0_3 = arith.constant 0 : index
    %c0_4 = arith.constant 0 : index
    %2 = vector.load %arg0[%c0_3, %c0_4] : memref<289x32xbf16, #tpu.memory_space<vmem>>, vector<289x32xbf16>
    %cst = arith.constant dense<0.000000e+00> : vector<64x32xf32>
    %3 = tpu.matmul %1, %2, %cst {dimension_numbers = #tpu.dot_dimension_numbers<[1], [0], [0], [1], [0, 0, 1, 1], [], []>} : vector<64x289xbf16>, vector<289x32xbf16>, vector<64x32xf32> -> vector<64x32xf32>
    %4 = arith.negf %3 : vector<64x32xf32>
    %5 = math.exp %4 : vector<64x32xf32>
    %cst_5 = arith.constant 1.000000e+00 : f32
    %6 = vector.broadcast %cst_5 : f32 to vector<64x32xf32>
    %7 = arith.addf %6, %5 : vector<64x32xf32>
    %8 = arith.divf %6, %7 : vector<64x32xf32>
    %9 = arith.mulf %3, %8 : vector<64x32xf32>
    %c0_6 = arith.constant 0 : index
    %c0_7 = arith.constant 0 : index
    %10 = vector.load %arg3[%c0_6, %c0_7] : memref<32x64xbf16, #tpu.memory_space<vmem>>, vector<32x64xbf16>
    %c0_8 = arith.constant 0 : index
    %c0_9 = arith.constant 0 : index
    %11 = vector.load %arg4[%c0_8, %c0_9] : memref<32x1xf32, #tpu.memory_space<vmem>>, vector<32x1xf32>
    %12 = arith.truncf %9 : vector<64x32xf32> to vector<64x32xbf16>
    %cst_10 = arith.constant dense<0.000000e+00> : vector<32x32xf32>
    %13 = tpu.matmul %10, %12, %cst_10 {dimension_numbers = #tpu.dot_dimension_numbers<[1], [0], [0], [1], [0, 0, 1, 1], [], []>} : vector<32x64xbf16>, vector<64x32xbf16>, vector<32x32xf32> -> vector<32x32xf32>
    %14 = vector.broadcast %11 : vector<32x1xf32> to vector<32x32xf32>
    %15 = arith.addf %13, %14 : vector<32x32xf32>
    %16 = arith.negf %15 : vector<32x32xf32>
    %17 = math.exp %16 : vector<32x32xf32>
    %cst_11 = arith.constant 1.000000e+00 : f32
    %18 = vector.broadcast %cst_11 : f32 to vector<32x32xf32>
    %19 = arith.addf %18, %17 : vector<32x32xf32>
    %20 = arith.divf %18, %19 : vector<32x32xf32>
    %21 = arith.mulf %15, %20 : vector<32x32xf32>
    %cst_12 = arith.constant -1.000000e+04 : f32
    %22 = vector.broadcast %cst_12 : f32 to vector<32x52xf32>
    %c0_13 = arith.constant 0 : index
    %c0_14 = arith.constant 0 : index
    %23 = vector.load %arg18[%c0_13, %c0_14] : memref<32x52xf32, #tpu.memory_space<vmem>>, vector<32x52xf32>
    tpu.vector_store %arg18[%c0_13, %c0_14], %22 {strides = array<i32>} : memref<32x52xf32, #tpu.memory_space<vmem>>, vector<32x52xf32>,
    %24 = vector.broadcast %0 : vector<1x32xf32> to vector<32x32xf32>
    %25 = arith.mulf %21, %24 : vector<32x32xf32>
    %cst_15 = arith.constant 1.000000e+00 : f32
    %26 = vector.broadcast %cst_15 : f32 to vector<1x32xf32>
    %27 = arith.subf %26, %0 : vector<1x32xf32>
    %cst_16 = arith.constant -1.000000e+04 : f32
    %28 = vector.broadcast %cst_16 : f32 to vector<1x32xf32>
    %29 = arith.mulf %28, %27 : vector<1x32xf32>
    %30 = vector.broadcast %29 : vector<1x32xf32> to vector<32x32xf32>
    %31 = arith.addf %25, %30 : vector<32x32xf32>
    %c0_17 = arith.constant 0 : index
    %c10 = arith.constant 10 : index
    %32 = vector.load %arg18[%c0_17, %c10] : memref<32x52xf32, #tpu.memory_space<vmem>>, vector<32x32xf32>
    tpu.vector_store %arg18[%c0_17, %c10], %31 {strides = array<i32>} : memref<32x52xf32, #tpu.memory_space<vmem>>, vector<32x32xf32>,
    %c0_18 = arith.constant 0 : index
    %c8 = arith.constant 8 : index
    %33 = vector.load %arg18[%c0_18, %c8] : memref<32x52xf32, #tpu.memory_space<vmem>>, vector<32x32xf32>
    %c0_19 = arith.constant 0 : index
    %c9 = arith.constant 9 : index
    %34 = vector.load %arg18[%c0_19, %c9] : memref<32x52xf32, #tpu.memory_space<vmem>>, vector<32x32xf32>
    %35 = arith.maximumf %33, %34 : vector<32x32xf32>
    %c0_20 = arith.constant 0 : index
    %c10_21 = arith.constant 10 : index
    %36 = vector.load %arg18[%c0_20, %c10_21] : memref<32x52xf32, #tpu.memory_space<vmem>>, vector<32x32xf32>
    %37 = arith.maximumf %35, %36 : vector<32x32xf32>
    %c0_22 = arith.constant 0 : index
    %c11 = arith.constant 11 : index
    %38 = vector.load %arg18[%c0_22, %c11] : memref<32x52xf32, #tpu.memory_space<vmem>>, vector<32x32xf32>
    %39 = arith.maximumf %37, %38 : vector<32x32xf32>
    %c0_23 = arith.constant 0 : index
    %c12 = arith.constant 12 : index
    %40 = vector.load %arg18[%c0_23, %c12] : memref<32x52xf32, #tpu.memory_space<vmem>>, vector<32x32xf32>
    %41 = arith.maximumf %39, %40 : vector<32x32xf32>
    %42 = vector.broadcast %0 : vector<1x32xf32> to vector<32x32xf32>
    %43 = arith.mulf %41, %42 : vector<32x32xf32>
    %cst_24 = arith.constant 1.000000e+00 : f32
    %44 = vector.broadcast %cst_24 : f32 to vector<1x32xf32>
    %45 = arith.subf %44, %0 : vector<1x32xf32>
    %cst_25 = arith.constant -1.000000e+04 : f32
    %46 = vector.broadcast %cst_25 : f32 to vector<1x32xf32>
    %47 = arith.mulf %46, %45 : vector<1x32xf32>
    %48 = vector.broadcast %47 : vector<1x32xf32> to vector<32x32xf32>
    %49 = arith.addf %43, %48 : vector<32x32xf32>
    %c0_26 = arith.constant 0 : index
    %c10_27 = arith.constant 10 : index
    %50 = vector.load %arg18[%c0_26, %c10_27] : memref<32x52xf32, #tpu.memory_space<vmem>>, vector<32x32xf32>
    tpu.vector_store %arg18[%c0_26, %c10_27], %49 {strides = array<i32>} : memref<32x52xf32, #tpu.memory_space<vmem>>, vector<32x32xf32>,
    %c0_28 = arith.constant 0 : index
    %c2 = arith.constant 2 : index
    %51 = vector.load %arg18[%c0_28, %c2] : memref<32x52xf32, #tpu.memory_space<vmem>>, vector<32x32xf32>
    %c0_29 = arith.constant 0 : index
    %c6 = arith.constant 6 : index
    %52 = vector.load %arg18[%c0_29, %c6] : memref<32x52xf32, #tpu.memory_space<vmem>>, vector<32x32xf32>
    %53 = arith.maximumf %51, %52 : vector<32x32xf32>
    %c0_30 = arith.constant 0 : index
    %c10_31 = arith.constant 10 : index
    %54 = vector.load %arg18[%c0_30, %c10_31] : memref<32x52xf32, #tpu.memory_space<vmem>>, vector<32x32xf32>
    %55 = arith.maximumf %53, %54 : vector<32x32xf32>
    %c0_32 = arith.constant 0 : index
    %c14 = arith.constant 14 : index
    %56 = vector.load %arg18[%c0_32, %c14] : memref<32x52xf32, #tpu.memory_space<vmem>>, vector<32x32xf32>
    %57 = arith.maximumf %55, %56 : vector<32x32xf32>
    %c0_33 = arith.constant 0 : index
    %c18 = arith.constant 18 : index
    %58 = vector.load %arg18[%c0_33, %c18] : memref<32x52xf32, #tpu.memory_space<vmem>>, vector<32x32xf32>
    %59 = arith.maximumf %57, %58 : vector<32x32xf32>
    %60 = vector.broadcast %0 : vector<1x32xf32> to vector<32x32xf32>
    %61 = arith.mulf %59, %60 : vector<32x32xf32>
    %cst_34 = arith.constant 1.000000e+00 : f32
    %62 = vector.broadcast %cst_34 : f32 to vector<1x32xf32>
    %63 = arith.subf %62, %0 : vector<1x32xf32>
    %cst_35 = arith.constant -1.000000e+04 : f32
    %64 = vector.broadcast %cst_35 : f32 to vector<1x32xf32>
    %65 = arith.mulf %64, %63 : vector<1x32xf32>
    %66 = vector.broadcast %65 : vector<1x32xf32> to vector<32x32xf32>
    %67 = arith.addf %61, %66 : vector<32x32xf32>
    %c0_36 = arith.constant 0 : index
    %c10_37 = arith.constant 10 : index
    %68 = vector.load %arg18[%c0_36, %c10_37] : memref<32x52xf32, #tpu.memory_space<vmem>>, vector<32x32xf32>
    tpu.vector_store %arg18[%c0_36, %c10_37], %67 {strides = array<i32>} : memref<32x52xf32, #tpu.memory_space<vmem>>, vector<32x32xf32>,
    %c0_38 = arith.constant 0 : index
    %c8_39 = arith.constant 8 : index
    %69 = vector.load %arg18[%c0_38, %c8_39] : memref<32x52xf32, #tpu.memory_space<vmem>>, vector<32x32xf32>
    %c0_40 = arith.constant 0 : index
    %c9_41 = arith.constant 9 : index
    %70 = vector.load %arg18[%c0_40, %c9_41] : memref<32x52xf32, #tpu.memory_space<vmem>>, vector<32x32xf32>
    %71 = arith.maximumf %69, %70 : vector<32x32xf32>
    %c0_42 = arith.constant 0 : index
    %c10_43 = arith.constant 10 : index
    %72 = vector.load %arg18[%c0_42, %c10_43] : memref<32x52xf32, #tpu.memory_space<vmem>>, vector<32x32xf32>
    %73 = arith.maximumf %71, %72 : vector<32x32xf32>
    %c0_44 = arith.constant 0 : index
    %c11_45 = arith.constant 11 : index
    %74 = vector.load %arg18[%c0_44, %c11_45] : memref<32x52xf32, #tpu.memory_space<vmem>>, vector<32x32xf32>
    %75 = arith.maximumf %73, %74 : vector<32x32xf32>
    %c0_46 = arith.constant 0 : index
    %c12_47 = arith.constant 12 : index
    %76 = vector.load %arg18[%c0_46, %c12_47] : memref<32x52xf32, #tpu.memory_space<vmem>>, vector<32x32xf32>
    %77 = arith.maximumf %75, %76 : vector<32x32xf32>
    %78 = vector.broadcast %0 : vector<1x32xf32> to vector<32x32xf32>
    %79 = arith.mulf %77, %78 : vector<32x32xf32>
    %cst_48 = arith.constant 1.000000e+00 : f32
    %80 = vector.broadcast %cst_48 : f32 to vector<1x32xf32>
    %81 = arith.subf %80, %0 : vector<1x32xf32>
    %cst_49 = arith.constant -1.000000e+04 : f32
    %82 = vector.broadcast %cst_49 : f32 to vector<1x32xf32>
    %83 = arith.mulf %82, %81 : vector<1x32xf32>
    %84 = vector.broadcast %83 : vector<1x32xf32> to vector<32x32xf32>
    %85 = arith.addf %79, %84 : vector<32x32xf32>
    %c0_50 = arith.constant 0 : index
    %c10_51 = arith.constant 10 : index
    %86 = vector.load %arg18[%c0_50, %c10_51] : memref<32x52xf32, #tpu.memory_space<vmem>>, vector<32x32xf32>
    tpu.vector_store %arg18[%c0_50, %c10_51], %85 {strides = array<i32>} : memref<32x52xf32, #tpu.memory_space<vmem>>, vector<32x32xf32>,
    %c0_52 = arith.constant 0 : index
    %c2_53 = arith.constant 2 : index
    %87 = vector.load %arg18[%c0_52, %c2_53] : memref<32x52xf32, #tpu.memory_space<vmem>>, vector<32x32xf32>
    %c0_54 = arith.constant 0 : index
    %c6_55 = arith.constant 6 : index
    %88 = vector.load %arg18[%c0_54, %c6_55] : memref<32x52xf32, #tpu.memory_space<vmem>>, vector<32x32xf32>
    %89 = arith.maximumf %87, %88 : vector<32x32xf32>
    %c0_56 = arith.constant 0 : index
    %c10_57 = arith.constant 10 : index
    %90 = vector.load %arg18[%c0_56, %c10_57] : memref<32x52xf32, #tpu.memory_space<vmem>>, vector<32x32xf32>
    %91 = arith.maximumf %89, %90 : vector<32x32xf32>
    %c0_58 = arith.constant 0 : index
    %c14_59 = arith.constant 14 : index
    %92 = vector.load %arg18[%c0_58, %c14_59] : memref<32x52xf32, #tpu.memory_space<vmem>>, vector<32x32xf32>
    %93 = arith.maximumf %91, %92 : vector<32x32xf32>
    %c0_60 = arith.constant 0 : index
    %c18_61 = arith.constant 18 : index
    %94 = vector.load %arg18[%c0_60, %c18_61] : memref<32x52xf32, #tpu.memory_space<vmem>>, vector<32x32xf32>
    %95 = arith.maximumf %93, %94 : vector<32x32xf32>
    %96 = vector.broadcast %0 : vector<1x32xf32> to vector<32x32xf32>
    %97 = arith.mulf %95, %96 : vector<32x32xf32>
    %cst_62 = arith.constant 1.000000e+00 : f32
    %98 = vector.broadcast %cst_62 : f32 to vector<1x32xf32>
    %99 = arith.subf %98, %0 : vector<1x32xf32>
    %cst_63 = arith.constant -1.000000e+04 : f32
    %100 = vector.broadcast %cst_63 : f32 to vector<1x32xf32>
    %101 = arith.mulf %100, %99 : vector<1x32xf32>
    %102 = vector.broadcast %101 : vector<1x32xf32> to vector<32x32xf32>
    %103 = arith.addf %97, %102 : vector<32x32xf32>
    %c0_64 = arith.constant 0 : index
    %c10_65 = arith.constant 10 : index
    %104 = vector.load %arg18[%c0_64, %c10_65] : memref<32x52xf32, #tpu.memory_space<vmem>>, vector<32x32xf32>
    tpu.vector_store %arg18[%c0_64, %c10_65], %103 {strides = array<i32>} : memref<32x52xf32, #tpu.memory_space<vmem>>, vector<32x32xf32>,
    %c0_66 = arith.constant 0 : index
    %c8_67 = arith.constant 8 : index
    %105 = vector.load %arg18[%c0_66, %c8_67] : memref<32x52xf32, #tpu.memory_space<vmem>>, vector<32x32xf32>
    %c0_68 = arith.constant 0 : index
    %c9_69 = arith.constant 9 : index
    %106 = vector.load %arg18[%c0_68, %c9_69] : memref<32x52xf32, #tpu.memory_space<vmem>>, vector<32x32xf32>
    %107 = arith.maximumf %105, %106 : vector<32x32xf32>
    %c0_70 = arith.constant 0 : index
    %c10_71 = arith.constant 10 : index
    %108 = vector.load %arg18[%c0_70, %c10_71] : memref<32x52xf32, #tpu.memory_space<vmem>>, vector<32x32xf32>
    %109 = arith.maximumf %107, %108 : vector<32x32xf32>
    %c0_72 = arith.constant 0 : index
    %c11_73 = arith.constant 11 : index
    %110 = vector.load %arg18[%c0_72, %c11_73] : memref<32x52xf32, #tpu.memory_space<vmem>>, vector<32x32xf32>
    %111 = arith.maximumf %109, %110 : vector<32x32xf32>
    %c0_74 = arith.constant 0 : index
    %c12_75 = arith.constant 12 : index
    %112 = vector.load %arg18[%c0_74, %c12_75] : memref<32x52xf32, #tpu.memory_space<vmem>>, vector<32x32xf32>
    %113 = arith.maximumf %111, %112 : vector<32x32xf32>
    %114 = vector.broadcast %0 : vector<1x32xf32> to vector<32x32xf32>
    %115 = arith.mulf %113, %114 : vector<32x32xf32>
    %cst_76 = arith.constant 1.000000e+00 : f32
    %116 = vector.broadcast %cst_76 : f32 to vector<1x32xf32>
    %117 = arith.subf %116, %0 : vector<1x32xf32>
    %cst_77 = arith.constant -1.000000e+04 : f32
    %118 = vector.broadcast %cst_77 : f32 to vector<1x32xf32>
    %119 = arith.mulf %118, %117 : vector<1x32xf32>
    %120 = vector.broadcast %119 : vector<1x32xf32> to vector<32x32xf32>
    %121 = arith.addf %115, %120 : vector<32x32xf32>
    %c0_78 = arith.constant 0 : index
    %c10_79 = arith.constant 10 : index
    %122 = vector.load %arg18[%c0_78, %c10_79] : memref<32x52xf32, #tpu.memory_space<vmem>>, vector<32x32xf32>
    tpu.vector_store %arg18[%c0_78, %c10_79], %121 {strides = array<i32>} : memref<32x52xf32, #tpu.memory_space<vmem>>, vector<32x32xf32>,
    %c0_80 = arith.constant 0 : index
    %c2_81 = arith.constant 2 : index
    %123 = vector.load %arg18[%c0_80, %c2_81] : memref<32x52xf32, #tpu.memory_space<vmem>>, vector<32x32xf32>
    %c0_82 = arith.constant 0 : index
    %c6_83 = arith.constant 6 : index
    %124 = vector.load %arg18[%c0_82, %c6_83] : memref<32x52xf32, #tpu.memory_space<vmem>>, vector<32x32xf32>
    %125 = arith.maximumf %123, %124 : vector<32x32xf32>
    %c0_84 = arith.constant 0 : index
    %c10_85 = arith.constant 10 : index
    %126 = vector.load %arg18[%c0_84, %c10_85] : memref<32x52xf32, #tpu.memory_space<vmem>>, vector<32x32xf32>
    %127 = arith.maximumf %125, %126 : vector<32x32xf32>
    %c0_86 = arith.constant 0 : index
    %c14_87 = arith.constant 14 : index
    %128 = vector.load %arg18[%c0_86, %c14_87] : memref<32x52xf32, #tpu.memory_space<vmem>>, vector<32x32xf32>
    %129 = arith.maximumf %127, %128 : vector<32x32xf32>
    %c0_88 = arith.constant 0 : index
    %c18_89 = arith.constant 18 : index
    %130 = vector.load %arg18[%c0_88, %c18_89] : memref<32x52xf32, #tpu.memory_space<vmem>>, vector<32x32xf32>
    %131 = arith.maximumf %129, %130 : vector<32x32xf32>
    %132 = vector.broadcast %0 : vector<1x32xf32> to vector<32x32xf32>
    %133 = arith.mulf %131, %132 : vector<32x32xf32>
    %cst_90 = arith.constant 1.000000e+00 : f32
    %134 = vector.broadcast %cst_90 : f32 to vector<1x32xf32>
    %135 = arith.subf %134, %0 : vector<1x32xf32>
    %cst_91 = arith.constant -1.000000e+04 : f32
    %136 = vector.broadcast %cst_91 : f32 to vector<1x32xf32>
    %137 = arith.mulf %136, %135 : vector<1x32xf32>
    %138 = vector.broadcast %137 : vector<1x32xf32> to vector<32x32xf32>
    %139 = arith.addf %133, %138 : vector<32x32xf32>
    %c0_92 = arith.constant 0 : index
    %c10_93 = arith.constant 10 : index
    %140 = vector.load %arg18[%c0_92, %c10_93] : memref<32x52xf32, #tpu.memory_space<vmem>>, vector<32x32xf32>
    tpu.vector_store %arg18[%c0_92, %c10_93], %139 {strides = array<i32>} : memref<32x52xf32, #tpu.memory_space<vmem>>, vector<32x32xf32>,
    %c0_94 = arith.constant 0 : index
    %c0_95 = arith.constant 0 : index
    %c0_96 = arith.constant 0 : index
    %141 = vector.load %arg5[%c0_94, %c0_95, %c0_96] : memref<4x64x32xbf16, #tpu.memory_space<vmem>>, vector<1x64x32xbf16>
    %142 = vector.shape_cast %141 : vector<1x64x32xbf16> to vector<64x32xbf16>
    %143 = arith.truncf %21 : vector<32x32xf32> to vector<32x32xbf16>
    %cst_97 = arith.constant dense<0.000000e+00> : vector<64x32xf32>
    %144 = tpu.matmul %142, %143, %cst_97 {dimension_numbers = #tpu.dot_dimension_numbers<[1], [0], [0], [1], [0, 0, 1, 1], [], []>} : vector<64x32xbf16>, vector<32x32xbf16>, vector<64x32xf32> -> vector<64x32xf32>
    %c1 = arith.constant 1 : index
    %c0_98 = arith.constant 0 : index
    %c0_99 = arith.constant 0 : index
    %145 = vector.load %arg5[%c1, %c0_98, %c0_99] : memref<4x64x32xbf16, #tpu.memory_space<vmem>>, vector<1x64x32xbf16>
    %146 = vector.shape_cast %145 : vector<1x64x32xbf16> to vector<64x32xbf16>
    %147 = arith.truncf %59 : vector<32x32xf32> to vector<32x32xbf16>
    %cst_100 = arith.constant dense<0.000000e+00> : vector<64x32xf32>
    %148 = tpu.matmul %146, %147, %cst_100 {dimension_numbers = #tpu.dot_dimension_numbers<[1], [0], [0], [1], [0, 0, 1, 1], [], []>} : vector<64x32xbf16>, vector<32x32xbf16>, vector<64x32xf32> -> vector<64x32xf32>
    %149 = arith.addf %144, %148 : vector<64x32xf32>
    %c2_101 = arith.constant 2 : index
    %c0_102 = arith.constant 0 : index
    %c0_103 = arith.constant 0 : index
    %150 = vector.load %arg5[%c2_101, %c0_102, %c0_103] : memref<4x64x32xbf16, #tpu.memory_space<vmem>>, vector<1x64x32xbf16>
    %151 = vector.shape_cast %150 : vector<1x64x32xbf16> to vector<64x32xbf16>
    %152 = arith.truncf %95 : vector<32x32xf32> to vector<32x32xbf16>
    %cst_104 = arith.constant dense<0.000000e+00> : vector<64x32xf32>
    %153 = tpu.matmul %151, %152, %cst_104 {dimension_numbers = #tpu.dot_dimension_numbers<[1], [0], [0], [1], [0, 0, 1, 1], [], []>} : vector<64x32xbf16>, vector<32x32xbf16>, vector<64x32xf32> -> vector<64x32xf32>
    %154 = arith.addf %149, %153 : vector<64x32xf32>
    %c3 = arith.constant 3 : index
    %c0_105 = arith.constant 0 : index
    %c0_106 = arith.constant 0 : index
    %155 = vector.load %arg5[%c3, %c0_105, %c0_106] : memref<4x64x32xbf16, #tpu.memory_space<vmem>>, vector<1x64x32xbf16>
    %156 = vector.shape_cast %155 : vector<1x64x32xbf16> to vector<64x32xbf16>
    %157 = arith.truncf %131 : vector<32x32xf32> to vector<32x32xbf16>
    %cst_107 = arith.constant dense<0.000000e+00> : vector<64x32xf32>
    %158 = tpu.matmul %156, %157, %cst_107 {dimension_numbers = #tpu.dot_dimension_numbers<[1], [0], [0], [1], [0, 0, 1, 1], [], []>} : vector<64x32xbf16>, vector<32x32xbf16>, vector<64x32xf32> -> vector<64x32xf32>
    %159 = arith.addf %154, %158 : vector<64x32xf32>
    %c0_108 = arith.constant 0 : index
    %c0_109 = arith.constant 0 : index
    %160 = vector.load %arg6[%c0_108, %c0_109] : memref<64x1xf32, #tpu.memory_space<vmem>>, vector<64x1xf32>
    %161 = vector.broadcast %160 : vector<64x1xf32> to vector<64x32xf32>
    %162 = arith.addf %159, %161 : vector<64x32xf32>
    %163 = arith.negf %162 : vector<64x32xf32>
    %164 = math.exp %163 : vector<64x32xf32>
    %cst_110 = arith.constant 1.000000e+00 : f32
    %165 = vector.broadcast %cst_110 : f32 to vector<64x32xf32>
    %166 = arith.addf %165, %164 : vector<64x32xf32>
    %167 = arith.divf %165, %166 : vector<64x32xf32>
    %168 = arith.mulf %162, %167 : vector<64x32xf32>
    %169 = arith.truncf %168 : vector<64x32xf32> to vector<64x32xbf16>
    %c0_111 = arith.constant 0 : index
    %c0_112 = arith.constant 0 : index
    %170 = vector.load %arg7[%c0_111, %c0_112] : memref<64x64xbf16, #tpu.memory_space<vmem>>, vector<64x64xbf16>
    %c0_113 = arith.constant 0 : index
    %c0_114 = arith.constant 0 : index
    %171 = vector.load %arg8[%c0_113, %c0_114] : memref<64x1xf32, #tpu.memory_space<vmem>>, vector<64x1xf32>
    %c0_115 = arith.constant 0 : index
    %c0_116 = arith.constant 0 : index
    %172 = vector.load %arg13[%c0_115, %c0_116] : memref<64x32xbf16, #tpu.memory_space<vmem>>, vector<64x32xbf16>
    %c0_117 = arith.constant 0 : index
    %c0_118 = arith.constant 0 : index
    %173 = vector.load %arg14[%c0_117, %c0_118] : memref<64x32xbf16, #tpu.memory_space<vmem>>, vector<64x32xbf16>
    %c0_119 = arith.constant 0 : index
    %c0_120 = arith.constant 0 : index
    %174 = vector.load %arg15[%c0_119, %c0_120] : memref<64x1xf32, #tpu.memory_space<vmem>>, vector<64x1xf32>
    %cst_121 = arith.constant dense<0.000000e+00> : vector<64x32xf32>
    %175 = tpu.matmul %170, %169, %cst_121 {dimension_numbers = #tpu.dot_dimension_numbers<[1], [0], [0], [1], [0, 0, 1, 1], [], []>} : vector<64x64xbf16>, vector<64x32xbf16>, vector<64x32xf32> -> vector<64x32xf32>
    %176 = vector.broadcast %171 : vector<64x1xf32> to vector<64x32xf32>
    %177 = arith.addf %175, %176 : vector<64x32xf32>
    %178 = arith.negf %177 : vector<64x32xf32>
    %179 = math.exp %178 : vector<64x32xf32>
    %cst_122 = arith.constant 1.000000e+00 : f32
    %180 = vector.broadcast %cst_122 : f32 to vector<64x32xf32>
    %181 = arith.addf %180, %179 : vector<64x32xf32>
    %182 = arith.divf %180, %181 : vector<64x32xf32>
    %183 = arith.mulf %177, %182 : vector<64x32xf32>
    %184 = vector.extract_strided_slice %183 {offsets = [0, 0], sizes = [32, 32], strides = [1, 1]} : vector<64x32xf32> to vector<32x32xf32>
    %185 = vector.extract_strided_slice %183 {offsets = [32, 0], sizes = [32, 32], strides = [1, 1]} : vector<64x32xf32> to vector<32x32xf32>
    %186 = arith.truncf %185 : vector<32x32xf32> to vector<32x32xbf16>
    %c0_123 = arith.constant 0 : index
    %c0_124 = arith.constant 0 : index
    %c0_125 = arith.constant 0 : index
    %187 = vector.load %arg9[%c0_123, %c0_124, %c0_125] : memref<1x32x32xbf16, #tpu.memory_space<vmem>>, vector<1x32x32xbf16>
    %188 = vector.shape_cast %187 : vector<1x32x32xbf16> to vector<32x32xbf16>
    %c0_126 = arith.constant 0 : index
    %c0_127 = arith.constant 0 : index
    %c0_128 = arith.constant 0 : index
    %189 = vector.load %arg10[%c0_126, %c0_127, %c0_128] : memref<1x32x1xf32, #tpu.memory_space<vmem>>, vector<1x32x1xf32>
    %190 = vector.shape_cast %189 : vector<1x32x1xf32> to vector<32x1xf32>
    %191 = arith.truncf %184 : vector<32x32xf32> to vector<32x32xbf16>
    %cst_129 = arith.constant dense<0.000000e+00> : vector<32x32xf32>
    %192 = tpu.matmul %188, %191, %cst_129 {dimension_numbers = #tpu.dot_dimension_numbers<[1], [0], [0], [1], [0, 0, 1, 1], [], []>} : vector<32x32xbf16>, vector<32x32xbf16>, vector<32x32xf32> -> vector<32x32xf32>
    %193 = vector.broadcast %190 : vector<32x1xf32> to vector<32x32xf32>
    %194 = arith.addf %192, %193 : vector<32x32xf32>
    %195 = arith.negf %194 : vector<32x32xf32>
    %196 = math.exp %195 : vector<32x32xf32>
    %cst_130 = arith.constant 1.000000e+00 : f32
    %197 = vector.broadcast %cst_130 : f32 to vector<32x32xf32>
    %198 = arith.addf %197, %196 : vector<32x32xf32>
    %199 = arith.divf %197, %198 : vector<32x32xf32>
    %200 = arith.mulf %194, %199 : vector<32x32xf32>
    %201 = vector.broadcast %0 : vector<1x32xf32> to vector<32x32xf32>
    %202 = arith.mulf %200, %201 : vector<32x32xf32>
    %cst_131 = arith.constant 0.000000e+00 : f32
    %203 = vector.broadcast %cst_131 : f32 to vector<288x32xf32>
    %c0_132 = arith.constant 0 : index
    %c0_133 = arith.constant 0 : index
    %204 = vector.load %arg17[%c0_132, %c0_133] : memref<288x32xf32, #tpu.memory_space<vmem>>, vector<288x32xf32>
    tpu.vector_store %arg17[%c0_132, %c0_133], %203 {strides = array<i32>} : memref<288x32xf32, #tpu.memory_space<vmem>>, vector<288x32xf32>,
    %205 = vector.extract_strided_slice %202 {offsets = [0, 0], sizes = [32, 27], strides = [1, 1]} : vector<32x32xf32> to vector<32x27xf32>
    %c0_134 = arith.constant 0 : index
    %c5 = arith.constant 5 : index
    %206 = vector.load %arg17[%c0_134, %c5] : memref<288x32xf32, #tpu.memory_space<vmem>>, vector<32x27xf32>
    tpu.vector_store %arg17[%c0_134, %c5], %205 {strides = array<i32>} : memref<288x32xf32, #tpu.memory_space<vmem>>, vector<32x27xf32>,
    %207 = vector.extract_strided_slice %202 {offsets = [0, 0], sizes = [32, 28], strides = [1, 1]} : vector<32x32xf32> to vector<32x28xf32>
    %c32 = arith.constant 32 : index
    %c4 = arith.constant 4 : index
    %208 = vector.load %arg17[%c32, %c4] : memref<288x32xf32, #tpu.memory_space<vmem>>, vector<32x28xf32>
    tpu.vector_store %arg17[%c32, %c4], %207 {strides = array<i32>} : memref<288x32xf32, #tpu.memory_space<vmem>>, vector<32x28xf32>,
    %209 = vector.extract_strided_slice %202 {offsets = [0, 0], sizes = [32, 29], strides = [1, 1]} : vector<32x32xf32> to vector<32x29xf32>
    %c64 = arith.constant 64 : index
    %c3_135 = arith.constant 3 : index
    %210 = vector.load %arg17[%c64, %c3_135] : memref<288x32xf32, #tpu.memory_space<vmem>>, vector<32x29xf32>
    tpu.vector_store %arg17[%c64, %c3_135], %209 {strides = array<i32>} : memref<288x32xf32, #tpu.memory_space<vmem>>, vector<32x29xf32>,
    %211 = vector.extract_strided_slice %202 {offsets = [0, 0], sizes = [32, 31], strides = [1, 1]} : vector<32x32xf32> to vector<32x31xf32>
    %c96 = arith.constant 96 : index
    %c1_136 = arith.constant 1 : index
    %212 = vector.load %arg17[%c96, %c1_136] : memref<288x32xf32, #tpu.memory_space<vmem>>, vector<32x31xf32>
    tpu.vector_store %arg17[%c96, %c1_136], %211 {strides = array<i32>} : memref<288x32xf32, #tpu.memory_space<vmem>>, vector<32x31xf32>,
    %c128 = arith.constant 128 : index
    %c0_137 = arith.constant 0 : index
    %213 = vector.load %arg17[%c128, %c0_137] : memref<288x32xf32, #tpu.memory_space<vmem>>, vector<32x32xf32>
    tpu.vector_store %arg17[%c128, %c0_137], %202 {strides = array<i32>} : memref<288x32xf32, #tpu.memory_space<vmem>>, vector<32x32xf32>,
    %214 = vector.extract_strided_slice %202 {offsets = [0, 1], sizes = [32, 31], strides = [1, 1]} : vector<32x32xf32> to vector<32x31xf32>
    %c160 = arith.constant 160 : index
    %c0_138 = arith.constant 0 : index
    %215 = vector.load %arg17[%c160, %c0_138] : memref<288x32xf32, #tpu.memory_space<vmem>>, vector<32x31xf32>
    tpu.vector_store %arg17[%c160, %c0_138], %214 {strides = array<i32>} : memref<288x32xf32, #tpu.memory_space<vmem>>, vector<32x31xf32>,
    %216 = vector.extract_strided_slice %202 {offsets = [0, 3], sizes = [32, 29], strides = [1, 1]} : vector<32x32xf32> to vector<32x29xf32>
    %c192 = arith.constant 192 : index
    %c0_139 = arith.constant 0 : index
    %217 = vector.load %arg17[%c192, %c0_139] : memref<288x32xf32, #tpu.memory_space<vmem>>, vector<32x29xf32>
    tpu.vector_store %arg17[%c192, %c0_139], %216 {strides = array<i32>} : memref<288x32xf32, #tpu.memory_space<vmem>>, vector<32x29xf32>,
    %218 = vector.extract_strided_slice %202 {offsets = [0, 4], sizes = [32, 28], strides = [1, 1]} : vector<32x32xf32> to vector<32x28xf32>
    %c224 = arith.constant 224 : index
    %c0_140 = arith.constant 0 : index
    %219 = vector.load %arg17[%c224, %c0_140] : memref<288x32xf32, #tpu.memory_space<vmem>>, vector<32x28xf32>
    tpu.vector_store %arg17[%c224, %c0_140], %218 {strides = array<i32>} : memref<288x32xf32, #tpu.memory_space<vmem>>, vector<32x28xf32>,
    %220 = vector.extract_strided_slice %202 {offsets = [0, 5], sizes = [32, 27], strides = [1, 1]} : vector<32x32xf32> to vector<32x27xf32>
    %c256 = arith.constant 256 : index
    %c0_141 = arith.constant 0 : index
    %221 = vector.load %arg17[%c256, %c0_141] : memref<288x32xf32, #tpu.memory_space<vmem>>, vector<32x27xf32>
    tpu.vector_store %arg17[%c256, %c0_141], %220 {strides = array<i32>} : memref<288x32xf32, #tpu.memory_space<vmem>>, vector<32x27xf32>,
    %c0_142 = arith.constant 0 : index
    %c0_143 = arith.constant 0 : index
    %c0_144 = arith.constant 0 : index
    %222 = vector.load %arg11[%c0_142, %c0_143, %c0_144] : memref<1x32x288xbf16, #tpu.memory_space<vmem>>, vector<1x32x288xbf16>
    %223 = vector.shape_cast %222 : vector<1x32x288xbf16> to vector<32x288xbf16>
    %c0_145 = arith.constant 0 : index
    %c0_146 = arith.constant 0 : index
    %c0_147 = arith.constant 0 : index
    %224 = vector.load %arg12[%c0_145, %c0_146, %c0_147] : memref<1x32x1xf32, #tpu.memory_space<vmem>>, vector<1x32x1xf32>
    %225 = vector.shape_cast %224 : vector<1x32x1xf32> to vector<32x1xf32>
    %c0_148 = arith.constant 0 : index
    %c0_149 = arith.constant 0 : index
    %226 = vector.load %arg17[%c0_148, %c0_149] : memref<288x32xf32, #tpu.memory_space<vmem>>, vector<288x32xf32>
    %227 = arith.truncf %226 : vector<288x32xf32> to vector<288x32xbf16>
    %cst_150 = arith.constant dense<0.000000e+00> : vector<32x32xf32>
    %228 = tpu.matmul %223, %227, %cst_150 {dimension_numbers = #tpu.dot_dimension_numbers<[1], [0], [0], [1], [0, 0, 1, 1], [], []>} : vector<32x288xbf16>, vector<288x32xbf16>, vector<32x32xf32> -> vector<32x32xf32>
    %229 = vector.broadcast %225 : vector<32x1xf32> to vector<32x32xf32>
    %230 = arith.addf %228, %229 : vector<32x32xf32>
    %231 = arith.negf %230 : vector<32x32xf32>
    %232 = math.exp %231 : vector<32x32xf32>
    %cst_151 = arith.constant 1.000000e+00 : f32
    %233 = vector.broadcast %cst_151 : f32 to vector<32x32xf32>
    %234 = arith.addf %233, %232 : vector<32x32xf32>
    %235 = arith.divf %233, %234 : vector<32x32xf32>
    %236 = arith.mulf %230, %235 : vector<32x32xf32>
    %237 = arith.truncf %236 : vector<32x32xf32> to vector<32x32xbf16>
    %cst_152 = arith.constant dense<0.000000e+00> : vector<64x32xf32>
    %238 = tpu.matmul %172, %237, %cst_152 {dimension_numbers = #tpu.dot_dimension_numbers<[1], [0], [0], [1], [0, 0, 1, 1], [], []>} : vector<64x32xbf16>, vector<32x32xbf16>, vector<64x32xf32> -> vector<64x32xf32>
    %cst_153 = arith.constant dense<0.000000e+00> : vector<64x32xf32>
    %239 = tpu.matmul %173, %186, %cst_153 {dimension_numbers = #tpu.dot_dimension_numbers<[1], [0], [0], [1], [0, 0, 1, 1], [], []>} : vector<64x32xbf16>, vector<32x32xbf16>, vector<64x32xf32> -> vector<64x32xf32>
    %240 = arith.addf %238, %239 : vector<64x32xf32>
    %241 = vector.broadcast %174 : vector<64x1xf32> to vector<64x32xf32>
    %242 = arith.addf %240, %241 : vector<64x32xf32>
    %243 = arith.negf %242 : vector<64x32xf32>
    %244 = math.exp %243 : vector<64x32xf32>
    %cst_154 = arith.constant 1.000000e+00 : f32
    %245 = vector.broadcast %cst_154 : f32 to vector<64x32xf32>
    %246 = arith.addf %245, %244 : vector<64x32xf32>
    %247 = arith.divf %245, %246 : vector<64x32xf32>
    %248 = arith.mulf %242, %247 : vector<64x32xf32>
    %249 = vector.broadcast %0 : vector<1x32xf32> to vector<64x32xf32>
    %250 = arith.mulf %248, %249 : vector<64x32xf32>
    %251 = arith.truncf %250 : vector<64x32xf32> to vector<64x32xbf16>
    %c0_155 = arith.constant 0 : index
    %c0_156 = arith.constant 0 : index
    %252 = vector.load %arg16[%c0_155, %c0_156] : memref<64x32xbf16, #tpu.memory_space<vmem>>, vector<64x32xbf16>
    tpu.vector_store %arg16[%c0_155, %c0_156], %251 {strides = array<i32>} : memref<64x32xbf16, #tpu.memory_space<vmem>>, vector<64x32xbf16>,
    return
  }
}

</mosaic_0001>

<bundles_post_ra>
// kernel: cspdarknet_forward.5
= control target key start
LH: loop header
LB: loop body
LE: loop exit
PB: predicated region body
PF: predicated region fallthrough
CT: control target
= control target key end

     0   :  { %v2112_v1 = vmov 0   ;;  %vm813_vm0 = vcmask 1045504   ;;  %vm814_vm1 = vcmask 1046528   ;;  %v2113_v20 = vmov 65535   ;;  %s2684_s0 = inlined_call_operand.vmem [shape: bf16[109,2312], index: 0, kind: input, shape index: {}]   ;;  %s2685_s2 = inlined_call_operand.vmem [shape: bf16[8,109], index: 2, kind: input, shape index: {}]   ;;  %s2686_s1 = inlined_call_operand.vmem [shape: f32[1,2312], index: 1, kind: input, shape index: {}]   ;;  %s2687_s3 = inlined_call_operand.vmem [shape: bf16[8,2312], index: 3, kind: output, shape index: {}]  }
   0x1   :  { %v1840_v0 = vld [vmem:[%s2684_s0 + $0x4] ss:$76 sps:$4 sm:$0xff]   ;;  %906 = vmatprep.mubr.bf16.mxu0 %v2112_v1  ;;  %947 = vmatprep.mubr.bf16.mxu1 %v2112_v1  ;;  %v1842_v2 = vld [vmem:[%s2684_s0 + $0xc] ss:$76 sps:$4 sm:$0xff]   ;;  %v1845_v4 = vld [vmem:[%s2684_s0 + $0x8] ss:$76 sps:$4 sm:$0xff]  }
   0x2   :  { %874 = vmatprep.subr.bf16.mxu0 %v1840_v0  ;;  %v1844_v3 = vld [vmem:[%s2684_s0] ss:$76 sps:$4 sm:$0xff]   ;;  %915 = vmatprep.subr.bf16.mxu1 %v1842_v2  ;;  %v1846_v5 = vld [vmem:[%s2684_s0 + $0x9c] ss:$76 sps:$4 sm:$0xff]   ;;  %v1848_v6 = vld [vmem:[%s2684_s0 + $0xa4] ss:$76 sps:$4 sm:$0xff]  }
   0x3   :  { %875 = vmatpush1.bf16.msra.mxu0 %v1844_v3  ;;  %916 = vmatpush1.bf16.msra.mxu1 %v1845_v4  ;;  %v1850_v7 = vld [vmem:[%s2684_s0 + $0x98] ss:$76 sps:$4 sm:$0xff]   ;;  %v1851_v8 = vld [vmem:[%s2684_s0 + $0xa0] ss:$76 sps:$4 sm:$0xff]   ;;  %v1854_v10 = vld [vmem:[%s2684_s0 + $0x13c] ss:$76 sps:$4 sm:$0xff]  }
   0x4   :  { %876 = vmatprep.subr.bf16.mxu0 %v1846_v5  ;;  %917 = vmatprep.subr.bf16.mxu1 %v1848_v6  ;;  %v1852_v9 = vld [vmem:[%s2684_s0 + $0x134] ss:$76 sps:$4 sm:$0xff]   ;;  %v1856_v11 = vld [vmem:[%s2684_s0 + $0x130] ss:$76 sps:$4 sm:$0xff]   ;;  %v1857_v12 = vld [vmem:[%s2684_s0 + $0x138] ss:$76 sps:$4 sm:$0xff]  }
   0x5   :  { %v1858_v13 = vld [vmem:[%s2684_s0 + $0x1cc] ss:$76 sps:$4 sm:$0xff]   ;;  %v1860_v14 = vld [vmem:[%s2684_s0 + $0x1d4] ss:$76 sps:$4 sm:$0xff]   ;;  %v1863_v16 = vld [vmem:[%s2684_s0 + $0x1d0] ss:$76 sps:$4 sm:$0xff]  }
   0x6   :  { %v1862_v15 = vld [vmem:[%s2684_s0 + $0x1c8] ss:$76 sps:$4 sm:$0xff]   ;;  %v1864_v17 = vld [vmem:[%s2684_s0 + $0x264] ss:$76 sps:$4 sm:$0xff]   ;;  %v1866_v18 = vld [vmem:[%s2684_s0 + $0x26c] ss:$76 sps:$4 sm:$0xff]  }
   0x7   :  { %877 = vmatpush1.bf16.msra.mxu0 %v1850_v7  ;;  %918 = vmatpush1.bf16.msra.mxu1 %v1851_v8  ;;  %v1868_v19 = vld [vmem:[%s2684_s0 + $0x260] ss:$76 sps:$4 sm:$0xff]   ;;  %v815_v21 = vsel %vm813_vm0, 4294967295, %v2113_v20  ;;  %v1869_v22 = vld [vmem:[%s2684_s0 + $0x268] ss:$76 sps:$4 sm:$0xff]   ;;  %vm809_vm2 = vcmask 891904  }
   0x8   :  { %878 = vmatprep.subr.bf16.mxu0 %v1852_v9  ;;  %919 = vmatprep.subr.bf16.mxu1 %v1854_v10  ;;  %v1870_v23 = vld [vmem:[%s2684_s0 + $0x2fc] ss:$76 sps:$4 sm:$0xff]   ;;  %v1872_v24 = vld [vmem:[%s2684_s0 + $0x304] ss:$76 sps:$4 sm:$0xff]   ;;  %v2213_v28 = vsel %vm814_vm1, %v815_v21, 0  ;;  %vm2115_vm3 = vmmov 0  }
   0x9   :  { %v1876_v25 = vld [vmem:[%s2684_s0 + $0x394] ss:$76 sps:$4 sm:$0x7f]   ;;  %v1878_v26 = vld [vmem:[%s2684_s0 + $0x39c] ss:$76 sps:$4 sm:$0x7f]  }
   0xa   :  { %v1874_v27 = vld [vmem:[%s2684_s0 + $0x2f8] ss:$76 sps:$4 sm:$0xff]   ;;  %v1880_v29 = vld [vmem:[%s2684_s0 + $0x390] ss:$76 sps:$4 sm:$0x7f]   ;;  %v821_v32 = vand.u32 %v1876_v25, %v2213_v28  ;;  %v827_v33 = vand.u32 %v1878_v26, %v2213_v28  ;;  %vm1622_vm4 = vcmask 60416  }
   0xb   :  { %879 = vmatpush1.bf16.msra.mxu0 %v1856_v11  ;;  %920 = vmatpush1.bf16.msra.mxu1 %v1857_v12  ;;  %v1875_v30 = vld [vmem:[%s2684_s0 + $0x300] ss:$76 sps:$4 sm:$0xff]   ;;  %v1881_v31 = vld [vmem:[%s2684_s0 + $0x398] ss:$76 sps:$4 sm:$0x7f]   ;;  %v818_v34 = vand.u32 %v1880_v29, %v2213_v28 }
   0xc   :  { %880 = vmatprep.subr.bf16.mxu0 %v1858_v13  ;;  %921 = vmatprep.subr.bf16.mxu1 %v1860_v14  ;;  %v824_v35 = vand.u32 %v1881_v31, %v2213_v28  ;;  %v1884_v36 = vld [vmem:[%s2684_s0 + $0x14] ss:$76 sps:$4 sm:$0xff]   ;;  %v1887_v37 = vld [vmem:[%s2684_s0 + $0x1c] ss:$76 sps:$4 sm:$0xff]   ;;  %v1885_v40 = vld [vmem:[%s2684_s0 + $0x18] ss:$76 sps:$4 sm:$0xff]  }
   0xd   :  { %v2237_v38 = vld [vmem:[%s2685_s2] sm:$0xf]  ;;  %v1882_v39 = vld [vmem:[%s2684_s0 + $0x10] ss:$76 sps:$4 sm:$0xff]   ;;  %v1890_v41 = vld [vmem:[%s2684_s0 + $0xac] ss:$76 sps:$4 sm:$0xff]  }
   0xe   :  { %v1893_v42 = vld [vmem:[%s2684_s0 + $0xb4] ss:$76 sps:$4 sm:$0xff]   ;;  %v1891_v44 = vld [vmem:[%s2684_s0 + $0xb0] ss:$76 sps:$4 sm:$0xff]   ;;  %v1899_v46 = vld [vmem:[%s2684_s0 + $0x14c] ss:$76 sps:$4 sm:$0xff]  }
   0xf   :  { %881 = vmatpush1.bf16.msra.mxu0 %v1862_v15  ;;  %922 = vmatpush1.bf16.msra.mxu1 %v1863_v16  ;;  %v1888_v43 = vld [vmem:[%s2684_s0 + $0xa8] ss:$76 sps:$4 sm:$0xff]   ;;  %v1896_v45 = vld [vmem:[%s2684_s0 + $0x144] ss:$76 sps:$4 sm:$0xff]   ;;  %v1894_v47 = vld [vmem:[%s2684_s0 + $0x140] ss:$76 sps:$4 sm:$0xff]  }
  0x10   :  { %882 = vmatprep.subr.bf16.mxu0 %v1864_v17  ;;  %923 = vmatprep.subr.bf16.mxu1 %v1866_v18  ;;  %v1897_v48 = vld [vmem:[%s2684_s0 + $0x148] ss:$76 sps:$4 sm:$0xff]   ;;  %v1905_v50 = vld [vmem:[%s2684_s0 + $0x1e4] ss:$76 sps:$4 sm:$0xff]   ;;  %v1903_v52 = vld [vmem:[%s2684_s0 + $0x1e0] ss:$76 sps:$4 sm:$0xff]  }
  0x11   :  { %v1902_v49 = vld [vmem:[%s2684_s0 + $0x1dc] ss:$76 sps:$4 sm:$0xff]   ;;  %v1900_v51 = vld [vmem:[%s2684_s0 + $0x1d8] ss:$76 sps:$4 sm:$0xff]   ;;  %v1908_v53 = vld [vmem:[%s2684_s0 + $0x274] ss:$76 sps:$4 sm:$0xff]  }
  0x12   :  { %v1911_v54 = vld [vmem:[%s2684_s0 + $0x27c] ss:$76 sps:$4 sm:$0xff]   ;;  %v1909_v56 = vld [vmem:[%s2684_s0 + $0x278] ss:$76 sps:$4 sm:$0xff]   ;;  %v1917_v58 = vld [vmem:[%s2684_s0 + $0x314] ss:$76 sps:$4 sm:$0xff]  }
  0x13   :  { %883 = vmatpush1.bf16.msra.mxu0 %v1868_v19  ;;  %924 = vmatpush1.bf16.msra.mxu1 %v1869_v22  ;;  %v1906_v55 = vld [vmem:[%s2684_s0 + $0x270] ss:$76 sps:$4 sm:$0xff]   ;;  %v1914_v57 = vld [vmem:[%s2684_s0 + $0x30c] ss:$76 sps:$4 sm:$0xff]   ;;  %v1912_v61 = vld [vmem:[%s2684_s0 + $0x308] ss:$76 sps:$4 sm:$0xff]  }
  0x14   :  { %884 = vmatprep.subr.bf16.mxu0 %v1870_v23  ;;  %925 = vmatprep.subr.bf16.mxu1 %v1872_v24  ;;  %v1920_v59 = vld [vmem:[%s2684_s0 + $0x3a4] ss:$76 sps:$4 sm:$0x7f]   ;;  %v1923_v60 = vld [vmem:[%s2684_s0 + $0x3ac] ss:$76 sps:$4 sm:$0x7f]  }
  0x15   :  { %v1918_v62 = vld [vmem:[%s2684_s0 + $0x3a0] ss:$76 sps:$4 sm:$0x7f]   ;;  %v1915_v63 = vld [vmem:[%s2684_s0 + $0x310] ss:$76 sps:$4 sm:$0xff]   ;;  %v833_v2 = vand.u32 %v1920_v59, %v2213_v28  ;;  %v839_v3 = vand.u32 %v1923_v60, %v2213_v28 }
  0x16   :  { %v1921_v0 = vld [vmem:[%s2684_s0 + $0x3a8] ss:$76 sps:$4 sm:$0x7f]   ;;  %v830_v4 = vand.u32 %v1918_v62, %v2213_v28  ;;  %v1926_v6 = vld [vmem:[%s2684_s0 + $0x24] ss:$76 sps:$4 sm:$0xff]  }
  0x17   :  { %885 = vmatpush1.bf16.msra.mxu0 %v1874_v27  ;;  %926 = vmatpush1.bf16.msra.mxu1 %v1875_v30  ;;  %v836_v5 = vand.u32 %v1921_v0, %v2213_v28  ;;  %v1929_v7 = vld [vmem:[%s2684_s0 + $0x2c] ss:$76 sps:$4 sm:$0xff]   ;;  %v1927_v9 = vld [vmem:[%s2684_s0 + $0x28] ss:$76 sps:$4 sm:$0xff]   ;;  %v1935_v11 = vld [vmem:[%s2684_s0 + $0xc4] ss:$76 sps:$4 sm:$0xff]  }
  0x18   :  { %886 = vmatprep.subr.bf16.mxu0 %v821_v32  ;;  %927 = vmatprep.subr.bf16.mxu1 %v827_v33  ;;  %v1924_v8 = vld [vmem:[%s2684_s0 + $0x20] ss:$76 sps:$4 sm:$0xff]   ;;  %v1932_v10 = vld [vmem:[%s2684_s0 + $0xbc] ss:$76 sps:$4 sm:$0xff]   ;;  %v1930_v12 = vld [vmem:[%s2684_s0 + $0xb8] ss:$76 sps:$4 sm:$0xff]  }
  0x19   :  { %v1933_v13 = vld [vmem:[%s2684_s0 + $0xc0] ss:$76 sps:$4 sm:$0xff]   ;;  %v1941_v15 = vld [vmem:[%s2684_s0 + $0x15c] ss:$76 sps:$4 sm:$0xff]   ;;  %v1939_v17 = vld [vmem:[%s2684_s0 + $0x158] ss:$76 sps:$4 sm:$0xff]  }
  0x1a   :  { %v1938_v14 = vld [vmem:[%s2684_s0 + $0x154] ss:$76 sps:$4 sm:$0xff]   ;;  %v1936_v16 = vld [vmem:[%s2684_s0 + $0x150] ss:$76 sps:$4 sm:$0xff]   ;;  %v1944_v18 = vld [vmem:[%s2684_s0 + $0x1ec] ss:$76 sps:$4 sm:$0xff]  }
  0x1b   :  { %887 = vmatpush1.bf16.msra.mxu0 %v818_v34  ;;  %928 = vmatpush1.bf16.msra.mxu1 %v824_v35  ;;  %v1947_v19 = vld [vmem:[%s2684_s0 + $0x1f4] ss:$76 sps:$4 sm:$0xff]   ;;  %v1945_v21 = vld [vmem:[%s2684_s0 + $0x1f0] ss:$76 sps:$4 sm:$0xff]   ;;  %v1953_v23 = vld [vmem:[%s2684_s0 + $0x28c] ss:$76 sps:$4 sm:$0xff]  }
  0x1c   :  { %956 = vmatprep.subr.bf16.mxu0 %v1884_v36  ;;  %997 = vmatprep.subr.bf16.mxu1 %v1887_v37  ;;  %v1942_v20 = vld [vmem:[%s2684_s0 + $0x1e8] ss:$76 sps:$4 sm:$0xff]   ;;  %v1950_v22 = vld [vmem:[%s2684_s0 + $0x284] ss:$76 sps:$4 sm:$0xff]   ;;  %v1948_v24 = vld [vmem:[%s2684_s0 + $0x280] ss:$76 sps:$4 sm:$0xff]  }
  0x1d   :  { %v1951_v25 = vld [vmem:[%s2684_s0 + $0x288] ss:$76 sps:$4 sm:$0xff]   ;;  %v1959_v27 = vld [vmem:[%s2684_s0 + $0x324] ss:$76 sps:$4 sm:$0xff]   ;;  %v1957_v32 = vld [vmem:[%s2684_s0 + $0x320] ss:$76 sps:$4 sm:$0xff]  }
  0x1e   :  { %1761 = vmatmul.mubr.msk.bf16.vlgmr.msra.gmra.mrb[0].mxu0 %vm809_vm2, %v2237_v38  ;;  %1762 = vmatmul.mubr.msk.bf16.vlgmr.msra.gmra.mrb[0].mxu1 %vm809_vm2, %v2237_v38  ;;  %v1956_v26 = vld [vmem:[%s2684_s0 + $0x31c] ss:$76 sps:$4 sm:$0xff]   ;;  %v1962_v29 = vld [vmem:[%s2684_s0 + $0x3b4] ss:$76 sps:$4 sm:$0x7f]  }
  0x1f   :  { %957 = vmatpush1.bf16.msra.mxu0 %v1882_v39  ;;  %998 = vmatpush1.bf16.msra.mxu1 %v1885_v40  ;;  %v1965_v30 = vld [vmem:[%s2684_s0 + $0x3bc] ss:$76 sps:$4 sm:$0x7f]   ;;  %v1954_v31 = vld [vmem:[%s2684_s0 + $0x318] ss:$76 sps:$4 sm:$0xff]   ;;  %v845_v35 = vand.u32 %v1962_v29, %v2213_v28 }
  0x20   :  { %958 = vmatprep.subr.bf16.mxu0 %v1890_v41  ;;  %999 = vmatprep.subr.bf16.mxu1 %v1893_v42  ;;  %v1960_v33 = vld [vmem:[%s2684_s0 + $0x3b0] ss:$76 sps:$4 sm:$0x7f]   ;;  %v1963_v34 = vld [vmem:[%s2684_s0 + $0x3b8] ss:$76 sps:$4 sm:$0x7f]   ;;  %v851_v36 = vand.u32 %v1965_v30, %v2213_v28 }
  0x21   :  { %988 = vmatprep.mubr.bf16.mxu0 %v2112_v1  ;;  %1029 = vmatprep.mubr.bf16.mxu1 %v2112_v1  ;;  %v842_v37 = vand.u32 %v1960_v33, %v2213_v28  ;;  %v848_v39 = vand.u32 %v1963_v34, %v2213_v28  ;;  %v1968_v40 = vld [vmem:[%s2684_s0 + $0x34] ss:$76 sps:$4 sm:$0xff]   ;;  %v1971_v41 = vld [vmem:[%s2684_s0 + $0x3c] ss:$76 sps:$4 sm:$0xff]   ;;  %v1993_v59 = vld [vmem:[%s2684_s0 + $0x298] ss:$76 sps:$4 sm:$0xff]  }
  0x22   :  { %v1966_v42 = vld [vmem:[%s2684_s0 + $0x30] ss:$76 sps:$4 sm:$0xff]   ;;  %v1998_v60 = vld [vmem:[%s2684_s0 + $0x32c] ss:$76 sps:$4 sm:$0xff]   ;;  %v1996_v0 = vld [vmem:[%s2684_s0 + $0x328] ss:$76 sps:$4 sm:$0xff]  }
  0x23   :  { %959 = vmatpush1.bf16.msra.mxu0 %v1888_v43  ;;  %1000 = vmatpush1.bf16.msra.mxu1 %v1891_v44  ;;  %v1969_v43 = vld [vmem:[%s2684_s0 + $0x38] ss:$76 sps:$4 sm:$0xff]   ;;  %v2032_v29 = vld [vmem:[%s2684_s0 + $0x3d0] ss:$76 sps:$4 sm:$0x7f]  }
  0x24   :  { %960 = vmatprep.subr.bf16.mxu0 %v1896_v45  ;;  %1001 = vmatprep.subr.bf16.mxu1 %v1899_v46  ;;  %v1974_v44 = vld [vmem:[%s2684_s0 + $0xcc] ss:$76 sps:$4 sm:$0xff]   ;;  %v1977_v45 = vld [vmem:[%s2684_s0 + $0xd4] ss:$76 sps:$4 sm:$0xff]  }
  0x25   :  { %v1972_v46 = vld [vmem:[%s2684_s0 + $0xc8] ss:$76 sps:$4 sm:$0xff]   ;;  %v2004_v62 = vld [vmem:[%s2684_s0 + $0x3c4] ss:$76 sps:$4 sm:$0x7f]  }
  0x26   :  { %v2035_v30 = vld [vmem:[%s2684_s0 + $0x3d8] ss:$76 sps:$4 sm:$0x7f]  }
  0x27   :  { %961 = vmatpush1.bf16.msra.mxu0 %v1894_v47  ;;  %1002 = vmatpush1.bf16.msra.mxu1 %v1897_v48  ;;  %v1975_v47 = vld [vmem:[%s2684_s0 + $0xd0] ss:$76 sps:$4 sm:$0xff]   ;;  %v872_v33 = vand.u32 %v2035_v30, %v2213_v28 }
  0x28   :  { %962 = vmatprep.subr.bf16.mxu0 %v1902_v49  ;;  %1003 = vmatprep.subr.bf16.mxu1 %v1905_v50  ;;  %v1980_v48 = vld [vmem:[%s2684_s0 + $0x164] ss:$76 sps:$4 sm:$0xff]   ;;  %v1983_v49 = vld [vmem:[%s2684_s0 + $0x16c] ss:$76 sps:$4 sm:$0xff]  }
  0x29   :  { %v1978_v50 = vld [vmem:[%s2684_s0 + $0x160] ss:$76 sps:$4 sm:$0xff]  }
  0x2b   :  { %963 = vmatpush1.bf16.msra.mxu0 %v1900_v51  ;;  %1004 = vmatpush1.bf16.msra.mxu1 %v1903_v52  ;;  %v1981_v51 = vld [vmem:[%s2684_s0 + $0x168] ss:$76 sps:$4 sm:$0xff]  }
  0x2c   :  { %964 = vmatprep.subr.bf16.mxu0 %v1908_v53  ;;  %1005 = vmatprep.subr.bf16.mxu1 %v1911_v54  ;;  %v1986_v52 = vld [vmem:[%s2684_s0 + $0x1fc] ss:$76 sps:$4 sm:$0xff]   ;;  %v1989_v53 = vld [vmem:[%s2684_s0 + $0x204] ss:$76 sps:$4 sm:$0xff]  }
  0x2d   :  { %v1984_v54 = vld [vmem:[%s2684_s0 + $0x1f8] ss:$76 sps:$4 sm:$0xff]  }
  0x2f   :  { %965 = vmatpush1.bf16.msra.mxu0 %v1906_v55  ;;  %1006 = vmatpush1.bf16.msra.mxu1 %v1909_v56  ;;  %v1987_v55 = vld [vmem:[%s2684_s0 + $0x200] ss:$76 sps:$4 sm:$0xff]  }
  0x30   :  { %966 = vmatprep.subr.bf16.mxu0 %v1914_v57  ;;  %1007 = vmatprep.subr.bf16.mxu1 %v1917_v58  ;;  %v1992_v56 = vld [vmem:[%s2684_s0 + $0x294] ss:$76 sps:$4 sm:$0xff]   ;;  %v1995_v57 = vld [vmem:[%s2684_s0 + $0x29c] ss:$76 sps:$4 sm:$0xff]  }
  0x31   :  { %v1990_v58 = vld [vmem:[%s2684_s0 + $0x290] ss:$76 sps:$4 sm:$0xff]  }
  0x33   :  { %967 = vmatpush1.bf16.msra.mxu0 %v1912_v61  ;;  %1008 = vmatpush1.bf16.msra.mxu1 %v1915_v63  ;;  %v2001_v61 = vld [vmem:[%s2684_s0 + $0x334] ss:$76 sps:$4 sm:$0xff]   ;;  %v2007_v63 = vld [vmem:[%s2684_s0 + $0x3cc] ss:$76 sps:$4 sm:$0x7f]  }
  0x34   :  { %968 = vmatprep.subr.bf16.mxu0 %v833_v2  ;;  %1009 = vmatprep.subr.bf16.mxu1 %v839_v3  ;;  %v1999_v2 = vld [vmem:[%s2684_s0 + $0x330] ss:$76 sps:$4 sm:$0xff]   ;;  %v2002_v3 = vld [vmem:[%s2684_s0 + $0x3c0] ss:$76 sps:$4 sm:$0x7f]  }
  0x37   :  { %969 = vmatpush1.bf16.msra.mxu0 %v830_v4  ;;  %1010 = vmatpush1.bf16.msra.mxu1 %v836_v5  ;;  %v2005_v4 = vld [vmem:[%s2684_s0 + $0x3c8] ss:$76 sps:$4 sm:$0x7f]   ;;  %v857_v5 = vand.u32 %v2004_v62, %v2213_v28 }
  0x38   :  { %1038 = vmatprep.subr.bf16.mxu0 %v1926_v6  ;;  %1079 = vmatprep.subr.bf16.mxu1 %v1929_v7  ;;  %v863_v6 = vand.u32 %v2007_v63, %v2213_v28  ;;  %v854_v7 = vand.u32 %v2002_v3, %v2213_v28 }
  0x3a   :  { %1763 = vmatmul.mubr.msk.bf16.vlgmr.msra.gmra.mrb[4].mxu0 %vm809_vm2, %v2237_v38  ;;  %1764 = vmatmul.mubr.msk.bf16.vlgmr.msra.gmra.mrb[4].mxu1 %vm809_vm2, %v2237_v38 }
  0x3b   :  { %1039 = vmatpush1.bf16.msra.mxu0 %v1924_v8  ;;  %1080 = vmatpush1.bf16.msra.mxu1 %v1927_v9  ;;  %v860_v8 = vand.u32 %v2005_v4, %v2213_v28  ;;  %v2010_v9 = vld [vmem:[%s2684_s0 + $0x44] ss:$76 sps:$4 sm:$0xff]  }
  0x3c   :  { %1040 = vmatprep.subr.bf16.mxu0 %v1932_v10  ;;  %1081 = vmatprep.subr.bf16.mxu1 %v1935_v11  ;;  %v2008_v10 = vld [vmem:[%s2684_s0 + $0x40] ss:$76 sps:$4 sm:$0xff]   ;;  %v2011_v11 = vld [vmem:[%s2684_s0 + $0x48] ss:$76 sps:$4 sm:$0xff]  }
  0x3d   :  { %1070 = vmatprep.mubr.bf16.mxu0 %v2112_v1  ;;  %1111 = vmatprep.mubr.bf16.mxu1 %v2112_v1 }
  0x3f   :  { %1041 = vmatpush1.bf16.msra.mxu0 %v1930_v12  ;;  %1082 = vmatpush1.bf16.msra.mxu1 %v1933_v13  ;;  %v2114_v12 = vmov 0.0   ;;  %v2014_v13 = vld [vmem:[%s2684_s0 + $0xdc] ss:$76 sps:$4 sm:$0xff]  }
  0x40   :  { %1042 = vmatprep.subr.bf16.mxu0 %v1938_v14  ;;  %1083 = vmatprep.subr.bf16.mxu1 %v1941_v15  ;;  %v2012_v14 = vld [vmem:[%s2684_s0 + $0xd8] ss:$76 sps:$4 sm:$0xff]   ;;  %v2015_v15 = vld [vmem:[%s2684_s0 + $0xe0] ss:$76 sps:$4 sm:$0xff]  }
  0x43   :  { %1043 = vmatpush1.bf16.msra.mxu0 %v1936_v16  ;;  %1084 = vmatpush1.bf16.msra.mxu1 %v1939_v17  ;;  %v2018_v16 = vld [vmem:[%s2684_s0 + $0x174] ss:$76 sps:$4 sm:$0xff]   ;;  %v2016_v17 = vld [vmem:[%s2684_s0 + $0x170] ss:$76 sps:$4 sm:$0xff]  }
  0x44   :  { %1044 = vmatprep.subr.bf16.mxu0 %v1944_v18  ;;  %1085 = vmatprep.subr.bf16.mxu1 %v1947_v19  ;;  %v2019_v18 = vld [vmem:[%s2684_s0 + $0x178] ss:$76 sps:$4 sm:$0xff]  }
  0x45   :  { %v2022_v19 = vld [vmem:[%s2684_s0 + $0x20c] ss:$76 sps:$4 sm:$0xff]  }
  0x47   :  { %1045 = vmatpush1.bf16.msra.mxu0 %v1942_v20  ;;  %1086 = vmatpush1.bf16.msra.mxu1 %v1945_v21  ;;  %v2023_v20 = vld [vmem:[%s2684_s0 + $0x210] ss:$76 sps:$4 sm:$0xff]  }
  0x48   :  { %1046 = vmatprep.subr.bf16.mxu0 %v1950_v22  ;;  %1087 = vmatprep.subr.bf16.mxu1 %v1953_v23  ;;  %v2026_v21 = vld [vmem:[%s2684_s0 + $0x2a4] ss:$76 sps:$4 sm:$0xff]   ;;  %v2024_v22 = vld [vmem:[%s2684_s0 + $0x2a0] ss:$76 sps:$4 sm:$0xff]   ;;  %v2027_v23 = vld [vmem:[%s2684_s0 + $0x2a8] ss:$76 sps:$4 sm:$0xff]  }
  0x4b   :  { %1047 = vmatpush1.bf16.msra.mxu0 %v1948_v24  ;;  %1088 = vmatpush1.bf16.msra.mxu1 %v1951_v25  ;;  %v2030_v24 = vld [vmem:[%s2684_s0 + $0x33c] ss:$76 sps:$4 sm:$0xff]   ;;  %v2034_v25 = vld [vmem:[%s2684_s0 + $0x3d4] ss:$76 sps:$4 sm:$0x7f]  }
  0x4c   :  { %1048 = vmatprep.subr.bf16.mxu0 %v1956_v26  ;;  %1089 = vmatprep.subr.bf16.mxu1 %v1959_v27  ;;  %v2028_v26 = vld [vmem:[%s2684_s0 + $0x338] ss:$76 sps:$4 sm:$0xff]   ;;  %v2031_v27 = vld [vmem:[%s2684_s0 + $0x340] ss:$76 sps:$4 sm:$0xff]  }
  0x4f   :  { %1049 = vmatpush1.bf16.msra.mxu0 %v1954_v31  ;;  %1090 = vmatpush1.bf16.msra.mxu1 %v1957_v32  ;;  %v869_v31 = vand.u32 %v2034_v25, %v2213_v28  ;;  %v866_v32 = vand.u32 %v2032_v29, %v2213_v28 }
  0x50   :  { %1050 = vmatprep.subr.bf16.mxu0 %v845_v35  ;;  %1091 = vmatprep.subr.bf16.mxu1 %v851_v36 }
  0x53   :  { %1051 = vmatpush1.bf16.msra.mxu0 %v842_v37  ;;  %1092 = vmatpush1.bf16.msra.mxu1 %v848_v39 }
  0x54   :  { %1120 = vmatprep.subr.bf16.mxu0 %v1968_v40  ;;  %1161 = vmatprep.subr.bf16.mxu1 %v1971_v41 }
  0x56   :  { %1765 = vmatmul.mubr.msk.bf16.vlgmr.msra.gmra.mrb[8].mxu0 %vm809_vm2, %v2237_v38  ;;  %1766 = vmatmul.mubr.msk.bf16.vlgmr.msra.gmra.mrb[8].mxu1 %vm809_vm2, %v2237_v38 }
  0x57   :  { %1121 = vmatpush1.bf16.msra.mxu0 %v1966_v42  ;;  %1162 = vmatpush1.bf16.msra.mxu1 %v1969_v43 }
  0x58   :  { %1122 = vmatprep.subr.bf16.mxu0 %v1974_v44  ;;  %1163 = vmatprep.subr.bf16.mxu1 %v1977_v45 }
  0x59   :  { %1152 = vmatprep.mubr.bf16.mxu0 %v2112_v1  ;;  %1193 = vmatprep.mubr.bf16.mxu1 %v2112_v1 }
  0x5b   :  { %1123 = vmatpush1.bf16.msra.mxu0 %v1972_v46  ;;  %1164 = vmatpush1.bf16.msra.mxu1 %v1975_v47  ;;  %v1422_v47 = vlaneseq }
  0x5c   :  { %1124 = vmatprep.subr.bf16.mxu0 %v1980_v48  ;;  %1165 = vmatprep.subr.bf16.mxu1 %v1983_v49 }
  0x5f   :  { %1125 = vmatpush1.bf16.msra.mxu0 %v1978_v50  ;;  %1166 = vmatpush1.bf16.msra.mxu1 %v1981_v51 }
  0x60   :  { %1126 = vmatprep.subr.bf16.mxu0 %v1986_v52  ;;  %1167 = vmatprep.subr.bf16.mxu1 %v1989_v53  ;;  %v2590_v53 = vshrl.u32 %v1422_v47, 7 }
  0x63   :  { %1127 = vmatpush1.bf16.msra.mxu0 %v1984_v54  ;;  %1168 = vmatpush1.bf16.msra.mxu1 %v1987_v55  ;;  %v2593_v55 = vsub.s32 0, %v2590_v53 }
  0x64   :  { %1128 = vmatprep.subr.bf16.mxu0 %v1992_v56  ;;  %1169 = vmatprep.subr.bf16.mxu1 %v1995_v57  ;;  %v2598_v56 = vld [vmem:[%s2686_s1] sm:$0xff]  ;;  %v2601_v57 = vsub.s32 2, %v2590_v53 }
  0x66   :  { %v1433_v62 = vrot.slane %v2598_v56, %v2601_v57 }
  0x67   :  { %1129 = vmatpush1.bf16.msra.mxu0 %v1990_v58  ;;  %1170 = vmatpush1.bf16.msra.mxu1 %v1993_v59  ;;  %v2604_v58 = vsub.s32 1, %v2590_v53  ;;  %v1436_v59 = vsub.s32 3, %v2590_v53 }
  0x68   :  { %1130 = vmatprep.subr.bf16.mxu0 %v1998_v60  ;;  %1171 = vmatprep.subr.bf16.mxu1 %v2001_v61  ;;  %v1425_v60 = vrot.slane %v2598_v56, %v2593_v55 }
  0x6b   :  { %1131 = vmatpush1.bf16.msra.mxu0 %v1996_v0  ;;  %1172 = vmatpush1.bf16.msra.mxu1 %v1999_v2  ;;  %v1429_v2 = vrot.slane %v2598_v56, %v2604_v58 }
  0x6c   :  { %1132 = vmatprep.subr.bf16.mxu0 %v857_v5  ;;  %1173 = vmatprep.subr.bf16.mxu1 %v863_v6  ;;  %v1437_v5 = vrot.slane %v2598_v56, %v1436_v59 }
  0x6f   :  { %1133 = vmatpush1.bf16.msra.mxu0 %v854_v7  ;;  %1174 = vmatpush1.bf16.msra.mxu1 %v860_v8 }
  0x70   :  { %1202 = vmatprep.subr.bf16.mxu0 %v2010_v9  ;;  %1818 = vmatprep.subr.bf16.mxu1 %v2114_v12 }
  0x72   :  { %1767 = vmatmul.mubr.msk.bf16.vlgmr.msra.gmra.mrb[12].mxu0 %vm809_vm2, %v2237_v38  ;;  %1768 = vmatmul.mubr.msk.bf16.vlgmr.msra.gmra.mrb[12].mxu1 %vm809_vm2, %v2237_v38 }
  0x73   :  { %1203 = vmatpush1.bf16.msra.mxu0 %v2008_v10  ;;  %1819 = vmatpush3.bf16.msra.mxu1 %v2011_v11 }
  0x74   :  { %1204 = vmatprep.subr.bf16.mxu0 %v2014_v13  ;;  %1820 = vmatprep.subr.bf16.mxu1 %v2114_v12 }
  0x75   :  { %1234 = vmatprep.mubr.bf16.mxu0 %v2112_v1  ;;  %1832 = vmatprep.mubr.msk.bf16.mxu1 %vm2115_vm3, %v2114_v12  ;;  %v2020_v1 = vld [vmem:[%s2684_s0 + $0x208] ss:$76 sps:$4 sm:$0xff]  }
  0x77   :  { %1205 = vmatpush1.bf16.msra.mxu0 %v2012_v14  ;;  %1821 = vmatpush3.bf16.msra.mxu1 %v2015_v15 }
  0x78   :  { %1206 = vmatprep.subr.bf16.mxu0 %v2018_v16  ;;  %1822 = vmatprep.subr.bf16.mxu1 %v2114_v12 }
  0x7b   :  { %1207 = vmatpush1.bf16.msra.mxu0 %v2016_v17  ;;  %1823 = vmatpush3.bf16.msra.mxu1 %v2019_v18 }
  0x7c   :  { %1208 = vmatprep.subr.bf16.mxu0 %v2022_v19  ;;  %1824 = vmatprep.subr.bf16.mxu1 %v2114_v12 }
  0x7f   :  { %1209 = vmatpush1.bf16.msra.mxu0 %v2020_v1  ;;  %1825 = vmatpush3.bf16.msra.mxu1 %v2023_v20 }
  0x80   :  { %1210 = vmatprep.subr.bf16.mxu0 %v2026_v21  ;;  %1826 = vmatprep.subr.bf16.mxu1 %v2114_v12 }
  0x83   :  { %1211 = vmatpush1.bf16.msra.mxu0 %v2024_v22  ;;  %1827 = vmatpush3.bf16.msra.mxu1 %v2027_v23 }
  0x84   :  { %1212 = vmatprep.subr.bf16.mxu0 %v2030_v24  ;;  %1828 = vmatprep.subr.bf16.mxu1 %v2114_v12 }
  0x87   :  { %1213 = vmatpush1.bf16.msra.mxu0 %v2028_v26  ;;  %1829 = vmatpush3.bf16.msra.mxu1 %v2031_v27 }
  0x88   :  { %1214 = vmatprep.subr.bf16.mxu0 %v869_v31  ;;  %1830 = vmatprep.subr.bf16.mxu1 %v2114_v12 }
  0x8b   :  { %1215 = vmatpush1.bf16.msra.mxu0 %v866_v32  ;;  %1831 = vmatpush3.bf16.msra.mxu1 %v872_v33 }
  0x8e   :  { %1769 = vmatmul.mubr.msk.bf16.vlgmr.msra.gmra.mrb[16].mxu0 %vm809_vm2, %v2237_v38  ;;  %1833 = vmatmul.mubr.msk.bf16.vlgmr.msra.gmra.mrb[16].mxu1 %vm809_vm2, %v2237_v38 }
  0xf1   :  { %v908_v34 = vpop.f32.mrb[0].mxu0  ;;  %v949_v35 = vpop.f32.mrb[0].mxu1 }
  0xf2   :  { %v1771_v36 = vmul.f32 -1.442695, %v908_v34  ;;  %v1773_v37 = vmul.f32 -1.442695, %v949_v35  ;;  %v910_v39 = vpop.f32.mrb[1].mxu0  ;;  %v951_v40 = vpop.f32.mrb[1].mxu1 }
  0xf3   :  { %v1772_v41 = vmul.f32 -1.442695, %v910_v39  ;;  %v1774_v42 = vmul.f32 -1.442695, %v951_v40  ;;  %v912_v43 = vpop.f32.mrb[2].mxu0  ;;  %v953_v28 = vpop.f32.mrb[2].mxu1 }
  0xf4   :  { %2036 = vpow2.f32 %v1771_v36  ;;  %v913_v44 = vpop.f32.mrb[3].mxu0  ;;  %v954_v45 = vpop.f32.mrb[3].mxu1  ;;  %v1448_v36 = vsub.s32 6, %v2590_v53 }
  0xf5   :  { %2038 = vpow2.f32 %v1773_v37  ;;  %v1444_v37 = vsub.s32 5, %v2590_v53 }
  0xf6   :  { %2040 = vpow2.f32 %v1772_v41 }
  0xf7   :  { %2042 = vpow2.f32 %v1774_v42  ;;  %v1449_v42 = vrot.slane %v2598_v56, %v1448_v36  ;;  %v1445_v44 = vrot.slane %v2598_v56, %v1444_v37 }
  0xfe   :  { %v2037_v46 = vpop.eup %2036 }
  0xff   :  { %v2039_v48 = vpop.eup %2038  ;;  %v1340_v38 = vadd.f32 1.0, %v2037_v46 }
 0x100   :  { %v2041_v49 = vpop.eup %2040  ;;  %v1342_v50 = vadd.f32 1.0, %v2039_v48 }
 0x101   :  { %v2043_v51 = vpop.eup %2042  ;;  %2044 = vrcp.f32 %v1340_v38  ;;  %v1341_v52 = vadd.f32 1.0, %v2041_v49 }
 0x102   :  { %2046 = vrcp.f32 %v1342_v50  ;;  %v1343_v54 = vadd.f32 1.0, %v2043_v51 }
 0x103   :  { %2048 = vrcp.f32 %v1341_v52 }
 0x104   :  { %2050 = vrcp.f32 %v1343_v54 }
 0x10b   :  { %v2045_v61 = vpop.eup %2044 }
 0x10c   :  { %v2047_v63 = vpop.eup %2046  ;;  %v1397_v0 = vmul.f32 %v2045_v61, %v908_v34 }
 0x10d   :  { %v2049_v3 = vpop.eup %2048  ;;  %v1399_v4 = vmul.f32 %v2047_v63, %v949_v35  ;;  %v990_v6 = vpop.f32.mrb[4].mxu0  ;;  %v1440_v35 = vsub.s32 4, %v2590_v53 }
 0x10e   :  { %v1031_v7 = vpop.f32.mrb[4].mxu1  ;;  %v2051_v8 = vpop.eup %2050  ;;  %v1517_v9 = vmul.f32 %v1425_v60, %v1397_v0  ;;  %v1398_v10 = vmul.f32 %v2049_v3, %v910_v39  ;;  %v1775_v11 = vmul.f32 -1.442695, %v990_v6  ;;  %v1452_v39 = vsub.s32 7, %v2590_v53 }
 0x10f   :  { %v1777_v12 = vmul.f32 -1.442695, %v1031_v7  ;;  %v992_v13 = vpop.f32.mrb[5].mxu0  ;;  %v1033_v14 = vpop.f32.mrb[5].mxu1  ;;  %v1519_v15 = vmul.f32 %v1433_v62, %v1399_v4  ;;  %v1400_v16 = vmul.f32 %v2051_v8, %v951_v40  ;;  %v1441_v40 = vrot.slane %v2598_v56, %v1440_v35 }
 0x110   :  { %v1776_v17 = vmul.f32 -1.442695, %v992_v13  ;;  %v1778_v18 = vmul.f32 -1.442695, %v1033_v14  ;;  %v994_v19 = vpop.f32.mrb[6].mxu0  ;;  %v1035_v1 = vpop.f32.mrb[6].mxu1  ;;  %v1518_v20 = vmul.f32 %v1429_v2, %v1398_v10  ;;  %2052 = vpow2.f32 %v1775_v11 }
 0x111   :  { %v995_v21 = vpop.f32.mrb[7].mxu0  ;;  %v1036_v22 = vpop.f32.mrb[7].mxu1  ;;  %v1520_v23 = vmul.f32 %v1437_v5, %v1400_v16  ;;  %2054 = vpow2.f32 %v1777_v12  ;;  %v1453_v47 = vrot.slane %v2598_v56, %v1452_v39 }
 0x112   :  { %v1800_v24 = vpack.c.bf16 %v1518_v20, %v1517_v9  ;;  %2056 = vpow2.f32 %v1776_v17 }
 0x113   :  { %v1801_v25 = vpack.c.bf16 %v1520_v23, %v1519_v15  ;;  %2058 = vpow2.f32 %v1778_v18  ;;  %v1417_v18 = vld [vmem:[%s2686_s1 + $0x8] sm:$0xff] }
 0x114   :  { %1613 = vst [vmem:[%s2687_s3] sm:$0xff] %v1800_v24  ;;  %v1457_v19 = vrot.slane %v1417_v18, %v2593_v55  ;;  %v1465_v20 = vrot.slane %v1417_v18, %v2601_v57  ;;  %v1461_v23 = vrot.slane %v1417_v18, %v2604_v58 }
 0x115   :  { %1614 = vst [vmem:[%s2687_s3 + $0x8] sm:$0xff] %v1801_v25 }
 0x11a   :  { %v2053_v26 = vpop.eup %2052 }
 0x11b   :  { %v2055_v27 = vpop.eup %2054  ;;  %v1344_v29 = vadd.f32 1.0, %v2053_v26  ;;  %v1469_v26 = vrot.slane %v1417_v18, %v1436_v59 }
 0x11c   :  { %v2057_v30 = vpop.eup %2056  ;;  %v1346_v31 = vadd.f32 1.0, %v2055_v27 }
 0x11d   :  { %v2059_v32 = vpop.eup %2058  ;;  %2060 = vrcp.f32 %v1344_v29  ;;  %v1345_v33 = vadd.f32 1.0, %v2057_v30 }
 0x11e   :  { %2062 = vrcp.f32 %v1346_v31  ;;  %v1347_v34 = vadd.f32 1.0, %v2059_v32 }
 0x11f   :  { %2064 = vrcp.f32 %v1345_v33 }
 0x120   :  { %2066 = vrcp.f32 %v1347_v34 }
 0x127   :  { %v2061_v41 = vpop.eup %2060 }
 0x128   :  { %v2063_v43 = vpop.eup %2062  ;;  %v1401_v28 = vmul.f32 %v2061_v41, %v990_v6 }
 0x129   :  { %v2065_v45 = vpop.eup %2064  ;;  %v1403_v46 = vmul.f32 %v2063_v43, %v1031_v7  ;;  %v1072_v48 = vpop.f32.mrb[8].mxu0 }
 0x12a   :  { %v1113_v38 = vpop.f32.mrb[8].mxu1  ;;  %v2067_v49 = vpop.eup %2066  ;;  %v1521_v50 = vmul.f32 %v1441_v40, %v1401_v28  ;;  %v1402_v51 = vmul.f32 %v2065_v45, %v992_v13  ;;  %v1779_v52 = vmul.f32 -1.442695, %v1072_v48 }
 0x12b   :  { %v1781_v54 = vmul.f32 -1.442695, %v1113_v38  ;;  %v1074_v60 = vpop.f32.mrb[9].mxu0  ;;  %v1115_v61 = vpop.f32.mrb[9].mxu1  ;;  %v1523_v62 = vmul.f32 %v1449_v42, %v1403_v46  ;;  %v1404_v63 = vmul.f32 %v2067_v49, %v1033_v14 }
 0x12c   :  { %v1780_v0 = vmul.f32 -1.442695, %v1074_v60  ;;  %v1782_v2 = vmul.f32 -1.442695, %v1115_v61  ;;  %v1076_v3 = vpop.f32.mrb[10].mxu0  ;;  %v1117_v4 = vpop.f32.mrb[10].mxu1  ;;  %v1522_v5 = vmul.f32 %v1445_v44, %v1402_v51  ;;  %2068 = vpow2.f32 %v1779_v52 }
 0x12d   :  { %v1077_v6 = vpop.f32.mrb[11].mxu0  ;;  %v1118_v7 = vpop.f32.mrb[11].mxu1  ;;  %v1524_v56 = vmul.f32 %v1453_v47, %v1404_v63  ;;  %2070 = vpow2.f32 %v1781_v54  ;;  %v1481_v4 = vrot.slane %v1417_v18, %v1448_v36 }
 0x12e   :  { %v1802_v8 = vpack.c.bf16 %v1522_v5, %v1521_v50  ;;  %2072 = vpow2.f32 %v1780_v0  ;;  %v1477_v7 = vrot.slane %v1417_v18, %v1444_v37 }
 0x12f   :  { %v1803_v9 = vpack.c.bf16 %v1524_v56, %v1523_v62  ;;  %2074 = vpow2.f32 %v1782_v2  ;;  %v1473_v2 = vrot.slane %v1417_v18, %v1440_v35 }
 0x130   :  { %1615 = vst [vmem:[%s2687_s3 + $0x10] sm:$0xff] %v1802_v8 }
 0x131   :  { %1616 = vst [vmem:[%s2687_s3 + $0x18] sm:$0xff] %v1803_v9  ;;  %v1485_v9 = vrot.slane %v1417_v18, %v1452_v39 }
 0x136   :  { %v2069_v10 = vpop.eup %2068 }
 0x137   :  { %v2071_v11 = vpop.eup %2070  ;;  %v1348_v12 = vadd.f32 1.0, %v2069_v10 }
 0x138   :  { %v2073_v13 = vpop.eup %2072  ;;  %v1350_v14 = vadd.f32 1.0, %v2071_v11 }
 0x139   :  { %v2075_v15 = vpop.eup %2074  ;;  %2076 = vrcp.f32 %v1348_v12  ;;  %v1349_v16 = vadd.f32 1.0, %v2073_v13 }
 0x13a   :  { %2078 = vrcp.f32 %v1350_v14  ;;  %v1351_v17 = vadd.f32 1.0, %v2075_v15 }
 0x13b   :  { %2080 = vrcp.f32 %v1349_v16 }
 0x13c   :  { %2082 = vrcp.f32 %v1351_v17 }
 0x143   :  { %v2077_v1 = vpop.eup %2076 }
 0x144   :  { %v2079_v21 = vpop.eup %2078  ;;  %v1405_v22 = vmul.f32 %v2077_v1, %v1072_v48 }
 0x145   :  { %v2081_v24 = vpop.eup %2080  ;;  %v1407_v25 = vmul.f32 %v2079_v21, %v1113_v38  ;;  %v1154_v27 = vpop.f32.mrb[12].mxu0 }
 0x146   :  { %v1195_v29 = vpop.f32.mrb[12].mxu1  ;;  %v2083_v30 = vpop.eup %2082  ;;  %v1525_v31 = vmul.f32 %v1457_v19, %v1405_v22  ;;  %v1406_v32 = vmul.f32 %v2081_v24, %v1074_v60  ;;  %v1783_v33 = vmul.f32 -1.442695, %v1154_v27 }
 0x147   :  { %v1785_v34 = vmul.f32 -1.442695, %v1195_v29  ;;  %v1156_v40 = vpop.f32.mrb[13].mxu0  ;;  %v1197_v41 = vpop.f32.mrb[13].mxu1  ;;  %v1527_v42 = vmul.f32 %v1465_v20, %v1407_v25  ;;  %v1408_v43 = vmul.f32 %v2083_v30, %v1115_v61 }
 0x148   :  { %v1784_v28 = vmul.f32 -1.442695, %v1156_v40  ;;  %v1786_v44 = vmul.f32 -1.442695, %v1197_v41  ;;  %v1158_v45 = vpop.f32.mrb[14].mxu0  ;;  %v1199_v46 = vpop.f32.mrb[14].mxu1  ;;  %v1526_v47 = vmul.f32 %v1461_v23, %v1406_v32  ;;  %2084 = vpow2.f32 %v1783_v33 }
 0x149   :  { %v1159_v48 = vpop.f32.mrb[15].mxu0  ;;  %v1200_v38 = vpop.f32.mrb[15].mxu1  ;;  %v1528_v59 = vmul.f32 %v1469_v26, %v1408_v43  ;;  %2086 = vpow2.f32 %v1785_v34 }
 0x14a   :  { %v1804_v49 = vpack.c.bf16 %v1526_v47, %v1525_v31  ;;  %2088 = vpow2.f32 %v1784_v28  ;;  %v1418_v31 = vld [vmem:[%s2686_s1 + $0x10] sm:$0x7] }
 0x14b   :  { %v1805_v50 = vpack.c.bf16 %v1528_v59, %v1527_v42  ;;  %2090 = vpow2.f32 %v1786_v44  ;;  %v1489_v32 = vrot.slane %v1418_v31, %v2593_v55  ;;  %v1497_v34 = vrot.slane %v1418_v31, %v2601_v57 }
 0x14c   :  { %1617 = vst [vmem:[%s2687_s3 + $0x20] sm:$0xff] %v1804_v49  ;;  %v1493_v42 = vrot.slane %v1418_v31, %v2604_v58 }
 0x14d   :  { %1618 = vst [vmem:[%s2687_s3 + $0x28] sm:$0xff] %v1805_v50 }
 0x152   :  { %v2085_v51 = vpop.eup %2084 }
 0x153   :  { %v2087_v52 = vpop.eup %2086  ;;  %v1352_v54 = vadd.f32 1.0, %v2085_v51 }
 0x154   :  { %v2089_v60 = vpop.eup %2088  ;;  %v1354_v61 = vadd.f32 1.0, %v2087_v52 }
 0x155   :  { %v2091_v62 = vpop.eup %2090  ;;  %2092 = vrcp.f32 %v1352_v54  ;;  %v1353_v63 = vadd.f32 1.0, %v2089_v60 }
 0x156   :  { %2094 = vrcp.f32 %v1354_v61  ;;  %v1355_v0 = vadd.f32 1.0, %v2091_v62 }
 0x157   :  { %2096 = vrcp.f32 %v1353_v63 }
 0x158   :  { %2098 = vrcp.f32 %v1355_v0 }
 0x15f   :  { %v2093_v3 = vpop.eup %2092 }
 0x160   :  { %v2095_v5 = vpop.eup %2094  ;;  %v1409_v6 = vmul.f32 %v2093_v3, %v1154_v27 }
 0x161   :  { %v2097_v56 = vpop.eup %2096  ;;  %v1411_v8 = vmul.f32 %v2095_v5, %v1195_v29  ;;  %v1236_v10 = vpop.f32.mrb[16].mxu0 }
 0x162   :  { %v1277_v11 = vpop.f32.mrb[16].mxu1  ;;  %v2099_v12 = vpop.eup %2098  ;;  %v1529_v13 = vmul.f32 %v1473_v2, %v1409_v6  ;;  %v1410_v14 = vmul.f32 %v2097_v56, %v1156_v40  ;;  %v1787_v35 = vmul.f32 -1.442695, %v1236_v10 }
 0x163   :  { %v1789_v15 = vmul.f32 -1.442695, %v1277_v11  ;;  %v1238_v16 = vpop.f32.mrb[17].mxu0  ;;  %v1834_v17 = vpop.f32.mrb[17].mxu1  ;;  %v1531_v36 = vmul.f32 %v1481_v4, %v1411_v8  ;;  %v1412_v19 = vmul.f32 %v2099_v12, %v1197_v41 }
 0x164   :  { %v1788_v1 = vmul.f32 -1.442695, %v1238_v16  ;;  %v1240_v20 = vpop.f32.mrb[18].mxu0  ;;  %v1280_v21 = vpop.f32.mrb[18].mxu1  ;;  %v1530_v37 = vmul.f32 %v1477_v7, %v1410_v14  ;;  %2100 = vpow2.f32 %v1787_v35 }
 0x165   :  { %v1241_v22 = vpop.f32.mrb[19].mxu0  ;;  %v1835_v23 = vpop.f32.mrb[19].mxu1  ;;  %v1532_v53 = vmul.f32 %v1485_v9, %v1412_v19  ;;  %2102 = vpow2.f32 %v1789_v15 }
 0x166   :  { %v1806_v39 = vpack.c.bf16 %v1530_v37, %v1529_v13  ;;  %2104 = vpow2.f32 %v1788_v1 }
 0x167   :  { %v1807_v18 = vpack.c.bf16 %v1532_v53, %v1531_v36 }
 0x168   :  { %1619 = vst [vmem:[%s2687_s3 + $0x30] sm:$0xff] %v1806_v39 }
 0x169   :  { %1620 = vst [vmem:[%s2687_s3 + $0x38] sm:$0xff] %v1807_v18 }
 0x16e   :  { %v2101_v24 = vpop.eup %2100 }
 0x16f   :  { %v2103_v25 = vpop.eup %2102  ;;  %v1356_v26 = vadd.f32 1.0, %v2101_v24 }
 0x170   :  { %v2105_v27 = vpop.eup %2104  ;;  %v1358_v29 = vadd.f32 1.0, %v2103_v25 }
 0x171   :  { %2106 = vrcp.f32 %v1356_v26  ;;  %v1357_v30 = vadd.f32 1.0, %v2105_v27 }
 0x172   :  { %2108 = vrcp.f32 %v1358_v29 }
 0x173   :  { %2110 = vrcp.f32 %v1357_v30 }
 0x17b   :  { %v2107_v33 = vpop.eup %2106 }
 0x17c   :  { %v2109_v40 = vpop.eup %2108  ;;  %v1413_v41 = vmul.f32 %v2107_v33, %v1236_v10 }
 0x17d   :  { %v2111_v43 = vpop.eup %2110  ;;  %v1415_v28 = vmul.f32 %v2109_v40, %v1277_v11 }
 0x17e   :  { %v1533_v44 = vmul.f32 %v1489_v32, %v1413_v41  ;;  %v1414_v45 = vmul.f32 %v2111_v43, %v1238_v16 }
 0x17f   :  { %v1535_v46 = vmul.f32 %v1497_v34, %v1415_v28 }
 0x180   :  { %v1534_v47 = vmul.f32 %v1493_v42, %v1414_v45 }
 0x181   :  { %v1809_v48 = vpack.c.bf16 %v1535_v46, %v1535_v46 }
 0x182   :  { %v1808_v38 = vpack.c.bf16 %v1534_v47, %v1533_v44 }
 0x183   :  { %1623 = vst.msk [vmem:[%s2687_s3 + $0x48] sm:$0xf] %vm1622_vm4, %v1809_v48 }
 0x184   :  { %1621 = vst [vmem:[%s2687_s3 + $0x40] sm:$0xff] %v1808_v38 }

// kernel: cspdarknet_forward.6
= control target key start
LH: loop header
LB: loop body
LE: loop exit
PB: predicated region body
PF: predicated region fallthrough
CT: control target
= control target key end

     0   :  { %v2409_v1 = vmov 0   ;;  %vm228_vm0 = vcmask 1043456   ;;  %vm229_vm1 = vcmask 1044480   ;;  %v2410_v7 = vmov 65535   ;;  %s2413_s15 = smov 19   ;;  %s2414_s16 = smov 17   ;;  %s3002_s0 = inlined_call_operand.vmem [shape: bf16[73,648], index: 0, kind: input, shape index: {}]   ;;  %s3003_s2 = inlined_call_operand.vmem [shape: bf16[16,73], index: 2, kind: input, shape index: {}]   ;;  %s3004_s3 = inlined_call_operand.vmem [shape: bf16[16,16], index: 3, kind: input, shape index: {}]   ;;  %s3005_s4 = inlined_call_operand.vmem [shape: f32[16,1], index: 4, kind: input, shape index: {}, may-alias: {4,11}]   ;;  %s3006_s6 = inlined_call_operand.vmem [shape: f32[1,8,1], index: 6, kind: input, shape index: {}, may-alias: {6,8}]   ;;  %s3007_s5 = inlined_call_operand.vmem [shape: bf16[1,8,8], index: 5, kind: input, shape index: {}]   ;;  %s3008_s1 = inlined_call_operand.vmem [shape: f32[1,648], index: 1, kind: input, shape index: {}]   ;;  %s3009_s8 = inlined_call_operand.vmem [shape: f32[1,8,1], index: 8, kind: input, shape index: {}, may-alias: {6,8}]   ;;  %s3010_s11 = inlined_call_operand.vmem [shape: f32[16,1], index: 11, kind: input, shape index: {}, may-alias: {4,11}]   ;;  %s3011_s10 = inlined_call_operand.vmem [shape: bf16[16,8], index: 10, kind: input, shape index: {}]   ;;  %s3012_s7 = inlined_call_operand.vmem [shape: bf16[1,8,72], index: 7, kind: input, shape index: {}]   ;;  %s3013_s9 = inlined_call_operand.vmem [shape: bf16[16,8], index: 9, kind: input, shape index: {}]   ;;  %s3014_s12 = inlined_call_operand.vmem [shape: bf16[16,648], index: 12, kind: output, shape index: {}]  }
   0x1   :  { %v2168_v0 = vld [vmem:[%s3002_s0 + $0x4] ss:$24 sps:$4 sm:$0xff]   ;;  %282 = vmatprep.mubr.bf16.mxu1 %v2409_v1  ;;  %368 = vmatprep.mubr.bf16.mxu0 %v2409_v1  ;;  %v2170_v2 = vld [vmem:[%s3002_s0] ss:$24 sps:$4 sm:$0xff]   ;;  %v2171_v3 = vld [vmem:[%s3002_s0 + $0x34] ss:$24 sps:$4 sm:$0xff]  }
   0x2   :  { %2166 = vset.pattern.permute.xlu0 %v2409_v1  ;;  %2167 = vset.pattern.permute.xlu1 %v2409_v1  ;;  %v2173_v4 = vld [vmem:[%s3002_s0 + $0x30] ss:$24 sps:$4 sm:$0xff]   ;;  %v2174_v5 = vld [vmem:[%s3002_s0 + $0x64] ss:$24 sps:$4 sm:$0xff]   ;;  %v2176_v6 = vld [vmem:[%s3002_s0 + $0x60] ss:$24 sps:$4 sm:$0xff]  }
   0x3   :  { %250 = vmatprep.subr.bf16.mxu1 %v2168_v0  ;;  %v230_v8 = vsel %vm228_vm0, 4294967295, %v2410_v7  ;;  %v2177_v9 = vld [vmem:[%s3002_s0 + $0x94] ss:$24 sps:$4 sm:$0xff]   ;;  %v2180_v10 = vld [vmem:[%s3002_s0 + $0xc4] ss:$24 sps:$4 sm:$0x1f]  }
   0x4   :  { %251 = vmatpush1.bf16.msra.mxu1 %v2170_v2  ;;  %v231_v11 = vsel %vm229_vm1, %v230_v8, 0  ;;  %v2179_v12 = vld [vmem:[%s3002_s0 + $0x90] ss:$24 sps:$4 sm:$0xff]   ;;  %v2182_v13 = vld [vmem:[%s3002_s0 + $0xc0] ss:$24 sps:$4 sm:$0x1f]  }
   0x5   :  { %252 = vmatprep.subr.bf16.mxu1 %v2171_v3  ;;  %v236_v14 = vand.u32 %v2180_v10, %v231_v11  ;;  %v2193_v15 = vld [vmem:[%s3002_s0 + $0x14] ss:$24 sps:$4 sm:$0xff]   ;;  %v2195_v16 = vld [vmem:[%s3002_s0 + $0x10] ss:$24 sps:$4 sm:$0xff]   ;;  %v233_v17 = vand.u32 %v2182_v13, %v231_v11  ;;  %v2199_v18 = vld [vmem:[%s3002_s0 + $0x44] ss:$24 sps:$4 sm:$0xff]  }
   0x6   :  { %336 = vmatprep.subr.bf16.mxu0 %v2193_v15  ;;  %v2201_v19 = vld [vmem:[%s3002_s0 + $0x40] ss:$24 sps:$4 sm:$0xff]   ;;  %v2186_v20 = vld [vmem:[%s3002_s0 + $0xc] ss:$24 sps:$4 sm:$0xff]   ;;  %vm224_vm2 = vcmask 596992   ;;  %vm494_vm3 = vcmask 130048  }
   0x7   :  { %337 = vmatpush1.bf16.msra.mxu0 %v2195_v16  ;;  %v2183_v21 = vld [vmem:[%s3003_s2] sm:$0xff]   ;;  %v2205_v23 = vld [vmem:[%s3002_s0 + $0x74] ss:$24 sps:$4 sm:$0xff]   ;;  %v2207_v25 = vld [vmem:[%s3002_s0 + $0x70] ss:$24 sps:$4 sm:$0xff]   ;;  %vm730_vm4 = vcmask 64512  }
   0x8   :  { %253 = vmatpush1.bf16.msra.mxu1 %v2173_v4  ;;  %338 = vmatprep.subr.bf16.mxu0 %v2199_v18  ;;  %v2184_v22 = vld [vmem:[%s3002_s0 + $0x8] ss:$24 sps:$4 sm:$0xff]   ;;  %v2189_v24 = vld [vmem:[%s3002_s0 + $0x3c] ss:$24 sps:$4 sm:$0xff]   ;;  %v2187_v28 = vld [vmem:[%s3002_s0 + $0x38] ss:$24 sps:$4 sm:$0xff]  }
   0x9   :  { %254 = vmatprep.subr.bf16.mxu1 %v2174_v5  ;;  %v2211_v26 = vld [vmem:[%s3002_s0 + $0xd4] ss:$24 sps:$4 sm:$0x1f]   ;;  %v2208_v27 = vld [vmem:[%s3002_s0 + $0xa4] ss:$24 sps:$4 sm:$0xff]   ;;  %s2415_s17 = smov 111  }
   0xa   :  { %v2210_v29 = vld [vmem:[%s3002_s0 + $0xa0] ss:$24 sps:$4 sm:$0xff]   ;;  %v2213_v30 = vld [vmem:[%s3002_s0 + $0xd0] ss:$24 sps:$4 sm:$0x1f]   ;;  %v248_v32 = vand.u32 %v2211_v26, %v231_v11  ;;  %s2416_s18 = smov 1  }
   0xb   :  { %339 = vmatpush1.bf16.msra.mxu0 %v2201_v19  ;;  %v2192_v31 = vld [vmem:[%s3002_s0 + $0x6c] ss:$24 sps:$4 sm:$0xff]   ;;  %v2190_v33 = vld [vmem:[%s3002_s0 + $0x68] ss:$24 sps:$4 sm:$0xff]   ;;  %v245_v34 = vand.u32 %v2213_v30, %v231_v11  ;;  %v2198_v35 = vld [vmem:[%s3002_s0 + $0x9c] ss:$24 sps:$4 sm:$0xff]  }
   0xc   :  { %255 = vmatpush1.bf16.msra.mxu1 %v2176_v6  ;;  %340 = vmatprep.subr.bf16.mxu0 %v2205_v23  ;;  %v2204_v36 = vld [vmem:[%s3002_s0 + $0xcc] ss:$24 sps:$4 sm:$0x1f]   ;;  %v2196_v37 = vld [vmem:[%s3002_s0 + $0x98] ss:$24 sps:$4 sm:$0xff]   ;;  %s2417_s19 = smov 109  }
   0xd   :  { %256 = vmatprep.subr.bf16.mxu1 %v2177_v9  ;;  %v2202_v38 = vld [vmem:[%s3002_s0 + $0xc8] ss:$24 sps:$4 sm:$0x1f]   ;;  %v242_v39 = vand.u32 %v2204_v36, %v231_v11  ;;  %s2418_s20 = smov 127   ;;  %s2419_s21 = smov 110   ;;  %vm1062_vm5 = vcmask 1047696  }
   0xe   :  { %v239_v40 = vand.u32 %v2202_v38, %v231_v11  ;;  %v471_v41 = vld [vmem:[%s3005_s4] sm:$0xff]  ;;  %vm1034_vm6 = vcmask 1047704   ;;  %vm1090_vm7 = vcmask 1047688   ;;  %vm1122_vm8 = vcmask 1047560  }
   0xf   :  { %341 = vmatpush1.bf16.msra.mxu0 %v2207_v25  ;;  %481 = vperm.xlu0 %2166, %v471_v41   ;;  %v718_v42 = vld [vmem:[%s3006_s6] sm:$0xff]  ;;  %vm1023_vm9 = vcmask 154624   ;;  %vm1051_vm10 = vcmask 146432   ;;  %vm1147_vm11 = vcmask 1039360   ;;  %vm1079_vm12 = vcmask 138240  }
  0x10   :  { %257 = vmatpush1.bf16.msra.mxu1 %v2179_v12  ;;  %342 = vmatprep.subr.bf16.mxu0 %v2208_v27  ;;  %vm1236_vm13 = vcmask 891904   ;;  %vm1110_vm14 = vcmask 7168   ;;  %vm1178_vm15 = vcmask 908288   ;;  %vm1207_vm1 = vcmask 900096  }
  0x11   :  { %258 = vmatprep.subr.bf16.mxu1 %v236_v14 }
  0x13   :  { %343 = vmatpush1.bf16.msra.mxu0 %v2210_v29  ;;  %727 = vperm.xlu0 %2166, %v718_v42  }
  0x14   :  { %259 = vmatpush1.bf16.msra.mxu1 %v233_v17  ;;  %344 = vmatprep.subr.bf16.mxu0 %v248_v32 }
  0x15   :  { %293 = vmatprep.subr.bf16.mxu1 %v2186_v20 }
  0x17   :  { %2050 = vmatmul.mubr.msk.bf16.vlgmr.msra.gmra.mrb[0].mxu1 %vm224_vm2, %v2183_v21  ;;  %345 = vmatpush1.bf16.msra.mxu0 %v245_v34 }
  0x18   :  { %294 = vmatpush1.bf16.msra.mxu1 %v2184_v22  ;;  %325 = vmatprep.mubr.bf16.mxu1 %v2409_v1 }
  0x19   :  { %295 = vmatprep.subr.bf16.mxu1 %v2189_v24 }
  0x1a   :  { %2052 = vmatmul.mubr.msk.bf16.vlgmr.msra.gmra.mrb[0].mxu0 %vm224_vm2, %v2183_v21 }
  0x1b   :  { %784 = vmatprep.mubr.bf16.mxu0 %v2409_v1 }
  0x1c   :  { %296 = vmatpush1.bf16.msra.mxu1 %v2187_v28 }
  0x1d   :  { %297 = vmatprep.subr.bf16.mxu1 %v2192_v31 }
  0x20   :  { %298 = vmatpush1.bf16.msra.mxu1 %v2190_v33  ;;  %v2214_v33 = vld [vmem:[%s3004_s3] sm:$0xff]  }
  0x21   :  { %299 = vmatprep.subr.bf16.mxu1 %v2198_v35 }
  0x24   :  { %300 = vmatpush1.bf16.msra.mxu1 %v2196_v37 }
  0x25   :  { %301 = vmatprep.subr.bf16.mxu1 %v242_v39 }
  0x28   :  { %302 = vmatpush1.bf16.msra.mxu1 %v239_v40 }
  0x2b   :  { %2051 = vmatmul.mubr.msk.bf16.vlgmr.msra.gmra.mrb[4].mxu1 %vm224_vm2, %v2183_v21  ;;  %vm1344_vm2 = vcmask 588800  }
  0x2c   :  { %530 = vmatprep.mubr.bf16.mxu1 %v2409_v1 }
  0xea   :  { %v284_v43 = vpop.f32.mrb[0].mxu1 }
  0xeb   :  { %v2053_v44 = vmul.f32 -1.442695, %v284_v43  ;;  %v286_v45 = vpop.f32.mrb[1].mxu1 }
  0xec   :  { %v2054_v46 = vmul.f32 -1.442695, %v286_v45  ;;  %v288_v47 = vpop.f32.mrb[2].mxu1 }
  0xed   :  { %2217 = vpow2.f32 %v2053_v44  ;;  %v2059_v48 = vmul.f32 -1.442695, %v288_v47  ;;  %v290_v49 = vpop.f32.mrb[3].mxu1  ;;  %v2595_v51 = vpop.f32.mrb[0].mxu0 }
  0xee   :  { %2219 = vpow2.f32 %v2054_v46  ;;  %v2060_v50 = vmul.f32 -1.442695, %v290_v49  ;;  %v2057_v53 = vmul.f32 -1.442695, %v2595_v51  ;;  %v2598_v54 = vpop.f32.mrb[1].mxu0 }
  0xef   :  { %2221 = vpow2.f32 %v2059_v48  ;;  %v2600_v57 = vpop.f32.mrb[2].mxu0  ;;  %v2058_v63 = vmul.f32 -1.442695, %v2598_v54 }
  0xf0   :  { %2223 = vpow2.f32 %v2060_v50  ;;  %v2602_v60 = vpop.f32.mrb[3].mxu0  ;;  %v2063_v2 = vmul.f32 -1.442695, %v2600_v57 }
  0xf1   :  { %2225 = vpow2.f32 %v2057_v53  ;;  %v2064_v3 = vmul.f32 -1.442695, %v2602_v60 }
  0xf7   :  { %v2218_v52 = vpop.eup %2217 }
  0xf8   :  { %v2220_v55 = vpop.eup %2219  ;;  %v415_v56 = vadd.f32 1.0, %v2218_v52 }
  0xf9   :  { %v2222_v58 = vpop.eup %2221  ;;  %v416_v59 = vadd.f32 1.0, %v2220_v55 }
  0xfa   :  { %v2224_v61 = vpop.eup %2223  ;;  %2227 = vrcp.f32 %v415_v56  ;;  %v421_v62 = vadd.f32 1.0, %v2222_v58 }
  0xfb   :  { %2229 = vrcp.f32 %v416_v59  ;;  %v422_v0 = vadd.f32 1.0, %v2224_v61  ;;  %v2226_v12 = vpop.eup %2225 }
  0xfc   :  { %2231 = vrcp.f32 %v421_v62  ;;  %v419_v14 = vadd.f32 1.0, %v2226_v12 }
  0xfd   :  { %2233 = vrcp.f32 %v422_v0 }
  0xfe   :  { %v2607_v4 = vpop.f32.mrb[4].mxu1  ;;  %2235 = vpow2.f32 %v2058_v63 }
  0xff   :  { %v2055_v5 = vmul.f32 -1.442695, %v2607_v4  ;;  %v2610_v6 = vpop.f32.mrb[5].mxu1  ;;  %2237 = vpow2.f32 %v2063_v2 }
 0x100   :  { %v2056_v7 = vmul.f32 -1.442695, %v2610_v6  ;;  %v2613_v8 = vpop.f32.mrb[6].mxu1  ;;  %2239 = vpow2.f32 %v2064_v3 }
 0x101   :  { %2241 = vpow2.f32 %v2055_v5  ;;  %v2061_v9 = vmul.f32 -1.442695, %v2613_v8  ;;  %v333_v10 = vpop.f32.mrb[7].mxu1 }
 0x102   :  { %2243 = vpow2.f32 %v2056_v7  ;;  %v2062_v11 = vmul.f32 -1.442695, %v333_v10 }
 0x103   :  { %2245 = vpow2.f32 %v2061_v9 }
 0x104   :  { %v2228_v13 = vpop.eup %2227  ;;  %2247 = vpow2.f32 %v2062_v11 }
 0x105   :  { %v2230_v15 = vpop.eup %2229  ;;  %v451_v18 = vmul.f32 %v2228_v13, %v284_v43  ;;  %2249 = vrcp.f32 %v419_v14 }
 0x106   :  { %v2232_v16 = vpop.eup %2231  ;;  %v452_v21 = vmul.f32 %v2230_v15, %v286_v45 }
 0x107   :  { %v2234_v17 = vpop.eup %2233  ;;  %v457_v19 = vmul.f32 %v2232_v16, %v288_v47 }
 0x108   :  { %v2236_v20 = vpop.eup %2235  ;;  %v458_v22 = vmul.f32 %v2234_v17, %v290_v49 }
 0x109   :  { %v2238_v23 = vpop.eup %2237  ;;  %v463_v24 = vpack.c.bf16 %v457_v19, %v451_v18  ;;  %v420_v25 = vadd.f32 1.0, %v2236_v20 }
 0x10a   :  { %v2240_v26 = vpop.eup %2239  ;;  %v464_v27 = vpack.c.bf16 %v458_v22, %v452_v21  ;;  %v425_v28 = vadd.f32 1.0, %v2238_v23 }
 0x10b   :  { %v2242_v29 = vpop.eup %2241  ;;  %2251 = vrcp.f32 %v420_v25  ;;  %v426_v30 = vadd.f32 1.0, %v2240_v26 }
 0x10c   :  { %v2244_v31 = vpop.eup %2243  ;;  %v417_v32 = vadd.f32 1.0, %v2242_v29  ;;  %2253 = vrcp.f32 %v425_v28  ;;  %498 = vmatprep.subr.bf16.mxu1 %v464_v27 }
 0x10d   :  { %v2246_v34 = vpop.eup %2245  ;;  %v418_v35 = vadd.f32 1.0, %v2244_v31  ;;  %2255 = vrcp.f32 %v426_v30  ;;  %499 = vmatpush1.bf16.msra.mxu1 %v463_v24 }
 0x10e   :  { %v2248_v36 = vpop.eup %2247  ;;  %2257 = vrcp.f32 %v417_v32  ;;  %v423_v37 = vadd.f32 1.0, %v2246_v34 }
 0x10f   :  { %2259 = vrcp.f32 %v418_v35  ;;  %v424_v38 = vadd.f32 1.0, %v2248_v36  ;;  %v2250_v39 = vpop.eup %2249 }
 0x110   :  { %2261 = vrcp.f32 %v423_v37  ;;  %2066 = vmatmul.mubr.msk.bf16.vlgmr.msra.gmra.mrb[8].mxu1 %vm494_vm3, %v2214_v33  ;;  %v455_v41 = vmul.f32 %v2250_v39, %v2595_v51 }
 0x111   :  { %2263 = vrcp.f32 %v424_v38  ;;  %573 = vmatprep.mubr.bf16.mxu1 %v2409_v1 }
 0x115   :  { %v2252_v40 = vpop.eup %2251 }
 0x116   :  { %v2254_v42 = vpop.eup %2253  ;;  %v456_v43 = vmul.f32 %v2252_v40, %v2598_v54 }
 0x117   :  { %v2256_v44 = vpop.eup %2255  ;;  %v461_v45 = vmul.f32 %v2254_v42, %v2600_v57  ;;  %v482_v57 = vpop.permute.xlu0 %481 }
 0x118   :  { %v2258_v46 = vpop.eup %2257  ;;  %v462_v47 = vmul.f32 %v2256_v44, %v2602_v60 }
 0x119   :  { %v2260_v48 = vpop.eup %2259  ;;  %v467_v49 = vpack.c.bf16 %v461_v45, %v455_v41  ;;  %v453_v55 = vmul.f32 %v2258_v46, %v2607_v4 }
 0x11a   :  { %v2262_v50 = vpop.eup %2261  ;;  %v468_v52 = vpack.c.bf16 %v462_v47, %v456_v43  ;;  %v454_v51 = vmul.f32 %v2260_v48, %v2610_v6 }
 0x11b   :  { %v2264_v53 = vpop.eup %2263  ;;  %v459_v56 = vmul.f32 %v2262_v50, %v2613_v8 }
 0x11c   :  { %v460_v58 = vmul.f32 %v2264_v53, %v333_v10 }
 0x11d   :  { %v465_v59 = vpack.c.bf16 %v459_v56, %v453_v55 }
 0x11e   :  { %v466_v54 = vpack.c.bf16 %v460_v58, %v454_v51  ;;  %v2411_v51 = vmov 0.0   ;;  %v728_v58 = vpop.permute.xlu0 %727 }
 0x11f   :  { %983 = vst.msk [vmem:[#allocation2 + $0xe8] sm:$0xff] %vm730_vm4, %v2411_v51  ;;  %954 = vst [vmem:[#allocation2] sm:$0xff] %v2411_v51 }
 0x120   :  { %541 = vmatprep.subr.bf16.mxu1 %v466_v54  ;;  %959 = vst.msk [vmem:[#allocation2 + $0x28] sm:$0xff] %vm730_vm4, %v2411_v51  ;;  %960 = vst [vmem:[#allocation2 + $0x30] sm:$0xff] %v2411_v51 }
 0x121   :  { %542 = vmatpush1.bf16.msra.mxu1 %v465_v59  ;;  %965 = vst.msk [vmem:[#allocation2 + $0x58] sm:$0xff] %vm730_vm4, %v2411_v51  ;;  %966 = vst [vmem:[#allocation2 + $0x60] sm:$0xff] %v2411_v51 }
 0x122   :  { %584 = vmatprep.subr.bf16.mxu1 %v468_v52  ;;  %971 = vst.msk [vmem:[#allocation2 + $0x88] sm:$0xff] %vm730_vm4, %v2411_v51  ;;  %972 = vst [vmem:[#allocation2 + $0x90] sm:$0xff] %v2411_v51 }
 0x123   :  { %977 = vst.msk [vmem:[#allocation2 + $0xb8] sm:$0xff] %vm730_vm4, %v2411_v51  ;;  %989 = vst.msk [vmem:[#allocation2 + $0x118] sm:$0xff] %vm730_vm4, %v2411_v51 }
 0x124   :  { %2067 = vmatmul.mubr.msk.bf16.vlgmr.msra.gmra.mrb[12].mxu1 %vm494_vm3, %v2214_v33  ;;  %994 = vst [vmem:[#allocation2 + $0x140] sm:$0xff] %v2411_v51  ;;  %995 = vst.msk [vmem:[#allocation2 + $0x148] sm:$0xff] %vm730_vm4, %v2411_v51 }
 0x125   :  { %585 = vmatpush1.bf16.msra.mxu1 %v467_v49  ;;  %616 = vmatprep.mubr.bf16.mxu1 %v2409_v1  ;;  %1000 = vst [vmem:[#allocation2 + $0x170] sm:$0xff] %v2411_v51  ;;  %1001 = vst.msk [vmem:[#allocation2 + $0x178] sm:$0xff] %vm730_vm4, %v2411_v51 }
 0x126   :  { %1006 = vst [vmem:[#allocation2 + $0x1a0] sm:$0xff] %v2411_v51  ;;  %1007 = vst.msk [vmem:[#allocation2 + $0x1a8] sm:$0xff] %vm730_vm4, %v2411_v51 }
 0x12c   :  { %2068 = vmatmul.mubr.msk.bf16.vlgmr.msra.gmra.mrb[16].mxu1 %vm494_vm3, %v2214_v33  ;;  %v717_v33 = vld [vmem:[%s3007_s5] sm:$0xf]  ;;  %vm1193_vm3 = vcmask 973824  }
 0x12d   :  { %825 = vmatprep.mubr.bf16.mxu1 %v2409_v1 }
 0x1e3   :  { %v532_v60 = vpop.f32.mrb[8].mxu1 }
 0x1e4   :  { %v533_v61 = vadd.f32 %v532_v60, %v482_v57  ;;  %v534_v62 = vpop.f32.mrb[9].mxu1 }
 0x1e5   :  { %v535_v63 = vadd.f32 %v534_v62, %v482_v57  ;;  %v2632_v0 = vpop.f32.mrb[10].mxu1 }
 0x1e6   :  { %v2069_v2 = vmul.f32 -1.442695, %v533_v61  ;;  %v2634_v3 = vpop.f32.mrb[11].mxu1 }
 0x1e7   :  { %v2070_v4 = vmul.f32 -1.442695, %v535_v63 }
 0x1e8   :  { %2265 = vpow2.f32 %v2069_v2 }
 0x1e9   :  { %2267 = vpow2.f32 %v2070_v4 }
 0x1f2   :  { %v2266_v5 = vpop.eup %2265 }
 0x1f3   :  { %v2268_v6 = vpop.eup %2267  ;;  %v663_v7 = vadd.f32 1.0, %v2266_v5  ;;  %v918_v5 = vlaneseq }
 0x1f4   :  { %v664_v8 = vadd.f32 1.0, %v2268_v6 }
 0x1f5   :  { %2269 = vrcp.f32 %v663_v7 }
 0x1f6   :  { %2271 = vrcp.f32 %v664_v8 }
 0x1f7   :  { %v575_v9 = vpop.f32.mrb[12].mxu1 }
 0x1f8   :  { %v576_v10 = vadd.f32 %v575_v9, %v482_v57  ;;  %v577_v11 = vpop.f32.mrb[13].mxu1  ;;  %v2692_v9 = vshrl.u32 %v918_v5, 7 }
 0x1f9   :  { %v578_v12 = vadd.f32 %v577_v11, %v482_v57  ;;  %v2636_v13 = vpop.f32.mrb[14].mxu1 }
 0x1fa   :  { %v2071_v14 = vmul.f32 -1.442695, %v576_v10  ;;  %v2638_v15 = vpop.f32.mrb[15].mxu1  ;;  %v940_v5 = vsub.s32 5, %v2692_v9 }
 0x1fb   :  { %v2072_v16 = vmul.f32 -1.442695, %v578_v12 }
 0x1fc   :  { %2273 = vpow2.f32 %v2071_v14 }
 0x1fd   :  { %2275 = vpow2.f32 %v2072_v16 }
 0x1ff   :  { %v2270_v17 = vpop.eup %2269  ;;  %v618_v18 = vpop.f32.mrb[16].mxu1 }
 0x200   :  { %v2272_v19 = vpop.eup %2271  ;;  %v2640_v20 = vmul.f32 %v2270_v17, %v533_v61  ;;  %v619_v21 = vadd.f32 %v618_v18, %v482_v57  ;;  %v620_v22 = vpop.f32.mrb[17].mxu1  ;;  %v920_v17 = vsub.s32 0, %v2692_v9 }
 0x201   :  { %v2642_v23 = vmul.f32 %v2272_v19, %v535_v63  ;;  %v621_v24 = vadd.f32 %v620_v22, %v482_v57  ;;  %v2644_v25 = vpop.f32.mrb[18].mxu1  ;;  %v924_v22 = vsub.s32 1, %v2692_v9 }
 0x202   :  { %v719_v26 = vpack.c.bf16 %v2640_v20, %v2640_v20  ;;  %v2073_v27 = vmul.f32 -1.442695, %v619_v21  ;;  %v2648_v28 = vpop.f32.mrb[19].mxu1 }
 0x203   :  { %v720_v29 = vpack.c.bf16 %v2642_v23, %v2642_v23  ;;  %v2074_v30 = vmul.f32 -1.442695, %v621_v24 }
 0x204   :  { %2277 = vpow2.f32 %v2073_v27  ;;  %v735_v31 = vsel %vm228_vm0, %v719_v26, 0 }
 0x205   :  { %2279 = vpow2.f32 %v2074_v30  ;;  %2081 = vmatprep.subr.msk.bf16.mxu0 %vm228_vm0, %v720_v29 }
 0x206   :  { %v2274_v32 = vpop.eup %2273  ;;  %753 = vmatpush1.bf16.msra.mxu0 %v735_v31 }
 0x207   :  { %v2276_v34 = vpop.eup %2275  ;;  %v665_v35 = vadd.f32 1.0, %v2274_v32 }
 0x208   :  { %v666_v36 = vadd.f32 1.0, %v2276_v34 }
 0x209   :  { %2281 = vrcp.f32 %v665_v35  ;;  %2082 = vmatmul.mubr.msk.bf16.vlgmr.msra.gmra.mrb[4].mxu0 %vm730_vm4, %v717_v33 }
 0x20a   :  { %2283 = vrcp.f32 %v666_v36  ;;  %866 = vmatprep.mubr.bf16.mxu0 %v2409_v1 }
 0x20e   :  { %v2278_v37 = vpop.eup %2277 }
 0x20f   :  { %v2280_v38 = vpop.eup %2279  ;;  %v667_v39 = vadd.f32 1.0, %v2278_v37 }
 0x210   :  { %v668_v40 = vadd.f32 1.0, %v2280_v38 }
 0x211   :  { %2285 = vrcp.f32 %v667_v39 }
 0x212   :  { %2287 = vrcp.f32 %v668_v40 }
 0x213   :  { %v2282_v41 = vpop.eup %2281 }
 0x214   :  { %v2284_v42 = vpop.eup %2283  ;;  %v2659_v43 = vmul.f32 %v2282_v41, %v576_v10 }
 0x215   :  { %v2661_v44 = vmul.f32 %v2284_v42, %v578_v12 }
 0x216   :  { %v721_v45 = vpack.c.bf16 %v2659_v43, %v2659_v43 }
 0x217   :  { %v722_v46 = vpack.c.bf16 %v2661_v44, %v2661_v44 }
 0x218   :  { %v741_v47 = vsel %vm228_vm0, %v721_v45, 0 }
 0x219   :  { %2083 = vmatprep.subr.msk.bf16.mxu1 %vm228_vm0, %v722_v46 }
 0x21a   :  { %794 = vmatpush1.bf16.msra.mxu1 %v741_v47 }
 0x21b   :  { %v2286_v48 = vpop.eup %2285 }
 0x21c   :  { %v2288_v49 = vpop.eup %2287  ;;  %v2669_v50 = vmul.f32 %v2286_v48, %v619_v21  ;;  %v2703_v21 = vld [vmem:[%s3008_s1] sm:$0x3f]  ;;  %s2412_s1 = smov 18  }
 0x21d   :  { %v2671_v52 = vmul.f32 %v2288_v49, %v621_v24  ;;  %2084 = vmatmul.mubr.msk.bf16.vlgmr.msra.gmra.mrb[20].mxu1 %vm730_vm4, %v717_v33  ;;  %v2708_v26 = vrot.slane %v2703_v21, %v920_v17  ;;  %v2711_v29 = vrot.slane %v2703_v21, %v924_v22  ;;  %v478_v17 = vld [vmem:[%s3010_s11 + $0x8] sm:$0xff] }
 0x21e   :  { %v723_v53 = vpack.c.bf16 %v2669_v50, %v2669_v50  ;;  %1398 = vmatprep.mubr.bf16.mxu1 %v2409_v1 }
 0x21f   :  { %v724_v55 = vpack.c.bf16 %v2671_v52, %v2671_v52 }
 0x220   :  { %v747_v56 = vsel %vm228_vm0, %v723_v53, 0  ;;  %v928_v53 = vsub.s32 2, %v2692_v9 }
 0x221   :  { %2085 = vmatprep.subr.msk.bf16.mxu0 %vm228_vm0, %v724_v55 }
 0x222   :  { %835 = vmatpush1.bf16.msra.mxu0 %v747_v56  ;;  %v932_v56 = vsub.s32 3, %v2692_v9 }
 0x225   :  { %2086 = vmatmul.mubr.msk.bf16.vlgmr.msra.gmra.mrb[8].mxu0 %vm730_vm4, %v717_v33 }
 0x226   :  { %1439 = vmatprep.mubr.bf16.mxu0 %v2409_v1 }
 0x2dc   :  { %v786_v59 = vpop.f32.mrb[4].mxu0 }
 0x2dd   :  { %v787_v54 = vadd.f32 %v786_v59, %v728_v58  ;;  %v788_v57 = vpop.f32.mrb[5].mxu0  ;;  %v2738_v59 = vrot.slane %v2703_v21, %v928_v53 }
 0x2de   :  { %v789_v60 = vadd.f32 %v788_v57, %v728_v58  ;;  %v790_v61 = vpop.f32.mrb[6].mxu0  ;;  %v2741_v57 = vrot.slane %v2703_v21, %v932_v56  ;;  %v477_v56 = vld [vmem:[%s3010_s11] sm:$0xff] }
 0x2df   :  { %v2087_v62 = vmul.f32 -1.442695, %v787_v54  ;;  %v791_v63 = vpop.f32.mrb[7].mxu0 }
 0x2e0   :  { %v2088_v2 = vmul.f32 -1.442695, %v789_v60 }
 0x2e1   :  { %2289 = vpow2.f32 %v2087_v62 }
 0x2e2   :  { %2291 = vpow2.f32 %v2088_v2  ;;  %v936_v2 = vsub.s32 4, %v2692_v9 }
 0x2eb   :  { %v2290_v4 = vpop.eup %2289 }
 0x2ec   :  { %v2292_v6 = vpop.eup %2291  ;;  %v893_v7 = vadd.f32 1.0, %v2290_v4 }
 0x2ed   :  { %v894_v8 = vadd.f32 1.0, %v2292_v6  ;;  %v2762_v6 = vrot.slane %v2703_v21, %v936_v2 }
 0x2ee   :  { %2293 = vrcp.f32 %v893_v7 }
 0x2ef   :  { %2295 = vrcp.f32 %v894_v8  ;;  %v2765_v8 = vrot.slane %v2703_v21, %v940_v5 }
 0x2f0   :  { %v827_v10 = vpop.f32.mrb[20].mxu1 }
 0x2f1   :  { %v2694_v11 = vadd.f32 %v827_v10, %v728_v58  ;;  %v829_v12 = vpop.f32.mrb[21].mxu1 }
 0x2f2   :  { %v2696_v14 = vadd.f32 %v829_v12, %v728_v58  ;;  %v831_v16 = vpop.f32.mrb[22].mxu1 }
 0x2f3   :  { %v2089_v18 = vmul.f32 -1.442695, %v2694_v11  ;;  %v832_v19 = vpop.f32.mrb[23].mxu1  ;;  %v1254_v16 = vld [vmem:[%s3009_s8] sm:$0xff] }
 0x2f4   :  { %v2090_v24 = vmul.f32 -1.442695, %v2696_v14 }
 0x2f5   :  { %2297 = vpow2.f32 %v2089_v18  ;;  %v472_v18 = vld [vmem:[%s3005_s4 + $0x8] sm:$0xff] }
 0x2f6   :  { %2299 = vpow2.f32 %v2090_v24 }
 0x2f8   :  { %v2294_v27 = vpop.eup %2293  ;;  %v868_v30 = vpop.f32.mrb[8].mxu0 }
 0x2f9   :  { %v2296_v31 = vpop.eup %2295  ;;  %v911_v32 = vmul.f32 %v2294_v27, %v787_v54  ;;  %v869_v33 = vadd.f32 %v868_v30, %v728_v58  ;;  %v870_v34 = vpop.f32.mrb[9].mxu0 }
 0x2fa   :  { %v912_v35 = vmul.f32 %v2296_v31, %v789_v60  ;;  %v871_v36 = vadd.f32 %v870_v34, %v728_v58  ;;  %v872_v37 = vpop.f32.mrb[10].mxu0 }
 0x2fb   :  { %v2714_v38 = vmul.f32 %v2708_v26, %v911_v32  ;;  %v2091_v39 = vmul.f32 -1.442695, %v869_v33  ;;  %v873_v40 = vpop.f32.mrb[11].mxu0 }
 0x2fc   :  { %v2717_v41 = vmul.f32 %v2711_v29, %v912_v35  ;;  %v2092_v42 = vmul.f32 -1.442695, %v871_v36 }
 0x2fd   :  { %2301 = vpow2.f32 %v2091_v39  ;;  %1041 = vrot.lane.b32.xlu0 %v2714_v38, %s2412_s1  ;;  %1013 = vrot.lane.b32.xlu1 %v2714_v38, %s2413_s15 }
 0x2fe   :  { %2303 = vpow2.f32 %v2092_v42 }
 0x2ff   :  { %v2298_v45 = vpop.eup %2297 }
 0x300   :  { %v2300_v46 = vpop.eup %2299  ;;  %v895_v47 = vadd.f32 1.0, %v2298_v45 }
 0x301   :  { %v896_v48 = vadd.f32 1.0, %v2300_v46  ;;  %1069 = vrot.lane.b32.xlu0 %v2714_v38, %s2414_s16  ;;  %1166 = vrot.lane.b32.xlu1 %v2714_v38, %s2415_s17 }
 0x302   :  { %2305 = vrcp.f32 %v895_v47 }
 0x303   :  { %2307 = vrcp.f32 %v896_v48 }
 0x305   :  { %1098 = vrot.lane.b32.xlu0 %v2714_v38, %s2416_s18  ;;  %1224 = vrot.lane.b32.xlu1 %v2714_v38, %s2417_s19 }
 0x307   :  { %v2302_v49 = vpop.eup %2301 }
 0x308   :  { %v2304_v55 = vpop.eup %2303  ;;  %v897_v51 = vadd.f32 1.0, %v2302_v49 }
 0x309   :  { %v898_v58 = vadd.f32 1.0, %v2304_v55  ;;  %1135 = vrot.lane.b32.xlu0 %v2714_v38, %s2418_s20  ;;  %1015 = vrot.lane.b32.xlu1 %v2717_v41, %s2413_s15 }
 0x30a   :  { %2309 = vrcp.f32 %v897_v51 }
 0x30b   :  { %2311 = vrcp.f32 %v898_v58 }
 0x30c   :  { %v2306_v54 = vpop.eup %2305 }
 0x30d   :  { %v2308_v60 = vpop.eup %2307  ;;  %v913_v61 = vmul.f32 %v2306_v54, %v2694_v11  ;;  %1195 = vrot.lane.b32.xlu0 %v2714_v38, %s2419_s21  ;;  %1043 = vrot.lane.b32.xlu1 %v2717_v41, %s2412_s1 }
 0x30e   :  { %v914_v62 = vmul.f32 %v2308_v60, %v2696_v14 }
 0x30f   :  { %v2750_v63 = vmul.f32 %v2738_v59, %v913_v61 }
 0x310   :  { %v2754_v4 = vmul.f32 %v2741_v57, %v914_v62 }
 0x311   :  { %1137 = vrot.lane.b32.xlu0 %v2717_v41, %s2418_s20  ;;  %1071 = vrot.lane.b32.xlu1 %v2717_v41, %s2414_s16 }
 0x314   :  { %v2310_v7 = vpop.eup %2309 }
 0x315   :  { %v2312_v10 = vpop.eup %2311  ;;  %v915_v11 = vmul.f32 %v2310_v7, %v869_v33  ;;  %1226 = vrot.lane.b32.xlu0 %v2717_v41, %s2417_s19  ;;  %1100 = vrot.lane.b32.xlu1 %v2717_v41, %s2416_s18 }
 0x316   :  { %v916_v9 = vmul.f32 %v2312_v10, %v871_v36 }
 0x317   :  { %v2772_v12 = vmul.f32 %v2762_v6, %v915_v11 }
 0x318   :  { %v953_v14 = vmul.f32 %v2765_v8, %v916_v9 }
 0x319   :  { %1168 = vrot.lane.b32.xlu1 %v2717_v41, %s2415_s17  ;;  %1170 = vrot.lane.b32.xlu0 %v2750_v63, %s2415_s17 }
 0x31a   :  { %1134 = vst.msk [vmem:[#allocation2 + $0xe8] sm:$0xff] %vm730_vm4, %v953_v14 }
 0x31d   :  { %1197 = vrot.lane.b32.xlu1 %v2717_v41, %s2419_s21  ;;  %1199 = vrot.lane.b32.xlu0 %v2750_v63, %s2419_s21 }
 0x321   :  { %1019 = vrot.lane.b32.xlu0 %v2754_v4, %s2413_s15  ;;  %1139 = vrot.lane.b32.xlu1 %v2750_v63, %s2418_s20 }
 0x325   :  { %1047 = vrot.lane.b32.xlu0 %v2754_v4, %s2412_s1  ;;  %1017 = vrot.lane.b32.xlu1 %v2750_v63, %s2413_s15 }
 0x329   :  { %1075 = vrot.lane.b32.xlu0 %v2754_v4, %s2414_s16  ;;  %1045 = vrot.lane.b32.xlu1 %v2750_v63, %s2412_s1 }
 0x32d   :  { %1104 = vrot.lane.b32.xlu0 %v2754_v4, %s2416_s18  ;;  %1073 = vrot.lane.b32.xlu1 %v2750_v63, %s2414_s16 }
 0x331   :  { %1141 = vrot.lane.b32.xlu0 %v2754_v4, %s2418_s20  ;;  %1102 = vrot.lane.b32.xlu1 %v2750_v63, %s2416_s18 }
 0x335   :  { %1172 = vrot.lane.b32.xlu0 %v2754_v4, %s2415_s17  ;;  %1228 = vrot.lane.b32.xlu1 %v2750_v63, %s2417_s19 }
 0x339   :  { %1201 = vrot.lane.b32.xlu0 %v2754_v4, %s2419_s21  ;;  %1143 = vrot.lane.b32.xlu1 %v2772_v12, %s2418_s20 }
 0x33d   :  { %1021 = vrot.lane.b32.xlu0 %v2772_v12, %s2413_s15  ;;  %1049 = vrot.lane.b32.xlu1 %v2772_v12, %s2412_s1 }
 0x341   :  { %1106 = vrot.lane.b32.xlu0 %v2772_v12, %s2416_s18  ;;  %1174 = vrot.lane.b32.xlu1 %v2772_v12, %s2415_s17 }
 0x345   :  { %1077 = vrot.lane.b32.xlu0 %v2772_v12, %s2414_s16  ;;  %1203 = vrot.lane.b32.xlu1 %v2772_v12, %s2419_s21 }
 0x349   :  { %1232 = vrot.lane.b32.xlu0 %v2772_v12, %s2417_s19  ;;  %1108 = vrot.lane.b32.xlu1 %v953_v14, %s2416_s18 }
 0x34d   :  { %1176 = vrot.lane.b32.xlu0 %v953_v14, %s2415_s17  ;;  %1230 = vrot.lane.b32.xlu1 %v2754_v4, %s2417_s19 }
 0x351   :  { %1234 = vrot.lane.b32.xlu0 %v953_v14, %s2417_s19  ;;  %1145 = vrot.lane.b32.xlu1 %v953_v14, %s2418_s20 }
 0x355   :  { %1341 = vperm.xlu0 %2166, %v1254_v16   ;;  %1205 = vrot.lane.b32.xlu1 %v953_v14, %s2419_s21 }
 0x359   :  { %1860 = vperm.xlu0 %2166, %v478_v17   ;;  %486 = vperm.xlu1 %2167, %v472_v18  }
 0x35d   :  { %1855 = vperm.xlu1 %2167, %v477_v56  }
 0x36f   :  { %v1042_v19 = vpop.permute.xlu0 %1041  ;;  %v1014_v21 = vpop.permute.xlu1 %1013 }
 0x370   :  { %1063 = vst.msk [vmem:[#allocation2 + $0x30] sm:$0xff] %vm1062_vm5, %v1042_v19  ;;  %vm1164_vm5 = vcmask 56320  }
 0x371   :  { %1035 = vst.msk [vmem:[#allocation2] sm:$0xff] %vm1034_vm6, %v1014_v21  ;;  %vm1251_vm6 = vcmask 957440  }
 0x373   :  { %v1070_v22 = vpop.permute.xlu0 %1069  ;;  %v1167_v24 = vpop.permute.xlu1 %1166 }
 0x374   :  { %1091 = vst.msk [vmem:[#allocation2 + $0x60] sm:$0xff] %vm1090_vm7, %v1070_v22  ;;  %vm1222_vm7 = vcmask 965632  }
 0x377   :  { %v1099_v27 = vpop.permute.xlu0 %1098  ;;  %v1225_v30 = vpop.permute.xlu1 %1224  ;;  %v1261_v37 = vld [vmem:[#allocation2 + $0x30] sm:$0xff] }
 0x378   :  { %1123 = vst.msk [vmem:[#allocation2 + $0x90] sm:$0xff] %vm1122_vm8, %v1099_v27  ;;  %v1255_v36 = vld [vmem:[#allocation2] sm:$0xff] }
 0x379   :  { %v1309_v42 = vpack.c.bf16 %v1261_v37, %v1255_v36 }
 0x37b   :  { %v1136_v31 = vpop.permute.xlu0 %1135  ;;  %v1016_v32 = vpop.permute.xlu1 %1015  ;;  %v1267_v60 = vld [vmem:[#allocation2 + $0x60] sm:$0xff] }
 0x37c   :  { %v1024_v33 = vsel %vm1023_vm9, %v1014_v21, %v1016_v32 }
 0x37f   :  { %v1196_v34 = vpop.permute.xlu0 %1195  ;;  %v1044_v35 = vpop.permute.xlu1 %1043  ;;  %v1273_v55 = vld [vmem:[#allocation2 + $0x90] sm:$0xff] }
 0x380   :  { %v1052_v39 = vsel %vm1051_vm10, %v1042_v19, %v1044_v35  ;;  %v1315_v61 = vpack.c.bf16 %v1273_v55, %v1267_v60 }
 0x381   :  { %v1310_v40 = vpack.c.bf16 %v1052_v39, %v1024_v33 }
 0x383   :  { %v1138_v45 = vpop.permute.xlu0 %1137  ;;  %v1072_v46 = vpop.permute.xlu1 %1071  ;;  %1366 = vmatprep.subr.bf16.mxu1 %v1310_v40 }
 0x384   :  { %v1148_v47 = vsel %vm1147_vm11, %v1136_v31, %v1138_v45  ;;  %v1080_v48 = vsel %vm1079_vm12, %v1070_v22, %v1072_v46  ;;  %1367 = vmatpush1.bf16.msra.mxu1 %v1309_v42 }
 0x385   :  { %v1321_v21 = vpack.c.bf16 %v1148_v47, %v2714_v38 }
 0x387   :  { %v1227_v49 = vpop.permute.xlu0 %1226  ;;  %v1101_v53 = vpop.permute.xlu1 %1100 }
 0x388   :  { %v2850_v51 = vsel %vm1236_vm13, %v1225_v30, %v1227_v49  ;;  %v1111_v58 = vsel %vm1110_vm14, %v1099_v27, %v1101_v53 }
 0x389   :  { %v1316_v54 = vpack.c.bf16 %v1111_v58, %v1080_v48 }
 0x38b   :  { %v1169_v62 = vpop.permute.xlu1 %1168  ;;  %v1171_v2 = vpop.permute.xlu0 %1170  ;;  %1368 = vmatprep.subr.bf16.mxu1 %v1316_v54 }
 0x38c   :  { %v1179_v5 = vsel %vm1178_vm15, %v1167_v24, %v1169_v62  ;;  %v1180_v7 = vsel %vm1178_vm15, %v1169_v62, %v1171_v2  ;;  %1369 = vmatpush1.bf16.msra.mxu1 %v1315_v61  ;;  %v1333_v62 = vpack.c.bf16 %v2850_v51, %v2850_v51  ;;  %v2880_v51 = vld [vmem:[%s3012_s7] sm:$0xf] }
 0x38f   :  { %v1198_v10 = vpop.permute.xlu1 %1197  ;;  %v1200_v11 = vpop.permute.xlu0 %1199 }
 0x390   :  { %v1208_v9 = vsel %vm1207_vm1, %v1196_v34, %v1198_v10  ;;  %v1209_v14 = vsel %vm1207_vm1, %v1198_v10, %v1200_v11 }
 0x391   :  { %v1328_v27 = vpack.c.bf16 %v1209_v14, %v1180_v7  ;;  %v1327_v33 = vpack.c.bf16 %v1208_v9, %v1179_v5 }
 0x393   :  { %v1020_v16 = vpop.permute.xlu0 %1019  ;;  %v1140_v17 = vpop.permute.xlu1 %1139 }
 0x394   :  { %v1149_v18 = vsel %vm1147_vm11, %v1138_v45, %v1140_v17 }
 0x395   :  { %v1322_v19 = vpack.c.bf16 %v1149_v18, %v2717_v41 }
 0x397   :  { %v1048_v22 = vpop.permute.xlu0 %1047  ;;  %v1018_v24 = vpop.permute.xlu1 %1017  ;;  %1370 = vmatprep.subr.bf16.mxu1 %v1322_v19 }
 0x398   :  { %v1025_v30 = vsel %vm1023_vm9, %v1016_v32, %v1018_v24  ;;  %v1026_v31 = vsel %vm1023_vm9, %v1018_v24, %v1020_v16  ;;  %1371 = vmatpush1.bf16.msra.mxu1 %v1321_v21 }
 0x399   :  { %1372 = vmatprep.subr.bf16.mxu1 %v1328_v27 }
 0x39b   :  { %v1076_v34 = vpop.permute.xlu0 %1075  ;;  %v1046_v36 = vpop.permute.xlu1 %1045 }
 0x39c   :  { %v1053_v37 = vsel %vm1051_vm10, %v1044_v35, %v1046_v36  ;;  %v1054_v39 = vsel %vm1051_vm10, %v1046_v36, %v1048_v22  ;;  %1373 = vmatpush1.bf16.msra.mxu1 %v1327_v33 }
 0x39d   :  { %v1312_v41 = vpack.c.bf16 %v1054_v39, %v1026_v31  ;;  %v1311_v38 = vpack.c.bf16 %v1053_v37, %v1025_v30 }
 0x39f   :  { %v1105_v40 = vpop.permute.xlu0 %1104  ;;  %v1074_v42 = vpop.permute.xlu1 %1073  ;;  %1407 = vmatprep.subr.bf16.mxu0 %v1312_v41 }
 0x3a0   :  { %v1081_v45 = vsel %vm1079_vm12, %v1072_v46, %v1074_v42  ;;  %v1082_v32 = vsel %vm1079_vm12, %v1074_v42, %v1076_v34  ;;  %1408 = vmatpush1.bf16.msra.mxu0 %v1311_v38 }
 0x3a3   :  { %v1142_v47 = vpop.permute.xlu0 %1141  ;;  %v1103_v48 = vpop.permute.xlu1 %1102 }
 0x3a4   :  { %v1150_v55 = vsel %vm1147_vm11, %v1140_v17, %v1142_v47  ;;  %v1112_v56 = vsel %vm1110_vm14, %v1101_v53, %v1103_v48  ;;  %v1113_v35 = vsel %vm1110_vm14, %v1103_v48, %v1105_v40  ;;  %v1349_v53 = vsel %vm228_vm0, %v1333_v62, 0 }
 0x3a5   :  { %v1318_v58 = vpack.c.bf16 %v1113_v35, %v1082_v32  ;;  %v1317_v54 = vpack.c.bf16 %v1112_v56, %v1081_v45 }
 0x3a7   :  { %v1173_v60 = vpop.permute.xlu0 %1172  ;;  %v1229_v61 = vpop.permute.xlu1 %1228  ;;  %1409 = vmatprep.subr.bf16.mxu0 %v1318_v58 }
 0x3a8   :  { %v1181_v46 = vsel %vm1178_vm15, %v1171_v2, %v1173_v60  ;;  %v1238_v5 = vsel %vm1236_vm13, %v1227_v49, %v1229_v61  ;;  %1410 = vmatpush1.bf16.msra.mxu0 %v1317_v54  ;;  %v1323_v2 = vpack.c.bf16 %v1150_v55, %v2750_v63 }
 0x3a9   :  { %v1334_v7 = vpack.c.bf16 %v1238_v5, %v1238_v5 }
 0x3ab   :  { %v1202_v10 = vpop.permute.xlu0 %1201  ;;  %v1144_v9 = vpop.permute.xlu1 %1143  ;;  %2093 = vmatprep.subr.msk.bf16.mxu1 %vm228_vm0, %v1334_v7 }
 0x3ac   :  { %v1210_v14 = vsel %vm1207_vm1, %v1200_v11, %v1202_v10  ;;  %v1151_v17 = vsel %vm1147_vm11, %v1142_v47, %v1144_v9  ;;  %1375 = vmatpush1.bf16.msra.mxu1 %v1349_v53 }
 0x3ad   :  { %v1324_v49 = vpack.c.bf16 %v1151_v17, %v2754_v4  ;;  %v1329_v38 = vpack.c.bf16 %v1210_v14, %v1181_v46  ;;  %v1302_v17 = vld [vmem:[#allocation2 + $0x178] sm:$0xff] }
 0x3af   :  { %v1022_v18 = vpop.permute.xlu0 %1021  ;;  %v1050_v19 = vpop.permute.xlu1 %1049  ;;  %2094 = vmatmul.mubr.msk.bf16.vlgmr.msra.gmra.mrb[24].mxu1 %vm1344_vm2, %v2880_v51  ;;  %1411 = vmatprep.subr.bf16.mxu0 %v1324_v49  ;;  %v1284_v49 = vld [vmem:[#allocation2 + $0xe8] sm:$0xff] }
 0x3b0   :  { %v1027_v11 = vsel %vm1023_vm9, %v1020_v16, %v1022_v18  ;;  %1040 = vst.msk [vmem:[#allocation2 + $0x28] sm:$0xff] %vm730_vm4, %v1022_v18  ;;  %v1055_v21 = vsel %vm1051_vm10, %v1048_v22, %v1050_v19  ;;  %1068 = vst.msk [vmem:[#allocation2 + $0x58] sm:$0xff] %vm730_vm4, %v1050_v19  ;;  %1412 = vmatpush1.bf16.msra.mxu0 %v1323_v2  ;;  %1480 = vmatprep.mubr.bf16.mxu1 %v2409_v1 }
 0x3b1   :  { %v1313_v39 = vpack.c.bf16 %v1055_v21, %v1027_v11  ;;  %v1308_v21 = vld [vmem:[#allocation2 + $0x1a8] sm:$0xff] }
 0x3b3   :  { %v1107_v4 = vpop.permute.xlu0 %1106  ;;  %v1175_v24 = vpop.permute.xlu1 %1174 }
 0x3b4   :  { %v1114_v63 = vsel %vm1110_vm14, %v1105_v40, %v1107_v4  ;;  %v1182_v27 = vsel %vm1178_vm15, %v1173_v60, %v1175_v24 }
 0x3b7   :  { %v1078_v30 = vpop.permute.xlu0 %1077  ;;  %v1204_v31 = vpop.permute.xlu1 %1203  ;;  %v1260_v33 = vld [vmem:[#allocation2 + $0x28] sm:$0xff]  ;;  %v1266_v36 = vld [vmem:[#allocation2 + $0x58] sm:$0xff] }
 0x3b8   :  { %v1083_v16 = vsel %vm1079_vm12, %v1076_v34, %v1078_v30  ;;  %1096 = vst.msk [vmem:[#allocation2 + $0x88] sm:$0xff] %vm730_vm4, %v1078_v30  ;;  %v1211_v22 = vsel %vm1207_vm1, %v1202_v10, %v1204_v31  ;;  %v1314_v37 = vpack.c.bf16 %v1266_v36, %v1260_v33 }
 0x3b9   :  { %v1330_v41 = vpack.c.bf16 %v1211_v22, %v1182_v27  ;;  %v1319_v10 = vpack.c.bf16 %v1114_v63, %v1083_v16  ;;  %v1338_v27 = vpack.c.bf16 %v1308_v21, %v1308_v21 }
 0x3ba   :  { %1448 = vmatprep.subr.bf16.mxu1 %v1314_v37 }
 0x3bb   :  { %v1233_v42 = vpop.permute.xlu0 %1232  ;;  %1449 = vmatpush1.bf16.msra.mxu1 %v1313_v39  ;;  %v1109_v40 = vpop.permute.xlu1 %1108  ;;  %1413 = vmatprep.subr.bf16.mxu0 %v1330_v41 }
 0x3bc   :  { %v1115_v45 = vsel %vm1110_vm14, %v1107_v4, %v1109_v40  ;;  %1414 = vmatpush1.bf16.msra.mxu0 %v1329_v38 }
 0x3bd   :  { %1128 = vst.msk [vmem:[#allocation2 + $0xb8] sm:$0xff] %vm730_vm4, %v1115_v45 }
 0x3bf   :  { %v1177_v34 = vpop.permute.xlu0 %1176  ;;  %v1231_v32 = vpop.permute.xlu1 %1230  ;;  %v1272_v5 = vld [vmem:[#allocation2 + $0x88] sm:$0xff] }
 0x3c0   :  { %v1183_v47 = vsel %vm1178_vm15, %v1175_v24, %v1177_v34  ;;  %v1239_v48 = vsel %vm1236_vm13, %v1229_v61, %v1231_v32  ;;  %v1240_v55 = vsel %vm1236_vm13, %v1231_v32, %v1233_v42 }
 0x3c1   :  { %1194 = vst.msk [vmem:[#allocation2 + $0x140] sm:$0xff] %vm1193_vm3, %v1183_v47  ;;  %v1336_v56 = vpack.c.bf16 %v1240_v55, %v1240_v55  ;;  %v1335_v35 = vpack.c.bf16 %v1239_v48, %v1239_v48 }
 0x3c3   :  { %v1235_v58 = vpop.permute.xlu0 %1234  ;;  %v1146_v54 = vpop.permute.xlu1 %1145  ;;  %2095 = vmatprep.subr.msk.bf16.mxu0 %vm228_vm0, %v1336_v56  ;;  %v1355_v60 = vsel %vm228_vm0, %v1335_v35, 0 }
 0x3c4   :  { %v1241_v62 = vsel %vm1236_vm13, %v1233_v42, %v1235_v58  ;;  %v1152_v46 = vsel %vm1147_vm11, %v1144_v9, %v1146_v54  ;;  %1165 = vst.msk [vmem:[#allocation2 + $0x118] sm:$0xff] %vm1164_vm5, %v1146_v54  ;;  %v1278_v61 = vld [vmem:[#allocation2 + $0xb8] sm:$0xff]  ;;  %1416 = vmatpush1.bf16.msra.mxu0 %v1355_v60  ;;  %v1296_v9 = vld [vmem:[#allocation2 + $0x148] sm:$0xff] }
 0x3c5   :  { %1252 = vst.msk [vmem:[#allocation2 + $0x1a0] sm:$0xff] %vm1251_vm6, %v1241_v62  ;;  %v1320_v7 = vpack.c.bf16 %v1278_v61, %v1272_v5  ;;  %v1332_v19 = vpack.c.bf16 %v1302_v17, %v1296_v9  ;;  %v1325_v11 = vpack.c.bf16 %v1152_v46, %v2772_v12 }
 0x3c7   :  { %1450 = vmatprep.subr.bf16.mxu1 %v1320_v7  ;;  %v1206_v53 = vpop.permute.xlu1 %1205  ;;  %2096 = vmatmul.mubr.msk.bf16.vlgmr.msra.gmra.mrb[12].mxu0 %vm1344_vm2, %v2880_v51 }
 0x3c8   :  { %v1212_v14 = vsel %vm1207_vm1, %v1204_v31, %v1206_v53  ;;  %1451 = vmatpush1.bf16.msra.mxu1 %v1319_v10  ;;  %1601 = vmatprep.mubr.bf16.mxu0 %v2409_v1  ;;  %v1295_v24 = vld [vmem:[#allocation2 + $0x140] sm:$0xff] }
 0x3c9   :  { %1223 = vst.msk [vmem:[#allocation2 + $0x170] sm:$0xff] %vm1222_vm7, %v1212_v14 }
 0x3cb   :  { %v1290_v2 = vld [vmem:[#allocation2 + $0x118] sm:$0xff] }
 0x3cc   :  { %v1326_v18 = vpack.c.bf16 %v1290_v2, %v1284_v49  ;;  %v1307_v4 = vld [vmem:[#allocation2 + $0x1a0] sm:$0xff] }
 0x3cd   :  { %v1337_v31 = vpack.c.bf16 %v1307_v4, %v1307_v4  ;;  %v2215_v49 = vld [vmem:[%s3011_s10] sm:$0xff]  }
 0x3ce   :  { %1452 = vmatprep.subr.bf16.mxu1 %v1326_v18 }
 0x3cf   :  { %1453 = vmatpush1.bf16.msra.mxu1 %v1325_v11  ;;  %v1361_v33 = vsel %vm228_vm0, %v1337_v31, 0 }
 0x3d0   :  { %1454 = vmatprep.subr.bf16.mxu1 %v1332_v19  ;;  %v1301_v63 = vld [vmem:[#allocation2 + $0x170] sm:$0xff] }
 0x3d1   :  { %v1331_v30 = vpack.c.bf16 %v1301_v63, %v1295_v24 }
 0x3d3   :  { %1455 = vmatpush1.bf16.msra.mxu1 %v1331_v30 }
 0x3d4   :  { %2097 = vmatprep.subr.msk.bf16.mxu1 %vm228_vm0, %v1338_v27  ;;  %v1342_v27 = vpop.permute.xlu0 %1341 }
 0x3d7   :  { %1457 = vmatpush1.bf16.msra.mxu1 %v1361_v33 }
 0x3d8   :  { %v487_v36 = vpop.permute.xlu1 %486 }
 0x3d9   :  { %v539_v16 = vadd.f32 %v2634_v3, %v487_v36  ;;  %v537_v12 = vadd.f32 %v2632_v0, %v487_v36  ;;  %v582_v22 = vadd.f32 %v2638_v15, %v487_v36  ;;  %v580_v37 = vadd.f32 %v2636_v13, %v487_v36 }
 0x3da   :  { %2098 = vmatmul.mubr.msk.bf16.vlgmr.msra.gmra.mrb[28].mxu1 %vm1344_vm2, %v2880_v51  ;;  %v625_v39 = vadd.f32 %v2648_v28, %v487_v36  ;;  %v623_v41 = vadd.f32 %v2644_v25, %v487_v36 }
 0x3db   :  { %v2076_v38 = vmul.f32 -1.442695, %v539_v16  ;;  %v2075_v42 = vmul.f32 -1.442695, %v537_v12  ;;  %v2078_v40 = vmul.f32 -1.442695, %v582_v22 }
 0x3dc   :  { %v2077_v45 = vmul.f32 -1.442695, %v580_v37  ;;  %v2080_v34 = vmul.f32 -1.442695, %v625_v39  ;;  %v2079_v3 = vmul.f32 -1.442695, %v623_v41 }
 0x3dd   :  { %2313 = vpow2.f32 %v2076_v38 }
 0x3de   :  { %2315 = vpow2.f32 %v2075_v42 }
 0x3df   :  { %2317 = vpow2.f32 %v2078_v40 }
 0x3e0   :  { %2319 = vpow2.f32 %v2077_v45 }
 0x3e1   :  { %2321 = vpow2.f32 %v2080_v34 }
 0x3e2   :  { %2323 = vpow2.f32 %v2079_v3 }
 0x3e7   :  { %v2314_v0 = vpop.eup %2313 }
 0x3e8   :  { %v2316_v13 = vpop.eup %2315  ;;  %v670_v15 = vadd.f32 1.0, %v2314_v0 }
 0x3e9   :  { %v2318_v51 = vpop.eup %2317  ;;  %v669_v32 = vadd.f32 1.0, %v2316_v13 }
 0x3ea   :  { %v2320_v28 = vpop.eup %2319  ;;  %2325 = vrcp.f32 %v670_v15  ;;  %v672_v25 = vadd.f32 1.0, %v2318_v51 }
 0x3eb   :  { %v2322_v47 = vpop.eup %2321  ;;  %2327 = vrcp.f32 %v669_v32  ;;  %v671_v48 = vadd.f32 1.0, %v2320_v28 }
 0x3ec   :  { %v2324_v55 = vpop.eup %2323  ;;  %2329 = vrcp.f32 %v672_v25  ;;  %v674_v56 = vadd.f32 1.0, %v2322_v47 }
 0x3ed   :  { %2331 = vrcp.f32 %v671_v48  ;;  %v673_v35 = vadd.f32 1.0, %v2324_v55 }
 0x3ee   :  { %2333 = vrcp.f32 %v674_v56 }
 0x3ef   :  { %2335 = vrcp.f32 %v673_v35 }
 0x3f4   :  { %v2326_v58 = vpop.eup %2325 }
 0x3f5   :  { %v2328_v54 = vpop.eup %2327  ;;  %v706_v60 = vmul.f32 %v2326_v58, %v539_v16 }
 0x3f6   :  { %v2330_v62 = vpop.eup %2329  ;;  %v705_v46 = vmul.f32 %v2328_v54, %v537_v12  ;;  %v2216_v54 = vld [vmem:[%s3013_s9] sm:$0xff]  }
 0x3f7   :  { %v2332_v5 = vpop.eup %2331  ;;  %v712_v61 = vpack.c.bf16 %v706_v60, %v706_v60  ;;  %v708_v7 = vmul.f32 %v2330_v62, %v582_v22 }
 0x3f8   :  { %v2334_v10 = vpop.eup %2333  ;;  %v711_v53 = vpack.c.bf16 %v705_v46, %v705_v46  ;;  %v707_v14 = vmul.f32 %v2332_v5, %v580_v37 }
 0x3f9   :  { %2106 = vmatprep.subr.msk.bf16.mxu0 %vm228_vm0, %v712_v61  ;;  %v714_v17 = vpack.c.bf16 %v708_v7, %v708_v7  ;;  %v710_v18 = vmul.f32 %v2334_v10, %v625_v39  ;;  %v2336_v19 = vpop.eup %2335 }
 0x3fa   :  { %v1552_v9 = vsel %vm228_vm0, %v711_v53, 0  ;;  %v713_v2 = vpack.c.bf16 %v707_v14, %v707_v14  ;;  %v709_v4 = vmul.f32 %v2336_v19, %v623_v41 }
 0x3fb   :  { %1570 = vmatpush1.bf16.msra.mxu0 %v1552_v9  ;;  %v716_v21 = vpack.c.bf16 %v710_v18, %v710_v18 }
 0x3fc   :  { %2108 = vmatprep.subr.msk.bf16.mxu0 %vm228_vm0, %v714_v17  ;;  %v1558_v11 = vsel %vm228_vm0, %v713_v2, 0  ;;  %v715_v24 = vpack.c.bf16 %v709_v4, %v709_v4 }
 0x3fe   :  { %2107 = vmatmul.mubr.msk.bf16.vlgmr.msra.gmra.mrb[16].mxu0 %vm730_vm4, %v2215_v49  ;;  %v1564_v63 = vsel %vm228_vm0, %v715_v24, 0 }
 0x3ff   :  { %1613 = vmatpush1.bf16.msra.mxu0 %v1558_v11  ;;  %1644 = vmatprep.mubr.bf16.mxu0 %v2409_v1 }
 0x400   :  { %2110 = vmatprep.subr.msk.bf16.mxu0 %vm228_vm0, %v716_v21 }
 0x406   :  { %2109 = vmatmul.mubr.msk.bf16.vlgmr.msra.gmra.mrb[20].mxu0 %vm730_vm4, %v2215_v49 }
 0x407   :  { %1656 = vmatpush1.bf16.msra.mxu0 %v1564_v63  ;;  %1687 = vmatprep.mubr.bf16.mxu0 %v2409_v1 }
 0x40e   :  { %2111 = vmatmul.mubr.msk.bf16.vlgmr.msra.gmra.mrb[24].mxu0 %vm730_vm4, %v2215_v49 }
 0x40f   :  { %1756 = vmatprep.mubr.bf16.mxu0 %v2409_v1 }
 0x482   :  { %v1400_v30 = vpop.f32.mrb[24].mxu1 }
 0x483   :  { %v1401_v31 = vadd.f32 %v1400_v30, %v1342_v27  ;;  %v1402_v33 = vpop.f32.mrb[25].mxu1 }
 0x484   :  { %v1403_v36 = vadd.f32 %v1402_v33, %v1342_v27  ;;  %v1404_v16 = vpop.f32.mrb[26].mxu1 }
 0x485   :  { %v2099_v12 = vmul.f32 -1.442695, %v1401_v31  ;;  %v1405_v22 = vpop.f32.mrb[27].mxu1 }
 0x486   :  { %v2100_v37 = vmul.f32 -1.442695, %v1403_v36 }
 0x487   :  { %2337 = vpow2.f32 %v2099_v12 }
 0x488   :  { %2339 = vpow2.f32 %v2100_v37 }
 0x491   :  { %v2338_v39 = vpop.eup %2337 }
 0x492   :  { %v2340_v41 = vpop.eup %2339  ;;  %v1507_v38 = vadd.f32 1.0, %v2338_v39 }
 0x493   :  { %v1508_v42 = vadd.f32 1.0, %v2340_v41  ;;  %v2955_v41 = vpop.permute.xlu1 %1855 }
 0x494   :  { %2341 = vrcp.f32 %v1507_v38 }
 0x495   :  { %2343 = vrcp.f32 %v1508_v42 }
 0x49a   :  { %v1441_v40 = vpop.f32.mrb[12].mxu0 }
 0x49b   :  { %v1442_v45 = vadd.f32 %v1441_v40, %v1342_v27  ;;  %v1443_v34 = vpop.f32.mrb[13].mxu0  ;;  %v2958_v40 = vpop.permute.xlu0 %1860 }
 0x49c   :  { %v1444_v3 = vadd.f32 %v1443_v34, %v1342_v27  ;;  %v1445_v0 = vpop.f32.mrb[14].mxu0 }
 0x49d   :  { %v2101_v13 = vmul.f32 -1.442695, %v1442_v45  ;;  %v1446_v15 = vpop.f32.mrb[15].mxu0 }
 0x49e   :  { %v2342_v51 = vpop.eup %2341  ;;  %v2102_v32 = vmul.f32 -1.442695, %v1444_v3 }
 0x49f   :  { %v2344_v28 = vpop.eup %2343  ;;  %v1525_v25 = vmul.f32 %v2342_v51, %v1401_v31  ;;  %2345 = vpow2.f32 %v2101_v13 }
 0x4a0   :  { %v1526_v47 = vmul.f32 %v2344_v28, %v1403_v36  ;;  %2347 = vpow2.f32 %v2102_v32 }
 0x4a1   :  { %v1531_v48 = vadd.f32 %v1525_v25, %v2640_v20 }
 0x4a2   :  { %v1532_v55 = vadd.f32 %v1526_v47, %v2642_v23 }
 0x4a3   :  { %v1537_v56 = vpack.c.bf16 %v1531_v48, %v1531_v48 }
 0x4a4   :  { %v1538_v35 = vpack.c.bf16 %v1532_v55, %v1532_v55 }
 0x4a5   :  { %v1707_v58 = vsel %vm228_vm0, %v1537_v56, 0 }
 0x4a6   :  { %2113 = vmatprep.subr.msk.bf16.mxu0 %vm228_vm0, %v1538_v35 }
 0x4a7   :  { %1725 = vmatpush1.bf16.msra.mxu0 %v1707_v58 }
 0x4a9   :  { %v2346_v60 = vpop.eup %2345 }
 0x4aa   :  { %v2348_v62 = vpop.eup %2347  ;;  %v1509_v46 = vadd.f32 1.0, %v2346_v60  ;;  %2114 = vmatmul.mubr.msk.bf16.vlgmr.msra.gmra.mrb[16].mxu0 %vm730_vm4, %v2216_v54 }
 0x4ab   :  { %v1510_v5 = vadd.f32 1.0, %v2348_v62  ;;  %1799 = vmatprep.mubr.bf16.mxu0 %v2409_v1 }
 0x4ac   :  { %2349 = vrcp.f32 %v1509_v46 }
 0x4ad   :  { %2351 = vrcp.f32 %v1510_v5  ;;  %v1482_v20 = vpop.f32.mrb[28].mxu1 }
 0x4ae   :  { %v1483_v23 = vadd.f32 %v1482_v20, %v1342_v27  ;;  %v1484_v61 = vpop.f32.mrb[29].mxu1 }
 0x4af   :  { %v1485_v7 = vadd.f32 %v1484_v61, %v1342_v27  ;;  %v1486_v10 = vpop.f32.mrb[30].mxu1 }
 0x4b0   :  { %v2103_v53 = vmul.f32 -1.442695, %v1483_v23  ;;  %v1487_v14 = vpop.f32.mrb[31].mxu1 }
 0x4b1   :  { %v2104_v9 = vmul.f32 -1.442695, %v1485_v7 }
 0x4b2   :  { %2353 = vpow2.f32 %v2103_v53 }
 0x4b3   :  { %2355 = vpow2.f32 %v2104_v9 }
 0x4b6   :  { %v2350_v17 = vpop.eup %2349 }
 0x4b7   :  { %v2352_v49 = vpop.eup %2351  ;;  %v1527_v2 = vmul.f32 %v2350_v17, %v1442_v45 }
 0x4b8   :  { %v1528_v18 = vmul.f32 %v2352_v49, %v1444_v3 }
 0x4b9   :  { %v1533_v19 = vadd.f32 %v1527_v2, %v2659_v43 }
 0x4ba   :  { %v1534_v11 = vadd.f32 %v1528_v18, %v2661_v44 }
 0x4bb   :  { %v1539_v21 = vpack.c.bf16 %v1533_v19, %v1533_v19 }
 0x4bc   :  { %v2354_v4 = vpop.eup %2353  ;;  %v1540_v24 = vpack.c.bf16 %v1534_v11, %v1534_v11 }
 0x4bd   :  { %v2356_v63 = vpop.eup %2355  ;;  %v1511_v30 = vadd.f32 1.0, %v2354_v4  ;;  %v1713_v27 = vsel %vm228_vm0, %v1539_v21, 0 }
 0x4be   :  { %v1512_v31 = vadd.f32 1.0, %v2356_v63  ;;  %2115 = vmatprep.subr.msk.bf16.mxu0 %vm228_vm0, %v1540_v24 }
 0x4bf   :  { %2357 = vrcp.f32 %v1511_v30  ;;  %1768 = vmatpush1.bf16.msra.mxu0 %v1713_v27 }
 0x4c0   :  { %2359 = vrcp.f32 %v1512_v31 }
 0x4c2   :  { %2116 = vmatmul.mubr.msk.bf16.vlgmr.msra.gmra.mrb[20].mxu0 %vm730_vm4, %v2216_v54 }
 0x4c3   :  { %1842 = vmatprep.mubr.bf16.mxu0 %v2409_v1 }
 0x4c9   :  { %v2358_v43 = vpop.eup %2357 }
 0x4ca   :  { %v2360_v33 = vpop.eup %2359  ;;  %v1529_v44 = vmul.f32 %v2358_v43, %v1483_v23 }
 0x4cb   :  { %v1530_v36 = vmul.f32 %v2360_v33, %v1485_v7 }
 0x4cc   :  { %v1535_v16 = vadd.f32 %v1529_v44, %v2669_v50 }
 0x4cd   :  { %v1536_v12 = vadd.f32 %v1530_v36, %v2671_v52 }
 0x4ce   :  { %v1541_v22 = vpack.c.bf16 %v1535_v16, %v1535_v16 }
 0x4cf   :  { %v1542_v37 = vpack.c.bf16 %v1536_v12, %v1536_v12 }
 0x4d0   :  { %v1719_v39 = vsel %vm228_vm0, %v1541_v22, 0 }
 0x4d1   :  { %2117 = vmatprep.subr.msk.bf16.mxu0 %vm228_vm0, %v1542_v37 }
 0x4d2   :  { %1811 = vmatpush1.bf16.msra.mxu0 %v1719_v39 }
 0x4d5   :  { %2118 = vmatmul.mubr.msk.bf16.vlgmr.msra.gmra.mrb[24].mxu0 %vm730_vm4, %v2216_v54  ;;  %vm2009_vm4 = vcmask 64516  }
 0x4d6   :  { %vm2010_vm8 = vmor %vm2009_vm4, %vm228_vm0 }
 0x57d   :  { %v1758_v1 = vpop.f32.mrb[16].mxu0 }
 0x57e   :  { %v1863_v38 = vadd.f32 %v2955_v41, %v1758_v1  ;;  %v1760_v42 = vpop.f32.mrb[17].mxu0 }
 0x57f   :  { %v1864_v50 = vadd.f32 %v2955_v41, %v1760_v42  ;;  %v1762_v52 = vpop.f32.mrb[18].mxu0 }
 0x580   :  { %v2119_v45 = vmul.f32 -1.442695, %v1863_v38  ;;  %v1869_v34 = vadd.f32 %v2958_v40, %v1762_v52  ;;  %v1764_v3 = vpop.f32.mrb[19].mxu0 }
 0x581   :  { %v2120_v0 = vmul.f32 -1.442695, %v1864_v50  ;;  %v1870_v13 = vadd.f32 %v2958_v40, %v1764_v3 }
 0x582   :  { %2361 = vpow2.f32 %v2119_v45  ;;  %v2125_v15 = vmul.f32 -1.442695, %v1869_v34 }
 0x583   :  { %2363 = vpow2.f32 %v2120_v0  ;;  %v2126_v51 = vmul.f32 -1.442695, %v1870_v13 }
 0x584   :  { %2365 = vpow2.f32 %v2125_v15 }
 0x585   :  { %2367 = vpow2.f32 %v2126_v51 }
 0x58c   :  { %v2362_v32 = vpop.eup %2361 }
 0x58d   :  { %v2364_v28 = vpop.eup %2363  ;;  %v1911_v25 = vadd.f32 1.0, %v2362_v32 }
 0x58e   :  { %v2366_v47 = vpop.eup %2365  ;;  %v1912_v48 = vadd.f32 1.0, %v2364_v28 }
 0x58f   :  { %v2368_v55 = vpop.eup %2367  ;;  %2369 = vrcp.f32 %v1911_v25  ;;  %v1917_v56 = vadd.f32 1.0, %v2366_v47 }
 0x590   :  { %2371 = vrcp.f32 %v1912_v48  ;;  %v1918_v35 = vadd.f32 1.0, %v2368_v55 }
 0x591   :  { %2373 = vrcp.f32 %v1917_v56 }
 0x592   :  { %2375 = vrcp.f32 %v1918_v35 }
 0x595   :  { %v1801_v58 = vpop.f32.mrb[20].mxu0 }
 0x596   :  { %v1865_v54 = vadd.f32 %v2955_v41, %v1801_v58  ;;  %v1803_v60 = vpop.f32.mrb[21].mxu0 }
 0x597   :  { %v1866_v62 = vadd.f32 %v2955_v41, %v1803_v60  ;;  %v1805_v46 = vpop.f32.mrb[22].mxu0 }
 0x598   :  { %v2121_v5 = vmul.f32 -1.442695, %v1865_v54  ;;  %v1871_v20 = vadd.f32 %v2958_v40, %v1805_v46  ;;  %v1807_v23 = vpop.f32.mrb[23].mxu0 }
 0x599   :  { %v2370_v61 = vpop.eup %2369  ;;  %v2122_v7 = vmul.f32 -1.442695, %v1866_v62  ;;  %v1872_v10 = vadd.f32 %v2958_v40, %v1807_v23 }
 0x59a   :  { %v2372_v53 = vpop.eup %2371  ;;  %v1947_v14 = vmul.f32 %v2370_v61, %v1863_v38  ;;  %2377 = vpow2.f32 %v2121_v5  ;;  %v2127_v9 = vmul.f32 -1.442695, %v1871_v20 }
 0x59b   :  { %v2374_v17 = vpop.eup %2373  ;;  %v1948_v49 = vmul.f32 %v2372_v53, %v1864_v50  ;;  %2379 = vpow2.f32 %v2122_v7  ;;  %v2128_v2 = vmul.f32 -1.442695, %v1872_v10 }
 0x59c   :  { %v2376_v18 = vpop.eup %2375  ;;  %v1959_v19 = vmul.f32 %v1947_v14, %v2708_v26  ;;  %v1953_v11 = vmul.f32 %v2374_v17, %v1869_v34  ;;  %2381 = vpow2.f32 %v2127_v9 }
 0x59d   :  { %v1960_v21 = vmul.f32 %v1948_v49, %v2711_v29  ;;  %v1954_v4 = vmul.f32 %v2376_v18, %v1870_v13  ;;  %2383 = vpow2.f32 %v2128_v2 }
 0x59e   :  { %v1965_v24 = vmul.f32 %v1953_v11, %v2708_v26 }
 0x59f   :  { %v2137_v63 = vpack.c.bf16 %v1960_v21, %v1959_v19  ;;  %v1966_v30 = vmul.f32 %v1954_v4, %v2711_v29 }
 0x5a1   :  { %2007 = vst [vmem:[%s3014_s12] sm:$0xff] %v2137_v63  ;;  %v2140_v27 = vpack.c.bf16 %v1966_v30, %v1965_v24 }
 0x5a3   :  { %2012 = vst [vmem:[%s3014_s12 + $0x18] sm:$0xff] %v2140_v27 }
 0x5a4   :  { %v2378_v31 = vpop.eup %2377 }
 0x5a5   :  { %v2380_v43 = vpop.eup %2379  ;;  %v1913_v33 = vadd.f32 1.0, %v2378_v31 }
 0x5a6   :  { %v2382_v44 = vpop.eup %2381  ;;  %v1914_v36 = vadd.f32 1.0, %v2380_v43 }
 0x5a7   :  { %v2384_v16 = vpop.eup %2383  ;;  %2385 = vrcp.f32 %v1913_v33  ;;  %v1919_v26 = vadd.f32 1.0, %v2382_v44 }
 0x5a8   :  { %2387 = vrcp.f32 %v1914_v36  ;;  %v1920_v12 = vadd.f32 1.0, %v2384_v16  ;;  %v1844_v29 = vpop.f32.mrb[24].mxu0 }
 0x5a9   :  { %2389 = vrcp.f32 %v1919_v26  ;;  %v1867_v22 = vadd.f32 %v2955_v41, %v1844_v29  ;;  %v1846_v37 = vpop.f32.mrb[25].mxu0 }
 0x5aa   :  { %2391 = vrcp.f32 %v1920_v12  ;;  %v1868_v39 = vadd.f32 %v2955_v41, %v1846_v37  ;;  %v1848_v1 = vpop.f32.mrb[26].mxu0 }
 0x5ab   :  { %v2123_v38 = vmul.f32 -1.442695, %v1867_v22  ;;  %v1873_v42 = vadd.f32 %v2958_v40, %v1848_v1  ;;  %v1850_v50 = vpop.f32.mrb[27].mxu0 }
 0x5ac   :  { %v2124_v52 = vmul.f32 -1.442695, %v1868_v39  ;;  %v1874_v45 = vadd.f32 %v2958_v40, %v1850_v50 }
 0x5ad   :  { %2393 = vpow2.f32 %v2123_v38  ;;  %v2129_v34 = vmul.f32 -1.442695, %v1873_v42 }
 0x5ae   :  { %2395 = vpow2.f32 %v2124_v52  ;;  %v2130_v3 = vmul.f32 -1.442695, %v1874_v45 }
 0x5af   :  { %2397 = vpow2.f32 %v2129_v34 }
 0x5b0   :  { %2399 = vpow2.f32 %v2130_v3 }
 0x5b1   :  { %v2386_v0 = vpop.eup %2385 }
 0x5b2   :  { %v2388_v13 = vpop.eup %2387  ;;  %v1949_v15 = vmul.f32 %v2386_v0, %v1865_v54 }
 0x5b3   :  { %v2390_v51 = vpop.eup %2389  ;;  %v1950_v32 = vmul.f32 %v2388_v13, %v1866_v62 }
 0x5b4   :  { %v2392_v41 = vpop.eup %2391  ;;  %v1961_v28 = vmul.f32 %v1949_v15, %v2738_v59  ;;  %v1955_v25 = vmul.f32 %v2390_v51, %v1871_v20 }
 0x5b5   :  { %v1962_v47 = vmul.f32 %v1950_v32, %v2741_v57  ;;  %v1956_v48 = vmul.f32 %v2392_v41, %v1872_v10 }
 0x5b6   :  { %v1967_v40 = vmul.f32 %v1955_v25, %v2738_v59 }
 0x5b7   :  { %v2394_v55 = vpop.eup %2393  ;;  %v2138_v56 = vpack.c.bf16 %v1962_v47, %v1961_v28  ;;  %v1968_v35 = vmul.f32 %v1956_v48, %v2741_v57 }
 0x5b8   :  { %v2396_v58 = vpop.eup %2395  ;;  %v1915_v60 = vadd.f32 1.0, %v2394_v55 }
 0x5b9   :  { %v2398_v46 = vpop.eup %2397  ;;  %2008 = vst [vmem:[%s3014_s12 + $0x8] sm:$0xff] %v2138_v56  ;;  %v2141_v54 = vpack.c.bf16 %v1968_v35, %v1967_v40  ;;  %v1916_v62 = vadd.f32 1.0, %v2396_v58 }
 0x5ba   :  { %v2400_v5 = vpop.eup %2399  ;;  %2401 = vrcp.f32 %v1915_v60  ;;  %v1921_v20 = vadd.f32 1.0, %v2398_v46 }
 0x5bb   :  { %2013 = vst [vmem:[%s3014_s12 + $0x20] sm:$0xff] %v2141_v54  ;;  %2403 = vrcp.f32 %v1916_v62  ;;  %v1922_v59 = vadd.f32 1.0, %v2400_v5 }
 0x5bc   :  { %2405 = vrcp.f32 %v1921_v20 }
 0x5bd   :  { %2407 = vrcp.f32 %v1922_v59 }
 0x5c4   :  { %v2402_v57 = vpop.eup %2401 }
 0x5c5   :  { %v2404_v23 = vpop.eup %2403  ;;  %v1951_v61 = vmul.f32 %v2402_v57, %v1867_v22 }
 0x5c6   :  { %v2406_v7 = vpop.eup %2405  ;;  %v1952_v10 = vmul.f32 %v2404_v23, %v1868_v39 }
 0x5c7   :  { %v2408_v53 = vpop.eup %2407  ;;  %v1963_v14 = vmul.f32 %v1951_v61, %v2762_v6  ;;  %v1957_v9 = vmul.f32 %v2406_v7, %v1873_v42 }
 0x5c8   :  { %v1964_v17 = vmul.f32 %v1952_v10, %v2765_v8  ;;  %v1958_v49 = vmul.f32 %v2408_v53, %v1874_v45 }
 0x5c9   :  { %v1969_v2 = vmul.f32 %v1957_v9, %v2762_v6 }
 0x5ca   :  { %v2139_v18 = vpack.c.bf16 %v1964_v17, %v1963_v14  ;;  %v1970_v19 = vmul.f32 %v1958_v49, %v2765_v8 }
 0x5cc   :  { %2011 = vst.msk [vmem:[%s3014_s12 + $0x10] sm:$0xff] %vm2010_vm8, %v2139_v18  ;;  %v2142_v11 = vpack.c.bf16 %v1970_v19, %v1969_v2 }
 0x5ce   :  { %2014 = vst.msk [vmem:[%s3014_s12 + $0x28] sm:$0xff] %vm2010_vm8, %v2142_v11 }

// kernel: cspdarknet_forward.7
= control target key start
LH: loop header
LB: loop body
LE: loop exit
PB: predicated region body
PF: predicated region fallthrough
CT: control target
= control target key end

     0   :  { %v1492_v1 = vmov 0   ;;  %vm179_vm0 = vcmask 138240   ;;  %vm186_vm1 = vcmask 1040384   ;;  %vm358_vm2 = vcmask 261120   ;;  %s1495_s24 = smov 10   ;;  %s1496_s25 = smov 9   ;;  %s1883_s0 = inlined_call_operand.vmem [shape: bf16[145,200], index: 0, kind: input, shape index: {}]   ;;  %s1884_s2 = inlined_call_operand.vmem [shape: bf16[32,145], index: 2, kind: input, shape index: {}]   ;;  %s1885_s3 = inlined_call_operand.vmem [shape: bf16[32,32], index: 3, kind: input, shape index: {}]   ;;  %s1886_s4 = inlined_call_operand.vmem [shape: f32[32,1], index: 4, kind: input, shape index: {}, may-alias: {4,11}]   ;;  %s1887_s5 = inlined_call_operand.vmem [shape: bf16[1,16,16], index: 5, kind: input, shape index: {}]   ;;  %s1888_s6 = inlined_call_operand.vmem [shape: f32[1,16,1], index: 6, kind: input, shape index: {}, may-alias: {6,8}]   ;;  %s1889_s1 = inlined_call_operand.vmem [shape: f32[1,200], index: 1, kind: input, shape index: {}]   ;;  %s1890_s7 = inlined_call_operand.vmem [shape: bf16[1,16,144], index: 7, kind: input, shape index: {}]   ;;  %s1891_s8 = inlined_call_operand.vmem [shape: f32[1,16,1], index: 8, kind: input, shape index: {}, may-alias: {6,8}]   ;;  %s1892_s11 = inlined_call_operand.vmem [shape: f32[32,1], index: 11, kind: input, shape index: {}, may-alias: {4,11}]   ;;  %s1893_s10 = inlined_call_operand.vmem [shape: bf16[32,16], index: 10, kind: input, shape index: {}]   ;;  %s1894_s9 = inlined_call_operand.vmem [shape: bf16[32,16], index: 9, kind: input, shape index: {}]   ;;  %s1895_s12 = inlined_call_operand.vmem [shape: bf16[32,200], index: 12, kind: output, shape index: {}]  }
   0x1   :  { %v1319_v0 = vld [vmem:[%s1883_s0 + $0x4] ss:$8 sps:$4 sm:$0xff]   ;;  %397 = vmatprep.mubr.bf16.mxu1 %v1492_v1  ;;  %1317 = vset.pattern.permute.xlu0 %v1492_v1  ;;  %v1321_v2 = vld [vmem:[%s1883_s0] ss:$8 sps:$4 sm:$0xff]   ;;  %v1322_v3 = vld [vmem:[%s1883_s0 + $0x14] ss:$8 sps:$4 sm:$0xff]  }
   0x2   :  { %1318 = vset.pattern.permute.xlu1 %v1492_v1  ;;  %195 = vmatprep.subr.bf16.mxu0 %v1319_v0  ;;  %v1324_v4 = vld [vmem:[%s1883_s0 + $0x10] ss:$8 sps:$4 sm:$0xff]   ;;  %v1325_v5 = vld [vmem:[%s1883_s0 + $0x24] ss:$8 sps:$4 sm:$0xff]   ;;  %v1327_v6 = vld [vmem:[%s1883_s0 + $0x20] ss:$8 sps:$4 sm:$0xff]  }
   0x3   :  { %196 = vmatpush1.bf16.msra.mxu0 %v1321_v2  ;;  %v1328_v7 = vld [vmem:[%s1883_s0 + $0x34] ss:$8 sps:$4 sm:$0xff]   ;;  %v1330_v8 = vld [vmem:[%s1883_s0 + $0x30] ss:$8 sps:$4 sm:$0xff]   ;;  %v1331_v9 = vld [vmem:[%s1883_s0 + $0x44] ss:$8 sps:$4 sm:$0xff]  }
   0x4   :  { %197 = vmatprep.subr.bf16.mxu0 %v1322_v3  ;;  %v1350_v10 = vld [vmem:[%s1884_s2 + $0x4] ss:$8 sps:$4 sm:$0xff]   ;;  %v1333_v11 = vld [vmem:[%s1883_s0 + $0x40] ss:$8 sps:$4 sm:$0xff]   ;;  %v1334_v12 = vld [vmem:[%s1883_s0 + $0x54] ss:$8 sps:$4 sm:$0xff]  }
   0x5   :  { %1238 = vmatprep.mubr.msk.bf16.mxu0 %vm179_vm0, %v1350_v10  ;;  %v1336_v13 = vld [vmem:[%s1883_s0 + $0x50] ss:$8 sps:$4 sm:$0xff]   ;;  %v1337_v14 = vld [vmem:[%s1883_s0 + $0x64] ss:$8 sps:$4 sm:$0xff]   ;;  %v1339_v15 = vld [vmem:[%s1883_s0 + $0x60] ss:$8 sps:$4 sm:$0xff]  }
   0x6   :  { %v1340_v16 = vld [vmem:[%s1883_s0 + $0x74] ss:$8 sps:$4 sm:$0xff]   ;;  %v1342_v18 = vld [vmem:[%s1883_s0 + $0x70] ss:$8 sps:$4 sm:$0xff]   ;;  %v1343_v19 = vld [vmem:[%s1883_s0 + $0x84] ss:$8 sps:$4 sm:$0xff]  }
   0x7   :  { %198 = vmatpush1.bf16.msra.mxu0 %v1324_v4  ;;  %v65_v17 = vld [vmem:[%s1883_s0 + $0x90] sm:$0x11]  ;;  %v188_v21 = vsel %vm186_vm1, 65535, %v1492_v1  ;;  %v1345_v22 = vld [vmem:[%s1883_s0 + $0x80] ss:$8 sps:$4 sm:$0xff]   ;;  %vm497_vm3 = vcmask 130048  }
   0x8   :  { %199 = vmatprep.subr.bf16.mxu0 %v1325_v5  ;;  %v1237_v20 = vcombine.high %v65_v17, %v65_v17  ;;  %v1236_v23 = vcombine.low %v65_v17, %v65_v17  ;;  %v1348_v26 = vld [vmem:[%s1884_s2] ss:$8 sps:$4 sm:$0xff]   ;;  %v1351_v27 = vld [vmem:[%s1884_s2 + $0x14] ss:$8 sps:$4 sm:$0xff]   ;;  %v1353_v28 = vld [vmem:[%s1884_s2 + $0x10] ss:$8 sps:$4 sm:$0xff]  }
   0x9   :  { %v312_v29 = vld [vmem:[%s1886_s4] sm:$0xff]  ;;  %v313_v30 = vld [vmem:[%s1886_s4 + $0x8] sm:$0xff]  ;;  %vm588_vm4 = vcmask 588800   ;;  %s1497_s26 = smov 1   ;;  %s1498_s27 = smov 127   ;;  %vm643_vm5 = vcmask 1047640  }
   0xa   :  { %v193_v24 = vand.u32 %v1237_v20, %v188_v21  ;;  %v190_v25 = vand.u32 %v1236_v23, %v188_v21  ;;  %330 = vperm.xlu0 %1317, %v312_v29   ;;  %v1354_v20 = vld [vmem:[%s1885_s3] sm:$0xff]   ;;  %v1355_v21 = vld [vmem:[%s1885_s3 + $0x8] sm:$0xff]   ;;  %s1499_s28 = smov 119   ;;  %s1500_s29 = smov 118   ;;  %vm636_vm6 = vcmask 89088   ;;  %vm663_vm7 = vcmask 1047632  }
   0xb   :  { %200 = vmatpush1.bf16.msra.mxu0 %v1327_v6  ;;  %v479_v23 = vld [vmem:[%s1888_s6 + $0x8] sm:$0xff]  ;;  %s1501_s0 = smov 117   ;;  %vm656_vm8 = vcmask 80896   ;;  %vm683_vm9 = vcmask 1047624   ;;  %vm676_vm10 = vcmask 72704   ;;  %vm703_vm11 = vcmask 1047560  }
   0xc   :  { %201 = vmatprep.subr.bf16.mxu0 %v1328_v7  ;;  %vm696_vm12 = vcmask 7168   ;;  %vm720_vm13 = vcmask 1039360   ;;  %vm728_vm14 = vcmask 580608   ;;  %vm740_vm15 = vcmask 973824  }
   0xd   :  { %vm760_vm1 = vcmask 965632  }
   0xe   :  { %335 = vperm.xlu0 %1317, %v313_v30  }
   0xf   :  { %202 = vmatpush1.bf16.msra.mxu0 %v1330_v8 }
  0x10   :  { %203 = vmatprep.subr.bf16.mxu0 %v1331_v9 }
  0x13   :  { %204 = vmatpush1.bf16.msra.mxu0 %v1333_v11 }
  0x14   :  { %205 = vmatprep.subr.bf16.mxu0 %v1334_v12 }
  0x17   :  { %206 = vmatpush1.bf16.msra.mxu0 %v1336_v13 }
  0x18   :  { %207 = vmatprep.subr.bf16.mxu0 %v1337_v14 }
  0x1b   :  { %208 = vmatpush1.bf16.msra.mxu0 %v1339_v15 }
  0x1c   :  { %209 = vmatprep.subr.bf16.mxu0 %v1340_v16 }
  0x1f   :  { %210 = vmatpush1.bf16.msra.mxu0 %v1342_v18 }
  0x20   :  { %211 = vmatprep.subr.bf16.mxu0 %v1343_v19 }
  0x23   :  { %212 = vmatpush1.bf16.msra.mxu0 %v1345_v22  ;;  %v478_v22 = vld [vmem:[%s1888_s6] sm:$0xff] }
  0x24   :  { %213 = vmatprep.subr.bf16.mxu0 %v193_v24  ;;  %484 = vperm.xlu1 %1318, %v478_v22  }
  0x27   :  { %214 = vmatpush1.bf16.msra.mxu0 %v190_v25 }
  0x28   :  { %489 = vperm.xlu1 %1318, %v479_v23  }
  0x2a   :  { %228 = vmatmul.mubr.bf16.vlgmr.msra.gmra.mrb[0].mxu0 %v1348_v26 }
  0x2b   :  { %1239 = vmatprep.mubr.msk.bf16.mxu0 %vm179_vm0, %v1351_v27  ;;  %vm748_vm0 = vcmask 515072  }
  0x32   :  { %238 = vmatmul.mubr.bf16.gmra.mrb[4].mxu0 %v1353_v28 }
  0x33   :  { %997 = vmatprep.mubr.bf16.mxu0 %v1492_v1 }
  0x89   :  { %v331_v24 = vpop.permute.xlu0 %330 }
  0x8d   :  { %v336_v28 = vpop.permute.xlu0 %335 }
  0xfd   :  { %v229_v31 = vpop.f32.mrb[0].mxu0 }
  0xfe   :  { %v1240_v32 = vmul.f32 -1.442695, %v229_v31  ;;  %v231_v33 = vpop.f32.mrb[1].mxu0 }
  0xff   :  { %v1241_v34 = vmul.f32 -1.442695, %v231_v33  ;;  %v233_v35 = vpop.f32.mrb[2].mxu0 }
 0x100   :  { %1364 = vpow2.f32 %v1240_v32  ;;  %v1242_v36 = vmul.f32 -1.442695, %v233_v35  ;;  %v235_v37 = vpop.f32.mrb[3].mxu0 }
 0x101   :  { %1366 = vpow2.f32 %v1241_v34  ;;  %v1243_v38 = vmul.f32 -1.442695, %v235_v37 }
 0x102   :  { %1368 = vpow2.f32 %v1242_v36 }
 0x103   :  { %1370 = vpow2.f32 %v1243_v38 }
 0x105   :  { %v239_v39 = vpop.f32.mrb[4].mxu0 }
 0x106   :  { %v1244_v40 = vmul.f32 -1.442695, %v239_v39  ;;  %v241_v41 = vpop.f32.mrb[5].mxu0 }
 0x107   :  { %v1245_v42 = vmul.f32 -1.442695, %v241_v41  ;;  %v243_v43 = vpop.f32.mrb[6].mxu0 }
 0x108   :  { %1372 = vpow2.f32 %v1244_v40  ;;  %v1246_v44 = vmul.f32 -1.442695, %v243_v43  ;;  %v245_v45 = vpop.f32.mrb[7].mxu0 }
 0x109   :  { %1374 = vpow2.f32 %v1245_v42  ;;  %v1247_v46 = vmul.f32 -1.442695, %v245_v45 }
 0x10a   :  { %v1365_v47 = vpop.eup %1364  ;;  %1376 = vpow2.f32 %v1246_v44 }
 0x10b   :  { %v1367_v48 = vpop.eup %1366  ;;  %v272_v49 = vadd.f32 1.0, %v1365_v47  ;;  %1378 = vpow2.f32 %v1247_v46 }
 0x10c   :  { %v1369_v50 = vpop.eup %1368  ;;  %v273_v51 = vadd.f32 1.0, %v1367_v48 }
 0x10d   :  { %v1371_v52 = vpop.eup %1370  ;;  %1380 = vrcp.f32 %v272_v49  ;;  %v274_v53 = vadd.f32 1.0, %v1369_v50 }
 0x10e   :  { %1382 = vrcp.f32 %v273_v51  ;;  %v275_v54 = vadd.f32 1.0, %v1371_v52 }
 0x10f   :  { %1384 = vrcp.f32 %v274_v53 }
 0x110   :  { %1386 = vrcp.f32 %v275_v54 }
 0x112   :  { %v1373_v55 = vpop.eup %1372 }
 0x113   :  { %v1375_v56 = vpop.eup %1374  ;;  %v276_v57 = vadd.f32 1.0, %v1373_v55 }
 0x114   :  { %v1377_v58 = vpop.eup %1376  ;;  %v277_v59 = vadd.f32 1.0, %v1375_v56  ;;  %v1356_v56 = vld [vmem:[%s1887_s5] sm:$0xff]  }
 0x115   :  { %v1379_v60 = vpop.eup %1378  ;;  %1388 = vrcp.f32 %v276_v57  ;;  %v278_v61 = vadd.f32 1.0, %v1377_v58 }
 0x116   :  { %1390 = vrcp.f32 %v277_v59  ;;  %v279_v62 = vadd.f32 1.0, %v1379_v60 }
 0x117   :  { %v1381_v63 = vpop.eup %1380  ;;  %1392 = vrcp.f32 %v278_v61  ;;  %v1493_v61 = vmov 0.0  }
 0x118   :  { %v1383_v0 = vpop.eup %1382  ;;  %1394 = vrcp.f32 %v279_v62  ;;  %v296_v4 = vmul.f32 %v1381_v63, %v229_v31  ;;  %587 = vst [vmem:[#allocation2] sm:$0xff] %v1493_v61  ;;  %590 = vst [vmem:[#allocation2 + $0x10] sm:$0xff] %v1493_v61  ;;  %v485_v62 = vpop.permute.xlu1 %484 }
 0x119   :  { %v1385_v2 = vpop.eup %1384  ;;  %v297_v6 = vmul.f32 %v1383_v0, %v231_v33  ;;  %592 = vst [vmem:[#allocation2 + $0x20] sm:$0xff] %v1493_v61  ;;  %594 = vst [vmem:[#allocation2 + $0x30] sm:$0xff] %v1493_v61 }
 0x11a   :  { %v1387_v3 = vpop.eup %1386  ;;  %v298_v5 = vmul.f32 %v1385_v2, %v233_v35  ;;  %596 = vst [vmem:[#allocation2 + $0x40] sm:$0xff] %v1493_v61  ;;  %598 = vst [vmem:[#allocation2 + $0x50] sm:$0xff] %v1493_v61 }
 0x11b   :  { %v299_v7 = vmul.f32 %v1387_v3, %v235_v37  ;;  %600 = vst [vmem:[#allocation2 + $0x60] sm:$0xff] %v1493_v61  ;;  %602 = vst [vmem:[#allocation2 + $0x70] sm:$0xff] %v1493_v61 }
 0x11c   :  { %v304_v8 = vpack.c.bf16 %v298_v5, %v296_v4  ;;  %589 = vst.msk [vmem:[#allocation2 + $0x8] sm:$0xff] %vm588_vm4, %v1493_v61  ;;  %591 = vst.msk [vmem:[#allocation2 + $0x18] sm:$0xff] %vm588_vm4, %v1493_v61  ;;  %v490_v0 = vpop.permute.xlu1 %489 }
 0x11d   :  { %v305_v9 = vpack.c.bf16 %v299_v7, %v297_v6  ;;  %593 = vst.msk [vmem:[#allocation2 + $0x28] sm:$0xff] %vm588_vm4, %v1493_v61  ;;  %595 = vst.msk [vmem:[#allocation2 + $0x38] sm:$0xff] %vm588_vm4, %v1493_v61 }
 0x11e   :  { %597 = vst.msk [vmem:[#allocation2 + $0x48] sm:$0xff] %vm588_vm4, %v1493_v61  ;;  %599 = vst.msk [vmem:[#allocation2 + $0x58] sm:$0xff] %vm588_vm4, %v1493_v61 }
 0x11f   :  { %v1389_v10 = vpop.eup %1388  ;;  %365 = vmatprep.subr.bf16.mxu1 %v305_v9  ;;  %601 = vst.msk [vmem:[#allocation2 + $0x68] sm:$0xff] %vm588_vm4, %v1493_v61  ;;  %603 = vst.msk [vmem:[#allocation2 + $0x78] sm:$0xff] %vm588_vm4, %v1493_v61 }
 0x120   :  { %v1391_v11 = vpop.eup %1390  ;;  %366 = vmatpush1.bf16.msra.mxu1 %v304_v8  ;;  %v300_v14 = vmul.f32 %v1389_v10, %v239_v39  ;;  %605 = vst.msk [vmem:[#allocation2 + $0x88] sm:$0xff] %vm588_vm4, %v1493_v61  ;;  %607 = vst.msk [vmem:[#allocation2 + $0x98] sm:$0xff] %vm588_vm4, %v1493_v61 }
 0x121   :  { %v1393_v12 = vpop.eup %1392  ;;  %v301_v16 = vmul.f32 %v1391_v11, %v241_v41  ;;  %609 = vst.msk [vmem:[#allocation2 + $0xa8] sm:$0xff] %vm588_vm4, %v1493_v61  ;;  %611 = vst.msk [vmem:[#allocation2 + $0xb8] sm:$0xff] %vm588_vm4, %v1493_v61 }
 0x122   :  { %v1395_v13 = vpop.eup %1394  ;;  %v302_v15 = vmul.f32 %v1393_v12, %v243_v43  ;;  %613 = vst.msk [vmem:[#allocation2 + $0xc8] sm:$0xff] %vm588_vm4, %v1493_v61  ;;  %615 = vst.msk [vmem:[#allocation2 + $0xd8] sm:$0xff] %vm588_vm4, %v1493_v61 }
 0x123   :  { %v303_v17 = vmul.f32 %v1395_v13, %v245_v45  ;;  %617 = vst.msk [vmem:[#allocation2 + $0xe8] sm:$0xff] %vm588_vm4, %v1493_v61  ;;  %619 = vst.msk [vmem:[#allocation2 + $0xf8] sm:$0xff] %vm588_vm4, %v1493_v61 }
 0x124   :  { %v306_v18 = vpack.c.bf16 %v302_v15, %v300_v14  ;;  %621 = vst.msk [vmem:[#allocation2 + $0x108] sm:$0xff] %vm588_vm4, %v1493_v61  ;;  %623 = vst.msk [vmem:[#allocation2 + $0x118] sm:$0xff] %vm588_vm4, %v1493_v61  ;;  %v573_v14 = vlaneseq }
 0x125   :  { %v307_v19 = vpack.c.bf16 %v303_v17, %v301_v16 }
 0x127   :  { %367 = vmatprep.subr.bf16.mxu1 %v307_v19 }
 0x128   :  { %368 = vmatpush1.bf16.msra.mxu1 %v306_v18 }
 0x12b   :  { %1250 = vmatmul.mubr.msk.bf16.vlgmr.msra.gmra.mrb[0].mxu1 %vm358_vm2, %v1354_v20 }
 0x12c   :  { %407 = vmatprep.mubr.bf16.mxu1 %v1492_v1 }
 0x133   :  { %1251 = vmatmul.mubr.msk.bf16.gmra.mrb[4].mxu1 %vm358_vm2, %v1355_v21  ;;  %v574_v21 = vshrl.u32 %v573_v14, 7  ;;  %vm768_vm2 = vcmask 506880  }
 0x134   :  { %533 = vmatprep.mubr.bf16.mxu1 %v1492_v1 }
 0x135   :  { %v575_v23 = vsub.s32 0, %v574_v21 }
 0x1fe   :  { %v399_v25 = vpop.f32.mrb[0].mxu1 }
 0x1ff   :  { %v400_v26 = vadd.f32 %v399_v25, %v331_v24  ;;  %v401_v27 = vpop.f32.mrb[1].mxu1  ;;  %v579_v25 = vsub.s32 1, %v574_v21 }
 0x200   :  { %v402_v29 = vadd.f32 %v401_v27, %v331_v24  ;;  %v403_v30 = vpop.f32.mrb[2].mxu1  ;;  %v42_v24 = vld [vmem:[%s1889_s1] sm:$0x3]  ;;  %s1494_s1 = smov 11  }
 0x201   :  { %v1252_v31 = vmul.f32 -1.442695, %v400_v26  ;;  %v404_v32 = vadd.f32 %v403_v30, %v336_v28  ;;  %v405_v33 = vpop.f32.mrb[3].mxu1 }
 0x202   :  { %v1253_v34 = vmul.f32 -1.442695, %v402_v29  ;;  %v406_v35 = vadd.f32 %v405_v33, %v336_v28  ;;  %v1710_v28 = vrot.slane %v42_v24, %v579_v25 }
 0x203   :  { %1396 = vpow2.f32 %v1252_v31  ;;  %v1254_v36 = vmul.f32 -1.442695, %v404_v32 }
 0x204   :  { %1398 = vpow2.f32 %v1253_v34  ;;  %v1255_v37 = vmul.f32 -1.442695, %v406_v35 }
 0x205   :  { %1400 = vpow2.f32 %v1254_v36 }
 0x206   :  { %1402 = vpow2.f32 %v1255_v37  ;;  %v1679_v57 = vpop.f32.mrb[4].mxu1 }
 0x207   :  { %v1681_v58 = vpop.f32.mrb[5].mxu1 }
 0x208   :  { %v1683_v59 = vpop.f32.mrb[6].mxu1 }
 0x209   :  { %v1685_v60 = vpop.f32.mrb[7].mxu1 }
 0x20d   :  { %v1397_v38 = vpop.eup %1396 }
 0x20e   :  { %v1399_v39 = vpop.eup %1398  ;;  %v442_v40 = vadd.f32 1.0, %v1397_v38 }
 0x20f   :  { %v1401_v41 = vpop.eup %1400  ;;  %v443_v42 = vadd.f32 1.0, %v1399_v39 }
 0x210   :  { %v1403_v43 = vpop.eup %1402  ;;  %1404 = vrcp.f32 %v442_v40  ;;  %v444_v44 = vadd.f32 1.0, %v1401_v41  ;;  %v1357_v41 = vld [vmem:[%s1890_s7 + $0x4] ss:$8 sps:$4 sm:$0xff]  }
 0x211   :  { %1406 = vrcp.f32 %v443_v42  ;;  %v445_v45 = vadd.f32 1.0, %v1403_v43  ;;  %v314_v42 = vld [vmem:[%s1886_s4 + $0x10] sm:$0xff]  ;;  %v315_v43 = vld [vmem:[%s1886_s4 + $0x18] sm:$0xff] }
 0x212   :  { %1408 = vrcp.f32 %v444_v44  ;;  %v794_v44 = vld [vmem:[%s1891_s8] sm:$0xff] }
 0x213   :  { %1410 = vrcp.f32 %v445_v45  ;;  %v795_v45 = vld [vmem:[%s1891_s8 + $0x8] sm:$0xff] }
 0x21a   :  { %v1405_v46 = vpop.eup %1404 }
 0x21b   :  { %v1407_v47 = vpop.eup %1406  ;;  %v1669_v53 = vmul.f32 %v1405_v46, %v400_v26  ;;  %v1708_v26 = vrot.slane %v42_v24, %v575_v23  ;;  %v324_v46 = vld [vmem:[%s1892_s11] sm:$0xff] }
 0x21c   :  { %v1409_v48 = vpop.eup %1408  ;;  %v1665_v51 = vmul.f32 %v1407_v47, %v402_v29  ;;  %v325_v47 = vld [vmem:[%s1892_s11 + $0x8] sm:$0xff] }
 0x21d   :  { %v1411_v49 = vpop.eup %1410  ;;  %v1663_v50 = vmul.f32 %v1409_v48, %v404_v32  ;;  %v326_v48 = vld [vmem:[%s1892_s11 + $0x10] sm:$0xff] }
 0x21e   :  { %v1667_v52 = vmul.f32 %v1411_v49, %v406_v35  ;;  %v327_v49 = vld [vmem:[%s1892_s11 + $0x18] sm:$0xff] }
 0x21f   :  { %v480_v55 = vpack.c.bf16 %v1663_v50, %v1669_v53 }
 0x220   :  { %v481_v54 = vpack.c.bf16 %v1667_v52, %v1665_v51 }
 0x222   :  { %501 = vmatprep.subr.bf16.mxu1 %v481_v54 }
 0x223   :  { %502 = vmatpush1.bf16.msra.mxu1 %v480_v55 }
 0x226   :  { %1261 = vmatmul.mubr.msk.bf16.vlgmr.msra.gmra.mrb[8].mxu1 %vm497_vm3, %v1356_v56 }
 0x227   :  { %1268 = vmatprep.mubr.msk.bf16.mxu1 %vm497_vm3, %v1357_v41 }
 0x2f9   :  { %v535_v63 = vpop.f32.mrb[8].mxu1 }
 0x2fa   :  { %v536_v2 = vadd.f32 %v535_v63, %v485_v62  ;;  %v537_v3 = vpop.f32.mrb[9].mxu1 }
 0x2fb   :  { %v538_v4 = vadd.f32 %v537_v3, %v485_v62  ;;  %v539_v5 = vpop.f32.mrb[10].mxu1 }
 0x2fc   :  { %v1262_v6 = vmul.f32 -1.442695, %v536_v2  ;;  %v540_v7 = vadd.f32 %v539_v5, %v490_v0  ;;  %v541_v8 = vpop.f32.mrb[11].mxu1 }
 0x2fd   :  { %v1263_v9 = vmul.f32 -1.442695, %v538_v4  ;;  %v542_v10 = vadd.f32 %v541_v8, %v490_v0 }
 0x2fe   :  { %1412 = vpow2.f32 %v1262_v6  ;;  %v1264_v11 = vmul.f32 -1.442695, %v540_v7 }
 0x2ff   :  { %1414 = vpow2.f32 %v1263_v9  ;;  %v1265_v12 = vmul.f32 -1.442695, %v542_v10 }
 0x300   :  { %1416 = vpow2.f32 %v1264_v11 }
 0x301   :  { %1418 = vpow2.f32 %v1265_v12 }
 0x308   :  { %v1413_v13 = vpop.eup %1412 }
 0x309   :  { %v1415_v15 = vpop.eup %1414  ;;  %v556_v16 = vadd.f32 1.0, %v1413_v13 }
 0x30a   :  { %v1417_v17 = vpop.eup %1416  ;;  %v557_v18 = vadd.f32 1.0, %v1415_v15 }
 0x30b   :  { %v1419_v19 = vpop.eup %1418  ;;  %1420 = vrcp.f32 %v556_v16  ;;  %v558_v20 = vadd.f32 1.0, %v1417_v17 }
 0x30c   :  { %1422 = vrcp.f32 %v557_v18  ;;  %v559_v22 = vadd.f32 1.0, %v1419_v19 }
 0x30d   :  { %1424 = vrcp.f32 %v558_v20 }
 0x30e   :  { %1426 = vrcp.f32 %v559_v22 }
 0x315   :  { %v1421_v27 = vpop.eup %1420 }
 0x316   :  { %v1423_v29 = vpop.eup %1422  ;;  %v568_v30 = vmul.f32 %v1421_v27, %v536_v2 }
 0x317   :  { %v1425_v31 = vpop.eup %1424  ;;  %v569_v32 = vmul.f32 %v1423_v29, %v538_v4 }
 0x318   :  { %v1427_v33 = vpop.eup %1426  ;;  %v1713_v34 = vmul.f32 %v1708_v26, %v568_v30  ;;  %v570_v35 = vmul.f32 %v1425_v31, %v540_v7 }
 0x319   :  { %v584_v36 = vmul.f32 %v1710_v28, %v569_v32  ;;  %v571_v37 = vmul.f32 %v1427_v33, %v542_v10 }
 0x31a   :  { %v1717_v38 = vmul.f32 %v1708_v26, %v570_v35  ;;  %628 = vrot.lane.b32.xlu0 %v1713_v34, %s1494_s1 }
 0x31b   :  { %v586_v39 = vmul.f32 %v1710_v28, %v571_v37  ;;  %630 = vrot.lane.b32.xlu1 %v584_v36, %s1494_s1  ;;  %709 = vst.msk [vmem:[#allocation2 + $0x88] sm:$0xff] %vm588_vm4, %v584_v36 }
 0x31c   :  { %v840_v40 = vpack.c.bf16 %v1717_v38, %v1713_v34 }
 0x31d   :  { %711 = vst.msk [vmem:[#allocation2 + $0x98] sm:$0xff] %vm588_vm4, %v586_v39 }
 0x31e   :  { %648 = vrot.lane.b32.xlu0 %v1713_v34, %s1495_s24 }
 0x31f   :  { %650 = vrot.lane.b32.xlu1 %v584_v36, %s1495_s24 }
 0x322   :  { %668 = vrot.lane.b32.xlu0 %v1713_v34, %s1496_s25 }
 0x323   :  { %670 = vrot.lane.b32.xlu1 %v584_v36, %s1496_s25 }
 0x326   :  { %688 = vrot.lane.b32.xlu0 %v1713_v34, %s1497_s26 }
 0x327   :  { %690 = vrot.lane.b32.xlu1 %v584_v36, %s1497_s26 }
 0x32a   :  { %712 = vrot.lane.b32.xlu0 %v1713_v34, %s1498_s27 }
 0x32b   :  { %714 = vrot.lane.b32.xlu1 %v584_v36, %s1498_s27 }
 0x32e   :  { %732 = vrot.lane.b32.xlu0 %v1713_v34, %s1499_s28 }
 0x32f   :  { %734 = vrot.lane.b32.xlu1 %v584_v36, %s1499_s28 }
 0x332   :  { %632 = vrot.lane.b32.xlu0 %v1717_v38, %s1494_s1 }
 0x333   :  { %634 = vrot.lane.b32.xlu1 %v586_v39, %s1494_s1 }
 0x336   :  { %652 = vrot.lane.b32.xlu0 %v1717_v38, %s1495_s24 }
 0x337   :  { %654 = vrot.lane.b32.xlu1 %v586_v39, %s1495_s24 }
 0x33a   :  { %672 = vrot.lane.b32.xlu0 %v1717_v38, %s1496_s25 }
 0x33b   :  { %674 = vrot.lane.b32.xlu1 %v586_v39, %s1496_s25 }
 0x33e   :  { %692 = vrot.lane.b32.xlu0 %v1717_v38, %s1497_s26 }
 0x33f   :  { %694 = vrot.lane.b32.xlu1 %v586_v39, %s1497_s26 }
 0x342   :  { %752 = vrot.lane.b32.xlu0 %v1713_v34, %s1500_s29 }
 0x343   :  { %754 = vrot.lane.b32.xlu1 %v584_v36, %s1500_s29 }
 0x346   :  { %716 = vrot.lane.b32.xlu0 %v1717_v38, %s1498_s27 }
 0x347   :  { %774 = vrot.lane.b32.xlu1 %v584_v36, %s1501_s0 }
 0x34a   :  { %736 = vrot.lane.b32.xlu0 %v1717_v38, %s1499_s28 }
 0x34b   :  { %718 = vrot.lane.b32.xlu1 %v586_v39, %s1498_s27 }
 0x34e   :  { %756 = vrot.lane.b32.xlu0 %v1717_v38, %s1500_s29 }
 0x34f   :  { %738 = vrot.lane.b32.xlu1 %v586_v39, %s1499_s28 }
 0x352   :  { %772 = vrot.lane.b32.xlu0 %v1713_v34, %s1501_s0 }
 0x353   :  { %758 = vrot.lane.b32.xlu1 %v586_v39, %s1500_s29 }
 0x356   :  { %776 = vrot.lane.b32.xlu0 %v1717_v38, %s1501_s0 }
 0x357   :  { %778 = vrot.lane.b32.xlu1 %v586_v39, %s1501_s0 }
 0x35a   :  { %340 = vperm.xlu0 %1317, %v314_v42  }
 0x35b   :  { %345 = vperm.xlu1 %1318, %v315_v43  }
 0x35e   :  { %852 = vperm.xlu0 %1317, %v794_v44  }
 0x35f   :  { %857 = vperm.xlu1 %1318, %v795_v45  }
 0x362   :  { %1089 = vperm.xlu0 %1317, %v324_v46  }
 0x363   :  { %1094 = vperm.xlu1 %1318, %v325_v47  }
 0x366   :  { %1099 = vperm.xlu0 %1317, %v326_v48  }
 0x367   :  { %1104 = vperm.xlu1 %1318, %v327_v49  }
 0x38c   :  { %v629_v54 = vpop.permute.xlu0 %628 }
 0x38d   :  { %644 = vst.msk [vmem:[#allocation2] sm:$0xff] %vm643_vm5, %v629_v54  ;;  %v631_v55 = vpop.permute.xlu1 %630 }
 0x38e   :  { %v637_v56 = vsel %vm636_vm6, %v629_v54, %v631_v55 }
 0x38f   :  { %645 = vst.msk [vmem:[#allocation2 + $0x8] sm:$0xff] %vm588_vm4, %v637_v56 }
 0x390   :  { %v649_v61 = vpop.permute.xlu0 %648 }
 0x391   :  { %664 = vst.msk [vmem:[#allocation2 + $0x20] sm:$0xff] %vm663_vm7, %v649_v61  ;;  %v651_v62 = vpop.permute.xlu1 %650 }
 0x392   :  { %v657_v63 = vsel %vm656_vm8, %v649_v61, %v651_v62 }
 0x393   :  { %665 = vst.msk [vmem:[#allocation2 + $0x28] sm:$0xff] %vm588_vm4, %v657_v63 }
 0x394   :  { %v669_v0 = vpop.permute.xlu0 %668  ;;  %v796_v27 = vld [vmem:[#allocation2] sm:$0xff] }
 0x395   :  { %684 = vst.msk [vmem:[#allocation2 + $0x40] sm:$0xff] %vm683_vm9, %v669_v0  ;;  %v671_v2 = vpop.permute.xlu1 %670 }
 0x396   :  { %v677_v3 = vsel %vm676_vm10, %v669_v0, %v671_v2  ;;  %v797_v23 = vld [vmem:[#allocation2 + $0x8] sm:$0xff]  ;;  %v815_v0 = vld [vmem:[#allocation2 + $0x98] sm:$0xff] }
 0x397   :  { %685 = vst.msk [vmem:[#allocation2 + $0x48] sm:$0xff] %vm588_vm4, %v677_v3 }
 0x398   :  { %v689_v4 = vpop.permute.xlu0 %688  ;;  %v800_v39 = vld [vmem:[#allocation2 + $0x20] sm:$0xff] }
 0x399   :  { %704 = vst.msk [vmem:[#allocation2 + $0x60] sm:$0xff] %vm703_vm11, %v689_v4  ;;  %v691_v5 = vpop.permute.xlu1 %690 }
 0x39a   :  { %v697_v6 = vsel %vm696_vm12, %v689_v4, %v691_v5  ;;  %v801_v35 = vld [vmem:[#allocation2 + $0x28] sm:$0xff] }
 0x39b   :  { %705 = vst.msk [vmem:[#allocation2 + $0x68] sm:$0xff] %vm588_vm4, %v697_v6  ;;  %v813_v6 = vld [vmem:[#allocation2 + $0x88] sm:$0xff] }
 0x39c   :  { %v713_v7 = vpop.permute.xlu0 %712  ;;  %v804_v49 = vld [vmem:[#allocation2 + $0x40] sm:$0xff] }
 0x39d   :  { %v715_v8 = vpop.permute.xlu1 %714 }
 0x39e   :  { %v1781_v9 = vsel %vm720_vm13, %v713_v7, %v715_v8  ;;  %729 = vst.msk [vmem:[#allocation2 + $0xa8] sm:$0xff] %vm728_vm14, %v715_v8  ;;  %v805_v46 = vld [vmem:[#allocation2 + $0x48] sm:$0xff]  ;;  %v841_v8 = vpack.c.bf16 %v815_v0, %v813_v6 }
 0x3a0   :  { %v733_v10 = vpop.permute.xlu0 %732  ;;  %v808_v3 = vld [vmem:[#allocation2 + $0x60] sm:$0xff] }
 0x3a1   :  { %v735_v11 = vpop.permute.xlu1 %734 }
 0x3a2   :  { %v1785_v12 = vsel %vm740_vm15, %v733_v10, %v735_v11  ;;  %749 = vst.msk [vmem:[#allocation2 + $0xc8] sm:$0xff] %vm748_vm0, %v735_v11  ;;  %v809_v62 = vld [vmem:[#allocation2 + $0x68] sm:$0xff] }
 0x3a4   :  { %v633_v13 = vpop.permute.xlu0 %632 }
 0x3a5   :  { %646 = vst.msk [vmem:[#allocation2 + $0x10] sm:$0xff] %vm643_vm5, %v633_v13  ;;  %v635_v14 = vpop.permute.xlu1 %634  ;;  %vm788_vm5 = vcmask 498688  }
 0x3a6   :  { %v638_v15 = vsel %vm636_vm6, %v633_v13, %v635_v14  ;;  %vm1204_vm6 = vcmask 588804  }
 0x3a7   :  { %647 = vst.msk [vmem:[#allocation2 + $0x18] sm:$0xff] %vm588_vm4, %v638_v15 }
 0x3a8   :  { %v653_v16 = vpop.permute.xlu0 %652 }
 0x3a9   :  { %666 = vst.msk [vmem:[#allocation2 + $0x30] sm:$0xff] %vm663_vm7, %v653_v16  ;;  %v655_v17 = vpop.permute.xlu1 %654  ;;  %v821_v34 = vld [vmem:[#allocation2 + $0xc8] sm:$0xff] }
 0x3aa   :  { %v658_v18 = vsel %vm656_vm8, %v653_v16, %v655_v17 }
 0x3ab   :  { %667 = vst.msk [vmem:[#allocation2 + $0x38] sm:$0xff] %vm588_vm4, %v658_v18  ;;  %v817_v18 = vld [vmem:[#allocation2 + $0xa8] sm:$0xff] }
 0x3ac   :  { %v673_v19 = vpop.permute.xlu0 %672  ;;  %v798_v21 = vld [vmem:[#allocation2 + $0x10] sm:$0xff] }
 0x3ad   :  { %686 = vst.msk [vmem:[#allocation2 + $0x50] sm:$0xff] %vm683_vm9, %v673_v19  ;;  %v675_v20 = vpop.permute.xlu1 %674  ;;  %v832_v30 = vpack.c.bf16 %v798_v21, %v796_v27 }
 0x3ae   :  { %v678_v22 = vsel %vm676_vm10, %v673_v19, %v675_v20  ;;  %v799_v24 = vld [vmem:[#allocation2 + $0x18] sm:$0xff] }
 0x3af   :  { %687 = vst.msk [vmem:[#allocation2 + $0x58] sm:$0xff] %vm588_vm4, %v678_v22  ;;  %v833_v25 = vpack.c.bf16 %v799_v24, %v797_v23 }
 0x3b0   :  { %v693_v29 = vpop.permute.xlu0 %692  ;;  %v802_v32 = vld [vmem:[#allocation2 + $0x30] sm:$0xff] }
 0x3b1   :  { %706 = vst.msk [vmem:[#allocation2 + $0x70] sm:$0xff] %vm703_vm11, %v693_v29  ;;  %v695_v31 = vpop.permute.xlu1 %694  ;;  %872 = vmatprep.subr.bf16.mxu1 %v833_v25  ;;  %v834_v42 = vpack.c.bf16 %v802_v32, %v800_v39 }
 0x3b2   :  { %v698_v33 = vsel %vm696_vm12, %v693_v29, %v695_v31  ;;  %873 = vmatpush1.bf16.msra.mxu1 %v832_v30  ;;  %v803_v36 = vld [vmem:[#allocation2 + $0x38] sm:$0xff] }
 0x3b3   :  { %707 = vst.msk [vmem:[#allocation2 + $0x78] sm:$0xff] %vm588_vm4, %v698_v33  ;;  %v835_v37 = vpack.c.bf16 %v803_v36, %v801_v35  ;;  %vm780_vm4 = vcmask 957440  }
 0x3b4   :  { %v753_v41 = vpop.permute.xlu0 %752  ;;  %v806_v44 = vld [vmem:[#allocation2 + $0x50] sm:$0xff] }
 0x3b5   :  { %v755_v43 = vpop.permute.xlu1 %754  ;;  %874 = vmatprep.subr.bf16.mxu1 %v835_v37  ;;  %v836_v55 = vpack.c.bf16 %v806_v44, %v804_v49  ;;  %v1359_v37 = vld [vmem:[%s1890_s7] ss:$8 sps:$4 sm:$0xff]  }
 0x3b6   :  { %v761_v45 = vsel %vm760_vm1, %v753_v41, %v755_v43  ;;  %769 = vst.msk [vmem:[#allocation2 + $0xe8] sm:$0xff] %vm768_vm2, %v755_v43  ;;  %875 = vmatpush1.bf16.msra.mxu1 %v834_v42  ;;  %v807_v47 = vld [vmem:[#allocation2 + $0x58] sm:$0xff] }
 0x3b7   :  { %v837_v48 = vpack.c.bf16 %v807_v47, %v805_v46 }
 0x3b8   :  { %v717_v54 = vpop.permute.xlu0 %716  ;;  %v810_v61 = vld [vmem:[#allocation2 + $0x70] sm:$0xff] }
 0x3b9   :  { %v775_v56 = vpop.permute.xlu1 %774  ;;  %876 = vmatprep.subr.bf16.mxu1 %v837_v48  ;;  %v838_v5 = vpack.c.bf16 %v810_v61, %v808_v3 }
 0x3ba   :  { %789 = vst.msk [vmem:[#allocation2 + $0x108] sm:$0xff] %vm788_vm5, %v775_v56  ;;  %877 = vmatpush1.bf16.msra.mxu1 %v836_v55  ;;  %v811_v63 = vld [vmem:[#allocation2 + $0x78] sm:$0xff] }
 0x3bb   :  { %v839_v2 = vpack.c.bf16 %v811_v63, %v809_v62 }
 0x3bc   :  { %v737_v4 = vpop.permute.xlu0 %736 }
 0x3bd   :  { %v719_v7 = vpop.permute.xlu1 %718  ;;  %878 = vmatprep.subr.bf16.mxu1 %v839_v2  ;;  %v825_v29 = vld [vmem:[#allocation2 + $0xe8] sm:$0xff] }
 0x3be   :  { %v722_v10 = vsel %vm720_vm13, %v717_v54, %v719_v7  ;;  %731 = vst.msk [vmem:[#allocation2 + $0xb8] sm:$0xff] %vm728_vm14, %v719_v7  ;;  %879 = vmatpush1.bf16.msra.mxu1 %v838_v5 }
 0x3bf   :  { %880 = vmatprep.subr.bf16.mxu1 %v841_v8  ;;  %v842_v22 = vpack.c.bf16 %v722_v10, %v1781_v9  ;;  %v1360_v8 = vld [vmem:[%s1893_s10] sm:$0xff]   ;;  %v1362_v10 = vld [vmem:[%s1893_s10 + $0x8] sm:$0xff]  }
 0x3c0   :  { %v757_v11 = vpop.permute.xlu0 %756 }
 0x3c1   :  { %v739_v13 = vpop.permute.xlu1 %738  ;;  %v829_v9 = vld [vmem:[#allocation2 + $0x108] sm:$0xff] }
 0x3c2   :  { %v742_v14 = vsel %vm740_vm15, %v737_v4, %v739_v13  ;;  %751 = vst.msk [vmem:[#allocation2 + $0xd8] sm:$0xff] %vm748_vm0, %v739_v13  ;;  %881 = vmatpush1.bf16.msra.mxu1 %v840_v40 }
 0x3c3   :  { %v844_v27 = vpack.c.bf16 %v742_v14, %v1785_v12 }
 0x3c4   :  { %v773_v15 = vpop.permute.xlu0 %772 }
 0x3c5   :  { %v781_v16 = vsel %vm780_vm4, %v773_v15, %v775_v56  ;;  %v759_v17 = vpop.permute.xlu1 %758  ;;  %v819_v19 = vld [vmem:[#allocation2 + $0xb8] sm:$0xff] }
 0x3c6   :  { %v762_v20 = vsel %vm760_vm1, %v757_v11, %v759_v17  ;;  %771 = vst.msk [vmem:[#allocation2 + $0xf8] sm:$0xff] %vm768_vm2, %v759_v17  ;;  %v843_v21 = vpack.c.bf16 %v819_v19, %v817_v18 }
 0x3c7   :  { %v846_v32 = vpack.c.bf16 %v762_v20, %v761_v45 }
 0x3c8   :  { %v777_v23 = vpop.permute.xlu0 %776  ;;  %882 = vmatprep.subr.bf16.mxu1 %v843_v21 }
 0x3c9   :  { %v779_v24 = vpop.permute.xlu1 %778  ;;  %883 = vmatpush1.bf16.msra.mxu1 %v842_v22  ;;  %v823_v38 = vld [vmem:[#allocation2 + $0xd8] sm:$0xff] }
 0x3ca   :  { %v782_v40 = vsel %vm780_vm4, %v777_v23, %v779_v24  ;;  %791 = vst.msk [vmem:[#allocation2 + $0x118] sm:$0xff] %vm788_vm5, %v779_v24  ;;  %v845_v25 = vpack.c.bf16 %v823_v38, %v821_v34 }
 0x3cb   :  { %v848_v36 = vpack.c.bf16 %v782_v40, %v781_v16 }
 0x3cc   :  { %884 = vmatprep.subr.bf16.mxu1 %v845_v25 }
 0x3cd   :  { %885 = vmatpush1.bf16.msra.mxu1 %v844_v27  ;;  %v827_v30 = vld [vmem:[#allocation2 + $0xf8] sm:$0xff] }
 0x3ce   :  { %v847_v31 = vpack.c.bf16 %v827_v30, %v825_v29 }
 0x3d0   :  { %886 = vmatprep.subr.bf16.mxu1 %v847_v31 }
 0x3d1   :  { %887 = vmatpush1.bf16.msra.mxu1 %v846_v32  ;;  %v831_v33 = vld [vmem:[#allocation2 + $0x118] sm:$0xff] }
 0x3d2   :  { %v849_v35 = vpack.c.bf16 %v831_v33, %v829_v9 }
 0x3d4   :  { %888 = vmatprep.subr.bf16.mxu1 %v849_v35 }
 0x3d5   :  { %889 = vmatpush1.bf16.msra.mxu1 %v848_v36 }
 0x3d8   :  { %905 = vmatmul.mubr.bf16.vlgmr.msra.gmra.mrb[12].mxu1 %v1359_v37 }
 0x3d9   :  { %v341_v12 = vpop.permute.xlu0 %340  ;;  %1007 = vmatprep.mubr.bf16.mxu1 %v1492_v1 }
 0x3da   :  { %v410_v39 = vadd.f32 %v1679_v57, %v341_v12  ;;  %v412_v41 = vadd.f32 %v1681_v58, %v341_v12  ;;  %v346_v42 = vpop.permute.xlu1 %345 }
 0x3db   :  { %v414_v43 = vadd.f32 %v1683_v59, %v346_v42  ;;  %v416_v44 = vadd.f32 %v1685_v60, %v346_v42 }
 0x3dc   :  { %v1256_v45 = vmul.f32 -1.442695, %v410_v39  ;;  %v1257_v46 = vmul.f32 -1.442695, %v412_v41 }
 0x3dd   :  { %v1258_v47 = vmul.f32 -1.442695, %v414_v43  ;;  %v1259_v48 = vmul.f32 -1.442695, %v416_v44  ;;  %v853_v11 = vpop.permute.xlu0 %852 }
 0x3de   :  { %1428 = vpow2.f32 %v1256_v45  ;;  %v858_v16 = vpop.permute.xlu1 %857 }
 0x3df   :  { %1430 = vpow2.f32 %v1257_v46 }
 0x3e0   :  { %1432 = vpow2.f32 %v1258_v47 }
 0x3e1   :  { %1434 = vpow2.f32 %v1259_v48  ;;  %v1361_v48 = vld [vmem:[%s1894_s9] sm:$0xff]  }
 0x3e8   :  { %v1429_v49 = vpop.eup %1428 }
 0x3e9   :  { %v1431_v54 = vpop.eup %1430  ;;  %v446_v55 = vadd.f32 1.0, %v1429_v49 }
 0x3ea   :  { %v1433_v56 = vpop.eup %1432  ;;  %v447_v57 = vadd.f32 1.0, %v1431_v54  ;;  %v1090_v54 = vpop.permute.xlu0 %1089 }
 0x3eb   :  { %v1435_v61 = vpop.eup %1434  ;;  %1436 = vrcp.f32 %v446_v55  ;;  %v448_v58 = vadd.f32 1.0, %v1433_v56 }
 0x3ec   :  { %1438 = vrcp.f32 %v447_v57  ;;  %v449_v59 = vadd.f32 1.0, %v1435_v61  ;;  %v1095_v61 = vpop.permute.xlu1 %1094 }
 0x3ed   :  { %1440 = vrcp.f32 %v448_v58 }
 0x3ee   :  { %1442 = vrcp.f32 %v449_v59 }
 0x3f5   :  { %v1437_v60 = vpop.eup %1436 }
 0x3f6   :  { %v1439_v62 = vpop.eup %1438  ;;  %v470_v63 = vmul.f32 %v1437_v60, %v410_v39 }
 0x3f7   :  { %v1441_v0 = vpop.eup %1440  ;;  %v471_v2 = vmul.f32 %v1439_v62, %v412_v41 }
 0x3f8   :  { %v1443_v3 = vpop.eup %1442  ;;  %v472_v4 = vmul.f32 %v1441_v0, %v414_v43 }
 0x3f9   :  { %v473_v5 = vmul.f32 %v1443_v3, %v416_v44 }
 0x3fa   :  { %v474_v6 = vpack.c.bf16 %v472_v4, %v470_v63 }
 0x3fb   :  { %v475_v7 = vpack.c.bf16 %v473_v5, %v471_v2 }
 0x3fd   :  { %965 = vmatprep.subr.bf16.mxu0 %v475_v7  ;;  %1297 = vmatprep.subr.bf16.mxu1 %v475_v7  ;;  %v1100_v7 = vpop.permute.xlu0 %1099 }
 0x3fe   :  { %966 = vmatpush1.bf16.msra.mxu0 %v474_v6  ;;  %1298 = vmatpush1.bf16.msra.mxu1 %v474_v6 }
 0x401   :  { %1275 = vmatmul.mubr.msk.bf16.vlgmr.msra.gmra.mrb[8].mxu0 %vm497_vm3, %v1360_v8  ;;  %1276 = vmatmul.mubr.msk.bf16.vlgmr.msra.gmra.mrb[16].mxu1 %vm497_vm3, %v1362_v10 }
 0x402   :  { %1066 = vmatprep.mubr.bf16.mxu0 %v1492_v1 }
 0x4ab   :  { %v906_v13 = vpop.f32.mrb[12].mxu1 }
 0x4ac   :  { %v907_v14 = vadd.f32 %v906_v13, %v853_v11  ;;  %v908_v15 = vpop.f32.mrb[13].mxu1 }
 0x4ad   :  { %v909_v17 = vadd.f32 %v908_v15, %v853_v11  ;;  %v910_v18 = vpop.f32.mrb[14].mxu1  ;;  %v1105_v15 = vpop.permute.xlu1 %1104 }
 0x4ae   :  { %v1269_v19 = vmul.f32 -1.442695, %v907_v14  ;;  %v911_v20 = vadd.f32 %v910_v18, %v858_v16  ;;  %v912_v21 = vpop.f32.mrb[15].mxu1 }
 0x4af   :  { %v1270_v22 = vmul.f32 -1.442695, %v909_v17  ;;  %v913_v23 = vadd.f32 %v912_v21, %v858_v16 }
 0x4b0   :  { %1444 = vpow2.f32 %v1269_v19  ;;  %v1271_v24 = vmul.f32 -1.442695, %v911_v20 }
 0x4b1   :  { %1446 = vpow2.f32 %v1270_v22  ;;  %v1272_v34 = vmul.f32 -1.442695, %v913_v23 }
 0x4b2   :  { %1448 = vpow2.f32 %v1271_v24 }
 0x4b3   :  { %1450 = vpow2.f32 %v1272_v34 }
 0x4ba   :  { %v1445_v38 = vpop.eup %1444 }
 0x4bb   :  { %v1447_v40 = vpop.eup %1446  ;;  %v927_v25 = vadd.f32 1.0, %v1445_v38 }
 0x4bc   :  { %v1449_v27 = vpop.eup %1448  ;;  %v928_v29 = vadd.f32 1.0, %v1447_v40 }
 0x4bd   :  { %v1451_v30 = vpop.eup %1450  ;;  %1452 = vrcp.f32 %v927_v25  ;;  %v929_v31 = vadd.f32 1.0, %v1449_v27 }
 0x4be   :  { %1454 = vrcp.f32 %v928_v29  ;;  %v930_v32 = vadd.f32 1.0, %v1451_v30 }
 0x4bf   :  { %1456 = vrcp.f32 %v929_v31 }
 0x4c0   :  { %1458 = vrcp.f32 %v930_v32 }
 0x4c7   :  { %v1453_v9 = vpop.eup %1452 }
 0x4c8   :  { %v1455_v33 = vpop.eup %1454  ;;  %v939_v35 = vmul.f32 %v1453_v9, %v907_v14 }
 0x4c9   :  { %v1457_v36 = vpop.eup %1456  ;;  %v940_v37 = vmul.f32 %v1455_v33, %v909_v17 }
 0x4ca   :  { %v1459_v12 = vpop.eup %1458  ;;  %v941_v39 = vmul.f32 %v1457_v36, %v911_v20  ;;  %v943_v42 = vadd.f32 %v939_v35, %v1669_v53 }
 0x4cb   :  { %v942_v41 = vmul.f32 %v1459_v12, %v913_v23  ;;  %v944_v44 = vadd.f32 %v940_v37, %v1665_v51 }
 0x4cc   :  { %v945_v43 = vadd.f32 %v941_v39, %v1663_v50  ;;  %v1363_v50 = vld [vmem:[%s1894_s9 + $0x8] sm:$0xff]  }
 0x4cd   :  { %v946_v45 = vadd.f32 %v942_v41, %v1667_v52 }
 0x4ce   :  { %v947_v46 = vpack.c.bf16 %v945_v43, %v943_v42 }
 0x4cf   :  { %v948_v47 = vpack.c.bf16 %v946_v45, %v944_v44 }
 0x4d1   :  { %1034 = vmatprep.subr.bf16.mxu0 %v948_v47 }
 0x4d2   :  { %1035 = vmatpush1.bf16.msra.mxu0 %v947_v46 }
 0x4d4   :  { %v1009_v51 = vpop.f32.mrb[16].mxu1 }
 0x4d5   :  { %1279 = vmatmul.mubr.msk.bf16.vlgmr.msra.gmra.mrb[8].mxu0 %vm497_vm3, %v1361_v48  ;;  %v1011_v52 = vpop.f32.mrb[17].mxu1 }
 0x4d6   :  { %1076 = vmatprep.mubr.bf16.mxu0 %v1492_v1  ;;  %v1013_v53 = vpop.f32.mrb[18].mxu1 }
 0x4d7   :  { %v1015_v49 = vpop.f32.mrb[19].mxu1 }
 0x4dd   :  { %1280 = vmatmul.mubr.msk.bf16.gmra.mrb[12].mxu0 %vm497_vm3, %v1363_v50  ;;  %vm1203_vm3 = vcmask 1043456  }
 0x4de   :  { %vm1852_vm7 = vmor %vm1204_vm6, %vm1203_vm3 }
 0x5a8   :  { %v1068_v55 = vpop.f32.mrb[8].mxu0 }
 0x5a9   :  { %v1107_v56 = vadd.f32 %v1090_v54, %v1068_v55  ;;  %v1070_v57 = vpop.f32.mrb[9].mxu0 }
 0x5aa   :  { %v1108_v58 = vadd.f32 %v1090_v54, %v1070_v57  ;;  %v1072_v59 = vpop.f32.mrb[10].mxu0 }
 0x5ab   :  { %v1281_v60 = vmul.f32 -1.442695, %v1107_v56  ;;  %v1109_v62 = vadd.f32 %v1095_v61, %v1072_v59  ;;  %v1074_v1 = vpop.f32.mrb[11].mxu0 }
 0x5ac   :  { %v1282_v63 = vmul.f32 -1.442695, %v1108_v58  ;;  %v1110_v0 = vadd.f32 %v1095_v61, %v1074_v1 }
 0x5ad   :  { %1460 = vpow2.f32 %v1281_v60  ;;  %v1283_v2 = vmul.f32 -1.442695, %v1109_v62 }
 0x5ae   :  { %1462 = vpow2.f32 %v1282_v63  ;;  %v1284_v3 = vmul.f32 -1.442695, %v1110_v0 }
 0x5af   :  { %1464 = vpow2.f32 %v1283_v2 }
 0x5b0   :  { %1466 = vpow2.f32 %v1284_v3  ;;  %v1078_v4 = vpop.f32.mrb[12].mxu0 }
 0x5b1   :  { %v1079_v5 = vadd.f32 %v1078_v4, %v1009_v51  ;;  %v1080_v6 = vpop.f32.mrb[13].mxu0 }
 0x5b2   :  { %v1081_v8 = vadd.f32 %v1080_v6, %v1011_v52  ;;  %v1082_v10 = vpop.f32.mrb[14].mxu0 }
 0x5b3   :  { %v1111_v11 = vadd.f32 %v1100_v7, %v1079_v5  ;;  %v1083_v13 = vadd.f32 %v1082_v10, %v1013_v53  ;;  %v1084_v14 = vpop.f32.mrb[15].mxu0 }
 0x5b4   :  { %v1112_v16 = vadd.f32 %v1100_v7, %v1081_v8  ;;  %v1085_v17 = vadd.f32 %v1084_v14, %v1015_v49 }
 0x5b5   :  { %v1285_v18 = vmul.f32 -1.442695, %v1111_v11  ;;  %v1113_v19 = vadd.f32 %v1105_v15, %v1083_v13 }
 0x5b6   :  { %v1286_v20 = vmul.f32 -1.442695, %v1112_v16  ;;  %v1847_v21 = vadd.f32 %v1105_v15, %v1085_v17 }
 0x5b7   :  { %v1461_v22 = vpop.eup %1460  ;;  %1468 = vpow2.f32 %v1285_v18  ;;  %v1287_v23 = vmul.f32 -1.442695, %v1113_v19 }
 0x5b8   :  { %v1463_v24 = vpop.eup %1462  ;;  %v1139_v34 = vadd.f32 1.0, %v1461_v22  ;;  %1470 = vpow2.f32 %v1286_v20  ;;  %v1288_v29 = vmul.f32 -1.442695, %v1847_v21 }
 0x5b9   :  { %v1465_v38 = vpop.eup %1464  ;;  %v1140_v40 = vadd.f32 1.0, %v1463_v24  ;;  %1472 = vpow2.f32 %v1287_v23 }
 0x5ba   :  { %v1467_v25 = vpop.eup %1466  ;;  %1474 = vrcp.f32 %v1139_v34  ;;  %v1141_v27 = vadd.f32 1.0, %v1465_v38 }
 0x5bb   :  { %1476 = vrcp.f32 %v1140_v40  ;;  %v1142_v30 = vadd.f32 1.0, %v1467_v25 }
 0x5bc   :  { %1478 = vrcp.f32 %v1141_v27 }
 0x5bd   :  { %1480 = vrcp.f32 %v1142_v30 }
 0x5be   :  { %1482 = vpow2.f32 %v1288_v29 }
 0x5c1   :  { %v1469_v31 = vpop.eup %1468 }
 0x5c2   :  { %v1471_v32 = vpop.eup %1470  ;;  %v1143_v9 = vadd.f32 1.0, %v1469_v31 }
 0x5c3   :  { %v1473_v33 = vpop.eup %1472  ;;  %v1144_v35 = vadd.f32 1.0, %v1471_v32 }
 0x5c4   :  { %v1475_v36 = vpop.eup %1474  ;;  %1484 = vrcp.f32 %v1143_v9  ;;  %v1145_v37 = vadd.f32 1.0, %v1473_v33 }
 0x5c5   :  { %v1477_v12 = vpop.eup %1476  ;;  %v1163_v39 = vmul.f32 %v1475_v36, %v1107_v56  ;;  %1486 = vrcp.f32 %v1144_v35 }
 0x5c6   :  { %v1479_v41 = vpop.eup %1478  ;;  %v1164_v42 = vmul.f32 %v1477_v12, %v1108_v58  ;;  %1488 = vrcp.f32 %v1145_v37 }
 0x5c7   :  { %v1481_v43 = vpop.eup %1480  ;;  %v1171_v44 = vmul.f32 %v1163_v39, %v1708_v26  ;;  %v1165_v45 = vmul.f32 %v1479_v41, %v1109_v62 }
 0x5c8   :  { %v1483_v46 = vpop.eup %1482  ;;  %v1172_v47 = vmul.f32 %v1164_v42, %v1710_v28  ;;  %v1166_v48 = vmul.f32 %v1481_v43, %v1110_v0 }
 0x5c9   :  { %v1173_v51 = vmul.f32 %v1165_v45, %v1708_v26  ;;  %v1146_v52 = vadd.f32 1.0, %v1483_v46 }
 0x5ca   :  { %v1293_v53 = vpack.c.bf16 %v1172_v47, %v1171_v44  ;;  %v1174_v49 = vmul.f32 %v1166_v48, %v1710_v28 }
 0x5cb   :  { %1490 = vrcp.f32 %v1146_v52 }
 0x5cc   :  { %1206 = vst.msk [vmem:[%s1895_s12] sm:$0xff] %vm1852_vm7, %v1293_v53  ;;  %v1294_v54 = vpack.c.bf16 %v1174_v49, %v1173_v51 }
 0x5ce   :  { %v1485_v55 = vpop.eup %1484  ;;  %1207 = vst.msk [vmem:[%s1895_s12 + $0x8] sm:$0xff] %vm1852_vm7, %v1294_v54 }
 0x5cf   :  { %v1487_v56 = vpop.eup %1486  ;;  %v1167_v57 = vmul.f32 %v1485_v55, %v1111_v11 }
 0x5d0   :  { %v1489_v61 = vpop.eup %1488  ;;  %v1168_v58 = vmul.f32 %v1487_v56, %v1112_v16 }
 0x5d1   :  { %v1175_v59 = vmul.f32 %v1167_v57, %v1708_v26  ;;  %v1169_v62 = vmul.f32 %v1489_v61, %v1113_v19 }
 0x5d2   :  { %v1176_v60 = vmul.f32 %v1168_v58, %v1710_v28 }
 0x5d3   :  { %v1177_v0 = vmul.f32 %v1169_v62, %v1708_v26 }
 0x5d4   :  { %v1295_v1 = vpack.c.bf16 %v1176_v60, %v1175_v59 }
 0x5d5   :  { %v1491_v63 = vpop.eup %1490 }
 0x5d6   :  { %1208 = vst.msk [vmem:[%s1895_s12 + $0x10] sm:$0xff] %vm1852_vm7, %v1295_v1  ;;  %v1170_v2 = vmul.f32 %v1491_v63, %v1847_v21 }
 0x5d8   :  { %v1178_v3 = vmul.f32 %v1170_v2, %v1710_v28 }
 0x5da   :  { %v1296_v4 = vpack.c.bf16 %v1178_v3, %v1177_v0 }
 0x5dc   :  { %1209 = vst.msk [vmem:[%s1895_s12 + $0x18] sm:$0xff] %vm1852_vm7, %v1296_v4 }

// kernel: cspdarknet_forward.8
= control target key start
LH: loop header
LB: loop body
LE: loop exit
PB: predicated region body
PF: predicated region fallthrough
CT: control target
= control target key end

     0   :  { %v1277_v1 = vmov 0   ;;  %vm236_vm0 = vcmask 1040384   ;;  %vm229_vm1 = vcmask 269312   ;;  %vm420_vm2 = vcmask 261120   ;;  %s1280_s28 = smov 7   ;;  %s1281_s29 = smov 6   ;;  %s1568_s0 = inlined_call_operand.vmem [shape: bf16[289,72], index: 0, kind: input, shape index: {}]   ;;  %s1569_s2 = inlined_call_operand.vmem [shape: bf16[32,289], index: 2, kind: input, shape index: {}]   ;;  %s1570_s3 = inlined_call_operand.vmem [shape: bf16[32,32], index: 3, kind: input, shape index: {}]   ;;  %s1571_s4 = inlined_call_operand.vmem [shape: f32[32,1], index: 4, kind: input, shape index: {}, may-alias: {4,11}]   ;;  %s1572_s5 = inlined_call_operand.vmem [shape: bf16[1,16,16], index: 5, kind: input, shape index: {}]   ;;  %s1573_s6 = inlined_call_operand.vmem [shape: f32[1,16,1], index: 6, kind: input, shape index: {}, may-alias: {6,8}]   ;;  %s1574_s1 = inlined_call_operand.vmem [shape: f32[1,72], index: 1, kind: input, shape index: {}]   ;;  %s1575_s8 = inlined_call_operand.vmem [shape: f32[1,16,1], index: 8, kind: input, shape index: {}, may-alias: {6,8}]   ;;  %s1576_s7 = inlined_call_operand.vmem [shape: bf16[1,16,144], index: 7, kind: input, shape index: {}]   ;;  %s1577_s11 = inlined_call_operand.vmem [shape: f32[32,1], index: 11, kind: input, shape index: {}, may-alias: {4,11}]   ;;  %s1578_s10 = inlined_call_operand.vmem [shape: bf16[32,16], index: 10, kind: input, shape index: {}]   ;;  %s1579_s9 = inlined_call_operand.vmem [shape: bf16[32,16], index: 9, kind: input, shape index: {}]   ;;  %s1580_s12 = inlined_call_operand.vmem [shape: bf16[32,72], index: 12, kind: output, shape index: {}]  }
   0x1   :  { %v1176_v0 = vld [vmem:[%s1568_s0 + $0x40] sm:$0xff]   ;;  %1174 = vset.pattern.permute.xlu0 %v1277_v1  ;;  %1175 = vset.pattern.permute.xlu1 %v1277_v1  ;;  %v1178_v3 = vld [vmem:[%s1568_s0 + $0x48] sm:$0xff]   ;;  %v1180_v5 = vld [vmem:[%s1568_s0 + $0x50] sm:$0xff]   ;;  %v238_v15 = vsel %vm236_vm0, 65535, %v1277_v1  ;;  %vm1279_vm3 = vmmov 0   ;;  %vm525_vm4 = vcmask 130048  }
   0x2   :  { %v1177_v2 = vld [vmem:[%s1568_s0] sm:$0xff]   ;;  %1078 = vmatprep.subr.bf16.mxu0 %v1176_v0  ;;  %v1179_v4 = vld [vmem:[%s1568_s0 + $0x8] sm:$0xff]   ;;  %v1181_v6 = vld [vmem:[%s1568_s0 + $0x10] sm:$0xff]   ;;  %vm592_vm5 = vcmask 588800   ;;  %s1282_s30 = smov 5   ;;  %s1284_s13 = smov 127  }
   0x3   :  { %1079 = vmatpush3.bf16.msra.mxu0 %v1177_v2  ;;  %v1182_v7 = vld [vmem:[%s1568_s0 + $0x58] sm:$0xff]   ;;  %v1184_v9 = vld [vmem:[%s1568_s0 + $0x60] sm:$0xff]   ;;  %v1191_v12 = vld [vmem:[%s1568_s0 + $0x88] sm:$0xff]   ;;  %s1285_s14 = smov 123   ;;  %s1286_s15 = smov 122   ;;  %vm619_vm6 = vcmask 588856  }
   0x4   :  { %1080 = vmatprep.subr.bf16.mxu0 %v1178_v3  ;;  %v1183_v8 = vld [vmem:[%s1568_s0 + $0x18] sm:$0xff]   ;;  %v1188_v10 = vld [vmem:[%s1568_s0 + $0x80] sm:$0xff]   ;;  %v1186_v13 = vld [vmem:[%s1568_s0 + $0x68] sm:$0xff]   ;;  %s1287_s16 = smov 121   ;;  %vm628_vm7 = vcmask 588848   ;;  %vm637_vm8 = vcmask 588840  }
   0x5   :  { %v1185_v11 = vld [vmem:[%s1568_s0 + $0x20] sm:$0xff]   ;;  %1123 = vmatprep.subr.bf16.mxu1 %v1188_v10  ;;  %v1187_v14 = vld [vmem:[%s1568_s0 + $0x28] sm:$0xff]   ;;  %v1194_v16 = vld [vmem:[%s1568_s0 + $0x90] ss:$0 sps:$4 sm:$0x11]   ;;  %vm646_vm9 = vcmask 588808  }
   0x6   :  { %1124 = vmatpush3.bf16.msra.mxu1 %v1188_v10  ;;  %v1189_v17 = vld [vmem:[%s1568_s0 + $0x70] sm:$0xff]   ;;  %v240_v19 = vand.u32 %v1194_v16, %v238_v15  ;;  %v1199_v21 = vld [vmem:[%s1569_s2 + $0x20] ss:$12 sps:$4 sm:$0xff]   ;;  %v1192_v23 = vld [vmem:[%s1568_s0 + $0x78] sm:$0xff]   ;;  %vm657_vm10 = vcmask 580608   ;;  %vm666_vm11 = vcmask 547840  }
   0x7   :  { %1081 = vmatpush3.bf16.msra.mxu0 %v1179_v4  ;;  %1125 = vmatprep.subr.bf16.mxu1 %v1191_v12  ;;  %v1197_v18 = vld [vmem:[%s1569_s2 + $0x4] ss:$12 sps:$4 sm:$0xff]   ;;  %v1198_v20 = vld [vmem:[%s1569_s2 + $0x8] ss:$12 sps:$4 sm:$0xff]   ;;  %v1193_v24 = vld [vmem:[%s1568_s0 + $0x38] sm:$0xff]   ;;  %vm675_vm12 = vcmask 539648  }
   0x8   :  { %1082 = vmatprep.subr.bf16.mxu0 %v1180_v5  ;;  %274 = vmatprep.mubr.bf16.mxu0 %v1197_v18  ;;  %v1190_v22 = vld [vmem:[%s1568_s0 + $0x30] sm:$0xff]   ;;  %v1195_v25 = vld [vmem:[%s1569_s2] ss:$12 sps:$4 sm:$0xff]   ;;  %v1200_v26 = vld [vmem:[%s1569_s2 + $0x1c] ss:$12 sps:$4 sm:$0xff]   ;;  %vm684_vm13 = vcmask 531456  }
   0x9   :  { %1129 = vmatprep.mubr.msk.bf16.mxu1 %vm229_vm1, %v1198_v20  ;;  %v1202_v27 = vld [vmem:[%s1569_s2 + $0x18] ss:$12 sps:$4 sm:$0xff]   ;;  %v375_v30 = vld [vmem:[%s1571_s4 + $0x8] sm:$0xff]  ;;  %vm1000_vm14 = vcmask 584704  }
   0xa   :  { %1126 = vmatpush3.bf16.msra.mxu1 %v1191_v12  ;;  %v1203_v28 = vld [vmem:[%s1570_s3] sm:$0xff]   ;;  %v1204_v10 = vld [vmem:[%s1570_s3 + $0x8] sm:$0xff]  }
   0xb   :  { %1083 = vmatpush3.bf16.msra.mxu0 %v1181_v6  ;;  %1127 = vmatprep.subr.bf16.mxu1 %v240_v19  ;;  %v374_v29 = vld [vmem:[%s1571_s4] sm:$0xff] }
   0xc   :  { %1084 = vmatprep.subr.bf16.mxu0 %v1182_v7  ;;  %392 = vperm.xlu0 %1174, %v374_v29   ;;  %v507_v12 = vld [vmem:[%s1573_s6] sm:$0xff] }
   0xd   :  { %512 = vperm.xlu1 %1175, %v507_v12  }
   0xe   :  { %1128 = vmatpush3.bf16.msra.mxu1 %v240_v19 }
   0xf   :  { %1085 = vmatpush3.bf16.msra.mxu0 %v1183_v8 }
  0x10   :  { %1086 = vmatprep.subr.bf16.mxu0 %v1184_v9  ;;  %397 = vperm.xlu0 %1174, %v375_v30  }
  0x11   :  { %1130 = vmatmul.mubr.msk.bf16.vlgmr.msra.gmra.mrb[0].mxu1 %vm229_vm1, %v1199_v21 }
  0x12   :  { %1137 = vmatprep.mubr.msk.bf16.mxu1 %vm420_vm2, %v1203_v28 }
  0x13   :  { %1087 = vmatpush3.bf16.msra.mxu0 %v1185_v11  ;;  %v1278_v11 = vmov 0.0  }
  0x14   :  { %1088 = vmatprep.subr.bf16.mxu0 %v1186_v13  ;;  %v508_v13 = vld [vmem:[%s1573_s6 + $0x8] sm:$0xff]  ;;  %593 = vst.msk [vmem:[#allocation2] sm:$0xff] %vm592_vm5, %v1278_v11  ;;  %594 = vst.msk [vmem:[#allocation2 + $0x8] sm:$0xff] %vm592_vm5, %v1278_v11 }
  0x15   :  { %517 = vperm.xlu1 %1175, %v508_v13   ;;  %595 = vst.msk [vmem:[#allocation2 + $0x10] sm:$0xff] %vm592_vm5, %v1278_v11  ;;  %596 = vst.msk [vmem:[#allocation2 + $0x18] sm:$0xff] %vm592_vm5, %v1278_v11 }
  0x16   :  { %597 = vst.msk [vmem:[#allocation2 + $0x20] sm:$0xff] %vm592_vm5, %v1278_v11  ;;  %598 = vst.msk [vmem:[#allocation2 + $0x28] sm:$0xff] %vm592_vm5, %v1278_v11 }
  0x17   :  { %1089 = vmatpush3.bf16.msra.mxu0 %v1187_v14  ;;  %599 = vst.msk [vmem:[#allocation2 + $0x30] sm:$0xff] %vm592_vm5, %v1278_v11  ;;  %600 = vst.msk [vmem:[#allocation2 + $0x38] sm:$0xff] %vm592_vm5, %v1278_v11 }
  0x18   :  { %1090 = vmatprep.subr.bf16.mxu0 %v1189_v17  ;;  %601 = vst.msk [vmem:[#allocation2 + $0x40] sm:$0xff] %vm592_vm5, %v1278_v11  ;;  %602 = vst.msk [vmem:[#allocation2 + $0x48] sm:$0xff] %vm592_vm5, %v1278_v11 }
  0x19   :  { %603 = vst.msk [vmem:[#allocation2 + $0x50] sm:$0xff] %vm592_vm5, %v1278_v11  ;;  %604 = vst.msk [vmem:[#allocation2 + $0x58] sm:$0xff] %vm592_vm5, %v1278_v11 }
  0x1a   :  { %605 = vst.msk [vmem:[#allocation2 + $0x60] sm:$0xff] %vm592_vm5, %v1278_v11  ;;  %606 = vst.msk [vmem:[#allocation2 + $0x68] sm:$0xff] %vm592_vm5, %v1278_v11 }
  0x1b   :  { %1091 = vmatpush3.bf16.msra.mxu0 %v1190_v22  ;;  %607 = vst.msk [vmem:[#allocation2 + $0x70] sm:$0xff] %vm592_vm5, %v1278_v11  ;;  %608 = vst.msk [vmem:[#allocation2 + $0x78] sm:$0xff] %vm592_vm5, %v1278_v11 }
  0x1c   :  { %1092 = vmatprep.subr.bf16.mxu0 %v1192_v23  ;;  %609 = vst.msk [vmem:[#allocation2 + $0x80] sm:$0xff] %vm592_vm5, %v1278_v11  ;;  %610 = vst.msk [vmem:[#allocation2 + $0x88] sm:$0xff] %vm592_vm5, %v1278_v11 }
  0x1f   :  { %1093 = vmatpush3.bf16.msra.mxu0 %v1193_v24 }
  0x22   :  { %275 = vmatmul.mubr.bf16.vlgmr.msra.gmra.mrb[0].mxu0 %v1195_v25 }
  0x23   :  { %282 = vmatprep.mubr.bf16.mxu0 %v1200_v26 }
  0x2a   :  { %283 = vmatmul.mubr.bf16.gmra.mrb[4].mxu0 %v1202_v27 }
  0x8b   :  { %v393_v14 = vpop.permute.xlu0 %392 }
  0x8f   :  { %v398_v19 = vpop.permute.xlu0 %397 }
  0xe4   :  { %v1131_v31 = vpop.f32.mrb[0].mxu1 }
  0xe5   :  { %v325_v32 = vpop.f32.mrb[1].mxu1 }
  0xe6   :  { %v1132_v33 = vpop.f32.mrb[2].mxu1 }
  0xe7   :  { %v328_v34 = vpop.f32.mrb[3].mxu1 }
  0xf5   :  { %v1094_v35 = vpop.f32.mrb[0].mxu0 }
  0xf6   :  { %v1095_v36 = vpop.f32.mrb[1].mxu0 }
  0xf7   :  { %v1096_v37 = vadd.f32 %v1095_v36, %v1094_v35  ;;  %v1097_v38 = vpop.f32.mrb[2].mxu0 }
  0xf8   :  { %v1098_v39 = vpop.f32.mrb[3].mxu0 }
  0xf9   :  { %v1099_v40 = vadd.f32 %v1098_v39, %v1097_v38  ;;  %v326_v41 = vadd.f32 %v1096_v37, %v325_v32 }
  0xfb   :  { %v1036_v42 = vmul.f32 -1.442695, %v326_v41  ;;  %v329_v43 = vadd.f32 %v1099_v40, %v328_v34  ;;  %v513_v34 = vpop.permute.xlu1 %512 }
  0xfd   :  { %1213 = vpow2.f32 %v1036_v42  ;;  %v1037_v44 = vmul.f32 -1.442695, %v329_v43  ;;  %v1100_v45 = vpop.f32.mrb[4].mxu0 }
  0xfe   :  { %v1101_v46 = vpop.f32.mrb[5].mxu0 }
  0xff   :  { %1215 = vpow2.f32 %v1037_v44  ;;  %v1102_v47 = vadd.f32 %v1101_v46, %v1100_v45  ;;  %v1103_v48 = vpop.f32.mrb[6].mxu0  ;;  %v518_v38 = vpop.permute.xlu1 %517 }
 0x100   :  { %v1104_v49 = vpop.f32.mrb[7].mxu0 }
 0x101   :  { %v334_v50 = vadd.f32 %v1131_v31, %v1102_v47  ;;  %v1105_v51 = vadd.f32 %v1104_v49, %v1103_v48  ;;  %v1487_v49 = vld [vmem:[%s1574_s1] ss:$0 sm:$0xff]  ;;  %s1283_s1 = smov 1  }
 0x103   :  { %v1038_v52 = vmul.f32 -1.442695, %v334_v50  ;;  %v337_v53 = vadd.f32 %v1132_v33, %v1105_v51  ;;  %v1205_v33 = vld [vmem:[%s1572_s5] sm:$0xff]  }
 0x105   :  { %1217 = vpow2.f32 %v1038_v52  ;;  %v1039_v54 = vmul.f32 -1.442695, %v337_v53 }
 0x107   :  { %v1214_v55 = vpop.eup %1213  ;;  %1219 = vpow2.f32 %v1039_v54 }
 0x108   :  { %v352_v56 = vadd.f32 1.0, %v1214_v55  ;;  %v376_v55 = vld [vmem:[%s1571_s4 + $0x10] sm:$0xff] }
 0x109   :  { %v1216_v57 = vpop.eup %1215 }
 0x10a   :  { %1221 = vrcp.f32 %v352_v56  ;;  %v353_v58 = vadd.f32 1.0, %v1216_v57  ;;  %v377_v56 = vld [vmem:[%s1571_s4 + $0x18] sm:$0xff]  ;;  %v1206_v57 = vld [vmem:[%s1576_s7 + $0x4] ss:$8 sps:$4 sm:$0xff]  }
 0x10c   :  { %1223 = vrcp.f32 %v353_v58  ;;  %v689_v58 = vld [vmem:[%s1575_s8] sm:$0xff] }
 0x10f   :  { %v1218_v59 = vpop.eup %1217 }
 0x110   :  { %v354_v60 = vadd.f32 1.0, %v1218_v59  ;;  %v690_v59 = vld [vmem:[%s1575_s8 + $0x8] sm:$0xff] }
 0x111   :  { %v1220_v61 = vpop.eup %1219 }
 0x112   :  { %1225 = vrcp.f32 %v354_v60  ;;  %v355_v62 = vadd.f32 1.0, %v1220_v61  ;;  %v386_v60 = vld [vmem:[%s1577_s11] sm:$0xff]  ;;  %v387_v61 = vld [vmem:[%s1577_s11 + $0x8] sm:$0xff] }
 0x114   :  { %v1222_v63 = vpop.eup %1221  ;;  %1227 = vrcp.f32 %v355_v62  ;;  %v388_v62 = vld [vmem:[%s1577_s11 + $0x10] sm:$0xff] }
 0x115   :  { %v364_v2 = vmul.f32 %v1222_v63, %v326_v41  ;;  %v389_v63 = vld [vmem:[%s1577_s11 + $0x18] sm:$0xff] }
 0x116   :  { %v1224_v0 = vpop.eup %1223 }
 0x117   :  { %v365_v3 = vmul.f32 %v1224_v0, %v329_v43 }
 0x119   :  { %v368_v4 = vpack.c.bf16 %v365_v3, %v364_v2 }
 0x11b   :  { %1133 = vmatprep.subr.bf16.mxu1 %v368_v4 }
 0x11c   :  { %v1226_v5 = vpop.eup %1225  ;;  %1134 = vmatpush3.bf16.msra.mxu1 %v368_v4 }
 0x11d   :  { %v366_v7 = vmul.f32 %v1226_v5, %v334_v50 }
 0x11e   :  { %v1228_v6 = vpop.eup %1227 }
 0x11f   :  { %v367_v8 = vmul.f32 %v1228_v6, %v337_v53 }
 0x121   :  { %v369_v9 = vpack.c.bf16 %v367_v8, %v366_v7 }
 0x123   :  { %1135 = vmatprep.subr.bf16.mxu1 %v369_v9 }
 0x124   :  { %1136 = vmatpush3.bf16.msra.mxu1 %v369_v9 }
 0x125   :  { %1141 = vmatprep.subr.bf16.mxu1 %v1278_v11 }
 0x127   :  { %1138 = vmatmul.mubr.msk.bf16.vlgmr.msra.gmra.mrb[4].mxu1 %vm420_vm2, %v1204_v10 }
 0x128   :  { %1143 = vmatprep.mubr.msk.bf16.mxu1 %vm1279_vm3, %v1278_v11 }
 0x1fa   :  { %v1451_v15 = vpop.f32.mrb[4].mxu1 }
 0x1fb   :  { %v461_v16 = vpop.f32.mrb[5].mxu1 }
 0x1fc   :  { %v462_v17 = vadd.f32 %v461_v16, %v393_v14  ;;  %v1453_v18 = vpop.f32.mrb[6].mxu1 }
 0x1fd   :  { %v464_v20 = vpop.f32.mrb[7].mxu1 }
 0x1fe   :  { %v1044_v21 = vmul.f32 -1.442695, %v462_v17  ;;  %v465_v22 = vadd.f32 %v464_v20, %v398_v19 }
 0x200   :  { %1229 = vpow2.f32 %v1044_v21  ;;  %v1045_v23 = vmul.f32 -1.442695, %v465_v22 }
 0x202   :  { %1231 = vpow2.f32 %v1045_v23 }
 0x20a   :  { %v1230_v24 = vpop.eup %1229 }
 0x20b   :  { %v488_v25 = vadd.f32 1.0, %v1230_v24 }
 0x20c   :  { %v1232_v26 = vpop.eup %1231 }
 0x20d   :  { %1233 = vrcp.f32 %v488_v25  ;;  %v489_v27 = vadd.f32 1.0, %v1232_v26 }
 0x20f   :  { %1235 = vrcp.f32 %v489_v27 }
 0x217   :  { %v1234_v28 = vpop.eup %1233 }
 0x218   :  { %v1455_v30 = vmul.f32 %v1234_v28, %v462_v17 }
 0x219   :  { %v1236_v29 = vpop.eup %1235 }
 0x21a   :  { %v1457_v31 = vmul.f32 %v1236_v29, %v465_v22 }
 0x21c   :  { %v509_v32 = vpack.c.bf16 %v1457_v31, %v1455_v30 }
 0x21e   :  { %1142 = vmatpush3.bf16.msra.mxu1 %v509_v32 }
 0x21f   :  { %740 = vmatprep.subr.bf16.mxu1 %v1277_v1 }
 0x221   :  { %1144 = vmatmul.mubr.msk.bf16.vlgmr.msra.gmra.mrb[8].mxu1 %vm525_vm4, %v1205_v33 }
 0x222   :  { %1055 = vmatprep.mubr.msk.bf16.mxu1 %vm525_vm4, %v1206_v57 }
 0x2f4   :  { %v563_v35 = vpop.f32.mrb[8].mxu1 }
 0x2f5   :  { %v564_v36 = vadd.f32 %v563_v35, %v513_v34  ;;  %v1145_v37 = vpop.f32.mrb[9].mxu1 }
 0x2f6   :  { %v566_v39 = vpop.f32.mrb[10].mxu1 }
 0x2f7   :  { %v1050_v40 = vmul.f32 -1.442695, %v564_v36  ;;  %v567_v41 = vadd.f32 %v566_v39, %v518_v38  ;;  %v1146_v42 = vpop.f32.mrb[11].mxu1 }
 0x2f9   :  { %1237 = vpow2.f32 %v1050_v40  ;;  %v1051_v43 = vmul.f32 -1.442695, %v567_v41 }
 0x2fb   :  { %1239 = vpow2.f32 %v1051_v43 }
 0x303   :  { %v1238_v44 = vpop.eup %1237 }
 0x304   :  { %v576_v45 = vadd.f32 1.0, %v1238_v44 }
 0x305   :  { %v1240_v46 = vpop.eup %1239 }
 0x306   :  { %1241 = vrcp.f32 %v576_v45  ;;  %v577_v47 = vadd.f32 1.0, %v1240_v46 }
 0x308   :  { %1243 = vrcp.f32 %v577_v47 }
 0x310   :  { %v1242_v48 = vpop.eup %1241 }
 0x311   :  { %v582_v50 = vmul.f32 %v1242_v48, %v564_v36  ;;  %v1208_v48 = vld [vmem:[%s1576_s7] ss:$8 sps:$4 sm:$0xff]  }
 0x312   :  { %v1244_v51 = vpop.eup %1243 }
 0x313   :  { %v590_v52 = vmul.f32 %v1487_v49, %v582_v50  ;;  %v583_v53 = vmul.f32 %v1244_v51, %v567_v41 }
 0x315   :  { %v591_v54 = vmul.f32 %v1487_v49, %v583_v53  ;;  %613 = vrot.lane.b32.xlu0 %v590_v52, %s1280_s28  ;;  %649 = vst.msk [vmem:[#allocation2 + $0x40] sm:$0xff] %vm592_vm5, %v590_v52 }
 0x317   :  { %615 = vrot.lane.b32.xlu1 %v591_v54, %s1280_s28  ;;  %650 = vst.msk [vmem:[#allocation2 + $0x48] sm:$0xff] %vm592_vm5, %v591_v54 }
 0x319   :  { %622 = vrot.lane.b32.xlu0 %v590_v52, %s1281_s29 }
 0x31b   :  { %624 = vrot.lane.b32.xlu1 %v591_v54, %s1281_s29 }
 0x31c   :  { %v699_v32 = vld [vmem:[#allocation2 + $0x40] sm:$0xff] }
 0x31d   :  { %631 = vrot.lane.b32.xlu0 %v590_v52, %s1282_s30 }
 0x31e   :  { %v700_v28 = vld [vmem:[#allocation2 + $0x48] sm:$0xff] }
 0x31f   :  { %633 = vrot.lane.b32.xlu1 %v591_v54, %s1282_s30  ;;  %v713_v33 = vpack.c.bf16 %v700_v28, %v699_v32 }
 0x321   :  { %640 = vrot.lane.b32.xlu0 %v590_v52, %s1283_s1 }
 0x323   :  { %642 = vrot.lane.b32.xlu1 %v591_v54, %s1283_s1 }
 0x325   :  { %651 = vrot.lane.b32.xlu0 %v590_v52, %s1284_s13 }
 0x327   :  { %653 = vrot.lane.b32.xlu1 %v591_v54, %s1284_s13 }
 0x329   :  { %660 = vrot.lane.b32.xlu0 %v590_v52, %s1285_s14 }
 0x32b   :  { %662 = vrot.lane.b32.xlu1 %v591_v54, %s1285_s14 }
 0x32d   :  { %669 = vrot.lane.b32.xlu0 %v590_v52, %s1286_s15 }
 0x32f   :  { %671 = vrot.lane.b32.xlu1 %v591_v54, %s1286_s15 }
 0x331   :  { %678 = vrot.lane.b32.xlu0 %v590_v52, %s1287_s16 }
 0x333   :  { %680 = vrot.lane.b32.xlu1 %v591_v54, %s1287_s16 }
 0x335   :  { %402 = vperm.xlu0 %1174, %v376_v55  }
 0x337   :  { %407 = vperm.xlu1 %1175, %v377_v56  }
 0x339   :  { %720 = vperm.xlu0 %1174, %v689_v58  }
 0x33b   :  { %725 = vperm.xlu1 %1175, %v690_v59  }
 0x33d   :  { %930 = vperm.xlu0 %1174, %v386_v60  }
 0x33f   :  { %935 = vperm.xlu1 %1175, %v387_v61  }
 0x341   :  { %940 = vperm.xlu0 %1174, %v388_v62  }
 0x343   :  { %945 = vperm.xlu1 %1175, %v389_v63  }
 0x387   :  { %v614_v0 = vpop.permute.xlu0 %613 }
 0x388   :  { %620 = vst.msk [vmem:[#allocation2] sm:$0xff] %vm619_vm6, %v614_v0  ;;  %v1211_v0 = vld [vmem:[%s1579_s9] sm:$0xff]  }
 0x389   :  { %v616_v2 = vpop.permute.xlu1 %615 }
 0x38a   :  { %621 = vst.msk [vmem:[#allocation2 + $0x8] sm:$0xff] %vm619_vm6, %v616_v2 }
 0x38b   :  { %v623_v3 = vpop.permute.xlu0 %622 }
 0x38c   :  { %629 = vst.msk [vmem:[#allocation2 + $0x10] sm:$0xff] %vm628_vm7, %v623_v3 }
 0x38d   :  { %v625_v4 = vpop.permute.xlu1 %624 }
 0x38e   :  { %630 = vst.msk [vmem:[#allocation2 + $0x18] sm:$0xff] %vm628_vm7, %v625_v4 }
 0x38f   :  { %v632_v5 = vpop.permute.xlu0 %631  ;;  %v691_v7 = vld [vmem:[#allocation2] sm:$0xff] }
 0x390   :  { %638 = vst.msk [vmem:[#allocation2 + $0x20] sm:$0xff] %vm637_vm8, %v632_v5 }
 0x391   :  { %v634_v6 = vpop.permute.xlu1 %633  ;;  %v692_v8 = vld [vmem:[#allocation2 + $0x8] sm:$0xff] }
 0x392   :  { %639 = vst.msk [vmem:[#allocation2 + $0x28] sm:$0xff] %vm637_vm8, %v634_v6  ;;  %v709_v9 = vpack.c.bf16 %v692_v8, %v691_v7 }
 0x393   :  { %v641_v10 = vpop.permute.xlu0 %640  ;;  %v693_v12 = vld [vmem:[#allocation2 + $0x10] sm:$0xff] }
 0x394   :  { %647 = vst.msk [vmem:[#allocation2 + $0x30] sm:$0xff] %vm646_vm9, %v641_v10  ;;  %741 = vmatpush1.bf16.msra.mxu1 %v709_v9 }
 0x395   :  { %v643_v11 = vpop.permute.xlu1 %642  ;;  %742 = vmatprep.subr.bf16.mxu1 %v1277_v1  ;;  %v694_v13 = vld [vmem:[#allocation2 + $0x18] sm:$0xff] }
 0x396   :  { %648 = vst.msk [vmem:[#allocation2 + $0x38] sm:$0xff] %vm646_vm9, %v643_v11  ;;  %v710_v14 = vpack.c.bf16 %v694_v13, %v693_v12 }
 0x397   :  { %v652_v16 = vpop.permute.xlu0 %651  ;;  %v695_v19 = vld [vmem:[#allocation2 + $0x20] sm:$0xff] }
 0x398   :  { %658 = vst.msk [vmem:[#allocation2 + $0x50] sm:$0xff] %vm657_vm10, %v652_v16  ;;  %743 = vmatpush1.bf16.msra.mxu1 %v710_v14 }
 0x399   :  { %v654_v17 = vpop.permute.xlu1 %653  ;;  %744 = vmatprep.subr.bf16.mxu1 %v1277_v1  ;;  %v696_v20 = vld [vmem:[#allocation2 + $0x28] sm:$0xff] }
 0x39a   :  { %659 = vst.msk [vmem:[#allocation2 + $0x58] sm:$0xff] %vm657_vm10, %v654_v17  ;;  %v711_v21 = vpack.c.bf16 %v696_v20, %v695_v19 }
 0x39b   :  { %v661_v22 = vpop.permute.xlu0 %660  ;;  %v697_v24 = vld [vmem:[#allocation2 + $0x30] sm:$0xff] }
 0x39c   :  { %667 = vst.msk [vmem:[#allocation2 + $0x60] sm:$0xff] %vm666_vm11, %v661_v22  ;;  %745 = vmatpush1.bf16.msra.mxu1 %v711_v21 }
 0x39d   :  { %v663_v23 = vpop.permute.xlu1 %662  ;;  %746 = vmatprep.subr.bf16.mxu1 %v1277_v1  ;;  %v698_v25 = vld [vmem:[#allocation2 + $0x38] sm:$0xff] }
 0x39e   :  { %668 = vst.msk [vmem:[#allocation2 + $0x68] sm:$0xff] %vm666_vm11, %v663_v23  ;;  %v712_v26 = vpack.c.bf16 %v698_v25, %v697_v24  ;;  %v1212_v25 = vld [vmem:[%s1579_s9 + $0x8] sm:$0xff]  }
 0x39f   :  { %v670_v27 = vpop.permute.xlu0 %669  ;;  %v701_v37 = vld [vmem:[#allocation2 + $0x50] sm:$0xff] }
 0x3a0   :  { %676 = vst.msk [vmem:[#allocation2 + $0x70] sm:$0xff] %vm675_vm12, %v670_v27  ;;  %747 = vmatpush1.bf16.msra.mxu1 %v712_v26 }
 0x3a1   :  { %v672_v29 = vpop.permute.xlu1 %671  ;;  %748 = vmatprep.subr.bf16.mxu1 %v1277_v1  ;;  %v702_v35 = vld [vmem:[#allocation2 + $0x58] sm:$0xff] }
 0x3a2   :  { %677 = vst.msk [vmem:[#allocation2 + $0x78] sm:$0xff] %vm675_vm12, %v672_v29  ;;  %v714_v38 = vpack.c.bf16 %v702_v35, %v701_v37 }
 0x3a3   :  { %v679_v34 = vpop.permute.xlu0 %678  ;;  %v703_v40 = vld [vmem:[#allocation2 + $0x60] sm:$0xff] }
 0x3a4   :  { %685 = vst.msk [vmem:[#allocation2 + $0x80] sm:$0xff] %vm684_vm13, %v679_v34  ;;  %749 = vmatpush1.bf16.msra.mxu1 %v713_v33 }
 0x3a5   :  { %v681_v36 = vpop.permute.xlu1 %680  ;;  %750 = vmatprep.subr.bf16.mxu1 %v1277_v1  ;;  %v704_v39 = vld [vmem:[#allocation2 + $0x68] sm:$0xff] }
 0x3a6   :  { %686 = vst.msk [vmem:[#allocation2 + $0x88] sm:$0xff] %vm684_vm13, %v681_v36  ;;  %v715_v41 = vpack.c.bf16 %v704_v39, %v703_v40 }
 0x3a7   :  { %v705_v43 = vld [vmem:[#allocation2 + $0x70] sm:$0xff] }
 0x3a8   :  { %751 = vmatpush1.bf16.msra.mxu1 %v714_v38 }
 0x3a9   :  { %752 = vmatprep.subr.bf16.mxu1 %v1277_v1  ;;  %v706_v42 = vld [vmem:[#allocation2 + $0x78] sm:$0xff] }
 0x3aa   :  { %v716_v44 = vpack.c.bf16 %v706_v42, %v705_v43 }
 0x3ab   :  { %v707_v46 = vld [vmem:[#allocation2 + $0x80] sm:$0xff] }
 0x3ac   :  { %753 = vmatpush1.bf16.msra.mxu1 %v715_v41 }
 0x3ad   :  { %754 = vmatprep.subr.bf16.mxu1 %v1277_v1  ;;  %v708_v45 = vld [vmem:[#allocation2 + $0x88] sm:$0xff] }
 0x3ae   :  { %v717_v47 = vpack.c.bf16 %v708_v45, %v707_v46 }
 0x3b0   :  { %755 = vmatpush1.bf16.msra.mxu1 %v716_v44 }
 0x3b1   :  { %756 = vmatprep.subr.bf16.mxu1 %v1277_v1 }
 0x3b4   :  { %v403_v50 = vpop.permute.xlu0 %402  ;;  %757 = vmatpush1.bf16.msra.mxu1 %v717_v47 }
 0x3b5   :  { %v470_v51 = vadd.f32 %v1451_v15, %v403_v50  ;;  %v1209_v15 = vld [vmem:[%s1578_s10] sm:$0xff]  }
 0x3b6   :  { %v408_v52 = vpop.permute.xlu1 %407  ;;  %1149 = vmatprep.mubr.msk.bf16.mxu0 %vm525_vm4, %v1209_v15 }
 0x3b7   :  { %v1046_v53 = vmul.f32 -1.442695, %v470_v51  ;;  %v473_v54 = vadd.f32 %v1453_v18, %v408_v52  ;;  %773 = vmatmul.mubr.bf16.vlgmr.msra.gmra.mrb[12].mxu1 %v1208_v48  ;;  %v1210_v18 = vld [vmem:[%s1578_s10 + $0x8] sm:$0xff]  }
 0x3b8   :  { %v721_v2 = vpop.permute.xlu0 %720 }
 0x3b9   :  { %1245 = vpow2.f32 %v1046_v53  ;;  %v1047_v55 = vmul.f32 -1.442695, %v473_v54 }
 0x3ba   :  { %v726_v6 = vpop.permute.xlu1 %725 }
 0x3bb   :  { %1247 = vpow2.f32 %v1047_v55 }
 0x3bc   :  { %v931_v26 = vpop.permute.xlu0 %930 }
 0x3be   :  { %v936_v27 = vpop.permute.xlu1 %935 }
 0x3c0   :  { %v941_v28 = vpop.permute.xlu0 %940 }
 0x3c2   :  { %v946_v34 = vpop.permute.xlu1 %945 }
 0x3c3   :  { %v1246_v56 = vpop.eup %1245 }
 0x3c4   :  { %v490_v1 = vadd.f32 1.0, %v1246_v56 }
 0x3c5   :  { %v1248_v57 = vpop.eup %1247 }
 0x3c6   :  { %1249 = vrcp.f32 %v490_v1  ;;  %v491_v58 = vadd.f32 1.0, %v1248_v57 }
 0x3c8   :  { %1251 = vrcp.f32 %v491_v58 }
 0x3d0   :  { %v1250_v59 = vpop.eup %1249 }
 0x3d1   :  { %v502_v61 = vmul.f32 %v1250_v59, %v470_v51 }
 0x3d2   :  { %v1252_v60 = vpop.eup %1251 }
 0x3d3   :  { %v503_v62 = vmul.f32 %v1252_v60, %v473_v54 }
 0x3d5   :  { %v504_v63 = vpack.c.bf16 %v503_v62, %v502_v61 }
 0x3d7   :  { %1147 = vmatprep.subr.bf16.mxu0 %v504_v63 }
 0x3d8   :  { %1148 = vmatpush3.bf16.msra.mxu0 %v504_v63 }
 0x3db   :  { %1150 = vmatmul.mubr.msk.bf16.vlgmr.msra.gmra.mrb[8].mxu0 %vm525_vm4, %v1210_v18 }
 0x3dc   :  { %1155 = vmatprep.mubr.msk.bf16.mxu0 %vm525_vm4, %v1211_v0 }
 0x48a   :  { %v774_v3 = vpop.f32.mrb[12].mxu1 }
 0x48b   :  { %v775_v4 = vadd.f32 %v774_v3, %v721_v2  ;;  %v776_v5 = vpop.f32.mrb[13].mxu1 }
 0x48c   :  { %v777_v7 = vpop.f32.mrb[14].mxu1 }
 0x48d   :  { %v1056_v8 = vmul.f32 -1.442695, %v775_v4  ;;  %v778_v9 = vadd.f32 %v777_v7, %v726_v6  ;;  %v779_v10 = vpop.f32.mrb[15].mxu1 }
 0x48f   :  { %1253 = vpow2.f32 %v1056_v8  ;;  %v1057_v11 = vmul.f32 -1.442695, %v778_v9 }
 0x491   :  { %1255 = vpow2.f32 %v1057_v11 }
 0x499   :  { %v1254_v12 = vpop.eup %1253 }
 0x49a   :  { %v787_v13 = vadd.f32 1.0, %v1254_v12 }
 0x49b   :  { %v1256_v14 = vpop.eup %1255 }
 0x49c   :  { %1257 = vrcp.f32 %v787_v13  ;;  %v788_v16 = vadd.f32 1.0, %v1256_v14 }
 0x49e   :  { %1259 = vrcp.f32 %v788_v16 }
 0x4a6   :  { %v1258_v17 = vpop.eup %1257 }
 0x4a7   :  { %v793_v19 = vmul.f32 %v1258_v17, %v775_v4 }
 0x4a8   :  { %v1260_v20 = vpop.eup %1259 }
 0x4a9   :  { %v794_v21 = vmul.f32 %v1260_v20, %v778_v9  ;;  %v795_v22 = vadd.f32 %v793_v19, %v1455_v30 }
 0x4ab   :  { %v796_v23 = vadd.f32 %v794_v21, %v1457_v31 }
 0x4ad   :  { %v797_v24 = vpack.c.bf16 %v796_v23, %v795_v22 }
 0x4af   :  { %1153 = vmatprep.subr.bf16.mxu0 %v797_v24 }
 0x4b0   :  { %1154 = vmatpush3.bf16.msra.mxu0 %v797_v24 }
 0x4b3   :  { %1156 = vmatmul.mubr.msk.bf16.vlgmr.msra.gmra.mrb[8].mxu0 %vm525_vm4, %v1212_v25 }
 0x586   :  { %v1157_v29 = vpop.f32.mrb[8].mxu0 }
 0x587   :  { %v950_v32 = vadd.f32 %v1157_v29, %v941_v28  ;;  %v913_v33 = vpop.f32.mrb[9].mxu0 }
 0x588   :  { %v948_v35 = vadd.f32 %v931_v26, %v913_v33  ;;  %v1158_v30 = vpop.f32.mrb[10].mxu0 }
 0x589   :  { %v1068_v36 = vmul.f32 -1.442695, %v950_v32  ;;  %v951_v31 = vadd.f32 %v1158_v30, %v946_v34  ;;  %v916_v37 = vpop.f32.mrb[11].mxu0 }
 0x58a   :  { %v1066_v38 = vmul.f32 -1.442695, %v948_v35  ;;  %v949_v39 = vadd.f32 %v936_v27, %v916_v37 }
 0x58b   :  { %1261 = vpow2.f32 %v1068_v36  ;;  %v1069_v40 = vmul.f32 -1.442695, %v951_v31 }
 0x58c   :  { %1263 = vpow2.f32 %v1066_v38  ;;  %v1067_v41 = vmul.f32 -1.442695, %v949_v39 }
 0x58d   :  { %1265 = vpow2.f32 %v1069_v40 }
 0x58e   :  { %1267 = vpow2.f32 %v1067_v41 }
 0x595   :  { %v1262_v42 = vpop.eup %1261 }
 0x596   :  { %v1264_v43 = vpop.eup %1263  ;;  %v966_v44 = vadd.f32 1.0, %v1262_v42 }
 0x597   :  { %v1266_v45 = vpop.eup %1265  ;;  %v964_v46 = vadd.f32 1.0, %v1264_v43 }
 0x598   :  { %v1268_v47 = vpop.eup %1267  ;;  %1269 = vrcp.f32 %v966_v44  ;;  %v967_v48 = vadd.f32 1.0, %v1266_v45 }
 0x599   :  { %1271 = vrcp.f32 %v964_v46  ;;  %v965_v50 = vadd.f32 1.0, %v1268_v47 }
 0x59a   :  { %1273 = vrcp.f32 %v967_v48 }
 0x59b   :  { %1275 = vrcp.f32 %v965_v50 }
 0x5a2   :  { %v1270_v51 = vpop.eup %1269 }
 0x5a3   :  { %v1272_v52 = vpop.eup %1271  ;;  %v978_v53 = vmul.f32 %v1270_v51, %v950_v32 }
 0x5a4   :  { %v1274_v54 = vpop.eup %1273  ;;  %v976_v55 = vmul.f32 %v1272_v52, %v948_v35 }
 0x5a5   :  { %v1276_v56 = vpop.eup %1275  ;;  %v982_v1 = vmul.f32 %v1487_v49, %v978_v53  ;;  %v979_v57 = vmul.f32 %v1274_v54, %v951_v31 }
 0x5a6   :  { %v980_v58 = vmul.f32 %v1487_v49, %v976_v55  ;;  %v977_v59 = vmul.f32 %v1276_v56, %v949_v39 }
 0x5a7   :  { %v1076_v60 = vpack.c.bf16 %v982_v1, %v982_v1  ;;  %v983_v61 = vmul.f32 %v1487_v49, %v979_v57 }
 0x5a8   :  { %v1074_v62 = vpack.c.bf16 %v980_v58, %v980_v58  ;;  %v981_v63 = vmul.f32 %v1487_v49, %v977_v59 }
 0x5a9   :  { %1003 = vst.msk [vmem:[%s1580_s12 + $0x8] sm:$0xf] %vm1000_vm14, %v1076_v60  ;;  %v1077_v15 = vpack.c.bf16 %v983_v61, %v983_v61 }
 0x5aa   :  { %1001 = vst.msk [vmem:[%s1580_s12] sm:$0xf] %vm1000_vm14, %v1074_v62  ;;  %v1075_v18 = vpack.c.bf16 %v981_v63, %v981_v63 }
 0x5ab   :  { %1004 = vst.msk [vmem:[%s1580_s12 + $0xc] sm:$0xf] %vm1000_vm14, %v1077_v15 }
 0x5ac   :  { %1002 = vst.msk [vmem:[%s1580_s12 + $0x4] sm:$0xf] %vm1000_vm14, %v1075_v18 }

// kernel: cspdarknet_forward.9
= control target key start
LH: loop header
LB: loop body
LE: loop exit
PB: predicated region body
PF: predicated region fallthrough
CT: control target
= control target key end

     0   :  { %v3758_v1 = vmov 0   ;;  %vm292_vm0 = vcmask 1040384   ;;  %vm279_vm1 = vcmask 269312   ;;  %vm526_vm2 = vcmask 523264   ;;  %s3761_s22 = smov 8   ;;  %s3762_s24 = smov 124   ;;  %s4703_s0 = inlined_call_operand.vmem [shape: bf16[289,32], index: 0, kind: input, shape index: {}]   ;;  %s4704_s2 = inlined_call_operand.vmem [shape: bf16[64,289], index: 2, kind: input, shape index: {}]   ;;  %s4705_s3 = inlined_call_operand.vmem [shape: bf16[32,64], index: 3, kind: input, shape index: {}]   ;;  %s4706_s4 = inlined_call_operand.vmem [shape: f32[32,1], index: 4, kind: input, shape index: {}]   ;;  %s4707_s1 = inlined_call_operand.vmem [shape: f32[1,32], index: 1, kind: input, shape index: {}]   ;;  %s4708_s5 = inlined_call_operand.vmem [shape: bf16[4,64,32], index: 5, kind: input, shape index: {}]   ;;  %s4709_s6 = inlined_call_operand.vmem [shape: f32[64,1], index: 6, kind: input, shape index: {}, may-alias: {6,8,15}]   ;;  %s4710_s8 = inlined_call_operand.vmem [shape: f32[64,1], index: 8, kind: input, shape index: {}, may-alias: {6,8,15}]   ;;  %s4711_s10 = inlined_call_operand.vmem [shape: f32[1,32,1], index: 10, kind: input, shape index: {}, may-alias: {10,12}]   ;;  %s4712_s7 = inlined_call_operand.vmem [shape: bf16[64,64], index: 7, kind: input, shape index: {}]   ;;  %s4713_s9 = inlined_call_operand.vmem [shape: bf16[1,32,32], index: 9, kind: input, shape index: {}]   ;;  %s4714_s11 = inlined_call_operand.vmem [shape: bf16[1,32,288], index: 11, kind: input, shape index: {}]   ;;  %s4715_s12 = inlined_call_operand.vmem [shape: f32[1,32,1], index: 12, kind: input, shape index: {}, may-alias: {10,12}]   ;;  %s4716_s15 = inlined_call_operand.vmem [shape: f32[64,1], index: 15, kind: input, shape index: {}, may-alias: {6,8,15}]   ;;  %s4717_s14 = inlined_call_operand.vmem [shape: bf16[64,32], index: 14, kind: input, shape index: {}]   ;;  %s4718_s13 = inlined_call_operand.vmem [shape: bf16[64,32], index: 13, kind: input, shape index: {}]   ;;  %s4719_s16 = inlined_call_operand.vmem [shape: bf16[64,32], index: 16, kind: output, shape index: {}]  }
   0x1   :  { %4721 = sst [smem:[#allocation4_spill]] %s4703_s0  ;;  %3505 = vset.pattern.permute.xlu0 %v3758_v1  ;;  %3506 = vset.pattern.permute.xlu1 %v3758_v1  ;;  %v294_v15 = vsel %vm292_vm0, 65535, %v3758_v1  ;;  %v3528_v18 = vld [vmem:[%s4704_s2 + $0x4] ss:$12 sps:$4 sm:$0xff]   ;;  %v3529_v20 = vld [vmem:[%s4704_s2 + $0x8] ss:$12 sps:$4 sm:$0xff]  }
   0x2   :  { %s4722_s23 = sld [smem:[#allocation4_spill]]  ;;  %330 = vmatprep.mubr.bf16.mxu0 %v3528_v18  ;;  %3331 = vmatprep.mubr.msk.bf16.mxu1 %vm279_vm1, %v3529_v20  ;;  %v3530_v21 = vld [vmem:[%s4704_s2 + $0x20] ss:$12 sps:$4 sm:$0xff]   ;;  %v3537_v24 = vld [vmem:[%s4704_s2 + $0x38] ss:$12 sps:$4 sm:$0xff]   ;;  %v490_v36 = vld [vmem:[%s4706_s4 + $0x10] sm:$0xff] }
   0x3   :  { %v3526_v26 = vld [vmem:[%s4704_s2] ss:$12 sps:$4 sm:$0xff]   ;;  %v3538_v27 = vld [vmem:[%s4704_s2 + $0x50] ss:$12 sps:$4 sm:$0xff]   ;;  %v3533_v29 = vld [vmem:[%s4704_s2 + $0x18] ss:$12 sps:$4 sm:$0xff]   ;;  %508 = vperm.xlu1 %3506, %v490_v36  }
   0x4   :  { %v3531_v28 = vld [vmem:[%s4704_s2 + $0x1c] ss:$12 sps:$4 sm:$0xff]   ;;  %v3534_v30 = vld [vmem:[%s4704_s2 + $0x34] ss:$12 sps:$4 sm:$0xff]   ;;  %v3539_v32 = vld [vmem:[%s4704_s2 + $0x4c] ss:$12 sps:$4 sm:$0xff]  }
   0x5   :  { %v3536_v31 = vld [vmem:[%s4704_s2 + $0x30] ss:$12 sps:$4 sm:$0xff]   ;;  %v3541_v33 = vld [vmem:[%s4704_s2 + $0x48] ss:$12 sps:$4 sm:$0xff]   ;;  %v3542_v34 = vld [vmem:[%s4705_s3] sm:$0xff]   ;;  %vm610_vm3 = vcmask 424960  }
   0x6   :  { %v488_v35 = vld [vmem:[%s4706_s4] sm:$0xff]  ;;  %v489_v37 = vld [vmem:[%s4706_s4 + $0x8] sm:$0xff]  ;;  %v491_v38 = vld [vmem:[%s4706_s4 + $0x18] sm:$0xff]  ;;  %vm653_vm4 = vcmask 343120   ;;  %s3763_s25 = smov 127   ;;  %s3764_s26 = smov 126  }
   0x7   :  { %498 = vperm.xlu0 %3505, %v488_v35   ;;  %513 = vperm.xlu1 %3506, %v491_v38   ;;  %s3765_s27 = smov 125   ;;  %s3766_s28 = smov 2   ;;  %vm1319_vm5 = vcmask 261120   ;;  %vm2272_vm6 = vcmask 261160   ;;  %vm2344_vm7 = vcmask 252928   ;;  %vm2289_vm8 = vcmask 261152  }
   0x8   :  { %v3507_v0 = vld [vmem:[%s4722_s23 + $0x40] sm:$0xff]   ;;  %v3509_v3 = vld [vmem:[%s4722_s23 + $0x48] sm:$0xff]   ;;  %v3511_v5 = vld [vmem:[%s4722_s23 + $0x50] sm:$0xff]   ;;  %s3767_s29 = smov 112   ;;  %s3768_s30 = smov 120   ;;  %vm2361_vm9 = vcmask 236544  }
   0x9   :  { %v3508_v2 = vld [vmem:[%s4722_s23] sm:$0xff]   ;;  %3192 = vmatprep.subr.bf16.mxu0 %v3507_v0  ;;  %v3510_v4 = vld [vmem:[%s4722_s23 + $0x8] sm:$0xff]   ;;  %v3512_v6 = vld [vmem:[%s4722_s23 + $0x10] sm:$0xff]   ;;  %s3769_s0 = smov 116   ;;  %vm2306_vm10 = vcmask 261144   ;;  %vm2378_vm11 = vcmask 228352  }
   0xa   :  { %3193 = vmatpush3.bf16.msra.mxu0 %v3508_v2  ;;  %v3513_v7 = vld [vmem:[%s4722_s23 + $0x58] sm:$0xff]   ;;  %v3515_v9 = vld [vmem:[%s4722_s23 + $0x60] sm:$0xff]   ;;  %v3522_v12 = vld [vmem:[%s4722_s23 + $0x88] sm:$0xff]   ;;  %vm2323_vm12 = vcmask 261128   ;;  %vm2395_vm13 = vcmask 220160   ;;  %vm2988_vm14 = vcmask 257024  }
   0xb   :  { %3194 = vmatprep.subr.bf16.mxu0 %v3509_v3  ;;  %v3514_v8 = vld [vmem:[%s4722_s23 + $0x18] sm:$0xff]   ;;  %v3519_v10 = vld [vmem:[%s4722_s23 + $0x80] sm:$0xff]   ;;  %v3517_v13 = vld [vmem:[%s4722_s23 + $0x68] sm:$0xff]   ;;  %503 = vperm.xlu0 %3505, %v489_v37  }
   0xc   :  { %v3516_v11 = vld [vmem:[%s4722_s23 + $0x20] sm:$0xff]   ;;  %3325 = vmatprep.subr.bf16.mxu1 %v3519_v10  ;;  %v3518_v14 = vld [vmem:[%s4722_s23 + $0x28] sm:$0xff]   ;;  %v3525_v16 = vld [vmem:[%s4722_s23 + $0x90] ss:$0 sps:$4 sm:$0x11]  }
   0xd   :  { %3326 = vmatpush3.bf16.msra.mxu1 %v3519_v10  ;;  %v3520_v17 = vld [vmem:[%s4722_s23 + $0x70] sm:$0xff]   ;;  %v296_v19 = vand.u32 %v3525_v16, %v294_v15  ;;  %v3523_v23 = vld [vmem:[%s4722_s23 + $0x78] sm:$0xff]  }
   0xe   :  { %3195 = vmatpush3.bf16.msra.mxu0 %v3510_v4  ;;  %3327 = vmatprep.subr.bf16.mxu1 %v3522_v12  ;;  %v3521_v22 = vld [vmem:[%s4722_s23 + $0x30] sm:$0xff]   ;;  %v3524_v25 = vld [vmem:[%s4722_s23 + $0x38] sm:$0xff]  }
   0xf   :  { %3196 = vmatprep.subr.bf16.mxu0 %v3511_v5 }
  0x11   :  { %3328 = vmatpush3.bf16.msra.mxu1 %v3522_v12 }
  0x12   :  { %3197 = vmatpush3.bf16.msra.mxu0 %v3512_v6  ;;  %3329 = vmatprep.subr.bf16.mxu1 %v296_v19 }
  0x13   :  { %3198 = vmatprep.subr.bf16.mxu0 %v3513_v7 }
  0x15   :  { %3330 = vmatpush3.bf16.msra.mxu1 %v296_v19 }
  0x16   :  { %3199 = vmatpush3.bf16.msra.mxu0 %v3514_v8 }
  0x17   :  { %3200 = vmatprep.subr.bf16.mxu0 %v3515_v9 }
  0x18   :  { %3332 = vmatmul.mubr.msk.bf16.vlgmr.msra.gmra.mrb[0].mxu1 %vm279_vm1, %v3530_v21 }
  0x19   :  { %3335 = vmatprep.mubr.msk.bf16.mxu1 %vm279_vm1, %v3537_v24 }
  0x1a   :  { %3201 = vmatpush3.bf16.msra.mxu0 %v3516_v11 }
  0x1b   :  { %3202 = vmatprep.subr.bf16.mxu0 %v3517_v13 }
  0x1e   :  { %3203 = vmatpush3.bf16.msra.mxu0 %v3518_v14 }
  0x1f   :  { %3204 = vmatprep.subr.bf16.mxu0 %v3520_v17 }
  0x20   :  { %3336 = vmatmul.mubr.msk.bf16.gmra.mrb[4].mxu1 %vm279_vm1, %v3538_v27 }
  0x21   :  { %3347 = vmatprep.mubr.msk.bf16.mxu1 %vm526_vm2, %v3542_v34 }
  0x22   :  { %3205 = vmatpush3.bf16.msra.mxu0 %v3521_v22 }
  0x23   :  { %3206 = vmatprep.subr.bf16.mxu0 %v3523_v23 }
  0x26   :  { %3207 = vmatpush3.bf16.msra.mxu0 %v3524_v25 }
  0x29   :  { %331 = vmatmul.mubr.bf16.vlgmr.msra.gmra.mrb[0].mxu0 %v3526_v26 }
  0x2a   :  { %338 = vmatprep.mubr.bf16.mxu0 %v3531_v28 }
  0x31   :  { %339 = vmatmul.mubr.bf16.gmra.mrb[4].mxu0 %v3533_v29 }
  0x32   :  { %346 = vmatprep.mubr.bf16.mxu0 %v3534_v30 }
  0x39   :  { %347 = vmatmul.mubr.bf16.gmra.mrb[8].mxu0 %v3536_v31 }
  0x3a   :  { %354 = vmatprep.mubr.bf16.mxu0 %v3539_v32 }
  0x41   :  { %355 = vmatmul.mubr.bf16.gmra.mrb[12].mxu0 %v3541_v33 }
  0xeb   :  { %v3333_v39 = vpop.f32.mrb[0].mxu1 }
  0xec   :  { %v397_v40 = vpop.f32.mrb[1].mxu1 }
  0xed   :  { %v3334_v41 = vpop.f32.mrb[2].mxu1 }
  0xee   :  { %v400_v42 = vpop.f32.mrb[3].mxu1 }
  0xf3   :  { %v3337_v44 = vpop.f32.mrb[4].mxu1 }
  0xf4   :  { %v413_v46 = vpop.f32.mrb[5].mxu1 }
  0xf5   :  { %v3338_v49 = vpop.f32.mrb[6].mxu1 }
  0xf6   :  { %v416_v51 = vpop.f32.mrb[7].mxu1 }
  0xfc   :  { %v3208_v43 = vpop.f32.mrb[0].mxu0 }
  0xfd   :  { %v3209_v45 = vpop.f32.mrb[1].mxu0 }
  0xfe   :  { %v3210_v47 = vadd.f32 %v3209_v45, %v3208_v43  ;;  %v3211_v48 = vpop.f32.mrb[2].mxu0 }
  0xff   :  { %v3212_v50 = vpop.f32.mrb[3].mxu0 }
 0x100   :  { %v3213_v52 = vadd.f32 %v3212_v50, %v3211_v48  ;;  %v398_v53 = vadd.f32 %v3210_v47, %v397_v40 }
 0x102   :  { %v3036_v54 = vmul.f32 -1.442695, %v398_v53  ;;  %v401_v55 = vadd.f32 %v3213_v52, %v400_v42 }
 0x104   :  { %3582 = vpow2.f32 %v3036_v54  ;;  %v3037_v56 = vmul.f32 -1.442695, %v401_v55  ;;  %v3214_v57 = vpop.f32.mrb[4].mxu0 }
 0x105   :  { %v3215_v58 = vpop.f32.mrb[5].mxu0 }
 0x106   :  { %3584 = vpow2.f32 %v3037_v56  ;;  %v3216_v59 = vadd.f32 %v3215_v58, %v3214_v57  ;;  %v3217_v60 = vpop.f32.mrb[6].mxu0 }
 0x107   :  { %v3218_v61 = vpop.f32.mrb[7].mxu0 }
 0x108   :  { %v406_v62 = vadd.f32 %v3333_v39, %v3216_v59  ;;  %v3219_v63 = vadd.f32 %v3218_v61, %v3217_v60  ;;  %v3543_v59 = vld [vmem:[%s4705_s3 + $0x8] sm:$0xff]   ;;  %v3759_v60 = vmov -10000.0   ;;  %v509_v61 = vpop.permute.xlu1 %508 }
 0x109   :  { %611 = vst.msk [vmem:[#allocation3] sm:$0xff] %vm610_vm3, %v3759_v60  ;;  %612 = vst.msk [vmem:[#allocation3 + $0x8] sm:$0xff] %vm610_vm3, %v3759_v60 }
 0x10a   :  { %v3038_v0 = vmul.f32 -1.442695, %v406_v62  ;;  %v409_v1 = vadd.f32 %v3334_v41, %v3219_v63  ;;  %613 = vst.msk [vmem:[#allocation3 + $0x10] sm:$0xff] %vm610_vm3, %v3759_v60  ;;  %614 = vst.msk [vmem:[#allocation3 + $0x18] sm:$0xff] %vm610_vm3, %v3759_v60 }
 0x10c   :  { %3586 = vpow2.f32 %v3038_v0  ;;  %v3039_v2 = vmul.f32 -1.442695, %v409_v1  ;;  %v3220_v3 = vpop.f32.mrb[8].mxu0  ;;  %v514_v0 = vpop.permute.xlu1 %513 }
 0x10d   :  { %v3221_v4 = vpop.f32.mrb[9].mxu0 }
 0x10e   :  { %v3583_v5 = vpop.eup %3582  ;;  %3588 = vpow2.f32 %v3039_v2  ;;  %v3222_v6 = vadd.f32 %v3221_v4, %v3220_v3  ;;  %v3223_v7 = vpop.f32.mrb[10].mxu0 }
 0x10f   :  { %v452_v8 = vadd.f32 1.0, %v3583_v5  ;;  %v3224_v9 = vpop.f32.mrb[11].mxu0 }
 0x110   :  { %v3585_v10 = vpop.eup %3584  ;;  %v3225_v11 = vadd.f32 %v3224_v9, %v3223_v7  ;;  %v414_v12 = vadd.f32 %v3222_v6, %v413_v46 }
 0x111   :  { %3590 = vrcp.f32 %v452_v8  ;;  %v453_v13 = vadd.f32 1.0, %v3585_v10 }
 0x112   :  { %v3040_v14 = vmul.f32 -1.442695, %v414_v12  ;;  %v417_v15 = vadd.f32 %v3225_v11, %v416_v51 }
 0x113   :  { %3592 = vrcp.f32 %v453_v13 }
 0x114   :  { %3594 = vpow2.f32 %v3040_v14  ;;  %v3041_v16 = vmul.f32 -1.442695, %v417_v15  ;;  %v3226_v17 = vpop.f32.mrb[12].mxu0 }
 0x115   :  { %v3227_v18 = vpop.f32.mrb[13].mxu0 }
 0x116   :  { %v3587_v19 = vpop.eup %3586  ;;  %3596 = vpow2.f32 %v3041_v16  ;;  %v3228_v20 = vadd.f32 %v3227_v18, %v3226_v17  ;;  %v3229_v21 = vpop.f32.mrb[14].mxu0  ;;  %v616_v16 = vlaneseq }
 0x117   :  { %v454_v22 = vadd.f32 1.0, %v3587_v19  ;;  %v3230_v23 = vpop.f32.mrb[15].mxu0 }
 0x118   :  { %v3589_v24 = vpop.eup %3588  ;;  %v422_v25 = vadd.f32 %v3337_v44, %v3228_v20  ;;  %v3231_v26 = vadd.f32 %v3230_v23, %v3229_v21  ;;  %v54_v21 = vld [vmem:[%s4707_s1] sm:$0x1]  ;;  %v617_v23 = vshrl.u32 %v616_v16, 7  ;;  %s3760_s1 = smov 10  }
 0x119   :  { %3598 = vrcp.f32 %v454_v22  ;;  %v455_v27 = vadd.f32 1.0, %v3589_v24  ;;  %v625_v24 = vsub.f32 1.0, %v54_v21 }
 0x11a   :  { %v3042_v28 = vmul.f32 -1.442695, %v422_v25  ;;  %v425_v29 = vadd.f32 %v3338_v49, %v3231_v26 }
 0x11b   :  { %v3591_v30 = vpop.eup %3590  ;;  %3600 = vrcp.f32 %v455_v27  ;;  %v626_v26 = vmul.f32 -10000.0, %v625_v24 }
 0x11c   :  { %3602 = vpow2.f32 %v3042_v28  ;;  %v3043_v31 = vmul.f32 -1.442695, %v425_v29  ;;  %v476_v34 = vmul.f32 %v3591_v30, %v398_v53 }
 0x11d   :  { %v3593_v32 = vpop.eup %3592 }
 0x11e   :  { %v3595_v33 = vpop.eup %3594  ;;  %v477_v35 = vmul.f32 %v3593_v32, %v401_v55  ;;  %3604 = vpow2.f32 %v3043_v31 }
 0x11f   :  { %v456_v36 = vadd.f32 1.0, %v3595_v33 }
 0x120   :  { %v3597_v37 = vpop.eup %3596  ;;  %v492_v38 = vpack.c.bf16 %v477_v35, %v476_v34 }
 0x121   :  { %3606 = vrcp.f32 %v456_v36  ;;  %v457_v39 = vadd.f32 1.0, %v3597_v37 }
 0x122   :  { %3339 = vmatprep.subr.bf16.mxu1 %v492_v38 }
 0x123   :  { %v3599_v40 = vpop.eup %3598  ;;  %3608 = vrcp.f32 %v457_v39  ;;  %3340 = vmatpush3.bf16.msra.mxu1 %v492_v38 }
 0x124   :  { %v478_v43 = vmul.f32 %v3599_v40, %v406_v62  ;;  %v499_v62 = vpop.permute.xlu0 %498 }
 0x125   :  { %v3601_v41 = vpop.eup %3600 }
 0x126   :  { %v3603_v42 = vpop.eup %3602  ;;  %v479_v44 = vmul.f32 %v3601_v41, %v409_v1 }
 0x127   :  { %v458_v45 = vadd.f32 1.0, %v3603_v42 }
 0x128   :  { %v3605_v46 = vpop.eup %3604  ;;  %v493_v47 = vpack.c.bf16 %v479_v44, %v478_v43  ;;  %v504_v6 = vpop.permute.xlu0 %503 }
 0x129   :  { %3610 = vrcp.f32 %v458_v45  ;;  %v459_v48 = vadd.f32 1.0, %v3605_v46 }
 0x12a   :  { %3341 = vmatprep.subr.bf16.mxu1 %v493_v47 }
 0x12b   :  { %v3607_v49 = vpop.eup %3606  ;;  %3612 = vrcp.f32 %v459_v48  ;;  %3342 = vmatpush3.bf16.msra.mxu1 %v493_v47 }
 0x12c   :  { %v480_v51 = vmul.f32 %v3607_v49, %v414_v12 }
 0x12d   :  { %v3609_v50 = vpop.eup %3608 }
 0x12e   :  { %v481_v52 = vmul.f32 %v3609_v50, %v417_v15 }
 0x130   :  { %v494_v53 = vpack.c.bf16 %v481_v52, %v480_v51 }
 0x132   :  { %3343 = vmatprep.subr.bf16.mxu1 %v494_v53 }
 0x133   :  { %v3611_v54 = vpop.eup %3610  ;;  %3344 = vmatpush3.bf16.msra.mxu1 %v494_v53 }
 0x134   :  { %v482_v56 = vmul.f32 %v3611_v54, %v422_v25  ;;  %v618_v25 = vsub.s32 0, %v617_v23 }
 0x135   :  { %v3613_v55 = vpop.eup %3612 }
 0x136   :  { %v483_v57 = vmul.f32 %v3613_v55, %v425_v29  ;;  %v3981_v28 = vrot.slane %v54_v21, %v618_v25  ;;  %v3983_v33 = vrot.slane %v626_v26, %v618_v25 }
 0x138   :  { %v495_v58 = vpack.c.bf16 %v483_v57, %v482_v56 }
 0x13a   :  { %3345 = vmatprep.subr.bf16.mxu1 %v495_v58 }
 0x13b   :  { %3346 = vmatpush3.bf16.msra.mxu1 %v495_v58 }
 0x13e   :  { %3348 = vmatmul.mubr.msk.bf16.vlgmr.msra.gmra.mrb[8].mxu1 %vm526_vm2, %v3543_v59 }
 0x211   :  { %v3349_v63 = vpop.f32.mrb[8].mxu1 }
 0x212   :  { %v576_v1 = vadd.f32 %v3349_v63, %v509_v61  ;;  %v567_v2 = vpop.f32.mrb[9].mxu1 }
 0x213   :  { %v568_v3 = vadd.f32 %v567_v2, %v499_v62  ;;  %v3350_v4 = vpop.f32.mrb[10].mxu1 }
 0x214   :  { %v3050_v5 = vmul.f32 -1.442695, %v576_v1  ;;  %v579_v7 = vadd.f32 %v3350_v4, %v514_v0  ;;  %v570_v8 = vpop.f32.mrb[11].mxu1 }
 0x215   :  { %v3048_v9 = vmul.f32 -1.442695, %v568_v3  ;;  %v571_v10 = vadd.f32 %v570_v8, %v504_v6 }
 0x216   :  { %3614 = vpow2.f32 %v3050_v5  ;;  %v3051_v11 = vmul.f32 -1.442695, %v579_v7 }
 0x217   :  { %3616 = vpow2.f32 %v3048_v9  ;;  %v3049_v12 = vmul.f32 -1.442695, %v571_v10 }
 0x218   :  { %3618 = vpow2.f32 %v3051_v11 }
 0x219   :  { %3620 = vpow2.f32 %v3049_v12 }
 0x220   :  { %v3615_v13 = vpop.eup %3614 }
 0x221   :  { %v3617_v14 = vpop.eup %3616  ;;  %v596_v15 = vadd.f32 1.0, %v3615_v13 }
 0x222   :  { %v3619_v17 = vpop.eup %3618  ;;  %v594_v18 = vadd.f32 1.0, %v3617_v14 }
 0x223   :  { %v3621_v19 = vpop.eup %3620  ;;  %3622 = vrcp.f32 %v596_v15  ;;  %v597_v20 = vadd.f32 1.0, %v3619_v17 }
 0x224   :  { %3624 = vrcp.f32 %v594_v18  ;;  %v595_v22 = vadd.f32 1.0, %v3621_v19 }
 0x225   :  { %3626 = vrcp.f32 %v597_v20 }
 0x226   :  { %3628 = vrcp.f32 %v595_v22 }
 0x22d   :  { %v3623_v27 = vpop.eup %3622 }
 0x22e   :  { %v3625_v29 = vpop.eup %3624  ;;  %v608_v31 = vmul.f32 %v3623_v27, %v576_v1 }
 0x22f   :  { %v3627_v30 = vpop.eup %3626  ;;  %v606_v32 = vmul.f32 %v3625_v29, %v568_v3 }
 0x230   :  { %v3629_v34 = vpop.eup %3628  ;;  %v609_v35 = vmul.f32 %v3627_v30, %v579_v7  ;;  %v623_v39 = vmul.f32 %v3981_v28, %v608_v31 }
 0x231   :  { %v621_v36 = vmul.f32 %v3981_v28, %v606_v32  ;;  %v607_v37 = vmul.f32 %v3629_v34, %v571_v10 }
 0x232   :  { %v3986_v38 = vpack.c.bf16 %v609_v35, %v608_v31  ;;  %v624_v43 = vmul.f32 %v3981_v28, %v609_v35  ;;  %v635_v45 = vadd.f32 %v3983_v33, %v623_v39 }
 0x233   :  { %v622_v40 = vmul.f32 %v3981_v28, %v607_v37  ;;  %v633_v41 = vadd.f32 %v3983_v33, %v621_v36  ;;  %v3991_v42 = vpack.c.bf16 %v607_v37, %v606_v32 }
 0x234   :  { %v636_v46 = vadd.f32 %v3983_v33, %v624_v43 }
 0x235   :  { %641 = vrot.lane.b32.xlu0 %v633_v41, %s3760_s1  ;;  %v634_v44 = vadd.f32 %v3983_v33, %v622_v40 }
 0x237   :  { %643 = vrot.lane.b32.xlu1 %v634_v44, %s3760_s1 }
 0x239   :  { %645 = vrot.lane.b32.xlu0 %v635_v45, %s3760_s1 }
 0x23b   :  { %647 = vrot.lane.b32.xlu1 %v636_v46, %s3760_s1  ;;  %s3772_s1 = smov 4  }
 0x23d   :  { %730 = vrot.lane.b32.xlu0 %v3981_v28, %s3761_s22 }
 0x2a7   :  { %v642_v47 = vpop.permute.xlu0 %641 }
 0x2a8   :  { %654 = vst.msk [vmem:[#allocation3] sm:$0xff] %vm653_vm4, %v642_v47 }
 0x2a9   :  { %v644_v48 = vpop.permute.xlu1 %643 }
 0x2aa   :  { %655 = vst.msk [vmem:[#allocation3 + $0x8] sm:$0xff] %vm653_vm4, %v644_v48 }
 0x2ab   :  { %v646_v49 = vpop.permute.xlu0 %645 }
 0x2ac   :  { %656 = vst.msk [vmem:[#allocation3 + $0x10] sm:$0xff] %vm653_vm4, %v646_v49 }
 0x2ad   :  { %v648_v50 = vpop.permute.xlu1 %647 }
 0x2ae   :  { %657 = vst.msk [vmem:[#allocation3 + $0x18] sm:$0xff] %vm653_vm4, %v648_v50 }
 0x2af   :  { %v658_v53 = vld [vmem:[#allocation3] sm:$0xff]  ;;  %v4021_v55 = vpop.permute.xlu0 %730 }
 0x2b1   :  { %v659_v54 = vld [vmem:[#allocation3 + $0x8] sm:$0xff] }
 0x2b3   :  { %v660_v51 = vld [vmem:[#allocation3 + $0x10] sm:$0xff] }
 0x2b4   :  { %718 = vrot.lane.b32.xlu1 %v660_v51, %s3762_s24  ;;  %670 = vrot.lane.b32.xlu0 %v660_v51, %s3763_s25 }
 0x2b5   :  { %v661_v52 = vld [vmem:[#allocation3 + $0x18] sm:$0xff] }
 0x2b8   :  { %672 = vrot.lane.b32.xlu1 %v661_v52, %s3763_s25  ;;  %686 = vrot.lane.b32.xlu0 %v660_v51, %s3764_s26 }
 0x2bc   :  { %688 = vrot.lane.b32.xlu1 %v661_v52, %s3764_s26  ;;  %702 = vrot.lane.b32.xlu0 %v660_v51, %s3765_s27 }
 0x2c0   :  { %704 = vrot.lane.b32.xlu1 %v661_v52, %s3765_s27  ;;  %666 = vrot.lane.b32.xlu0 %v658_v53, %s3763_s25 }
 0x2c4   :  { %668 = vrot.lane.b32.xlu1 %v659_v54, %s3763_s25  ;;  %682 = vrot.lane.b32.xlu0 %v658_v53, %s3764_s26 }
 0x2c8   :  { %684 = vrot.lane.b32.xlu1 %v659_v54, %s3764_s26  ;;  %698 = vrot.lane.b32.xlu0 %v658_v53, %s3765_s27 }
 0x2cc   :  { %700 = vrot.lane.b32.xlu1 %v659_v54, %s3765_s27  ;;  %714 = vrot.lane.b32.xlu0 %v658_v53, %s3762_s24 }
 0x2d0   :  { %716 = vrot.lane.b32.xlu1 %v659_v54, %s3762_s24  ;;  %720 = vrot.lane.b32.xlu0 %v661_v52, %s3762_s24 }
 0x2d4   :  { %737 = vrot.lane.b32.xlu1 %v3983_v33, %s3761_s22 }
 0x326   :  { %v719_v56 = vpop.permute.xlu1 %718  ;;  %v671_v57 = vpop.permute.xlu0 %670 }
 0x327   :  { %v680_v5 = vmax.f32 %v660_v51, %v671_v57 }
 0x32a   :  { %v673_v58 = vpop.permute.xlu1 %672  ;;  %v687_v59 = vpop.permute.xlu0 %686 }
 0x32b   :  { %v681_v6 = vmax.f32 %v661_v52, %v673_v58  ;;  %v696_v11 = vmax.f32 %v680_v5, %v687_v59 }
 0x32e   :  { %v689_v60 = vpop.permute.xlu1 %688  ;;  %v703_v61 = vpop.permute.xlu0 %702 }
 0x32f   :  { %v697_v12 = vmax.f32 %v681_v6, %v689_v60  ;;  %v712_v15 = vmax.f32 %v696_v11, %v703_v61 }
 0x331   :  { %v728_v23 = vmax.f32 %v712_v15, %v719_v56 }
 0x332   :  { %v705_v62 = vpop.permute.xlu1 %704  ;;  %v667_v63 = vpop.permute.xlu0 %666 }
 0x333   :  { %v678_v4 = vmax.f32 %v658_v53, %v667_v63  ;;  %v713_v16 = vmax.f32 %v697_v12, %v705_v62  ;;  %v735_v31 = vmul.f32 %v4021_v55, %v728_v23 }
 0x336   :  { %v669_v0 = vpop.permute.xlu1 %668  ;;  %v683_v1 = vpop.permute.xlu0 %682 }
 0x337   :  { %v679_v7 = vmax.f32 %v659_v54, %v669_v0  ;;  %v694_v8 = vmax.f32 %v678_v4, %v683_v1 }
 0x33a   :  { %v685_v2 = vpop.permute.xlu1 %684  ;;  %v699_v3 = vpop.permute.xlu0 %698 }
 0x33b   :  { %v695_v13 = vmax.f32 %v679_v7, %v685_v2  ;;  %v710_v14 = vmax.f32 %v694_v8, %v699_v3 }
 0x33e   :  { %v701_v9 = vpop.permute.xlu1 %700  ;;  %v715_v10 = vpop.permute.xlu0 %714 }
 0x33f   :  { %v711_v17 = vmax.f32 %v695_v13, %v701_v9  ;;  %v726_v18 = vmax.f32 %v710_v14, %v715_v10 }
 0x341   :  { %v733_v24 = vmul.f32 %v4021_v55, %v726_v18 }
 0x342   :  { %v717_v19 = vpop.permute.xlu1 %716  ;;  %v721_v20 = vpop.permute.xlu0 %720 }
 0x343   :  { %v727_v21 = vmax.f32 %v711_v17, %v717_v19  ;;  %v729_v22 = vmax.f32 %v713_v16, %v721_v20 }
 0x345   :  { %v734_v25 = vmul.f32 %v4021_v55, %v727_v21  ;;  %v736_v27 = vmul.f32 %v4021_v55, %v729_v22 }
 0x346   :  { %v4025_v26 = vpop.permute.xlu1 %737 }
 0x347   :  { %v741_v29 = vadd.f32 %v4025_v26, %v734_v25  ;;  %v740_v30 = vadd.f32 %v4025_v26, %v733_v24  ;;  %v742_v32 = vadd.f32 %v4025_v26, %v735_v31  ;;  %v743_v34 = vadd.f32 %v4025_v26, %v736_v27 }
 0x349   :  { %750 = vrot.lane.b32.xlu1 %v741_v29, %s3766_s28  ;;  %748 = vrot.lane.b32.xlu0 %v740_v30, %s3766_s28 }
 0x34d   :  { %752 = vrot.lane.b32.xlu0 %v742_v32, %s3766_s28  ;;  %754 = vrot.lane.b32.xlu1 %v743_v34, %s3766_s28 }
 0x351   :  { %836 = vrot.lane.b32.xlu0 %v3981_v28, %s3766_s28 }
 0x3bb   :  { %v751_v35 = vpop.permute.xlu1 %750  ;;  %v749_v36 = vpop.permute.xlu0 %748 }
 0x3bc   :  { %761 = vst.msk [vmem:[#allocation3 + $0x8] sm:$0xff] %vm653_vm4, %v751_v35  ;;  %760 = vst.msk [vmem:[#allocation3] sm:$0xff] %vm653_vm4, %v749_v36 }
 0x3bf   :  { %v755_v37 = vpop.permute.xlu1 %754  ;;  %v753_v39 = vpop.permute.xlu0 %752 }
 0x3c0   :  { %763 = vst.msk [vmem:[#allocation3 + $0x18] sm:$0xff] %vm653_vm4, %v755_v37  ;;  %762 = vst.msk [vmem:[#allocation3 + $0x10] sm:$0xff] %vm653_vm4, %v753_v39 }
 0x3c3   :  { %v764_v43 = vld [vmem:[#allocation3] sm:$0xff]  ;;  %v765_v44 = vld [vmem:[#allocation3 + $0x8] sm:$0xff]  ;;  %v4061_v45 = vpop.permute.xlu0 %836 }
 0x3c7   :  { %v766_v40 = vld [vmem:[#allocation3 + $0x10] sm:$0xff]  ;;  %v767_v41 = vld [vmem:[#allocation3 + $0x18] sm:$0xff] }
 0x3c8   :  { %824 = vrot.lane.b32.xlu1 %v766_v40, %s3767_s29  ;;  %776 = vrot.lane.b32.xlu0 %v766_v40, %s3762_s24 }
 0x3cc   :  { %778 = vrot.lane.b32.xlu1 %v767_v41, %s3762_s24  ;;  %792 = vrot.lane.b32.xlu0 %v766_v40, %s3768_s30 }
 0x3d0   :  { %794 = vrot.lane.b32.xlu1 %v767_v41, %s3768_s30  ;;  %808 = vrot.lane.b32.xlu0 %v766_v40, %s3769_s0 }
 0x3d4   :  { %810 = vrot.lane.b32.xlu1 %v767_v41, %s3769_s0  ;;  %772 = vrot.lane.b32.xlu0 %v764_v43, %s3762_s24 }
 0x3d8   :  { %774 = vrot.lane.b32.xlu1 %v765_v44, %s3762_s24  ;;  %788 = vrot.lane.b32.xlu0 %v764_v43, %s3768_s30 }
 0x3dc   :  { %790 = vrot.lane.b32.xlu1 %v765_v44, %s3768_s30  ;;  %804 = vrot.lane.b32.xlu0 %v764_v43, %s3769_s0 }
 0x3e0   :  { %806 = vrot.lane.b32.xlu1 %v765_v44, %s3769_s0  ;;  %820 = vrot.lane.b32.xlu0 %v764_v43, %s3767_s29 }
 0x3e4   :  { %822 = vrot.lane.b32.xlu1 %v765_v44, %s3767_s29  ;;  %826 = vrot.lane.b32.xlu0 %v767_v41, %s3767_s29 }
 0x3e8   :  { %843 = vrot.lane.b32.xlu1 %v3983_v33, %s3766_s28 }
 0x43a   :  { %v825_v46 = vpop.permute.xlu1 %824  ;;  %v777_v47 = vpop.permute.xlu0 %776 }
 0x43b   :  { %v786_v59 = vmax.f32 %v766_v40, %v777_v47 }
 0x43e   :  { %v779_v48 = vpop.permute.xlu1 %778  ;;  %v793_v49 = vpop.permute.xlu0 %792 }
 0x43f   :  { %v787_v61 = vmax.f32 %v767_v41, %v779_v48  ;;  %v802_v62 = vmax.f32 %v786_v59, %v793_v49 }
 0x442   :  { %v795_v50 = vpop.permute.xlu1 %794  ;;  %v809_v51 = vpop.permute.xlu0 %808 }
 0x443   :  { %v803_v2 = vmax.f32 %v787_v61, %v795_v50  ;;  %v818_v3 = vmax.f32 %v802_v62, %v809_v51 }
 0x445   :  { %v4065_v11 = vmax.f32 %v818_v3, %v825_v46 }
 0x446   :  { %v811_v52 = vpop.permute.xlu1 %810  ;;  %v773_v53 = vpop.permute.xlu0 %772 }
 0x447   :  { %v784_v60 = vmax.f32 %v764_v43, %v773_v53  ;;  %v819_v6 = vmax.f32 %v803_v2, %v811_v52  ;;  %v841_v22 = vmul.f32 %v4061_v45, %v4065_v11 }
 0x44a   :  { %v775_v54 = vpop.permute.xlu1 %774  ;;  %v789_v56 = vpop.permute.xlu0 %788 }
 0x44b   :  { %v785_v63 = vmax.f32 %v765_v44, %v775_v54  ;;  %v800_v33 = vmax.f32 %v784_v60, %v789_v56 }
 0x44e   :  { %v791_v57 = vpop.permute.xlu1 %790  ;;  %v805_v58 = vpop.permute.xlu0 %804 }
 0x44f   :  { %v801_v4 = vmax.f32 %v785_v63, %v791_v57  ;;  %v816_v5 = vmax.f32 %v800_v33, %v805_v58 }
 0x452   :  { %v807_v0 = vpop.permute.xlu1 %806  ;;  %v821_v1 = vpop.permute.xlu0 %820 }
 0x453   :  { %v817_v7 = vmax.f32 %v801_v4, %v807_v0  ;;  %v4063_v8 = vmax.f32 %v816_v5, %v821_v1 }
 0x455   :  { %v839_v14 = vmul.f32 %v4061_v45, %v4063_v8 }
 0x456   :  { %v823_v9 = vpop.permute.xlu1 %822  ;;  %v827_v10 = vpop.permute.xlu0 %826 }
 0x457   :  { %v4067_v12 = vmax.f32 %v817_v7, %v823_v9  ;;  %v4069_v13 = vmax.f32 %v819_v6, %v827_v10 }
 0x459   :  { %v840_v15 = vmul.f32 %v4061_v45, %v4067_v12  ;;  %v1289_v16 = vpack.c.bf16 %v4067_v12, %v4063_v8  ;;  %v1290_v17 = vpack.c.bf16 %v4069_v13, %v4065_v11  ;;  %v842_v19 = vmul.f32 %v4061_v45, %v4069_v13 }
 0x45a   :  { %v4079_v18 = vpop.permute.xlu1 %843 }
 0x45b   :  { %v847_v20 = vadd.f32 %v4079_v18, %v840_v15  ;;  %v846_v21 = vadd.f32 %v4079_v18, %v839_v14  ;;  %v848_v23 = vadd.f32 %v4079_v18, %v841_v22  ;;  %v849_v24 = vadd.f32 %v4079_v18, %v842_v19 }
 0x45d   :  { %856 = vrot.lane.b32.xlu1 %v847_v20, %s3761_s22  ;;  %854 = vrot.lane.b32.xlu0 %v846_v21, %s3761_s22 }
 0x461   :  { %858 = vrot.lane.b32.xlu0 %v848_v23, %s3761_s22  ;;  %860 = vrot.lane.b32.xlu1 %v849_v24, %s3761_s22 }
 0x4cf   :  { %v857_v25 = vpop.permute.xlu1 %856  ;;  %v855_v27 = vpop.permute.xlu0 %854 }
 0x4d0   :  { %867 = vst.msk [vmem:[#allocation3 + $0x8] sm:$0xff] %vm653_vm4, %v857_v25  ;;  %866 = vst.msk [vmem:[#allocation3] sm:$0xff] %vm653_vm4, %v855_v27 }
 0x4d3   :  { %v861_v29 = vpop.permute.xlu1 %860  ;;  %v859_v30 = vpop.permute.xlu0 %858 }
 0x4d4   :  { %869 = vst.msk [vmem:[#allocation3 + $0x18] sm:$0xff] %vm653_vm4, %v861_v29  ;;  %868 = vst.msk [vmem:[#allocation3 + $0x10] sm:$0xff] %vm653_vm4, %v859_v30 }
 0x4d7   :  { %v871_v34 = vld [vmem:[#allocation3 + $0x8] sm:$0xff]  ;;  %v870_v35 = vld [vmem:[#allocation3] sm:$0xff] }
 0x4db   :  { %v873_v31 = vld [vmem:[#allocation3 + $0x18] sm:$0xff]  ;;  %v872_v32 = vld [vmem:[#allocation3 + $0x10] sm:$0xff] }
 0x4dc   :  { %884 = vrot.lane.b32.xlu1 %v873_v31, %s3763_s25  ;;  %882 = vrot.lane.b32.xlu0 %v872_v32, %s3763_s25 }
 0x4e0   :  { %900 = vrot.lane.b32.xlu1 %v873_v31, %s3764_s26  ;;  %898 = vrot.lane.b32.xlu0 %v872_v32, %s3764_s26 }
 0x4e4   :  { %916 = vrot.lane.b32.xlu1 %v873_v31, %s3765_s27  ;;  %914 = vrot.lane.b32.xlu0 %v872_v32, %s3765_s27 }
 0x4e8   :  { %880 = vrot.lane.b32.xlu1 %v871_v34, %s3763_s25  ;;  %878 = vrot.lane.b32.xlu0 %v870_v35, %s3763_s25 }
 0x4ec   :  { %896 = vrot.lane.b32.xlu1 %v871_v34, %s3764_s26  ;;  %894 = vrot.lane.b32.xlu0 %v870_v35, %s3764_s26 }
 0x4f0   :  { %912 = vrot.lane.b32.xlu1 %v871_v34, %s3765_s27  ;;  %910 = vrot.lane.b32.xlu0 %v870_v35, %s3765_s27 }
 0x4f4   :  { %928 = vrot.lane.b32.xlu1 %v871_v34, %s3762_s24  ;;  %926 = vrot.lane.b32.xlu0 %v870_v35, %s3762_s24 }
 0x4f8   :  { %932 = vrot.lane.b32.xlu1 %v873_v31, %s3762_s24  ;;  %930 = vrot.lane.b32.xlu0 %v872_v32, %s3762_s24 }
 0x54e   :  { %v885_v36 = vpop.permute.xlu1 %884  ;;  %v883_v37 = vpop.permute.xlu0 %882 }
 0x54f   :  { %v893_v56 = vmax.f32 %v873_v31, %v885_v36  ;;  %v892_v57 = vmax.f32 %v872_v32, %v883_v37 }
 0x552   :  { %v901_v39 = vpop.permute.xlu1 %900  ;;  %v899_v40 = vpop.permute.xlu0 %898 }
 0x553   :  { %v909_v62 = vmax.f32 %v893_v56, %v901_v39  ;;  %v908_v63 = vmax.f32 %v892_v57, %v899_v40 }
 0x556   :  { %v917_v41 = vpop.permute.xlu1 %916  ;;  %v915_v43 = vpop.permute.xlu0 %914 }
 0x557   :  { %v925_v1 = vmax.f32 %v909_v62, %v917_v41  ;;  %v924_v2 = vmax.f32 %v908_v63, %v915_v43 }
 0x55a   :  { %v881_v44 = vpop.permute.xlu1 %880  ;;  %v879_v46 = vpop.permute.xlu0 %878 }
 0x55b   :  { %v891_v49 = vmax.f32 %v871_v34, %v881_v44  ;;  %v890_v50 = vmax.f32 %v870_v35, %v879_v46 }
 0x55e   :  { %v897_v47 = vpop.permute.xlu1 %896  ;;  %v895_v48 = vpop.permute.xlu0 %894 }
 0x55f   :  { %v907_v53 = vmax.f32 %v891_v49, %v897_v47  ;;  %v906_v54 = vmax.f32 %v890_v50, %v895_v48 }
 0x562   :  { %v913_v51 = vpop.permute.xlu1 %912  ;;  %v911_v52 = vpop.permute.xlu0 %910 }
 0x563   :  { %v923_v58 = vmax.f32 %v907_v53, %v913_v51  ;;  %v922_v59 = vmax.f32 %v906_v54, %v911_v52 }
 0x566   :  { %v929_v60 = vpop.permute.xlu1 %928  ;;  %v927_v61 = vpop.permute.xlu0 %926 }
 0x567   :  { %v939_v33 = vmax.f32 %v923_v58, %v929_v60  ;;  %v938_v0 = vmax.f32 %v922_v59, %v927_v61 }
 0x569   :  { %v943_v3 = vmul.f32 %v939_v33, %v4021_v55  ;;  %v942_v4 = vmul.f32 %v938_v0, %v4021_v55 }
 0x56a   :  { %v933_v5 = vpop.permute.xlu1 %932  ;;  %v931_v6 = vpop.permute.xlu0 %930 }
 0x56b   :  { %v941_v7 = vmax.f32 %v925_v1, %v933_v5  ;;  %v940_v9 = vmax.f32 %v924_v2, %v931_v6  ;;  %v947_v10 = vadd.f32 %v943_v3, %v4025_v26  ;;  %v946_v14 = vadd.f32 %v942_v4, %v4025_v26 }
 0x56d   :  { %v945_v15 = vmul.f32 %v941_v7, %v4021_v55  ;;  %v944_v19 = vmul.f32 %v940_v9, %v4021_v55  ;;  %956 = vrot.lane.b32.xlu1 %v947_v10, %s3766_s28  ;;  %954 = vrot.lane.b32.xlu0 %v946_v14, %s3766_s28 }
 0x56f   :  { %v949_v20 = vadd.f32 %v945_v15, %v4025_v26  ;;  %v948_v21 = vadd.f32 %v944_v19, %v4025_v26 }
 0x571   :  { %960 = vrot.lane.b32.xlu1 %v949_v20, %s3766_s28  ;;  %958 = vrot.lane.b32.xlu0 %v948_v21, %s3766_s28 }
 0x5df   :  { %v957_v22 = vpop.permute.xlu1 %956  ;;  %v955_v23 = vpop.permute.xlu0 %954 }
 0x5e0   :  { %967 = vst.msk [vmem:[#allocation3 + $0x8] sm:$0xff] %vm653_vm4, %v957_v22  ;;  %966 = vst.msk [vmem:[#allocation3] sm:$0xff] %vm653_vm4, %v955_v23 }
 0x5e3   :  { %v961_v24 = vpop.permute.xlu1 %960  ;;  %v959_v25 = vpop.permute.xlu0 %958 }
 0x5e4   :  { %969 = vst.msk [vmem:[#allocation3 + $0x18] sm:$0xff] %vm653_vm4, %v961_v24  ;;  %968 = vst.msk [vmem:[#allocation3 + $0x10] sm:$0xff] %vm653_vm4, %v959_v25 }
 0x5e7   :  { %v971_v30 = vld [vmem:[#allocation3 + $0x8] sm:$0xff]  ;;  %v970_v31 = vld [vmem:[#allocation3] sm:$0xff] }
 0x5eb   :  { %v973_v27 = vld [vmem:[#allocation3 + $0x18] sm:$0xff]  ;;  %v972_v29 = vld [vmem:[#allocation3 + $0x10] sm:$0xff] }
 0x5ec   :  { %984 = vrot.lane.b32.xlu1 %v973_v27, %s3762_s24  ;;  %982 = vrot.lane.b32.xlu0 %v972_v29, %s3762_s24 }
 0x5f0   :  { %1000 = vrot.lane.b32.xlu1 %v973_v27, %s3768_s30  ;;  %998 = vrot.lane.b32.xlu0 %v972_v29, %s3768_s30 }
 0x5f4   :  { %1016 = vrot.lane.b32.xlu1 %v973_v27, %s3769_s0  ;;  %1014 = vrot.lane.b32.xlu0 %v972_v29, %s3769_s0 }
 0x5f8   :  { %980 = vrot.lane.b32.xlu1 %v971_v30, %s3762_s24  ;;  %978 = vrot.lane.b32.xlu0 %v970_v31, %s3762_s24 }
 0x5fc   :  { %996 = vrot.lane.b32.xlu1 %v971_v30, %s3768_s30  ;;  %994 = vrot.lane.b32.xlu0 %v970_v31, %s3768_s30 }
 0x600   :  { %1012 = vrot.lane.b32.xlu1 %v971_v30, %s3769_s0  ;;  %1010 = vrot.lane.b32.xlu0 %v970_v31, %s3769_s0 }
 0x604   :  { %1028 = vrot.lane.b32.xlu1 %v971_v30, %s3767_s29  ;;  %1026 = vrot.lane.b32.xlu0 %v970_v31, %s3767_s29 }
 0x608   :  { %1032 = vrot.lane.b32.xlu1 %v973_v27, %s3767_s29  ;;  %1030 = vrot.lane.b32.xlu0 %v972_v29, %s3767_s29 }
 0x65e   :  { %v985_v32 = vpop.permute.xlu1 %984  ;;  %v983_v34 = vpop.permute.xlu0 %982 }
 0x65f   :  { %v993_v52 = vmax.f32 %v973_v27, %v985_v32  ;;  %v992_v53 = vmax.f32 %v972_v29, %v983_v34 }
 0x662   :  { %v1001_v35 = vpop.permute.xlu1 %1000  ;;  %v999_v36 = vpop.permute.xlu0 %998 }
 0x663   :  { %v1009_v57 = vmax.f32 %v993_v52, %v1001_v35  ;;  %v1008_v60 = vmax.f32 %v992_v53, %v999_v36 }
 0x666   :  { %v1017_v37 = vpop.permute.xlu1 %1016  ;;  %v1015_v39 = vpop.permute.xlu0 %1014 }
 0x667   :  { %v1025_v63 = vmax.f32 %v1009_v57, %v1017_v37  ;;  %v1024_v33 = vmax.f32 %v1008_v60, %v1015_v39 }
 0x66a   :  { %v981_v40 = vpop.permute.xlu1 %980  ;;  %v979_v41 = vpop.permute.xlu0 %978 }
 0x66b   :  { %v991_v46 = vmax.f32 %v971_v30, %v981_v40  ;;  %v990_v47 = vmax.f32 %v970_v31, %v979_v41 }
 0x66e   :  { %v997_v43 = vpop.permute.xlu1 %996  ;;  %v995_v44 = vpop.permute.xlu0 %994 }
 0x66f   :  { %v1007_v50 = vmax.f32 %v991_v46, %v997_v43  ;;  %v1006_v51 = vmax.f32 %v990_v47, %v995_v44 }
 0x672   :  { %v1013_v48 = vpop.permute.xlu1 %1012  ;;  %v1011_v49 = vpop.permute.xlu0 %1010 }
 0x673   :  { %v1023_v54 = vmax.f32 %v1007_v50, %v1013_v48  ;;  %v1022_v56 = vmax.f32 %v1006_v51, %v1011_v49 }
 0x676   :  { %v1029_v58 = vpop.permute.xlu1 %1028  ;;  %v1027_v59 = vpop.permute.xlu0 %1026 }
 0x677   :  { %v4145_v61 = vmax.f32 %v1023_v54, %v1029_v58  ;;  %v4147_v62 = vmax.f32 %v1022_v56, %v1027_v59 }
 0x679   :  { %v1043_v0 = vmul.f32 %v4145_v61, %v4061_v45  ;;  %v1042_v1 = vmul.f32 %v4147_v62, %v4061_v45  ;;  %v1503_v2 = vpack.c.bf16 %v4145_v61, %v4147_v62 }
 0x67a   :  { %v1033_v3 = vpop.permute.xlu1 %1032  ;;  %v1031_v4 = vpop.permute.xlu0 %1030 }
 0x67b   :  { %v4155_v5 = vmax.f32 %v1025_v63, %v1033_v3  ;;  %v4157_v6 = vmax.f32 %v1024_v33, %v1031_v4  ;;  %v1047_v7 = vadd.f32 %v1043_v0, %v4079_v18  ;;  %v1046_v9 = vadd.f32 %v1042_v1, %v4079_v18 }
 0x67d   :  { %v1045_v10 = vmul.f32 %v4155_v5, %v4061_v45  ;;  %v1044_v14 = vmul.f32 %v4157_v6, %v4061_v45  ;;  %v1504_v15 = vpack.c.bf16 %v4155_v5, %v4157_v6  ;;  %1056 = vrot.lane.b32.xlu1 %v1047_v7, %s3761_s22  ;;  %1054 = vrot.lane.b32.xlu0 %v1046_v9, %s3761_s22 }
 0x67f   :  { %v1049_v19 = vadd.f32 %v1045_v10, %v4079_v18  ;;  %v1048_v20 = vadd.f32 %v1044_v14, %v4079_v18 }
 0x681   :  { %1060 = vrot.lane.b32.xlu1 %v1049_v19, %s3761_s22  ;;  %1058 = vrot.lane.b32.xlu0 %v1048_v20, %s3761_s22 }
 0x6ef   :  { %v1057_v21 = vpop.permute.xlu1 %1056  ;;  %v1055_v22 = vpop.permute.xlu0 %1054 }
 0x6f0   :  { %1067 = vst.msk [vmem:[#allocation3 + $0x8] sm:$0xff] %vm653_vm4, %v1057_v21  ;;  %1066 = vst.msk [vmem:[#allocation3] sm:$0xff] %vm653_vm4, %v1055_v22 }
 0x6f3   :  { %v1061_v23 = vpop.permute.xlu1 %1060  ;;  %v1059_v24 = vpop.permute.xlu0 %1058 }
 0x6f4   :  { %1069 = vst.msk [vmem:[#allocation3 + $0x18] sm:$0xff] %vm653_vm4, %v1061_v23  ;;  %1068 = vst.msk [vmem:[#allocation3 + $0x10] sm:$0xff] %vm653_vm4, %v1059_v24 }
 0x6f7   :  { %v1071_v29 = vld [vmem:[#allocation3 + $0x8] sm:$0xff]  ;;  %v1070_v30 = vld [vmem:[#allocation3] sm:$0xff] }
 0x6fb   :  { %v1073_v25 = vld [vmem:[#allocation3 + $0x18] sm:$0xff]  ;;  %v1072_v27 = vld [vmem:[#allocation3 + $0x10] sm:$0xff] }
 0x6fc   :  { %1084 = vrot.lane.b32.xlu1 %v1073_v25, %s3763_s25  ;;  %1082 = vrot.lane.b32.xlu0 %v1072_v27, %s3763_s25 }
 0x700   :  { %1100 = vrot.lane.b32.xlu1 %v1073_v25, %s3764_s26  ;;  %1098 = vrot.lane.b32.xlu0 %v1072_v27, %s3764_s26 }
 0x704   :  { %1116 = vrot.lane.b32.xlu1 %v1073_v25, %s3765_s27  ;;  %1114 = vrot.lane.b32.xlu0 %v1072_v27, %s3765_s27 }
 0x708   :  { %1080 = vrot.lane.b32.xlu1 %v1071_v29, %s3763_s25  ;;  %1078 = vrot.lane.b32.xlu0 %v1070_v30, %s3763_s25 }
 0x70c   :  { %1096 = vrot.lane.b32.xlu1 %v1071_v29, %s3764_s26  ;;  %1094 = vrot.lane.b32.xlu0 %v1070_v30, %s3764_s26 }
 0x710   :  { %1112 = vrot.lane.b32.xlu1 %v1071_v29, %s3765_s27  ;;  %1110 = vrot.lane.b32.xlu0 %v1070_v30, %s3765_s27 }
 0x714   :  { %1128 = vrot.lane.b32.xlu1 %v1071_v29, %s3762_s24  ;;  %1126 = vrot.lane.b32.xlu0 %v1070_v30, %s3762_s24 }
 0x718   :  { %1132 = vrot.lane.b32.xlu1 %v1073_v25, %s3762_s24  ;;  %1130 = vrot.lane.b32.xlu0 %v1072_v27, %s3762_s24 }
 0x76e   :  { %v1085_v31 = vpop.permute.xlu1 %1084  ;;  %v1083_v32 = vpop.permute.xlu0 %1082 }
 0x76f   :  { %v1093_v51 = vmax.f32 %v1073_v25, %v1085_v31  ;;  %v1092_v52 = vmax.f32 %v1072_v27, %v1083_v32  ;;  %v3544_v32 = vld [vmem:[%s4708_s5 + $0x20] sm:$0xff]  }
 0x770   :  { %3355 = vmatprep.mubr.msk.bf16.mxu1 %vm1319_vm5, %v3544_v32  ;;  %v3551_v32 = vld [vmem:[%s4708_s5 + $0x18] sm:$0xff]  }
 0x772   :  { %v1101_v34 = vpop.permute.xlu1 %1100  ;;  %v1099_v35 = vpop.permute.xlu0 %1098 }
 0x773   :  { %v1109_v58 = vmax.f32 %v1093_v51, %v1101_v34  ;;  %v1108_v59 = vmax.f32 %v1092_v52, %v1099_v35 }
 0x776   :  { %v1117_v36 = vpop.permute.xlu1 %1116  ;;  %v1115_v37 = vpop.permute.xlu0 %1114 }
 0x777   :  { %v1125_v33 = vmax.f32 %v1109_v58, %v1117_v36  ;;  %v1124_v0 = vmax.f32 %v1108_v59, %v1115_v37  ;;  %v1742_v59 = vld [vmem:[%s4709_s6] sm:$0xff] }
 0x77a   :  { %v1081_v39 = vpop.permute.xlu1 %1080  ;;  %v1079_v40 = vpop.permute.xlu0 %1078 }
 0x77b   :  { %v1091_v44 = vmax.f32 %v1071_v29, %v1081_v39  ;;  %v1090_v46 = vmax.f32 %v1070_v30, %v1079_v40 }
 0x77e   :  { %v1097_v41 = vpop.permute.xlu1 %1096  ;;  %v1095_v43 = vpop.permute.xlu0 %1094 }
 0x77f   :  { %v1107_v49 = vmax.f32 %v1091_v44, %v1097_v41  ;;  %v1106_v50 = vmax.f32 %v1090_v46, %v1095_v43 }
 0x782   :  { %v1113_v47 = vpop.permute.xlu1 %1112  ;;  %v1111_v48 = vpop.permute.xlu0 %1110 }
 0x783   :  { %v1123_v53 = vmax.f32 %v1107_v49, %v1113_v47  ;;  %v1122_v54 = vmax.f32 %v1106_v50, %v1111_v48 }
 0x786   :  { %v1129_v56 = vpop.permute.xlu1 %1128  ;;  %v1127_v57 = vpop.permute.xlu0 %1126 }
 0x787   :  { %v1139_v60 = vmax.f32 %v1123_v53, %v1129_v56  ;;  %v1138_v63 = vmax.f32 %v1122_v54, %v1127_v57 }
 0x789   :  { %v1143_v1 = vmul.f32 %v1139_v60, %v4021_v55  ;;  %v1142_v3 = vmul.f32 %v1138_v63, %v4021_v55 }
 0x78a   :  { %v1133_v4 = vpop.permute.xlu1 %1132  ;;  %v1131_v7 = vpop.permute.xlu0 %1130 }
 0x78b   :  { %v1147_v9 = vadd.f32 %v1143_v1, %v4025_v26  ;;  %v1146_v10 = vadd.f32 %v1142_v3, %v4025_v26  ;;  %v1141_v14 = vmax.f32 %v1125_v33, %v1133_v4  ;;  %v1140_v19 = vmax.f32 %v1124_v0, %v1131_v7  ;;  %v1744_v33 = vld [vmem:[%s4709_s6 + $0x10] sm:$0xff]  ;;  %v1743_v0 = vld [vmem:[%s4709_s6 + $0x8] sm:$0xff]  ;;  %v1746_v3 = vld [vmem:[%s4709_s6 + $0x20] sm:$0xff] }
 0x78c   :  { %v1745_v4 = vld [vmem:[%s4709_s6 + $0x18] sm:$0xff]  ;;  %v3545_v7 = vld [vmem:[%s4708_s5 + $0x28] sm:$0xff]  }
 0x78d   :  { %v1145_v20 = vmul.f32 %v1141_v14, %v4021_v55  ;;  %v1144_v21 = vmul.f32 %v1140_v19, %v4021_v55  ;;  %1156 = vrot.lane.b32.xlu1 %v1147_v9, %s3766_s28  ;;  %1154 = vrot.lane.b32.xlu0 %v1146_v10, %s3766_s28  ;;  %v3546_v9 = vld [vmem:[%s4708_s5 + $0x30] sm:$0xff]   ;;  %v1747_v14 = vld [vmem:[%s4709_s6 + $0x28] sm:$0xff] }
 0x78e   :  { %v1748_v10 = vld [vmem:[%s4709_s6 + $0x30] sm:$0xff]  ;;  %v1866_v19 = vld [vmem:[%s4710_s8] sm:$0xff] }
 0x78f   :  { %v1149_v22 = vadd.f32 %v1145_v20, %v4025_v26  ;;  %v1148_v23 = vadd.f32 %v1144_v21, %v4025_v26  ;;  %v1749_v20 = vld [vmem:[%s4709_s6 + $0x38] sm:$0xff] }
 0x790   :  { %v3547_v21 = vld [vmem:[%s4708_s5 + $0x38] sm:$0xff]  }
 0x791   :  { %1160 = vrot.lane.b32.xlu1 %v1149_v22, %s3766_s28  ;;  %1158 = vrot.lane.b32.xlu0 %v1148_v23, %s3766_s28  ;;  %v1868_v23 = vld [vmem:[%s4710_s8 + $0x10] sm:$0xff]  ;;  %s3773_s28 = smov 3  }
 0x7ff   :  { %v1157_v24 = vpop.permute.xlu1 %1156  ;;  %v1155_v25 = vpop.permute.xlu0 %1154 }
 0x800   :  { %1167 = vst.msk [vmem:[#allocation3 + $0x8] sm:$0xff] %vm653_vm4, %v1157_v24  ;;  %1166 = vst.msk [vmem:[#allocation3] sm:$0xff] %vm653_vm4, %v1155_v25  ;;  %v1867_v24 = vld [vmem:[%s4710_s8 + $0x8] sm:$0xff]  ;;  %v1869_v25 = vld [vmem:[%s4710_s8 + $0x18] sm:$0xff] }
 0x803   :  { %v1161_v27 = vpop.permute.xlu1 %1160  ;;  %v1159_v55 = vpop.permute.xlu0 %1158 }
 0x804   :  { %1169 = vst.msk [vmem:[#allocation3 + $0x18] sm:$0xff] %vm653_vm4, %v1161_v27  ;;  %1168 = vst.msk [vmem:[#allocation3 + $0x10] sm:$0xff] %vm653_vm4, %v1159_v55  ;;  %v3549_v27 = vld [vmem:[%s4708_s5 + $0x8] sm:$0xff]   ;;  %v3550_v55 = vld [vmem:[%s4708_s5 + $0x10] sm:$0xff]  }
 0x807   :  { %v1171_v26 = vld [vmem:[#allocation3 + $0x8] sm:$0xff]  ;;  %v1170_v31 = vld [vmem:[#allocation3] sm:$0xff] }
 0x80b   :  { %v1173_v29 = vld [vmem:[#allocation3 + $0x18] sm:$0xff]  ;;  %v1172_v30 = vld [vmem:[#allocation3 + $0x10] sm:$0xff] }
 0x80c   :  { %1184 = vrot.lane.b32.xlu1 %v1173_v29, %s3762_s24  ;;  %1182 = vrot.lane.b32.xlu0 %v1172_v30, %s3762_s24 }
 0x810   :  { %1200 = vrot.lane.b32.xlu1 %v1173_v29, %s3768_s30  ;;  %1198 = vrot.lane.b32.xlu0 %v1172_v30, %s3768_s30 }
 0x814   :  { %1216 = vrot.lane.b32.xlu1 %v1173_v29, %s3769_s0  ;;  %1214 = vrot.lane.b32.xlu0 %v1172_v30, %s3769_s0 }
 0x818   :  { %1180 = vrot.lane.b32.xlu1 %v1171_v26, %s3762_s24  ;;  %1178 = vrot.lane.b32.xlu0 %v1170_v31, %s3762_s24 }
 0x81c   :  { %1196 = vrot.lane.b32.xlu1 %v1171_v26, %s3768_s30  ;;  %1194 = vrot.lane.b32.xlu0 %v1170_v31, %s3768_s30 }
 0x820   :  { %1212 = vrot.lane.b32.xlu1 %v1171_v26, %s3769_s0  ;;  %1210 = vrot.lane.b32.xlu0 %v1170_v31, %s3769_s0 }
 0x824   :  { %1228 = vrot.lane.b32.xlu1 %v1171_v26, %s3767_s29  ;;  %1226 = vrot.lane.b32.xlu0 %v1170_v31, %s3767_s29 }
 0x828   :  { %1232 = vrot.lane.b32.xlu1 %v1173_v29, %s3767_s29  ;;  %1230 = vrot.lane.b32.xlu0 %v1172_v30, %s3767_s29 }
 0x82c   :  { %1315 = vrot.lane.b32.xlu1 %v1290_v17, %s3764_s26  ;;  %1313 = vrot.lane.b32.xlu0 %v1289_v16, %s3764_s26 }
 0x830   :  { %1529 = vrot.lane.b32.xlu1 %v1504_v15, %s3764_s26  ;;  %1527 = vrot.lane.b32.xlu0 %v1503_v2, %s3764_s26 }
 0x87e   :  { %v1185_v34 = vpop.permute.xlu1 %1184  ;;  %v1183_v35 = vpop.permute.xlu0 %1182 }
 0x87f   :  { %v1193_v43 = vmax.f32 %v1173_v29, %v1185_v34  ;;  %v1192_v44 = vmax.f32 %v1172_v30, %v1183_v35  ;;  %v2099_v29 = vld [vmem:[%s4711_s10 + $0x10] sm:$0xff]  ;;  %v2098_v30 = vld [vmem:[%s4711_s10 + $0x8] sm:$0xff]  ;;  %v3552_v34 = vld [vmem:[%s4708_s5 + $0x40] sm:$0xff]  }
 0x880   :  { %v3553_v35 = vld [vmem:[%s4708_s5 + $0x48] sm:$0xff]  }
 0x882   :  { %v1201_v36 = vpop.permute.xlu1 %1200  ;;  %v1199_v11 = vpop.permute.xlu0 %1198 }
 0x883   :  { %v1209_v47 = vmax.f32 %v1193_v43, %v1201_v36  ;;  %v1208_v48 = vmax.f32 %v1192_v44, %v1199_v11  ;;  %v3554_v36 = vld [vmem:[%s4708_s5 + $0x50] sm:$0xff]   ;;  %v3555_v11 = vld [vmem:[%s4708_s5 + $0x58] sm:$0xff]  }
 0x886   :  { %v1217_v13 = vpop.permute.xlu1 %1216  ;;  %v1215_v17 = vpop.permute.xlu0 %1214 }
 0x887   :  { %v1225_v51 = vmax.f32 %v1209_v47, %v1217_v13  ;;  %v1224_v52 = vmax.f32 %v1208_v48, %v1215_v17  ;;  %v3556_v13 = vld [vmem:[%s4708_s5 + $0x60] sm:$0xff]  }
 0x88a   :  { %v1181_v37 = vpop.permute.xlu1 %1180  ;;  %v1179_v39 = vpop.permute.xlu0 %1178 }
 0x88b   :  { %v1191_v16 = vmax.f32 %v1171_v26, %v1181_v37  ;;  %v1190_v40 = vmax.f32 %v1170_v31, %v1179_v39  ;;  %v2100_v31 = vld [vmem:[%s4711_s10 + $0x18] sm:$0xff]  ;;  %v3557_v39 = vld [vmem:[%s4708_s5 + $0x68] sm:$0xff]  }
 0x88e   :  { %v1197_v8 = vpop.permute.xlu1 %1196  ;;  %v1195_v12 = vpop.permute.xlu0 %1194 }
 0x88f   :  { %v1207_v6 = vmax.f32 %v1191_v16, %v1197_v8  ;;  %v1206_v15 = vmax.f32 %v1190_v40, %v1195_v12  ;;  %v3558_v8 = vld [vmem:[%s4708_s5 + $0x70] sm:$0xff]   ;;  %v3559_v12 = vld [vmem:[%s4708_s5 + $0x78] sm:$0xff]   ;;  %v3560_v16 = vld [vmem:[%s4712_s7] sm:$0xff]  }
 0x890   :  { %3407 = vmatprep.mubr.msk.bf16.mxu0 %vm526_vm2, %v3560_v16 }
 0x892   :  { %v1213_v41 = vpop.permute.xlu1 %1212  ;;  %v1211_v5 = vpop.permute.xlu0 %1210 }
 0x893   :  { %v1223_v61 = vmax.f32 %v1207_v6, %v1213_v41  ;;  %v1222_v62 = vmax.f32 %v1206_v15, %v1211_v5 }
 0x896   :  { %v1229_v2 = vpop.permute.xlu1 %1228  ;;  %v1227_v46 = vpop.permute.xlu0 %1226 }
 0x897   :  { %v4245_v49 = vmax.f32 %v1223_v61, %v1229_v2  ;;  %v4247_v50 = vmax.f32 %v1222_v62, %v1227_v46 }
 0x899   :  { %v1627_v53 = vpack.c.bf16 %v4245_v49, %v4247_v50 }
 0x89a   :  { %v1233_v54 = vpop.permute.xlu1 %1232  ;;  %v1231_v56 = vpop.permute.xlu0 %1230 }
 0x89b   :  { %v4251_v57 = vmax.f32 %v1225_v51, %v1233_v54  ;;  %v4253_v58 = vmax.f32 %v1224_v52, %v1231_v56  ;;  %1651 = vrot.lane.b32.xlu0 %v1627_v53, %s3764_s26 }
 0x89d   :  { %v1628_v60 = vpack.c.bf16 %v4251_v57, %v4253_v58 }
 0x89e   :  { %v1314_v63 = vpop.permute.xlu0 %1313  ;;  %v1316_v1 = vpop.permute.xlu1 %1315 }
 0x89f   :  { %1752 = vperm.xlu0 %3505, %v1742_v59   ;;  %1653 = vrot.lane.b32.xlu1 %v1628_v60, %s3764_s26  ;;  %s3774_s26 = smov 1  }
 0x8a0   :  { %3351 = vmatprep.subr.bf16.mxu1 %v1314_v63 }
 0x8a1   :  { %3352 = vmatpush3.bf16.msra.mxu1 %v1314_v63 }
 0x8a2   :  { %3353 = vmatprep.subr.bf16.mxu1 %v1316_v1  ;;  %v1528_v22 = vpop.permute.xlu0 %1527  ;;  %v1530_v26 = vpop.permute.xlu1 %1529 }
 0x8a3   :  { %1762 = vperm.xlu0 %3505, %v1744_v33   ;;  %1757 = vperm.xlu1 %3506, %v1743_v0  }
 0x8a5   :  { %3354 = vmatpush3.bf16.msra.mxu1 %v1316_v1 }
 0x8a6   :  { %3363 = vmatprep.subr.bf16.mxu1 %v3991_v42 }
 0x8a7   :  { %1772 = vperm.xlu0 %3505, %v1746_v3   ;;  %1767 = vperm.xlu1 %3506, %v1745_v4  }
 0x8a8   :  { %3356 = vmatmul.mubr.msk.bf16.vlgmr.msra.gmra.mrb[12].mxu1 %vm1319_vm5, %v3545_v7 }
 0x8a9   :  { %3364 = vmatpush3.bf16.msra.mxu1 %v3991_v42  ;;  %3359 = vmatprep.mubr.msk.bf16.mxu1 %vm1319_vm5, %v3546_v9  ;;  %v3548_v42 = vld [vmem:[%s4708_s5] sm:$0xff]  }
 0x8aa   :  { %3365 = vmatprep.subr.bf16.mxu1 %v3986_v38 }
 0x8ab   :  { %1782 = vperm.xlu0 %3505, %v1748_v10   ;;  %1777 = vperm.xlu1 %3506, %v1747_v14  }
 0x8ad   :  { %3366 = vmatpush3.bf16.msra.mxu1 %v3986_v38  ;;  %v2097_v38 = vld [vmem:[%s4711_s10] sm:$0xff] }
 0x8ae   :  { %3375 = vmatprep.subr.bf16.mxu1 %v1528_v22 }
 0x8af   :  { %1900 = vperm.xlu0 %3505, %v1866_v19   ;;  %1787 = vperm.xlu1 %3506, %v1749_v20  }
 0x8b0   :  { %3360 = vmatmul.mubr.msk.bf16.gmra.mrb[16].mxu1 %vm1319_vm5, %v3547_v21 }
 0x8b1   :  { %3367 = vmatprep.mubr.msk.bf16.mxu1 %vm1319_vm5, %v3548_v42 }
 0x8b3   :  { %1910 = vperm.xlu0 %3505, %v1868_v23   ;;  %1905 = vperm.xlu1 %3506, %v1867_v24  }
 0x8b7   :  { %2105 = vperm.xlu0 %3505, %v2097_v38   ;;  %1915 = vperm.xlu1 %3506, %v1869_v25  }
 0x8b8   :  { %3368 = vmatmul.mubr.msk.bf16.vlgmr.msra.gmra.mrb[12].mxu1 %vm1319_vm5, %v3549_v27 }
 0x8b9   :  { %3376 = vmatpush3.bf16.msra.mxu1 %v1528_v22  ;;  %3371 = vmatprep.mubr.msk.bf16.mxu1 %vm1319_vm5, %v3550_v55 }
 0x8ba   :  { %3377 = vmatprep.subr.bf16.mxu1 %v1530_v26 }
 0x8bb   :  { %2115 = vperm.xlu0 %3505, %v2099_v29   ;;  %2110 = vperm.xlu1 %3506, %v2098_v30  }
 0x8bd   :  { %3378 = vmatpush3.bf16.msra.mxu1 %v1530_v26 }
 0x8bf   :  { %2120 = vperm.xlu1 %3506, %v2100_v31  }
 0x8c0   :  { %3372 = vmatmul.mubr.msk.bf16.gmra.mrb[16].mxu1 %vm1319_vm5, %v3551_v32 }
 0x8c1   :  { %3379 = vmatprep.mubr.msk.bf16.mxu1 %vm1319_vm5, %v3552_v34 }
 0x8c8   :  { %3380 = vmatmul.mubr.msk.bf16.vlgmr.msra.gmra.mrb[12].mxu1 %vm1319_vm5, %v3553_v35 }
 0x8c9   :  { %3383 = vmatprep.mubr.msk.bf16.mxu1 %vm1319_vm5, %v3554_v36 }
 0x8d0   :  { %3384 = vmatmul.mubr.msk.bf16.gmra.mrb[16].mxu1 %vm1319_vm5, %v3555_v11 }
 0x8d1   :  { %3391 = vmatprep.mubr.msk.bf16.mxu1 %vm1319_vm5, %v3556_v13 }
 0x90d   :  { %v1652_v17 = vpop.permute.xlu0 %1651 }
 0x90e   :  { %3387 = vmatprep.subr.bf16.mxu1 %v1652_v17 }
 0x90f   :  { %3388 = vmatpush3.bf16.msra.mxu1 %v1652_v17 }
 0x911   :  { %v1654_v37 = vpop.permute.xlu1 %1653 }
 0x912   :  { %3389 = vmatprep.subr.bf16.mxu1 %v1654_v37 }
 0x913   :  { %3390 = vmatpush3.bf16.msra.mxu1 %v1654_v37 }
 0x916   :  { %3392 = vmatmul.mubr.msk.bf16.vlgmr.msra.gmra.mrb[12].mxu1 %vm1319_vm5, %v3557_v39 }
 0x917   :  { %3395 = vmatprep.mubr.msk.bf16.mxu1 %vm1319_vm5, %v3558_v8 }
 0x91e   :  { %3396 = vmatmul.mubr.msk.bf16.gmra.mrb[16].mxu1 %vm1319_vm5, %v3559_v12  ;;  %v1753_v40 = vpop.permute.xlu0 %1752 }
 0x922   :  { %v1758_v41 = vpop.permute.xlu1 %1757  ;;  %v1763_v5 = vpop.permute.xlu0 %1762 }
 0x926   :  { %v1768_v6 = vpop.permute.xlu1 %1767  ;;  %v1773_v61 = vpop.permute.xlu0 %1772 }
 0x92a   :  { %v1778_v51 = vpop.permute.xlu1 %1777  ;;  %v1783_v59 = vpop.permute.xlu0 %1782 }
 0x92e   :  { %v1788_v0 = vpop.permute.xlu1 %1787 }
 0x9e9   :  { %v3393_v15 = vpop.f32.mrb[12].mxu1 }
 0x9ea   :  { %v4375_v43 = vadd.f32 %v3393_v15, %v1763_v5  ;;  %v1703_v44 = vpop.f32.mrb[13].mxu1 }
 0x9eb   :  { %v1790_v62 = vadd.f32 %v1753_v40, %v1703_v44  ;;  %v3394_v2 = vpop.f32.mrb[14].mxu1 }
 0x9ec   :  { %v3110_v46 = vmul.f32 -1.442695, %v4375_v43  ;;  %v1793_v47 = vadd.f32 %v3394_v2, %v1768_v6  ;;  %v1706_v48 = vpop.f32.mrb[15].mxu1 }
 0x9ed   :  { %v3108_v52 = vmul.f32 -1.442695, %v1790_v62  ;;  %v1791_v53 = vadd.f32 %v1758_v41, %v1706_v48 }
 0x9ee   :  { %3630 = vpow2.f32 %v3110_v46  ;;  %v3111_v54 = vmul.f32 -1.442695, %v1793_v47 }
 0x9ef   :  { %3632 = vpow2.f32 %v3108_v52  ;;  %v3109_v56 = vmul.f32 -1.442695, %v1791_v53  ;;  %v3564_v52 = vld [vmem:[%s4713_s9] sm:$0xff]  }
 0x9f0   :  { %3634 = vpow2.f32 %v3111_v54  ;;  %v1906_v54 = vpop.permute.xlu1 %1905 }
 0x9f1   :  { %3636 = vpow2.f32 %v3109_v56  ;;  %v3397_v60 = vpop.f32.mrb[16].mxu1 }
 0x9f2   :  { %v1796_v63 = vadd.f32 %v3397_v60, %v1783_v59  ;;  %v1719_v33 = vpop.f32.mrb[17].mxu1 }
 0x9f3   :  { %v1794_v1 = vadd.f32 %v1773_v61, %v1719_v33  ;;  %v3398_v3 = vpop.f32.mrb[18].mxu1 }
 0x9f4   :  { %v3114_v4 = vmul.f32 -1.442695, %v1796_v63  ;;  %v1797_v7 = vadd.f32 %v3398_v3, %v1788_v0  ;;  %v1722_v9 = vpop.f32.mrb[19].mxu1  ;;  %v1916_v33 = vpop.permute.xlu1 %1915 }
 0x9f5   :  { %v3112_v10 = vmul.f32 -1.442695, %v1794_v1  ;;  %v1795_v14 = vadd.f32 %v1778_v51, %v1722_v9 }
 0x9f6   :  { %3638 = vpow2.f32 %v3114_v4  ;;  %v3115_v19 = vmul.f32 -1.442695, %v1797_v7 }
 0x9f7   :  { %3640 = vpow2.f32 %v3112_v10  ;;  %v3113_v20 = vmul.f32 -1.442695, %v1795_v14 }
 0x9f8   :  { %v3631_v21 = vpop.eup %3630  ;;  %3642 = vpow2.f32 %v3115_v19 }
 0x9f9   :  { %v3633_v22 = vpop.eup %3632  ;;  %v1824_v42 = vadd.f32 1.0, %v3631_v21  ;;  %3644 = vpow2.f32 %v3113_v20 }
 0x9fa   :  { %v3635_v23 = vpop.eup %3634  ;;  %v1822_v24 = vadd.f32 1.0, %v3633_v22 }
 0x9fb   :  { %v3637_v38 = vpop.eup %3636  ;;  %3646 = vrcp.f32 %v1824_v42  ;;  %v1825_v25 = vadd.f32 1.0, %v3635_v23 }
 0x9fc   :  { %3648 = vrcp.f32 %v1822_v24  ;;  %v1823_v27 = vadd.f32 1.0, %v3637_v38 }
 0x9fd   :  { %3650 = vrcp.f32 %v1825_v25 }
 0x9fe   :  { %3652 = vrcp.f32 %v1823_v27 }
 0xa00   :  { %v3639_v55 = vpop.eup %3638 }
 0xa01   :  { %v3641_v29 = vpop.eup %3640  ;;  %v1828_v30 = vadd.f32 1.0, %v3639_v55 }
 0xa02   :  { %v3643_v26 = vpop.eup %3642  ;;  %v1826_v31 = vadd.f32 1.0, %v3641_v29 }
 0xa03   :  { %v3645_v32 = vpop.eup %3644  ;;  %3654 = vrcp.f32 %v1828_v30  ;;  %v1829_v34 = vadd.f32 1.0, %v3643_v26 }
 0xa04   :  { %3656 = vrcp.f32 %v1826_v31  ;;  %v1827_v35 = vadd.f32 1.0, %v3645_v32 }
 0xa05   :  { %v3647_v36 = vpop.eup %3646  ;;  %3658 = vrcp.f32 %v1829_v34 }
 0xa06   :  { %v3649_v11 = vpop.eup %3648  ;;  %3660 = vrcp.f32 %v1827_v35  ;;  %v1848_v37 = vmul.f32 %v3647_v36, %v4375_v43  ;;  %v3561_v43 = vld [vmem:[%s4712_s7 + $0x8] sm:$0xff]  }
 0xa07   :  { %v3651_v13 = vpop.eup %3650  ;;  %v1846_v8 = vmul.f32 %v3649_v11, %v1790_v62  ;;  %v3562_v62 = vld [vmem:[%s4712_s7 + $0x10] sm:$0xff]   ;;  %v3565_v11 = vld [vmem:[%s4713_s9 + $0x8] sm:$0xff]   ;;  %s3771_s9 = smov 5  }
 0xa08   :  { %v3653_v17 = vpop.eup %3652  ;;  %v1849_v39 = vmul.f32 %v3651_v13, %v1793_v47  ;;  %v3563_v47 = vld [vmem:[%s4712_s7 + $0x18] sm:$0xff]  }
 0xa09   :  { %v1847_v12 = vmul.f32 %v3653_v17, %v1791_v53  ;;  %v1901_v53 = vpop.permute.xlu0 %1900 }
 0xa0a   :  { %v1855_v16 = vpack.c.bf16 %v1849_v39, %v1848_v37 }
 0xa0b   :  { %v1854_v40 = vpack.c.bf16 %v1847_v12, %v1846_v8  ;;  %v3770_v8 = vmov 0.0  }
 0xa0c   :  { %2236 = vst.msk [vmem:[#allocation2 + $0x80] sm:$0xff] %vm1319_vm5, %v3770_v8  ;;  %2237 = vst.msk [vmem:[#allocation2 + $0x88] sm:$0xff] %vm1319_vm5, %v3770_v8 }
 0xa0d   :  { %v3655_v41 = vpop.eup %3654  ;;  %3399 = vmatprep.subr.bf16.mxu0 %v1854_v40  ;;  %v1911_v56 = vpop.permute.xlu0 %1910  ;;  %2220 = vst.msk [vmem:[#allocation2] sm:$0xff] %vm1319_vm5, %v3770_v8  ;;  %2221 = vst.msk [vmem:[#allocation2 + $0x8] sm:$0xff] %vm1319_vm5, %v3770_v8 }
 0xa0e   :  { %v3657_v5 = vpop.eup %3656  ;;  %3400 = vmatpush3.bf16.msra.mxu0 %v1854_v40  ;;  %v1852_v44 = vmul.f32 %v3655_v41, %v1796_v63  ;;  %2222 = vst.msk [vmem:[#allocation2 + $0x10] sm:$0xff] %vm1319_vm5, %v3770_v8  ;;  %2223 = vst.msk [vmem:[#allocation2 + $0x18] sm:$0xff] %vm1319_vm5, %v3770_v8 }
 0xa0f   :  { %v3659_v6 = vpop.eup %3658  ;;  %3401 = vmatprep.subr.bf16.mxu0 %v1855_v16  ;;  %v1850_v2 = vmul.f32 %v3657_v5, %v1794_v1  ;;  %2224 = vst.msk [vmem:[#allocation2 + $0x20] sm:$0xff] %vm1319_vm5, %v3770_v8  ;;  %2225 = vst.msk [vmem:[#allocation2 + $0x28] sm:$0xff] %vm1319_vm5, %v3770_v8 }
 0xa10   :  { %v3661_v15 = vpop.eup %3660  ;;  %v1853_v61 = vmul.f32 %v3659_v6, %v1797_v7  ;;  %2226 = vst.msk [vmem:[#allocation2 + $0x30] sm:$0xff] %vm1319_vm5, %v3770_v8  ;;  %2227 = vst.msk [vmem:[#allocation2 + $0x38] sm:$0xff] %vm1319_vm5, %v3770_v8 }
 0xa11   :  { %v1851_v46 = vmul.f32 %v3661_v15, %v1795_v14  ;;  %2228 = vst.msk [vmem:[#allocation2 + $0x40] sm:$0xff] %vm1319_vm5, %v3770_v8  ;;  %2229 = vst.msk [vmem:[#allocation2 + $0x48] sm:$0xff] %vm1319_vm5, %v3770_v8  ;;  %v2106_v12 = vpop.permute.xlu0 %2105 }
 0xa12   :  { %3402 = vmatpush3.bf16.msra.mxu0 %v1855_v16  ;;  %v1857_v48 = vpack.c.bf16 %v1853_v61, %v1852_v44  ;;  %2230 = vst.msk [vmem:[#allocation2 + $0x50] sm:$0xff] %vm1319_vm5, %v3770_v8  ;;  %2231 = vst.msk [vmem:[#allocation2 + $0x58] sm:$0xff] %vm1319_vm5, %v3770_v8  ;;  %v2111_v16 = vpop.permute.xlu1 %2110 }
 0xa13   :  { %v1856_v51 = vpack.c.bf16 %v1851_v46, %v1850_v2  ;;  %2232 = vst.msk [vmem:[#allocation2 + $0x60] sm:$0xff] %vm1319_vm5, %v3770_v8  ;;  %2233 = vst.msk [vmem:[#allocation2 + $0x68] sm:$0xff] %vm1319_vm5, %v3770_v8 }
 0xa14   :  { %2234 = vst.msk [vmem:[#allocation2 + $0x70] sm:$0xff] %vm1319_vm5, %v3770_v8  ;;  %2235 = vst.msk [vmem:[#allocation2 + $0x78] sm:$0xff] %vm1319_vm5, %v3770_v8 }
 0xa15   :  { %3403 = vmatprep.subr.bf16.mxu0 %v1856_v51  ;;  %2238 = vst.msk [vmem:[#allocation2 + $0x90] sm:$0xff] %vm1319_vm5, %v3770_v8  ;;  %2239 = vst.msk [vmem:[#allocation2 + $0x98] sm:$0xff] %vm1319_vm5, %v3770_v8  ;;  %v2116_v40 = vpop.permute.xlu0 %2115 }
 0xa16   :  { %3404 = vmatpush3.bf16.msra.mxu0 %v1856_v51  ;;  %2240 = vst.msk [vmem:[#allocation2 + $0xa0] sm:$0xff] %vm1319_vm5, %v3770_v8  ;;  %2241 = vst.msk [vmem:[#allocation2 + $0xa8] sm:$0xff] %vm1319_vm5, %v3770_v8  ;;  %v2121_v15 = vpop.permute.xlu1 %2120 }
 0xa17   :  { %3405 = vmatprep.subr.bf16.mxu0 %v1857_v48  ;;  %2242 = vst.msk [vmem:[#allocation2 + $0xb0] sm:$0xff] %vm1319_vm5, %v3770_v8  ;;  %2243 = vst.msk [vmem:[#allocation2 + $0xb8] sm:$0xff] %vm1319_vm5, %v3770_v8 }
 0xa18   :  { %2244 = vst.msk [vmem:[#allocation2 + $0xc0] sm:$0xff] %vm1319_vm5, %v3770_v8  ;;  %2245 = vst.msk [vmem:[#allocation2 + $0xc8] sm:$0xff] %vm1319_vm5, %v3770_v8 }
 0xa19   :  { %2246 = vst.msk [vmem:[#allocation2 + $0xd0] sm:$0xff] %vm1319_vm5, %v3770_v8  ;;  %2247 = vst.msk [vmem:[#allocation2 + $0xd8] sm:$0xff] %vm1319_vm5, %v3770_v8 }
 0xa1a   :  { %3406 = vmatpush3.bf16.msra.mxu0 %v1857_v48  ;;  %2248 = vst.msk [vmem:[#allocation2 + $0xe0] sm:$0xff] %vm1319_vm5, %v3770_v8  ;;  %2249 = vst.msk [vmem:[#allocation2 + $0xe8] sm:$0xff] %vm1319_vm5, %v3770_v8 }
 0xa1b   :  { %2250 = vst.msk [vmem:[#allocation2 + $0xf0] sm:$0xff] %vm1319_vm5, %v3770_v8  ;;  %2251 = vst.msk [vmem:[#allocation2 + $0xf8] sm:$0xff] %vm1319_vm5, %v3770_v8 }
 0xa1c   :  { %2252 = vst.msk [vmem:[#allocation2 + $0x100] sm:$0xff] %vm1319_vm5, %v3770_v8  ;;  %2253 = vst.msk [vmem:[#allocation2 + $0x108] sm:$0xff] %vm1319_vm5, %v3770_v8 }
 0xa1d   :  { %3408 = vmatmul.mubr.msk.bf16.vlgmr.msra.gmra.mrb[16].mxu0 %vm526_vm2, %v3561_v43  ;;  %2254 = vst.msk [vmem:[#allocation2 + $0x110] sm:$0xff] %vm1319_vm5, %v3770_v8  ;;  %2255 = vst.msk [vmem:[#allocation2 + $0x118] sm:$0xff] %vm1319_vm5, %v3770_v8  ;;  %v1894_v8 = vld [vmem:[%s4716_s15 + $0x20] sm:$0xff] }
 0xa1e   :  { %3411 = vmatprep.mubr.msk.bf16.mxu0 %vm526_vm2, %v3562_v62 }
 0xa25   :  { %3412 = vmatmul.mubr.msk.bf16.gmra.mrb[20].mxu0 %vm526_vm2, %v3563_v47 }
 0xa26   :  { %3419 = vmatprep.mubr.msk.bf16.mxu0 %vm1319_vm5, %v3564_v52 }
 0xaf0   :  { %v3409_v59 = vpop.f32.mrb[16].mxu0 }
 0xaf1   :  { %v2013_v60 = vadd.f32 %v3409_v59, %v1911_v56  ;;  %v2004_v63 = vpop.f32.mrb[17].mxu0 }
 0xaf2   :  { %v2005_v0 = vadd.f32 %v2004_v63, %v1901_v53  ;;  %v3410_v1 = vpop.f32.mrb[18].mxu0 }
 0xaf3   :  { %v3126_v3 = vmul.f32 -1.442695, %v2013_v60  ;;  %v2016_v4 = vadd.f32 %v3410_v1, %v1916_v33  ;;  %v2007_v7 = vpop.f32.mrb[19].mxu0 }
 0xaf4   :  { %v3124_v9 = vmul.f32 -1.442695, %v2005_v0  ;;  %v2008_v10 = vadd.f32 %v2007_v7, %v1906_v54 }
 0xaf5   :  { %3662 = vpow2.f32 %v3126_v3  ;;  %v3127_v14 = vmul.f32 -1.442695, %v2016_v4 }
 0xaf6   :  { %3664 = vpow2.f32 %v3124_v9  ;;  %v3125_v19 = vmul.f32 -1.442695, %v2008_v10 }
 0xaf7   :  { %3666 = vpow2.f32 %v3127_v14 }
 0xaf8   :  { %3668 = vpow2.f32 %v3125_v19  ;;  %v4399_v13 = vpop.f32.mrb[20].mxu0 }
 0xaf9   :  { %v4401_v17 = vpop.f32.mrb[21].mxu0 }
 0xafa   :  { %v4403_v37 = vpop.f32.mrb[22].mxu0 }
 0xafb   :  { %v4405_v39 = vpop.f32.mrb[23].mxu0 }
 0xaff   :  { %v3663_v20 = vpop.eup %3662 }
 0xb00   :  { %v3665_v21 = vpop.eup %3664  ;;  %v2061_v22 = vadd.f32 1.0, %v3663_v20 }
 0xb01   :  { %v3667_v42 = vpop.eup %3666  ;;  %v2059_v23 = vadd.f32 1.0, %v3665_v21 }
 0xb02   :  { %v3669_v24 = vpop.eup %3668  ;;  %3670 = vrcp.f32 %v2061_v22  ;;  %v2062_v38 = vadd.f32 1.0, %v3667_v42 }
 0xb03   :  { %3672 = vrcp.f32 %v2059_v23  ;;  %v2060_v25 = vadd.f32 1.0, %v3669_v24 }
 0xb04   :  { %3674 = vrcp.f32 %v2062_v38  ;;  %v3568_v38 = vld [vmem:[%s4714_s11 + $0x4] ss:$12 sps:$4 sm:$0xff]  }
 0xb05   :  { %3676 = vrcp.f32 %v2060_v25  ;;  %v1870_v25 = vld [vmem:[%s4710_s8 + $0x20] sm:$0xff] }
 0xb0c   :  { %v3671_v27 = vpop.eup %3670 }
 0xb0d   :  { %v3673_v55 = vpop.eup %3672  ;;  %v2085_v26 = vmul.f32 %v3671_v27, %v2013_v60  ;;  %v1871_v27 = vld [vmem:[%s4710_s8 + $0x28] sm:$0xff] }
 0xb0e   :  { %v3675_v29 = vpop.eup %3674  ;;  %v2083_v32 = vmul.f32 %v3673_v55, %v2005_v0  ;;  %v1872_v55 = vld [vmem:[%s4710_s8 + $0x30] sm:$0xff] }
 0xb0f   :  { %v3677_v30 = vpop.eup %3676  ;;  %v2086_v31 = vmul.f32 %v3675_v29, %v2016_v4  ;;  %v1873_v29 = vld [vmem:[%s4710_s8 + $0x38] sm:$0xff] }
 0xb10   :  { %v2084_v34 = vmul.f32 %v3677_v30, %v2008_v10  ;;  %v2408_v30 = vld [vmem:[%s4715_s12] sm:$0xff] }
 0xb11   :  { %v2102_v35 = vpack.c.bf16 %v2086_v31, %v2085_v26  ;;  %v2409_v26 = vld [vmem:[%s4715_s12 + $0x8] sm:$0xff]  ;;  %v2410_v31 = vld [vmem:[%s4715_s12 + $0x10] sm:$0xff] }
 0xb12   :  { %v2101_v36 = vpack.c.bf16 %v2084_v34, %v2083_v32  ;;  %v2411_v32 = vld [vmem:[%s4715_s12 + $0x18] sm:$0xff]  ;;  %v1890_v34 = vld [vmem:[%s4716_s15] sm:$0xff] }
 0xb14   :  { %3415 = vmatprep.subr.bf16.mxu0 %v2101_v36 }
 0xb15   :  { %3416 = vmatpush3.bf16.msra.mxu0 %v2101_v36  ;;  %v1892_v36 = vld [vmem:[%s4716_s15 + $0x10] sm:$0xff] }
 0xb16   :  { %3417 = vmatprep.subr.bf16.mxu0 %v2102_v35 }
 0xb19   :  { %3418 = vmatpush3.bf16.msra.mxu0 %v2102_v35  ;;  %v1891_v35 = vld [vmem:[%s4716_s15 + $0x8] sm:$0xff] }
 0xb1c   :  { %3420 = vmatmul.mubr.msk.bf16.vlgmr.msra.gmra.mrb[24].mxu0 %vm1319_vm5, %v3565_v11  ;;  %v1893_v11 = vld [vmem:[%s4716_s15 + $0x18] sm:$0xff] }
 0xb1d   :  { %2554 = vmatprep.mubr.bf16.mxu0 %v3568_v38 }
 0xbef   :  { %v3421_v41 = vpop.f32.mrb[24].mxu0 }
 0xbf0   :  { %v2182_v5 = vadd.f32 %v3421_v41, %v2116_v40  ;;  %v2173_v6 = vpop.f32.mrb[25].mxu0  ;;  %v1242_v40 = vmul.f32 %v4247_v50, %v4061_v45  ;;  %v1897_v41 = vld [vmem:[%s4716_s15 + $0x38] sm:$0xff]  ;;  %v1245_v50 = vmul.f32 %v4251_v57, %v4061_v45 }
 0xbf1   :  { %v2174_v44 = vadd.f32 %v2173_v6, %v2106_v12  ;;  %v3422_v61 = vpop.f32.mrb[26].mxu0  ;;  %v1895_v12 = vld [vmem:[%s4716_s15 + $0x28] sm:$0xff] }
 0xbf2   :  { %v3138_v2 = vmul.f32 -1.442695, %v2182_v5  ;;  %v2185_v46 = vadd.f32 %v3422_v61, %v2121_v15  ;;  %v2176_v48 = vpop.f32.mrb[27].mxu0  ;;  %v1246_v6 = vadd.f32 %v1242_v40, %v4079_v18  ;;  %v1244_v15 = vmul.f32 %v4253_v58, %v4061_v45 }
 0xbf3   :  { %v3136_v51 = vmul.f32 -1.442695, %v2174_v44  ;;  %v2177_v43 = vadd.f32 %v2176_v48, %v2111_v16  ;;  %v1896_v16 = vld [vmem:[%s4716_s15 + $0x30] sm:$0xff] }
 0xbf4   :  { %3678 = vpow2.f32 %v3138_v2  ;;  %v3139_v62 = vmul.f32 -1.442695, %v2185_v46  ;;  %v1248_v61 = vadd.f32 %v1244_v15, %v4079_v18 }
 0xbf5   :  { %3680 = vpow2.f32 %v3136_v51  ;;  %v3137_v47 = vmul.f32 -1.442695, %v2177_v43 }
 0xbf6   :  { %3682 = vpow2.f32 %v3139_v62 }
 0xbf7   :  { %3684 = vpow2.f32 %v3137_v47 }
 0xbfe   :  { %v3679_v52 = vpop.eup %3678 }
 0xbff   :  { %v3681_v53 = vpop.eup %3680  ;;  %v2202_v54 = vadd.f32 1.0, %v3679_v52 }
 0xc00   :  { %v3683_v56 = vpop.eup %3682  ;;  %v2200_v59 = vadd.f32 1.0, %v3681_v53 }
 0xc01   :  { %v3685_v60 = vpop.eup %3684  ;;  %3686 = vrcp.f32 %v2202_v54  ;;  %v2203_v63 = vadd.f32 1.0, %v3683_v56 }
 0xc02   :  { %3688 = vrcp.f32 %v2200_v59  ;;  %v2201_v33 = vadd.f32 1.0, %v3685_v60 }
 0xc03   :  { %3690 = vrcp.f32 %v2203_v63 }
 0xc04   :  { %3692 = vrcp.f32 %v2201_v33 }
 0xc0b   :  { %v3687_v0 = vpop.eup %3686 }
 0xc0c   :  { %v3689_v1 = vpop.eup %3688  ;;  %v2214_v3 = vmul.f32 %v3687_v0, %v2182_v5  ;;  %v1243_v5 = vmul.f32 %v4245_v49, %v4061_v45  ;;  %v1249_v49 = vadd.f32 %v1245_v50, %v4079_v18 }
 0xc0d   :  { %v3691_v4 = vpop.eup %3690  ;;  %v2212_v7 = vmul.f32 %v3689_v1, %v2174_v44 }
 0xc0e   :  { %v3693_v9 = vpop.eup %3692  ;;  %v2218_v10 = vmul.f32 %v2214_v3, %v3981_v28  ;;  %v2215_v14 = vmul.f32 %v3691_v4, %v2185_v46  ;;  %v1247_v44 = vadd.f32 %v1243_v5, %v4079_v18 }
 0xc0f   :  { %v2216_v19 = vmul.f32 %v2212_v7, %v3981_v28  ;;  %v2213_v20 = vmul.f32 %v3693_v9, %v2177_v43 }
 0xc10   :  { %v2219_v21 = vmul.f32 %v2215_v14, %v3981_v28  ;;  %2264 = vrot.lane.b32.xlu0 %v2218_v10, %s3771_s9  ;;  %2330 = vst.msk [vmem:[#allocation2 + $0x90] sm:$0xff] %vm1319_vm5, %v2218_v10 }
 0xc11   :  { %v2217_v22 = vmul.f32 %v2213_v20, %v3981_v28  ;;  %2328 = vst.msk [vmem:[#allocation2 + $0x80] sm:$0xff] %vm1319_vm5, %v2216_v19 }
 0xc12   :  { %2266 = vrot.lane.b32.xlu1 %v2219_v21, %s3771_s9  ;;  %2331 = vst.msk [vmem:[#allocation2 + $0x98] sm:$0xff] %vm1319_vm5, %v2219_v21 }
 0xc13   :  { %2329 = vst.msk [vmem:[#allocation2 + $0x88] sm:$0xff] %vm1319_vm5, %v2217_v22 }
 0xc14   :  { %2336 = vrot.lane.b32.xlu0 %v2218_v10, %s3763_s25 }
 0xc16   :  { %2338 = vrot.lane.b32.xlu1 %v2219_v21, %s3763_s25 }
 0xc17   :  { %v2430_v4 = vld [vmem:[#allocation2 + $0x90] sm:$0xff] }
 0xc18   :  { %2281 = vrot.lane.b32.xlu0 %v2218_v10, %s3772_s1  ;;  %v2428_v42 = vld [vmem:[#allocation2 + $0x80] sm:$0xff] }
 0xc19   :  { %v2431_v63 = vld [vmem:[#allocation2 + $0x98] sm:$0xff] }
 0xc1a   :  { %2283 = vrot.lane.b32.xlu1 %v2219_v21, %s3772_s1  ;;  %v2429_v23 = vld [vmem:[#allocation2 + $0x88] sm:$0xff]  ;;  %v2457_v9 = vpack.c.bf16 %v2431_v63, %v2430_v4 }
 0xc1b   :  { %v2456_v24 = vpack.c.bf16 %v2429_v23, %v2428_v42 }
 0xc1c   :  { %2353 = vrot.lane.b32.xlu0 %v2218_v10, %s3765_s27 }
 0xc1d   :  { %3281 = vmatprep.subr.bf16.mxu0 %v2456_v24 }
 0xc1e   :  { %2355 = vrot.lane.b32.xlu1 %v2219_v21, %s3765_s27 }
 0xc20   :  { %2298 = vrot.lane.b32.xlu0 %v2218_v10, %s3773_s28 }
 0xc22   :  { %2300 = vrot.lane.b32.xlu1 %v2219_v21, %s3773_s28 }
 0xc24   :  { %2370 = vrot.lane.b32.xlu0 %v2218_v10, %s3762_s24 }
 0xc26   :  { %2372 = vrot.lane.b32.xlu1 %v2219_v21, %s3762_s24 }
 0xc28   :  { %2260 = vrot.lane.b32.xlu0 %v2216_v19, %s3771_s9 }
 0xc2a   :  { %2262 = vrot.lane.b32.xlu1 %v2217_v22, %s3771_s9 }
 0xc2c   :  { %2332 = vrot.lane.b32.xlu0 %v2216_v19, %s3763_s25 }
 0xc2e   :  { %2334 = vrot.lane.b32.xlu1 %v2217_v22, %s3763_s25  ;;  %s3775_s25 = smov 123  }
 0xc30   :  { %2277 = vrot.lane.b32.xlu0 %v2216_v19, %s3772_s1 }
 0xc32   :  { %2279 = vrot.lane.b32.xlu1 %v2217_v22, %s3772_s1 }
 0xc34   :  { %2349 = vrot.lane.b32.xlu0 %v2216_v19, %s3765_s27 }
 0xc36   :  { %2351 = vrot.lane.b32.xlu1 %v2217_v22, %s3765_s27 }
 0xc38   :  { %2294 = vrot.lane.b32.xlu0 %v2216_v19, %s3773_s28 }
 0xc3a   :  { %2296 = vrot.lane.b32.xlu1 %v2217_v22, %s3773_s28 }
 0xc3c   :  { %2366 = vrot.lane.b32.xlu0 %v2216_v19, %s3762_s24 }
 0xc3e   :  { %2368 = vrot.lane.b32.xlu1 %v2217_v22, %s3762_s24 }
 0xc40   :  { %2311 = vrot.lane.b32.xlu0 %v2216_v19, %s3774_s26 }
 0xc42   :  { %2313 = vrot.lane.b32.xlu1 %v2217_v22, %s3774_s26 }
 0xc44   :  { %2315 = vrot.lane.b32.xlu0 %v2218_v10, %s3774_s26 }
 0xc46   :  { %2317 = vrot.lane.b32.xlu1 %v2219_v21, %s3774_s26 }
 0xc48   :  { %2383 = vrot.lane.b32.xlu0 %v2216_v19, %s3775_s25 }
 0xc4a   :  { %2385 = vrot.lane.b32.xlu1 %v2217_v22, %s3775_s25 }
 0xc4c   :  { %2387 = vrot.lane.b32.xlu0 %v2218_v10, %s3775_s25 }
 0xc4e   :  { %2389 = vrot.lane.b32.xlu1 %v2219_v21, %s3775_s25 }
 0xc50   :  { %1920 = vperm.xlu0 %3505, %v1870_v25  }
 0xc52   :  { %1925 = vperm.xlu1 %3506, %v1871_v27  }
 0xc54   :  { %1930 = vperm.xlu0 %3505, %v1872_v55  }
 0xc56   :  { %1935 = vperm.xlu1 %3506, %v1873_v29  }
 0xc58   :  { %2468 = vperm.xlu0 %3505, %v2408_v30  }
 0xc5a   :  { %2473 = vperm.xlu1 %3506, %v2409_v26  }
 0xc5c   :  { %2478 = vperm.xlu0 %3505, %v2410_v31  }
 0xc5e   :  { %2483 = vperm.xlu1 %3506, %v2411_v32  }
 0xc60   :  { %2846 = vperm.xlu0 %3505, %v1890_v34  }
 0xc62   :  { %2851 = vperm.xlu1 %3506, %v1891_v35  }
 0xc64   :  { %2856 = vperm.xlu0 %3505, %v1892_v36  }
 0xc66   :  { %2861 = vperm.xlu1 %3506, %v1893_v11  }
 0xc68   :  { %2866 = vperm.xlu0 %3505, %v1894_v8  }
 0xc6a   :  { %2871 = vperm.xlu1 %3506, %v1895_v12  }
 0xc6c   :  { %2876 = vperm.xlu0 %3505, %v1896_v16  }
 0xc6e   :  { %2881 = vperm.xlu1 %3506, %v1897_v41  }
 0xc70   :  { %1254 = vrot.lane.b32.xlu0 %v1246_v6, %s3761_s22 }
 0xc72   :  { %1256 = vrot.lane.b32.xlu1 %v1247_v44, %s3761_s22 }
 0xc74   :  { %1258 = vrot.lane.b32.xlu0 %v1248_v61, %s3761_s22 }
 0xc76   :  { %1260 = vrot.lane.b32.xlu1 %v1249_v49, %s3761_s22 }
 0xc82   :  { %v2265_v58 = vpop.permute.xlu0 %2264 }
 0xc83   :  { %2275 = vst.msk [vmem:[#allocation2 + $0x10] sm:$0xff] %vm2272_vm6, %v2265_v58 }
 0xc84   :  { %v2267_v2 = vpop.permute.xlu1 %2266 }
 0xc85   :  { %2276 = vst.msk [vmem:[#allocation2 + $0x18] sm:$0xff] %vm2272_vm6, %v2267_v2 }
 0xc86   :  { %v2337_v45 = vpop.permute.xlu0 %2336 }
 0xc87   :  { %2347 = vst.msk [vmem:[#allocation2 + $0xb0] sm:$0xff] %vm2344_vm7, %v2337_v45 }
 0xc88   :  { %v2339_v57 = vpop.permute.xlu1 %2338 }
 0xc89   :  { %2348 = vst.msk [vmem:[#allocation2 + $0xb8] sm:$0xff] %vm2344_vm7, %v2339_v57 }
 0xc8a   :  { %v2282_v18 = vpop.permute.xlu0 %2281  ;;  %v2414_v19 = vld [vmem:[#allocation2 + $0x10] sm:$0xff] }
 0xc8b   :  { %2292 = vst.msk [vmem:[#allocation2 + $0x30] sm:$0xff] %vm2289_vm8, %v2282_v18 }
 0xc8c   :  { %v2284_v46 = vpop.permute.xlu1 %2283  ;;  %v2415_v10 = vld [vmem:[#allocation2 + $0x18] sm:$0xff] }
 0xc8d   :  { %2293 = vst.msk [vmem:[#allocation2 + $0x38] sm:$0xff] %vm2289_vm8, %v2284_v46  ;;  %v2449_v22 = vpack.c.bf16 %v2415_v10, %v2414_v19  ;;  %v3572_v19 = vld [vmem:[%s4714_s11 + $0x8] ss:$12 sps:$4 sm:$0xff]  }
 0xc8e   :  { %v2354_v48 = vpop.permute.xlu0 %2353  ;;  %v2434_v29 = vld [vmem:[#allocation2 + $0xb0] sm:$0xff] }
 0xc8f   :  { %2364 = vst.msk [vmem:[#allocation2 + $0xd0] sm:$0xff] %vm2361_vm9, %v2354_v48 }
 0xc90   :  { %v2356_v51 = vpop.permute.xlu1 %2355  ;;  %v2435_v24 = vld [vmem:[#allocation2 + $0xb8] sm:$0xff] }
 0xc91   :  { %2365 = vst.msk [vmem:[#allocation2 + $0xd8] sm:$0xff] %vm2361_vm9, %v2356_v51  ;;  %v2459_v26 = vpack.c.bf16 %v2435_v24, %v2434_v29  ;;  %v3573_v24 = vld [vmem:[%s4714_s11 + $0x20] ss:$12 sps:$4 sm:$0xff]  }
 0xc92   :  { %v2299_v43 = vpop.permute.xlu0 %2298  ;;  %v2418_v34 = vld [vmem:[#allocation2 + $0x30] sm:$0xff] }
 0xc93   :  { %2309 = vst.msk [vmem:[#allocation2 + $0x50] sm:$0xff] %vm2306_vm10, %v2299_v43 }
 0xc94   :  { %v2301_v62 = vpop.permute.xlu1 %2300  ;;  %v2419_v31 = vld [vmem:[#allocation2 + $0x38] sm:$0xff] }
 0xc95   :  { %2310 = vst.msk [vmem:[#allocation2 + $0x58] sm:$0xff] %vm2306_vm10, %v2301_v62  ;;  %v2451_v11 = vpack.c.bf16 %v2419_v31, %v2418_v34 }
 0xc96   :  { %v2371_v47 = vpop.permute.xlu0 %2370  ;;  %v2438_v15 = vld [vmem:[#allocation2 + $0xd0] sm:$0xff] }
 0xc97   :  { %2381 = vst.msk [vmem:[#allocation2 + $0xf0] sm:$0xff] %vm2378_vm11, %v2371_v47 }
 0xc98   :  { %v2373_v52 = vpop.permute.xlu1 %2372  ;;  %v2439_v16 = vld [vmem:[#allocation2 + $0xd8] sm:$0xff] }
 0xc99   :  { %2382 = vst.msk [vmem:[#allocation2 + $0xf8] sm:$0xff] %vm2378_vm11, %v2373_v52  ;;  %v2461_v50 = vpack.c.bf16 %v2439_v16, %v2438_v15 }
 0xc9a   :  { %v2261_v53 = vpop.permute.xlu0 %2260  ;;  %v2422_v58 = vld [vmem:[#allocation2 + $0x50] sm:$0xff] }
 0xc9b   :  { %2273 = vst.msk [vmem:[#allocation2] sm:$0xff] %vm2272_vm6, %v2261_v53 }
 0xc9c   :  { %v2263_v54 = vpop.permute.xlu1 %2262  ;;  %v2423_v61 = vld [vmem:[#allocation2 + $0x58] sm:$0xff] }
 0xc9d   :  { %2274 = vst.msk [vmem:[#allocation2 + $0x8] sm:$0xff] %vm2272_vm6, %v2263_v54  ;;  %v2453_v57 = vpack.c.bf16 %v2423_v61, %v2422_v58 }
 0xc9e   :  { %v2333_v56 = vpop.permute.xlu0 %2332  ;;  %v2442_v52 = vld [vmem:[#allocation2 + $0xf0] sm:$0xff] }
 0xc9f   :  { %2345 = vst.msk [vmem:[#allocation2 + $0xa0] sm:$0xff] %vm2344_vm7, %v2333_v56 }
 0xca0   :  { %v2335_v59 = vpop.permute.xlu1 %2334  ;;  %v2443_v48 = vld [vmem:[#allocation2 + $0xf8] sm:$0xff] }
 0xca1   :  { %2346 = vst.msk [vmem:[#allocation2 + $0xa8] sm:$0xff] %vm2344_vm7, %v2335_v59  ;;  %v2463_v54 = vpack.c.bf16 %v2443_v48, %v2442_v52 }
 0xca2   :  { %v2278_v60 = vpop.permute.xlu0 %2277  ;;  %v2412_v0 = vld [vmem:[#allocation2] sm:$0xff] }
 0xca3   :  { %2290 = vst.msk [vmem:[#allocation2 + $0x20] sm:$0xff] %vm2289_vm8, %v2278_v60 }
 0xca4   :  { %v2280_v33 = vpop.permute.xlu1 %2279  ;;  %v2413_v1 = vld [vmem:[#allocation2 + $0x8] sm:$0xff] }
 0xca5   :  { %2291 = vst.msk [vmem:[#allocation2 + $0x28] sm:$0xff] %vm2289_vm8, %v2280_v33  ;;  %v2448_v3 = vpack.c.bf16 %v2413_v1, %v2412_v0  ;;  %v3566_v33 = vld [vmem:[%s4714_s11] ss:$12 sps:$4 sm:$0xff]   ;;  %v3569_v0 = vld [vmem:[%s4714_s11 + $0x1c] ss:$12 sps:$4 sm:$0xff]  }
 0xca6   :  { %v2350_v7 = vpop.permute.xlu0 %2349  ;;  %v2432_v20 = vld [vmem:[#allocation2 + $0xa0] sm:$0xff] }
 0xca7   :  { %2362 = vst.msk [vmem:[#allocation2 + $0xc0] sm:$0xff] %vm2361_vm9, %v2350_v7  ;;  %3282 = vmatpush3.bf16.msra.mxu0 %v2448_v3 }
 0xca8   :  { %v2352_v14 = vpop.permute.xlu1 %2351  ;;  %3283 = vmatprep.subr.bf16.mxu0 %v2457_v9  ;;  %v2433_v21 = vld [vmem:[#allocation2 + $0xa8] sm:$0xff] }
 0xca9   :  { %2363 = vst.msk [vmem:[#allocation2 + $0xc8] sm:$0xff] %vm2361_vm9, %v2352_v14  ;;  %v2458_v42 = vpack.c.bf16 %v2433_v21, %v2432_v20  ;;  %v3571_v14 = vld [vmem:[%s4714_s11 + $0x18] ss:$12 sps:$4 sm:$0xff]  }
 0xcaa   :  { %v2295_v23 = vpop.permute.xlu0 %2294  ;;  %v2416_v25 = vld [vmem:[#allocation2 + $0x20] sm:$0xff] }
 0xcab   :  { %2307 = vst.msk [vmem:[#allocation2 + $0x40] sm:$0xff] %vm2306_vm10, %v2295_v23  ;;  %3284 = vmatpush3.bf16.msra.mxu0 %v2449_v22 }
 0xcac   :  { %v2297_v38 = vpop.permute.xlu1 %2296  ;;  %3285 = vmatprep.subr.bf16.mxu0 %v2458_v42  ;;  %v2417_v27 = vld [vmem:[#allocation2 + $0x28] sm:$0xff] }
 0xcad   :  { %2308 = vst.msk [vmem:[#allocation2 + $0x48] sm:$0xff] %vm2306_vm10, %v2297_v38  ;;  %v2450_v55 = vpack.c.bf16 %v2417_v27, %v2416_v25 }
 0xcae   :  { %v2367_v30 = vpop.permute.xlu0 %2366  ;;  %v2436_v35 = vld [vmem:[#allocation2 + $0xc0] sm:$0xff] }
 0xcaf   :  { %2379 = vst.msk [vmem:[#allocation2 + $0xe0] sm:$0xff] %vm2378_vm11, %v2367_v30  ;;  %3286 = vmatpush3.bf16.msra.mxu0 %v2450_v55 }
 0xcb0   :  { %v2369_v32 = vpop.permute.xlu1 %2368  ;;  %3287 = vmatprep.subr.bf16.mxu0 %v2459_v26  ;;  %v2437_v36 = vld [vmem:[#allocation2 + $0xc8] sm:$0xff] }
 0xcb1   :  { %2380 = vst.msk [vmem:[#allocation2 + $0xe8] sm:$0xff] %vm2378_vm11, %v2369_v32  ;;  %v2460_v8 = vpack.c.bf16 %v2437_v36, %v2436_v35 }
 0xcb2   :  { %v2312_v12 = vpop.permute.xlu0 %2311  ;;  %v2420_v41 = vld [vmem:[#allocation2 + $0x40] sm:$0xff] }
 0xcb3   :  { %2324 = vst.msk [vmem:[#allocation2 + $0x60] sm:$0xff] %vm2323_vm12, %v2312_v12  ;;  %3288 = vmatpush3.bf16.msra.mxu0 %v2451_v11 }
 0xcb4   :  { %v2314_v40 = vpop.permute.xlu1 %2313  ;;  %3289 = vmatprep.subr.bf16.mxu0 %v2460_v8  ;;  %v2421_v5 = vld [vmem:[#allocation2 + $0x48] sm:$0xff] }
 0xcb5   :  { %2325 = vst.msk [vmem:[#allocation2 + $0x68] sm:$0xff] %vm2323_vm12, %v2314_v40  ;;  %v2452_v6 = vpack.c.bf16 %v2421_v5, %v2420_v41 }
 0xcb6   :  { %v2316_v44 = vpop.permute.xlu0 %2315  ;;  %v2440_v2 = vld [vmem:[#allocation2 + $0xe0] sm:$0xff] }
 0xcb7   :  { %2326 = vst.msk [vmem:[#allocation2 + $0x70] sm:$0xff] %vm2323_vm12, %v2316_v44  ;;  %3290 = vmatpush3.bf16.msra.mxu0 %v2452_v6 }
 0xcb8   :  { %v2318_v49 = vpop.permute.xlu1 %2317  ;;  %3291 = vmatprep.subr.bf16.mxu0 %v2461_v50  ;;  %v2441_v45 = vld [vmem:[#allocation2 + $0xe8] sm:$0xff] }
 0xcb9   :  { %2327 = vst.msk [vmem:[#allocation2 + $0x78] sm:$0xff] %vm2323_vm12, %v2318_v49  ;;  %v2462_v18 = vpack.c.bf16 %v2441_v45, %v2440_v2 }
 0xcba   :  { %v2384_v46 = vpop.permute.xlu0 %2383  ;;  %v2424_v43 = vld [vmem:[#allocation2 + $0x60] sm:$0xff] }
 0xcbb   :  { %2396 = vst.msk [vmem:[#allocation2 + $0x100] sm:$0xff] %vm2395_vm13, %v2384_v46  ;;  %3292 = vmatpush3.bf16.msra.mxu0 %v2453_v57 }
 0xcbc   :  { %v2386_v51 = vpop.permute.xlu1 %2385  ;;  %3293 = vmatprep.subr.bf16.mxu0 %v2462_v18  ;;  %v2425_v62 = vld [vmem:[#allocation2 + $0x68] sm:$0xff] }
 0xcbd   :  { %2397 = vst.msk [vmem:[#allocation2 + $0x108] sm:$0xff] %vm2395_vm13, %v2386_v51  ;;  %v2454_v47 = vpack.c.bf16 %v2425_v62, %v2424_v43 }
 0xcbe   :  { %v2388_v53 = vpop.permute.xlu0 %2387  ;;  %v2426_v59 = vld [vmem:[#allocation2 + $0x70] sm:$0xff] }
 0xcbf   :  { %2398 = vst.msk [vmem:[#allocation2 + $0x110] sm:$0xff] %vm2395_vm13, %v2388_v53  ;;  %3294 = vmatpush3.bf16.msra.mxu0 %v2454_v47  ;;  %v3574_v53 = vld [vmem:[%s4717_s14] sm:$0xff]  }
 0xcc0   :  { %v2390_v56 = vpop.permute.xlu1 %2389  ;;  %3295 = vmatprep.subr.bf16.mxu0 %v2463_v54  ;;  %v2427_v60 = vld [vmem:[#allocation2 + $0x78] sm:$0xff]  ;;  %v3575_v54 = vld [vmem:[%s4717_s14 + $0x8] sm:$0xff]   ;;  %3435 = vmatprep.mubr.msk.bf16.mxu1 %vm1319_vm5, %v3574_v53 }
 0xcc1   :  { %2399 = vst.msk [vmem:[#allocation2 + $0x118] sm:$0xff] %vm2395_vm13, %v2390_v56  ;;  %v2455_v63 = vpack.c.bf16 %v2427_v60, %v2426_v59  ;;  %v3576_v56 = vld [vmem:[%s4717_s14 + $0x10] sm:$0xff]   ;;  %v3577_v59 = vld [vmem:[%s4717_s14 + $0x18] sm:$0xff]   ;;  %v3578_v60 = vld [vmem:[%s4718_s13] sm:$0xff]  }
 0xcc2   :  { %v2444_v1 = vld [vmem:[#allocation2 + $0x100] sm:$0xff] }
 0xcc3   :  { %3296 = vmatpush3.bf16.msra.mxu0 %v2455_v63 }
 0xcc4   :  { %v2445_v3 = vld [vmem:[#allocation2 + $0x108] sm:$0xff] }
 0xcc5   :  { %v2464_v4 = vpack.c.bf16 %v2445_v3, %v2444_v1 }
 0xcc6   :  { %2555 = vmatmul.mubr.bf16.vlgmr.msra.gmra.mrb[28].mxu0 %v3566_v33  ;;  %v2446_v7 = vld [vmem:[#allocation2 + $0x110] sm:$0xff] }
 0xcc7   :  { %3423 = vmatprep.subr.bf16.mxu0 %v2464_v4  ;;  %2562 = vmatprep.mubr.bf16.mxu0 %v3569_v0 }
 0xcc8   :  { %3424 = vmatpush3.bf16.msra.mxu0 %v2464_v4  ;;  %v2447_v9 = vld [vmem:[#allocation2 + $0x118] sm:$0xff] }
 0xcc9   :  { %v2465_v10 = vpack.c.bf16 %v2447_v9, %v2446_v7 }
 0xccb   :  { %3425 = vmatprep.subr.bf16.mxu0 %v2465_v10 }
 0xccc   :  { %3426 = vmatpush3.bf16.msra.mxu0 %v2465_v10 }
 0xcce   :  { %2563 = vmatmul.mubr.bf16.gmra.mrb[32].mxu0 %v3571_v14 }
 0xccf   :  { %v1921_v20 = vpop.permute.xlu0 %1920  ;;  %3427 = vmatprep.mubr.msk.bf16.mxu0 %vm1319_vm5, %v3572_v19 }
 0xcd0   :  { %v2021_v21 = vadd.f32 %v4401_v17, %v1921_v20 }
 0xcd1   :  { %v1926_v22 = vpop.permute.xlu1 %1925 }
 0xcd2   :  { %v3128_v42 = vmul.f32 -1.442695, %v2021_v21  ;;  %v2024_v23 = vadd.f32 %v4405_v39, %v1926_v22 }
 0xcd3   :  { %v1931_v38 = vpop.permute.xlu0 %1930 }
 0xcd4   :  { %3694 = vpow2.f32 %v3128_v42  ;;  %v3129_v25 = vmul.f32 -1.442695, %v2024_v23  ;;  %v2029_v27 = vadd.f32 %v4399_v13, %v1931_v38 }
 0xcd5   :  { %v1936_v55 = vpop.permute.xlu1 %1935 }
 0xcd6   :  { %3696 = vpow2.f32 %v3129_v25  ;;  %v3130_v29 = vmul.f32 -1.442695, %v2029_v27  ;;  %v2032_v30 = vadd.f32 %v4403_v37, %v1936_v55  ;;  %3428 = vmatmul.mubr.msk.bf16.vlgmr.msra.gmra.mrb[36].mxu0 %vm1319_vm5, %v3573_v24 }
 0xcd7   :  { %v4583_v17 = vpop.permute.xlu0 %2468 }
 0xcd8   :  { %3698 = vpow2.f32 %v3130_v29  ;;  %v3131_v39 = vmul.f32 -1.442695, %v2032_v30 }
 0xcd9   :  { %v4585_v26 = vpop.permute.xlu1 %2473 }
 0xcda   :  { %3700 = vpow2.f32 %v3131_v39 }
 0xcdb   :  { %v4587_v31 = vpop.permute.xlu0 %2478 }
 0xcdd   :  { %v4589_v32 = vpop.permute.xlu1 %2483 }
 0xcde   :  { %v3695_v34 = vpop.eup %3694 }
 0xcdf   :  { %v2063_v13 = vadd.f32 1.0, %v3695_v34  ;;  %v4591_v35 = vpop.permute.xlu0 %2846 }
 0xce0   :  { %v3697_v36 = vpop.eup %3696 }
 0xce1   :  { %3702 = vrcp.f32 %v2063_v13  ;;  %v2064_v37 = vadd.f32 1.0, %v3697_v36  ;;  %v4593_v11 = vpop.permute.xlu1 %2851 }
 0xce2   :  { %v3699_v8 = vpop.eup %3698 }
 0xce3   :  { %3704 = vrcp.f32 %v2064_v37  ;;  %v2065_v12 = vadd.f32 1.0, %v3699_v8  ;;  %v4595_v16 = vpop.permute.xlu0 %2856 }
 0xce4   :  { %v3701_v40 = vpop.eup %3700 }
 0xce5   :  { %3706 = vrcp.f32 %v2065_v12  ;;  %v2066_v41 = vadd.f32 1.0, %v3701_v40  ;;  %v4597_v5 = vpop.permute.xlu1 %2861 }
 0xce7   :  { %3708 = vrcp.f32 %v2066_v41  ;;  %v4599_v6 = vpop.permute.xlu0 %2866 }
 0xce9   :  { %v4601_v15 = vpop.permute.xlu1 %2871 }
 0xceb   :  { %v3703_v44 = vpop.eup %3702  ;;  %v4603_v50 = vpop.permute.xlu0 %2876 }
 0xcec   :  { %v2087_v58 = vmul.f32 %v3703_v44, %v2021_v21 }
 0xced   :  { %v3705_v61 = vpop.eup %3704  ;;  %v4605_v49 = vpop.permute.xlu1 %2881 }
 0xcee   :  { %v2088_v2 = vmul.f32 %v3705_v61, %v2024_v23 }
 0xcef   :  { %v3707_v45 = vpop.eup %3706  ;;  %v1255_v57 = vpop.permute.xlu0 %1254 }
 0xcf0   :  { %1266 = vst.msk [vmem:[#allocation3] sm:$0xff] %vm653_vm4, %v1255_v57  ;;  %v2091_v18 = vpack.c.bf16 %v2088_v2, %v2087_v58  ;;  %v2089_v51 = vmul.f32 %v3707_v45, %v2029_v27 }
 0xcf1   :  { %v3709_v46 = vpop.eup %3708  ;;  %v1257_v48 = vpop.permute.xlu1 %1256 }
 0xcf2   :  { %v2090_v43 = vmul.f32 %v3709_v46, %v2032_v30  ;;  %1267 = vst.msk [vmem:[#allocation3 + $0x8] sm:$0xff] %vm653_vm4, %v1257_v48  ;;  %3431 = vmatprep.subr.bf16.mxu1 %v2091_v18 }
 0xcf3   :  { %3432 = vmatpush3.bf16.msra.mxu1 %v2091_v18  ;;  %v1259_v62 = vpop.permute.xlu0 %1258 }
 0xcf4   :  { %1268 = vst.msk [vmem:[#allocation3 + $0x10] sm:$0xff] %vm653_vm4, %v1259_v62  ;;  %v2092_v47 = vpack.c.bf16 %v2090_v43, %v2089_v51  ;;  %v3579_v43 = vld [vmem:[%s4718_s13 + $0x8] sm:$0xff]   ;;  %v3580_v62 = vld [vmem:[%s4718_s13 + $0x10] sm:$0xff]  }
 0xcf5   :  { %v1261_v52 = vpop.permute.xlu1 %1260 }
 0xcf6   :  { %1269 = vst.msk [vmem:[#allocation3 + $0x18] sm:$0xff] %vm653_vm4, %v1261_v52  ;;  %3433 = vmatprep.subr.bf16.mxu1 %v2092_v47 }
 0xcf7   :  { %3434 = vmatpush3.bf16.msra.mxu1 %v2092_v47  ;;  %v3581_v47 = vld [vmem:[%s4718_s13 + $0x18] sm:$0xff]  }
 0xcfa   :  { %3436 = vmatmul.mubr.msk.bf16.vlgmr.msra.gmra.mrb[20].mxu1 %vm1319_vm5, %v3575_v54 }
 0xcfb   :  { %3439 = vmatprep.mubr.msk.bf16.mxu1 %vm1319_vm5, %v3576_v56 }
 0xd02   :  { %3440 = vmatmul.mubr.msk.bf16.gmra.mrb[24].mxu1 %vm1319_vm5, %v3577_v59 }
 0xd03   :  { %3447 = vmatprep.mubr.msk.bf16.mxu1 %vm1319_vm5, %v3578_v60 }
 0xd99   :  { %v3297_v63 = vpop.f32.mrb[28].mxu0 }
 0xd9a   :  { %v3298_v33 = vpop.f32.mrb[29].mxu0 }
 0xd9b   :  { %v3299_v0 = vadd.f32 %v3298_v33, %v3297_v63  ;;  %v3300_v1 = vpop.f32.mrb[30].mxu0 }
 0xd9c   :  { %v3301_v3 = vpop.f32.mrb[31].mxu0 }
 0xd9d   :  { %v3302_v4 = vadd.f32 %v3301_v3, %v3300_v1  ;;  %v2557_v42 = vadd.f32 %v3299_v0, %v4583_v17 }
 0xd9f   :  { %v2560_v55 = vadd.f32 %v3302_v4, %v4585_v26 }
 0xda1   :  { %v3303_v7 = vpop.f32.mrb[32].mxu0 }
 0xda2   :  { %v3304_v9 = vpop.f32.mrb[33].mxu0 }
 0xda3   :  { %v3305_v10 = vadd.f32 %v3304_v9, %v3303_v7  ;;  %v3306_v14 = vpop.f32.mrb[34].mxu0 }
 0xda4   :  { %v3307_v19 = vpop.f32.mrb[35].mxu0 }
 0xda5   :  { %v3308_v20 = vadd.f32 %v3307_v19, %v3306_v14  ;;  %v2565_v21 = vadd.f32 %v3305_v10, %v4587_v31 }
 0xda7   :  { %v2568_v38 = vadd.f32 %v3308_v20, %v4589_v32 }
 0xda9   :  { %v3429_v22 = vpop.f32.mrb[36].mxu0 }
 0xdaa   :  { %v2614_v23 = vadd.f32 %v3429_v22, %v2565_v21  ;;  %v2605_v24 = vpop.f32.mrb[37].mxu0 }
 0xdab   :  { %v2606_v25 = vadd.f32 %v2605_v24, %v2557_v42  ;;  %v3430_v27 = vpop.f32.mrb[38].mxu0 }
 0xdac   :  { %v3150_v29 = vmul.f32 -1.442695, %v2614_v23  ;;  %v2617_v30 = vadd.f32 %v3430_v27, %v2568_v38  ;;  %v2608_v39 = vpop.f32.mrb[39].mxu0 }
 0xdad   :  { %v3148_v34 = vmul.f32 -1.442695, %v2606_v25  ;;  %v2609_v13 = vadd.f32 %v2608_v39, %v2560_v55 }
 0xdae   :  { %3710 = vpow2.f32 %v3150_v29  ;;  %v3151_v36 = vmul.f32 -1.442695, %v2617_v30 }
 0xdaf   :  { %3712 = vpow2.f32 %v3148_v34  ;;  %v3149_v31 = vmul.f32 -1.442695, %v2609_v13 }
 0xdb0   :  { %3714 = vpow2.f32 %v3151_v36 }
 0xdb1   :  { %3716 = vpow2.f32 %v3149_v31 }
 0xdb8   :  { %v3711_v17 = vpop.eup %3710 }
 0xdb9   :  { %v3713_v37 = vpop.eup %3712  ;;  %v2634_v8 = vadd.f32 1.0, %v3711_v17 }
 0xdba   :  { %v3715_v12 = vpop.eup %3714  ;;  %v2632_v32 = vadd.f32 1.0, %v3713_v37 }
 0xdbb   :  { %v3717_v40 = vpop.eup %3716  ;;  %3718 = vrcp.f32 %v2634_v8  ;;  %v2635_v41 = vadd.f32 1.0, %v3715_v12 }
 0xdbc   :  { %3720 = vrcp.f32 %v2632_v32  ;;  %v2633_v26 = vadd.f32 1.0, %v3717_v40 }
 0xdbd   :  { %3722 = vrcp.f32 %v2635_v41 }
 0xdbe   :  { %3724 = vrcp.f32 %v2633_v26 }
 0xdc5   :  { %v3719_v44 = vpop.eup %3718 }
 0xdc6   :  { %v3721_v61 = vpop.eup %3720  ;;  %v2646_v45 = vmul.f32 %v3719_v44, %v2614_v23 }
 0xdc7   :  { %v3723_v58 = vpop.eup %3722  ;;  %v2644_v18 = vmul.f32 %v3721_v61, %v2606_v25 }
 0xdc8   :  { %v3725_v2 = vpop.eup %3724  ;;  %v2647_v57 = vmul.f32 %v3723_v58, %v2617_v30 }
 0xdc9   :  { %v2645_v46 = vmul.f32 %v3725_v2, %v2609_v13 }
 0xdca   :  { %v2649_v48 = vpack.c.bf16 %v2647_v57, %v2646_v45 }
 0xdcb   :  { %v2648_v51 = vpack.c.bf16 %v2645_v46, %v2644_v18 }
 0xdcd   :  { %3443 = vmatprep.subr.bf16.mxu1 %v2648_v51 }
 0xdce   :  { %3444 = vmatpush3.bf16.msra.mxu1 %v2648_v51 }
 0xdcf   :  { %3445 = vmatprep.subr.bf16.mxu1 %v2649_v48 }
 0xdd2   :  { %3446 = vmatpush3.bf16.msra.mxu1 %v2649_v48 }
 0xdd5   :  { %3448 = vmatmul.mubr.msk.bf16.vlgmr.msra.gmra.mrb[20].mxu1 %vm1319_vm5, %v3579_v43 }
 0xdd6   :  { %3451 = vmatprep.mubr.msk.bf16.mxu1 %vm1319_vm5, %v3580_v62 }
 0xddd   :  { %3452 = vmatmul.mubr.msk.bf16.gmra.mrb[24].mxu1 %vm1319_vm5, %v3581_v47 }
 0xea8   :  { %v3449_v52 = vpop.f32.mrb[20].mxu1 }
 0xea9   :  { %v2886_v53 = vadd.f32 %v3449_v52, %v4595_v16  ;;  %v2813_v54 = vpop.f32.mrb[21].mxu1 }
 0xeaa   :  { %v2884_v56 = vadd.f32 %v4591_v35, %v2813_v54  ;;  %v3450_v59 = vpop.f32.mrb[22].mxu1 }
 0xeab   :  { %v3170_v60 = vmul.f32 -1.442695, %v2886_v53  ;;  %v2887_v63 = vadd.f32 %v3450_v59, %v4597_v5  ;;  %v2816_v33 = vpop.f32.mrb[23].mxu1 }
 0xeac   :  { %v3168_v0 = vmul.f32 -1.442695, %v2884_v56  ;;  %v2885_v1 = vadd.f32 %v4593_v11, %v2816_v33 }
 0xead   :  { %3726 = vpow2.f32 %v3170_v60  ;;  %v3171_v3 = vmul.f32 -1.442695, %v2887_v63 }
 0xeae   :  { %3728 = vpow2.f32 %v3168_v0  ;;  %v3169_v4 = vmul.f32 -1.442695, %v2885_v1 }
 0xeaf   :  { %3730 = vpow2.f32 %v3171_v3 }
 0xeb0   :  { %3732 = vpow2.f32 %v3169_v4  ;;  %v3453_v7 = vpop.f32.mrb[24].mxu1 }
 0xeb1   :  { %v2890_v16 = vadd.f32 %v3453_v7, %v4603_v50  ;;  %v2829_v9 = vpop.f32.mrb[25].mxu1 }
 0xeb2   :  { %v4653_v35 = vadd.f32 %v4599_v6, %v2829_v9  ;;  %v3454_v10 = vpop.f32.mrb[26].mxu1 }
 0xeb3   :  { %v3174_v14 = vmul.f32 -1.442695, %v2890_v16  ;;  %v4656_v5 = vadd.f32 %v3454_v10, %v4605_v49  ;;  %v2832_v19 = vpop.f32.mrb[27].mxu1 }
 0xeb4   :  { %v3172_v11 = vmul.f32 -1.442695, %v4653_v35  ;;  %v2889_v20 = vadd.f32 %v4601_v15, %v2832_v19 }
 0xeb5   :  { %3734 = vpow2.f32 %v3174_v14  ;;  %v3175_v21 = vmul.f32 -1.442695, %v4656_v5 }
 0xeb6   :  { %3736 = vpow2.f32 %v3172_v11  ;;  %v3173_v22 = vmul.f32 -1.442695, %v2889_v20 }
 0xeb7   :  { %v3727_v50 = vpop.eup %3726  ;;  %3738 = vpow2.f32 %v3175_v21 }
 0xeb8   :  { %v3729_v42 = vpop.eup %3728  ;;  %v2918_v6 = vadd.f32 1.0, %v3727_v50  ;;  %3740 = vpow2.f32 %v3173_v22 }
 0xeb9   :  { %v3731_v23 = vpop.eup %3730  ;;  %v2916_v24 = vadd.f32 1.0, %v3729_v42 }
 0xeba   :  { %v3733_v38 = vpop.eup %3732  ;;  %3742 = vrcp.f32 %v2918_v6  ;;  %v2919_v49 = vadd.f32 1.0, %v3731_v23 }
 0xebb   :  { %3744 = vrcp.f32 %v2916_v24  ;;  %v2917_v25 = vadd.f32 1.0, %v3733_v38 }
 0xebc   :  { %3746 = vrcp.f32 %v2919_v49 }
 0xebd   :  { %3748 = vrcp.f32 %v2917_v25 }
 0xebf   :  { %v3735_v15 = vpop.eup %3734 }
 0xec0   :  { %v3737_v27 = vpop.eup %3736  ;;  %v2922_v55 = vadd.f32 1.0, %v3735_v15 }
 0xec1   :  { %v3739_v29 = vpop.eup %3738  ;;  %v2920_v30 = vadd.f32 1.0, %v3737_v27 }
 0xec2   :  { %v3741_v39 = vpop.eup %3740  ;;  %3750 = vrcp.f32 %v2922_v55  ;;  %v2923_v34 = vadd.f32 1.0, %v3739_v29 }
 0xec3   :  { %3752 = vrcp.f32 %v2920_v30  ;;  %v2921_v13 = vadd.f32 1.0, %v3741_v39 }
 0xec4   :  { %v3743_v36 = vpop.eup %3742  ;;  %3754 = vrcp.f32 %v2923_v34 }
 0xec5   :  { %v3745_v31 = vpop.eup %3744  ;;  %v2942_v17 = vmul.f32 %v3743_v36, %v2886_v53  ;;  %3756 = vrcp.f32 %v2921_v13 }
 0xec6   :  { %v3747_v37 = vpop.eup %3746  ;;  %v2940_v8 = vmul.f32 %v3745_v31, %v2884_v56 }
 0xec7   :  { %v3749_v12 = vpop.eup %3748  ;;  %v2950_v32 = vmul.f32 %v2942_v17, %v3981_v28  ;;  %v2943_v40 = vmul.f32 %v3747_v37, %v2887_v63 }
 0xec8   :  { %v2948_v41 = vmul.f32 %v2940_v8, %v3981_v28  ;;  %v2941_v26 = vmul.f32 %v3749_v12, %v2885_v1 }
 0xec9   :  { %v3186_v44 = vpack.c.bf16 %v2950_v32, %v2950_v32  ;;  %v2951_v61 = vmul.f32 %v2943_v40, %v3981_v28 }
 0xeca   :  { %v3184_v58 = vpack.c.bf16 %v2948_v41, %v2948_v41  ;;  %v2949_v2 = vmul.f32 %v2941_v26, %v3981_v28 }
 0xecb   :  { %2991 = vst.msk [vmem:[%s4719_s16 + $0x8] sm:$0xf] %vm2988_vm14, %v3186_v44  ;;  %v3187_v45 = vpack.c.bf16 %v2951_v61, %v2951_v61 }
 0xecc   :  { %v3751_v57 = vpop.eup %3750  ;;  %2989 = vst.msk [vmem:[%s4719_s16] sm:$0xf] %vm2988_vm14, %v3184_v58  ;;  %v3185_v18 = vpack.c.bf16 %v2949_v2, %v2949_v2 }
 0xecd   :  { %v3753_v46 = vpop.eup %3752  ;;  %2992 = vst.msk [vmem:[%s4719_s16 + $0xc] sm:$0xf] %vm2988_vm14, %v3187_v45  ;;  %v2946_v48 = vmul.f32 %v3751_v57, %v2890_v16 }
 0xece   :  { %v3755_v51 = vpop.eup %3754  ;;  %2990 = vst.msk [vmem:[%s4719_s16 + $0x4] sm:$0xf] %vm2988_vm14, %v3185_v18  ;;  %v2944_v43 = vmul.f32 %v3753_v46, %v4653_v35 }
 0xecf   :  { %v3757_v62 = vpop.eup %3756  ;;  %v2954_v47 = vmul.f32 %v2946_v48, %v3981_v28  ;;  %v2947_v52 = vmul.f32 %v3755_v51, %v4656_v5 }
 0xed0   :  { %v2952_v53 = vmul.f32 %v2944_v43, %v3981_v28  ;;  %v2945_v54 = vmul.f32 %v3757_v62, %v2889_v20 }
 0xed1   :  { %v3190_v56 = vpack.c.bf16 %v2954_v47, %v2954_v47  ;;  %v2955_v59 = vmul.f32 %v2947_v52, %v3981_v28 }
 0xed2   :  { %v3188_v60 = vpack.c.bf16 %v2952_v53, %v2952_v53  ;;  %v2953_v63 = vmul.f32 %v2945_v54, %v3981_v28 }
 0xed3   :  { %2995 = vst.msk [vmem:[%s4719_s16 + $0x18] sm:$0xf] %vm2988_vm14, %v3190_v56  ;;  %v3191_v33 = vpack.c.bf16 %v2955_v59, %v2955_v59 }
 0xed4   :  { %2993 = vst.msk [vmem:[%s4719_s16 + $0x10] sm:$0xf] %vm2988_vm14, %v3188_v60  ;;  %v3189_v0 = vpack.c.bf16 %v2953_v63, %v2953_v63 }
 0xed5   :  { %2996 = vst.msk [vmem:[%s4719_s16 + $0x1c] sm:$0xf] %vm2988_vm14, %v3191_v33 }
 0xed6   :  { %2994 = vst.msk [vmem:[%s4719_s16 + $0x14] sm:$0xf] %vm2988_vm14, %v3189_v0 }

</bundles_post_ra>
